<compile_context>
chip_gen: v6e
topology: v6e:2x2x1
jax: 0.10.0
libtpu: 0.0.40
codegen_flags: <defaults>
</compile_context>

<pallas_src>
import functools

import jax
import jax.numpy as jnp
from jax import lax
from jax.experimental import pallas as pl
from jax.experimental.pallas import tpu as pltpu

# Large finite negative: exp() underflows to 0 and we avoid inf-inf NaNs.
_MASK_VALUE = -1e30


def _flash_mhsa_kernel(q_ref, k_ref, v_ref, o_ref,
                       q_sc, m_sc, l_sc, acc_sc, *,
                       scale, kv_tile, kv_seq_len, needs_mask, compute_dtype):
    kv = pl.program_id(2)

    @pl.when(kv == 0)
    def _init():
        # The Q block is resident across the kv axis: scale it once, in f32,
        # then cast to the MXU compute dtype (no per-step re-multiply, no
        # bf16-precision scale fold).
        q_sc[...] = (q_ref[...].astype(jnp.float32) * scale).astype(compute_dtype)
        m_sc[...] = jnp.full_like(m_sc, -jnp.inf)
        l_sc[...] = jnp.zeros_like(l_sc)
        acc_sc[...] = jnp.zeros_like(acc_sc)

    q = q_sc[...]
    k = k_ref[...].astype(compute_dtype)
    v = v_ref[...].astype(compute_dtype)

    # scores: (bh_tile, TQ, TK); contract head_dim, batch over the head axis.
    s = lax.dot_general(
        q, k,
        dimension_numbers=(((2,), (2,)), ((0,), (0,))),
        preferred_element_type=jnp.float32,
    )

    if needs_mask:
        col = kv * kv_tile + lax.broadcasted_iota(jnp.int32, s.shape, dimension=2)
        s = jnp.where(col < kv_seq_len, s, _MASK_VALUE)

    m_prev = m_sc[...]
    m_new = jnp.maximum(m_prev, jnp.max(s, axis=-1, keepdims=True))
    alpha = jnp.exp(m_prev - m_new)
    p = jnp.exp(s - m_new)                        # un-normalized probabilities

    l_sc[...] = alpha * l_sc[...] + jnp.sum(p, axis=-1, keepdims=True)
    acc_sc[...] = alpha * acc_sc[...] + lax.dot_general(
        p.astype(compute_dtype), v,
        dimension_numbers=(((2,), (1,)), ((0,), (0,))),
        preferred_element_type=jnp.float32,
    )
    m_sc[...] = m_new

    @pl.when(kv == pl.num_programs(2) - 1)
    def _finalize():
        # Deferred normalization; exact reciprocal — it runs once per output
        # tile so it is essentially free and tightens accuracy.
        inv_l = pl.reciprocal(l_sc[...], approx=False)
        o_ref[...] = (acc_sc[...] * inv_l).astype(o_ref.dtype)


def _round_up(x: int, m: int) -> int:
    return ((x + m - 1) // m) * m


def _pick_tile(n: int, prefs) -> int:
    for t in prefs:
        if t <= n and n % t == 0:
            return t
    return n


def _vmem_limit_bytes() -> int:
    cap = None
    try:
        cap = getattr(pltpu.get_tpu_info(), "vmem_capacity_bytes", None)
    except Exception:
        cap = None
    if not cap:
        cap = 64 * 1024 * 1024  # conservative default: v7x per-TC VMEM
    # Leave ~8 MiB compiler headroom; clamp to a sane window
    # (v7x: 56 MiB, v5e/v6e: 96 MiB).
    return int(min(max(cap - 8 * 1024 * 1024, 32 * 1024 * 1024),
                   96 * 1024 * 1024))


def mhsa_exact(query: jax.Array, key: jax.Array, value: jax.Array,
               *, compute_dtype=None) -> jax.Array:
    """Exact multi-head self-attention: softmax(q k^T / sqrt(D)) v.

    query/key/value: (BH, S, D) with BH = batch * num_heads.
    Returns (BH, S, D), same dtype as query.
    """
    BH, S, D = query.shape
    assert key.shape == (BH, S, D) and value.shape == (BH, S, D)
    out_dtype = query.dtype

    # MXU compute dtype: f32 inputs use the fast bf16 MXU path (f32 accumulate);
    # pass compute_dtype=jnp.float32 to force the exact (slower) path.
    if compute_dtype is None:
        compute_dtype = jnp.bfloat16 if out_dtype == jnp.float32 else out_dtype

    # Pad S and D to lane-dense multiples of 128 (zero pad). Padded KV columns
    # are masked in-kernel; padded Q rows / D columns are sliced off below.
    S_pad = _round_up(max(S, 128), 128)
    D_pad = _round_up(max(D, 128), 128)
    if (S_pad, D_pad) != (S, D):
        pad = ((0, 0), (0, S_pad - S), (0, D_pad - D))
        query = jnp.pad(query, pad)
        key = jnp.pad(key, pad)
        value = jnp.pad(value, pad)

    # Tiles: large TQ (K/V are re-streamed from HBM S_pad/TQ times, so a bigger
    # TQ cuts bandwidth for long sequences), TK at the MXU-friendly 256.
    tq = _pick_tile(S_pad, (512, 256, 128))
    tk = _pick_tile(S_pad, (256, 128))

    # Head blocking: only when the per-step f32 score/prob tile stays small
    # (<= 512 KiB) and enough parallel grid extent remains for v7x's two TCs.
    max_bh_scores = max(1, (512 * 1024) // (tq * tk * 4))
    bh_tile = 1
    for cand in (8, 4, 2, 1):
        if BH % cand != 0 or cand > max_bh_scores:
            continue
        if cand > 1 and (BH // cand) * (S_pad // tq) < 4:
            continue
        bh_tile = cand
        break

    scale = float(D) ** -0.5          # scale uses the *original* head_dim
    needs_mask = S_pad != S
    kernel = functools.partial(
        _flash_mhsa_kernel, scale=scale, kv_tile=tk, kv_seq_len=S,
        needs_mask=needs_mask, compute_dtype=compute_dtype)

    q_spec = pl.BlockSpec((bh_tile, tq, D_pad), lambda b, qi, ki: (b, qi, 0))
    if tk <= 128:
        # Small per-step compute can expose K/V DMA latency (v5e/v6e): 3-deep.
        kv_spec = pl.BlockSpec((bh_tile, tk, D_pad), lambda b, qi, ki: (b, ki, 0),
                               pipeline_mode=pl.Buffered(3))
    else:
        kv_spec = pl.BlockSpec((bh_tile, tk, D_pad), lambda b, qi, ki: (b, ki, 0))
    o_spec = pl.BlockSpec((bh_tile, tq, D_pad), lambda b, qi, ki: (b, qi, 0))

    itemsize = jnp.dtype(out_dtype).itemsize
    n_q_tiles = S_pad // tq
    cost = pl.CostEstimate(
        flops=4 * BH * S_pad * S_pad * D_pad,       # QK^T + PV, 2 flops/MAC
        transcendentals=BH * S_pad * S_pad,         # one exp per score
        bytes_accessed=BH * S_pad * D_pad * itemsize * (2 + 2 * n_q_tiles),
    )

    out = pl.pallas_call(
        kernel,
        out_shape=jax.ShapeDtypeStruct((BH, S_pad, D_pad), out_dtype),
        grid_spec=pltpu.PrefetchScalarGridSpec(
            num_scalar_prefetch=0,
            grid=(BH // bh_tile, S_pad // tq, S_pad // tk),
            in_specs=[q_spec, kv_spec, kv_spec],
            out_specs=o_spec,
            scratch_shapes=[
                pltpu.VMEM((bh_tile, tq, D_pad), compute_dtype),  # scaled Q
                pltpu.VMEM((bh_tile, tq, 1), jnp.float32),        # running max m
                pltpu.VMEM((bh_tile, tq, 1), jnp.float32),        # running sum l
                pltpu.VMEM((bh_tile, tq, D_pad), jnp.float32),    # output acc
            ],
        ),
        compiler_params=pltpu.CompilerParams(
            # Head-block / Q-tile axes are independent (megacore-parallel);
            # the KV axis carries the online-softmax accumulator -> arbitrary.
            dimension_semantics=("parallel", "parallel", "arbitrary"),
            vmem_limit_bytes=_vmem_limit_bytes(),
        ),
        cost_estimate=cost,
    )(query, key, value)

    if (S_pad, D_pad) != (S, D):
        out = out[:, :S, :D]
    return out


def _mhsa_reference(q, k, v):
    scale = q.shape[-1] ** -0.5
    s = jnp.einsum("bqd,bkd->bqk", q.astype(jnp.float32),
                   k.astype(jnp.float32)) * scale
    p = jax.nn.softmax(s, axis=-1)
    return jnp.einsum("bqk,bkd->bqd", p, v.astype(jnp.float32)).astype(q.dtype)


if __name__ == "__main__":
    # TODO(synk): only the "exact" SELFATT_LOOKUP variant is implemented; the
    # wrapper's name-dispatch / error handling is host-side Python.
    key0 = jax.random.PRNGKey(0)

    # Case 1: aligned shapes (batch=2, heads=4, seq=512, head_dim=128 -> BH=8).
    # Multi-step online softmax, default bf16 MXU path for f32 inputs.
    kq, kk, kv_, key0 = jax.random.split(key0, 4)
    q1 = jax.random.normal(kq, (8, 512, 128), dtype=jnp.float32)
    k1 = jax.random.normal(kk, (8, 512, 128), dtype=jnp.float32)
    v1 = jax.random.normal(kv_, (8, 512, 128), dtype=jnp.float32)
    out1 = jax.block_until_ready(mhsa_exact(q1, k1, v1))
    ref1 = _mhsa_reference(q1, k1, v1)
    assert out1.shape == q1.shape
    assert jnp.allclose(out1, ref1, atol=2e-2, rtol=2e-2), "case1 mismatch"

    # Case 2: awkward shapes (batch=1, heads=2, seq=200, head_dim=64 -> BH=2).
    # Exercises pad-to-128 + in-kernel KV mask; checked bit-tight on the f32
    # compute path and loosely on the default bf16 path.
    kq, kk, kv_, key0 = jax.random.split(key0, 4)
    q2 = jax.random.normal(kq, (2, 200, 64), dtype=jnp.float32)
    k2 = jax.random.normal(kk, (2, 200, 64), dtype=jnp.float32)
    v2 = jax.random.normal(kv_, (2, 200, 64), dtype=jnp.float32)
    ref2 = _mhsa_reference(q2, k2, v2)
    out2_f32 = jax.block_until_ready(
        mhsa_exact(q2, k2, v2, compute_dtype=jnp.float32))
    assert out2_f32.shape == q2.shape
    assert jnp.allclose(out2_f32, ref2, atol=2e-3, rtol=2e-3), "case2 f32 mismatch"
    out2_bf16 = jax.block_until_ready(mhsa_exact(q2, k2, v2))
    assert jnp.allclose(out2_bf16, ref2, atol=2e-2, rtol=2e-2), "case2 bf16 mismatch"

    print("KERNEL_OK")
</pallas_src>

<mosaic_0001>
module attributes {stable_mosaic.version = 11 : i64} {
  func.func @_flash_mhsa_kernel(%arg0: i32, %arg1: i32, %arg2: i32, %arg3: memref<1x512x128xf32, #tpu.memory_space<vmem>>, %arg4: memref<1x256x128xf32, #tpu.memory_space<vmem>>, %arg5: memref<1x256x128xf32, #tpu.memory_space<vmem>>, %arg6: memref<1x512x128xf32, #tpu.memory_space<vmem>>, %arg7: memref<1x512x128xbf16, #tpu.memory_space<vmem>>, %arg8: memref<1x512x1xf32, #tpu.memory_space<vmem>>, %arg9: memref<1x512x1xf32, #tpu.memory_space<vmem>>, %arg10: memref<1x512x128xf32, #tpu.memory_space<vmem>>) attributes {dimension_semantics = [#tpu.dimension_semantics<parallel>, #tpu.dimension_semantics<parallel>, #tpu.dimension_semantics<arbitrary>], iteration_bounds = array<i64: 8, 1, 2>, scalar_prefetch = 0 : i64, scratch_operands = 4 : i64, tpu.core_type = #tpu.core_type<tc>, window_params = [{transform_indices = @transform_0, window_bounds = array<i64: 1, 512, 128>}, {transform_indices = @transform_1, window_bounds = array<i64: 1, 256, 128>}, {transform_indices = @transform_2, window_bounds = array<i64: 1, 256, 128>}, {transform_indices = @transform_3, window_bounds = array<i64: 1, 512, 128>}]} {
    %c0_i32 = arith.constant 0 : i32
    %0 = arith.cmpi eq, %arg2, %c0_i32 : i32
    %1 = arith.extui %0 : i1 to i32
    %c0_i32_0 = arith.constant 0 : i32
    %2 = arith.cmpi ne, %1, %c0_i32_0 : i32
    scf.if %2 {
      %c0_31 = arith.constant 0 : index
      %c0_32 = arith.constant 0 : index
      %c0_33 = arith.constant 0 : index
      %35 = vector.load %arg3[%c0_31, %c0_32, %c0_33] : memref<1x512x128xf32, #tpu.memory_space<vmem>>, vector<1x512x128xf32>
      %cst_34 = arith.constant 0.0883883461 : f32
      %36 = vector.broadcast %cst_34 : f32 to vector<1x512x128xf32>
      %37 = arith.mulf %35, %36 : vector<1x512x128xf32>
      %38 = arith.truncf %37 : vector<1x512x128xf32> to vector<1x512x128xbf16>
      %c0_35 = arith.constant 0 : index
      %c0_36 = arith.constant 0 : index
      %c0_37 = arith.constant 0 : index
      %39 = vector.load %arg7[%c0_35, %c0_36, %c0_37] : memref<1x512x128xbf16, #tpu.memory_space<vmem>>, vector<1x512x128xbf16>
      tpu.vector_store %arg7[%c0_35, %c0_36, %c0_37], %38 {strides = array<i32>} : memref<1x512x128xbf16, #tpu.memory_space<vmem>>, vector<1x512x128xbf16>,
      %cst_38 = arith.constant 0xFF800000 : f32
      %40 = vector.broadcast %cst_38 : f32 to vector<1x512x1xf32>
      %c0_39 = arith.constant 0 : index
      %c0_40 = arith.constant 0 : index
      %c0_41 = arith.constant 0 : index
      %41 = vector.load %arg8[%c0_39, %c0_40, %c0_41] : memref<1x512x1xf32, #tpu.memory_space<vmem>>, vector<1x512x1xf32>
      tpu.vector_store %arg8[%c0_39, %c0_40, %c0_41], %40 {strides = array<i32>} : memref<1x512x1xf32, #tpu.memory_space<vmem>>, vector<1x512x1xf32>,
      %cst_42 = arith.constant 0.000000e+00 : f32
      %42 = vector.broadcast %cst_42 : f32 to vector<1x512x1xf32>
      %c0_43 = arith.constant 0 : index
      %c0_44 = arith.constant 0 : index
      %c0_45 = arith.constant 0 : index
      %43 = vector.load %arg9[%c0_43, %c0_44, %c0_45] : memref<1x512x1xf32, #tpu.memory_space<vmem>>, vector<1x512x1xf32>
      tpu.vector_store %arg9[%c0_43, %c0_44, %c0_45], %42 {strides = array<i32>} : memref<1x512x1xf32, #tpu.memory_space<vmem>>, vector<1x512x1xf32>,
      %cst_46 = arith.constant 0.000000e+00 : f32
      %44 = vector.broadcast %cst_46 : f32 to vector<1x512x128xf32>
      %c0_47 = arith.constant 0 : index
      %c0_48 = arith.constant 0 : index
      %c0_49 = arith.constant 0 : index
      %45 = vector.load %arg10[%c0_47, %c0_48, %c0_49] : memref<1x512x128xf32, #tpu.memory_space<vmem>>, vector<1x512x128xf32>
      tpu.vector_store %arg10[%c0_47, %c0_48, %c0_49], %44 {strides = array<i32>} : memref<1x512x128xf32, #tpu.memory_space<vmem>>, vector<1x512x128xf32>,
    } else {
    }
    %c0 = arith.constant 0 : index
    %c0_1 = arith.constant 0 : index
    %c0_2 = arith.constant 0 : index
    %3 = vector.load %arg7[%c0, %c0_1, %c0_2] : memref<1x512x128xbf16, #tpu.memory_space<vmem>>, vector<1x512x128xbf16>
    %c0_3 = arith.constant 0 : index
    %c0_4 = arith.constant 0 : index
    %c0_5 = arith.constant 0 : index
    %4 = vector.load %arg4[%c0_3, %c0_4, %c0_5] : memref<1x256x128xf32, #tpu.memory_space<vmem>>, vector<1x256x128xf32>
    %5 = arith.truncf %4 : vector<1x256x128xf32> to vector<1x256x128xbf16>
    %c0_6 = arith.constant 0 : index
    %c0_7 = arith.constant 0 : index
    %c0_8 = arith.constant 0 : index
    %6 = vector.load %arg5[%c0_6, %c0_7, %c0_8] : memref<1x256x128xf32, #tpu.memory_space<vmem>>, vector<1x256x128xf32>
    %7 = arith.truncf %6 : vector<1x256x128xf32> to vector<1x256x128xbf16>
    %cst = arith.constant dense<0.000000e+00> : vector<1x512x256xf32>
    %8 = tpu.matmul %3, %5, %cst {dimension_numbers = #tpu.dot_dimension_numbers<[2], [2], [1], [1], [0, 0, 0, 1, 1, 1], [0], [0]>} : vector<1x512x128xbf16>, vector<1x256x128xbf16>, vector<1x512x256xf32> -> vector<1x512x256xf32>
    %c0_9 = arith.constant 0 : index
    %c0_10 = arith.constant 0 : index
    %c0_11 = arith.constant 0 : index
    %9 = vector.load %arg8[%c0_9, %c0_10, %c0_11] : memref<1x512x1xf32, #tpu.memory_space<vmem>>, vector<1x512x1xf32>
    %cst_12 = arith.constant dense<0xFF800000> : vector<1x512xf32>
    %10 = vector.multi_reduction <maximumf>, %8, %cst_12 [2] : vector<1x512x256xf32> to vector<1x512xf32>
    %11 = vector.shape_cast %10 : vector<1x512xf32> to vector<1x512x1xf32>
    %12 = arith.maximumf %9, %11 : vector<1x512x1xf32>
    %13 = arith.subf %9, %12 : vector<1x512x1xf32>
    %14 = math.exp %13 : vector<1x512x1xf32>
    %15 = vector.broadcast %12 : vector<1x512x1xf32> to vector<1x512x256xf32>
    %16 = arith.subf %8, %15 : vector<1x512x256xf32>
    %17 = math.exp %16 : vector<1x512x256xf32>
    %c0_13 = arith.constant 0 : index
    %c0_14 = arith.constant 0 : index
    %c0_15 = arith.constant 0 : index
    %18 = vector.load %arg9[%c0_13, %c0_14, %c0_15] : memref<1x512x1xf32, #tpu.memory_space<vmem>>, vector<1x512x1xf32>
    %19 = arith.mulf %14, %18 : vector<1x512x1xf32>
    %cst_16 = arith.constant dense<0.000000e+00> : vector<1x512xf32>
    %20 = vector.multi_reduction <add>, %17, %cst_16 [2] : vector<1x512x256xf32> to vector<1x512xf32>
    %21 = vector.shape_cast %20 : vector<1x512xf32> to vector<1x512x1xf32>
    %22 = arith.addf %19, %21 : vector<1x512x1xf32>
    %c0_17 = arith.constant 0 : index
    %c0_18 = arith.constant 0 : index
    %c0_19 = arith.constant 0 : index
    %23 = vector.load %arg9[%c0_17, %c0_18, %c0_19] : memref<1x512x1xf32, #tpu.memory_space<vmem>>, vector<1x512x1xf32>
    tpu.vector_store %arg9[%c0_17, %c0_18, %c0_19], %22 {strides = array<i32>} : memref<1x512x1xf32, #tpu.memory_space<vmem>>, vector<1x512x1xf32>,
    %c0_20 = arith.constant 0 : index
    %c0_21 = arith.constant 0 : index
    %c0_22 = arith.constant 0 : index
    %24 = vector.load %arg10[%c0_20, %c0_21, %c0_22] : memref<1x512x128xf32, #tpu.memory_space<vmem>>, vector<1x512x128xf32>
    %25 = vector.broadcast %14 : vector<1x512x1xf32> to vector<1x512x128xf32>
    %26 = arith.mulf %25, %24 : vector<1x512x128xf32>
    %27 = arith.truncf %17 : vector<1x512x256xf32> to vector<1x512x256xbf16>
    %cst_23 = arith.constant dense<0.000000e+00> : vector<1x512x128xf32>
    %28 = tpu.matmul %27, %7, %cst_23 {dimension_numbers = #tpu.dot_dimension_numbers<[2], [1], [1], [2], [0, 0, 0, 1, 1, 2], [0], [0]>} : vector<1x512x256xbf16>, vector<1x256x128xbf16>, vector<1x512x128xf32> -> vector<1x512x128xf32>
    %29 = arith.addf %26, %28 : vector<1x512x128xf32>
    %c0_24 = arith.constant 0 : index
    %c0_25 = arith.constant 0 : index
    %c0_26 = arith.constant 0 : index
    %30 = vector.load %arg10[%c0_24, %c0_25, %c0_26] : memref<1x512x128xf32, #tpu.memory_space<vmem>>, vector<1x512x128xf32>
    tpu.vector_store %arg10[%c0_24, %c0_25, %c0_26], %29 {strides = array<i32>} : memref<1x512x128xf32, #tpu.memory_space<vmem>>, vector<1x512x128xf32>,
    %c0_27 = arith.constant 0 : index
    %c0_28 = arith.constant 0 : index
    %c0_29 = arith.constant 0 : index
    %31 = vector.load %arg8[%c0_27, %c0_28, %c0_29] : memref<1x512x1xf32, #tpu.memory_space<vmem>>, vector<1x512x1xf32>
    tpu.vector_store %arg8[%c0_27, %c0_28, %c0_29], %12 {strides = array<i32>} : memref<1x512x1xf32, #tpu.memory_space<vmem>>, vector<1x512x1xf32>,
    %c1_i32 = arith.constant 1 : i32
    %32 = arith.cmpi eq, %arg2, %c1_i32 : i32
    %33 = arith.extui %32 : i1 to i32
    %c0_i32_30 = arith.constant 0 : i32
    %34 = arith.cmpi ne, %33, %c0_i32_30 : i32
    scf.if %34 {
      %c0_31 = arith.constant 0 : index
      %c0_32 = arith.constant 0 : index
      %c0_33 = arith.constant 0 : index
      %35 = vector.load %arg9[%c0_31, %c0_32, %c0_33] : memref<1x512x1xf32, #tpu.memory_space<vmem>>, vector<1x512x1xf32>
      %36 = tpu.reciprocal %35 : vector<1x512x1xf32> -> vector<1x512x1xf32>
      %c0_34 = arith.constant 0 : index
      %c0_35 = arith.constant 0 : index
      %c0_36 = arith.constant 0 : index
      %37 = vector.load %arg10[%c0_34, %c0_35, %c0_36] : memref<1x512x128xf32, #tpu.memory_space<vmem>>, vector<1x512x128xf32>
      %38 = vector.broadcast %36 : vector<1x512x1xf32> to vector<1x512x128xf32>
      %39 = arith.mulf %37, %38 : vector<1x512x128xf32>
      %c0_37 = arith.constant 0 : index
      %c0_38 = arith.constant 0 : index
      %c0_39 = arith.constant 0 : index
      %40 = vector.load %arg6[%c0_37, %c0_38, %c0_39] : memref<1x512x128xf32, #tpu.memory_space<vmem>>, vector<1x512x128xf32>
      tpu.vector_store %arg6[%c0_37, %c0_38, %c0_39], %39 {strides = array<i32>} : memref<1x512x128xf32, #tpu.memory_space<vmem>>, vector<1x512x128xf32>,
    } else {
    }
    return
  }
  func.func @transform_0(%arg0: i32, %arg1: i32, %arg2: i32) -> (i32, i32, i32) {
    %c0_i32 = arith.constant 0 : i32
    %c0_i32_0 = arith.constant 0 : i32
    return %arg0, %arg1, %c0_i32 : i32, i32, i32
  }
  func.func @transform_1(%arg0: i32, %arg1: i32, %arg2: i32) -> (i32, i32, i32) {
    %c0_i32 = arith.constant 0 : i32
    %c0_i32_0 = arith.constant 0 : i32
    return %arg0, %arg2, %c0_i32 : i32, i32, i32
  }
  func.func @transform_2(%arg0: i32, %arg1: i32, %arg2: i32) -> (i32, i32, i32) {
    %c0_i32 = arith.constant 0 : i32
    %c0_i32_0 = arith.constant 0 : i32
    return %arg0, %arg2, %c0_i32 : i32, i32, i32
  }
  func.func @transform_3(%arg0: i32, %arg1: i32, %arg2: i32) -> (i32, i32, i32) {
    %c0_i32 = arith.constant 0 : i32
    %c0_i32_0 = arith.constant 0 : i32
    return %arg0, %arg1, %c0_i32 : i32, i32, i32
  }
}

</mosaic_0001>

<bundles_post_ra>
// kernel: tpu_custom_call.1
= control target key start
LH: loop header
LB: loop body
LE: loop exit
PB: predicated region body
PF: predicated region fallthrough
CT: control target
= control target key end

     0   :  { %s9297_s0 = inlined_call_operand.hbm [shape: f32[8,512,128], index: 0, kind: input, shape index: {}]   ;;  %s9298_s1 = inlined_call_operand.hbm [shape: f32[8,512,128], index: 1, kind: input, shape index: {}]   ;;  %s9299_s2 = inlined_call_operand.hbm [shape: f32[8,512,128], index: 2, kind: input, shape index: {}]   ;;  %s9300_s3 = inlined_call_operand.hbm [shape: f32[8,512,128], index: 3, kind: output, shape index: {}]  }
   0x1   :  { %9616 = sst [smem:[#allocation186_spill]] %s9298_s1 }
   0x2   :  { %9617 = sst [smem:[#allocation187_spill]] %s9299_s2 }
   0x3   :  { %9618 = sst [smem:[#allocation188_spill]] %s9300_s3 }
   0x4   :  { %8 = vsyncpa [#allocation7], 0 }
   0x5   :  { %10 = vsyncpa [#allocation7 + $0x1], 0 }
   0x6   :  { %11 = vsyncpa [#allocation10], 0 }
   0x7   :  { %13 = vsyncpa [#allocation10 + $0x1], 0 }
   0x8   :  { %14 = vsyncpa [#allocation8], 0 }
   0x9   :  { %16 = vsyncpa [#allocation8 + $0x1], 0  ;;  %s6484_s12 = smov 0   ;;  %s6486_s13 = smov 0  }
   0xa   :  { %s6488_s14 = smov 0   ;;  %s6490_s15 = smov 0  }
   0xb   :  { %s6492_s16 = smov 0   ;;  %s6494_s17 = smov 0  }
   0xc   :  { %s6496_s18 = smov 0   ;;  %s6498_s19 = smov 0  }
   0xd   :  { %s6500_s20 = smov 0   ;;  %s6502_s21 = smov 0  }
   0xe   :  { %s6504_s22 = smov 0  }
   0xf LB: > { %9619 = sst [smem:[#allocation16_spill]] %s6438_s19  ;;  %s34_s23 = sadd.s32 1, %s6442_s20  ;;  %s6450_s22 = sphi %s6504_s22, %s22_s22   ;;  %s6446_s21 = sphi %s6502_s21, %s10207_s21   ;;  %s6442_s20 = sphi %s6500_s20, %s10206_s20   ;;  %s6438_s19 = sphi %s6498_s19, %s10205_s19   ;;  %s6434_s18 = sphi %s6496_s18, %s10204_s18   ;;  %s6430_s17 = sphi %s6494_s17, %s10213_s17   ;;  %s6426_s16 = sphi %s6492_s16, %s10212_s16   ;;  %s6422_s15 = sphi %s6490_s15, %s10211_s15   ;;  %s6418_s14 = sphi %s6488_s14, %s10210_s14   ;;  %s6414_s13 = sphi %s6486_s13, %s10209_s13   ;;  %s6410_s12 = sphi %s6484_s12, %s10208_s12  }
  0x10   : > { %9620 = sst [smem:[#allocation17_spill]] %s6442_s20  ;;  %p35_p0 = scmp.ge.s32.totalorder %s34_s23, 2 }
  0x11   : > { %9621 = sst [smem:[#allocation18_spill]] %s6446_s21  ;;  %s41_s24 = sadd.s32 1, %s6446_s21 }
  0x12   : > { %s6540_s25 = sadd.s32 4294967295, %s6450_s22   ;;  %p58_p1 = scmp.eq.s32.totalorder %s6450_s22, 0 }
  0x13   : > { %s10215_s23 = smov (%p35_p0, %s34_s23), 0  ;;  %s10217_s24 = smov (!%p35_p0, %s41_s24), %s6446_s21 }
  0x14   : > { %9622 = sst [smem:[#allocation19_spill]] %s10215_s23  ;;  %p64_p2 = scmp.eq.s32.totalorder %s6540_s25, 0 }
  0x15   : > { %s74_s26 = ssub.s32 %s6442_s20, %s10215_s23  ;;  %p43_p3 = scmp.ge.s32.totalorder %s10217_s24, 8 }
  0x16   : > { %p85_p4 = scmp.ne.s32.totalorder %s6418_s14, %s6414_s13  ;;  %p91_p5 = scmp.ne.s32.totalorder %s6414_s13, %s6410_s12 }
  0x17   : > { %s10219_s24 = smov (%p43_p3, %s10217_s24), 0  ;;  %s78_s27 = sadd.s32 1, %s6418_s14 }
  0x18   : > { %9623 = sst [smem:[#allocation20_spill]] %s10219_s24  ;;  %p6557_p6 = por %p91_p5, %p64_p2 }
  0x19   : > { %s6563_s29 = ssub.s32 %s6446_s21, %s10219_s24  ;;  %p6567_p7 = por %p85_p4, %p58_p1 }
  0x1a   : > { %s75_s4 = sor.u32 %s74_s26, %s6563_s29  ;;  %p9305_p8 = scmp.lt.s32.totalorder %s6450_s22, 16 }
  0x1b   : > { %p76_p9 = scmp.eq.s32.totalorder %s75_s4, 0  ;;  %s194_s5 = sand.u32 1, %s6450_s22  }
  0x1c   : > { %s196_s7 = sand.u32 1, %s6418_s14   ;;  %s5122_s9 = sshll.u32 %s6442_s20, 5 }
  0x1d   : > { %s6575_s6 = scalar_select %p76_p9, %s6418_s14, %s78_s27  }
  0x1e   : > { %s6578_s8 = sshll.u32 %s196_s7, 8  ;;  %s5123_s10 = sshll.u32 %s6446_s21, 6 }
  0x1f   : > { %s204_s11 = sadd.s32 %s5123_s10, %s5122_s9  ;;  %s198_s12 = scalar_lea.vmem [#allocation9], %s6578_s8 }
  0x20   : > { %s207_s24 = sshll.u32 %s198_s12, 4  ;;  %s5124_s23 = sshll.u32 %s204_s11, 7  ;;  %s208_s24 = int_to_ptr.vmem [resolvable:$true] %s207_s24 }
  0x21   : > { %s9626_s1 = sld [smem:[#allocation186_spill]]  ;;  %p6590_p10 = pnand %p9305_p8, %p6567_p7 }
  0x22   : > { %p48_p11 = scmp.eq.s32.totalorder %s6563_s29, 0  ;;  %s9628_s2 = sld [smem:[#allocation187_spill]] }
  0x23   : > { %s6600_s10 = scalar_lea.sflag [#allocation10], %s194_s5  ;;  %p9304_p12 = pneg %p6590_p10 }
  0x24   : > { %s6255_s3 = scalar_lea.vmem %s208_s24, 4096  ;;  %s6452_s19 = smov [#allocation9]  }
  0x25   : > { %p6256_p13 = scmp.ne.s32.totalorder %s208_s24, %s6255_s3  ;;  %s6260_s30 = sshll.u32 %s6452_s19, 4  ;;  %s6261_s30 = int_to_ptr.vmem [resolvable:$false] %s6260_s30 }
  0x26   : > { %s6262_s11 = scalar_lea.vmem %s6261_s30, 8192  ;;  %p6263_p4 = scmp.lt.s32.totalorder %s208_s24, %s6261_s30 }
  0x27   : > { %s206_s26 = scalar_lea.hbm %s9626_s1, %s5124_s23  ;;  %p6258_p0 = pnand %p6256_p13, %p9304_p12 }
  0x28   : > { %s6598_s9 = scalar_lea.hbm %s9628_s2, %s5124_s23  ;;  %p6264_p5 = scmp.lt.s32.totalorder %s6262_s11, %s6255_s3 }
  0x29   : > { %p6259_p3 = pneg %p6258_p0 }
  0x2a   : > { %p6265_p7 = por %p6264_p5, %p6263_p4 }
  0x2c   : > { %p6266_p9 = pnand %p6265_p7, %p6259_p3 }
  0x2e   : > { %6269 = shalt.err (!%p6266_p9)
}
  0x2f   : > { %s9306_s23 = smov 128   ;;  %s9308_s5 = smov 8  }
  0x30   : > { %5588 = dma.hbm_to_vmem [thread:$0]  (!%p6590_p10), %s206_s26, 4096, %s208_s24, %s6600_s10, %s9306_s23, %s9306_s23, %s9308_s5  }
  0x31   : > { %s221_s12 = scalar_lea.vmem [#allocation11], %s6578_s8  ;;  %p5129_p13 = scmp.ge.s32.totalorder %s6450_s22, 1 }
  0x32   : > { %s230_s4 = sshll.u32 %s221_s12, 4  ;;  %p238_p0 = scmp.lt.s32.totalorder %s6450_s22, 17  ;;  %s6659_s4 = int_to_ptr.vmem [resolvable:$true] %s230_s4 }
  0x33   : > { %s5115_s3 = sadd.s32 4294967294, %s6450_s22   ;;  %s50_s19 = sadd.s32 1, %s6430_s17 }
  0x34   : > { %p6616_p3 = pnand %p5129_p13, %p238_p0  ;;  %p57_p4 = scmp.ne.s32.totalorder %s6430_s17, %s6426_s16 }
  0x35   : > { %s6625_s30 = scalar_select %p48_p11, %s6430_s17, %s50_s19  }
  0x36   : > { %p63_p5 = scmp.ne.s32.totalorder %s6426_s16, %s6422_s15  ;;  %p145_p7 = scmp.eq.s32.totalorder %s6540_s25, 15 }
  0x37   : > { %p151_p9 = scmp.eq.s32.totalorder %s5115_s3, 15  ;;  %p59_p12 = por %p58_p1, %p57_p4 }
  0x38   : > { %p6636_p8 = por %p64_p2, %p63_p5  ;;  %p6640_p13 = por %p145_p7, %p57_p4 }
  0x39   : > { %p6644_p0 = por %p151_p9, %p63_p5  ;;  %s171_s26 = sand.u32 1, %s6430_s17  }
  0x3a   : > { %s9631_s8 = scalar_select %p6640_p13, 1, 0 }
  0x3b   : > { %s9632_s29 = scalar_select %p6644_p0, 1, 0 }
  0x3c   : > { %s5237_s11 = sshll.u32 %s6446_s21, 13  ;;  %s5118_s12 = sshll.u32 %s171_s26, 9 }
  0x3d   : > { %s183_s23 = scalar_lea.hbm %s9297_s0, %s5237_s11  ;;  %s175_s5 = scalar_lea.vmem [#allocation6], %s5118_s12 }
  0x3e   : > { %s184_s1 = sshll.u32 %s175_s5, 4  ;;  %p9633_p1 = scmp.lt.s32.totalorder %s6450_s22, 16  ;;  %s185_s1 = int_to_ptr.vmem [resolvable:$true] %s184_s1 }
  0x3f   : > { %s172_s20 = scalar_lea.sflag [#allocation7], %s171_s26  ;;  %s6283_s21 = scalar_lea.vmem %s185_s1, 8192 }
  0x40   : > { %p6655_p2 = pnand %p9633_p1, %p59_p12  ;;  %p6284_p4 = scmp.ne.s32.totalorder %s185_s1, %s6283_s21 }
  0x41   : > { %s6455_s19 = smov [#allocation6]  }
  0x42   : > { %p6272_p11 = pneg %p6655_p2  ;;  %s6288_s11 = sshll.u32 %s6455_s19, 4  ;;  %s6289_s11 = int_to_ptr.vmem [resolvable:$false] %s6288_s11 }
  0x43   : > { %s6290_s5 = scalar_lea.vmem %s6289_s11, 16384  ;;  %p6291_p9 = scmp.lt.s32.totalorder %s185_s1, %s6289_s11 }
  0x44   : > { %p6286_p5 = pnand %p6284_p4, %p6272_p11  ;;  %p6292_p12 = scmp.lt.s32.totalorder %s6290_s5, %s6283_s21 }
  0x46   : > { %p6287_p7 = pneg %p6286_p5  ;;  %p6293_p1 = por %p6292_p12, %p6291_p9 }
  0x48   : > { %p6294_p0 = pnand %p6293_p1, %p6287_p7 }
  0x4a   : > { %6297 = shalt.err (!%p6294_p0)
}
  0x4b   : > { %s9635_s12 = smov 8   ;;  %s9636_s3 = smov 128  }
  0x4c   : > { %5585 = dma.hbm_to_vmem [thread:$0]  (!%p6655_p2), %s183_s23, 8192, %s185_s1, %s172_s20, %s9636_s3, %s9636_s3, %s9635_s12  }
  0x4d   : > { %s6311_s26 = scalar_lea.vmem %s6659_s4, 4096  ;;  %p9637_p4 = pneg %p6590_p10 }
  0x4e   : > { %p6312_p11 = scmp.ne.s32.totalorder %s6659_s4, %s6311_s26  ;;  %s6456_s21 = smov [#allocation11]  }
  0x4f   : > { %s6316_s19 = sshll.u32 %s6456_s21, 4  ;;  %s6317_s19 = int_to_ptr.vmem [resolvable:$false] %s6316_s19 }
  0x50   : > { %p6314_p5 = pnand %p6312_p11, %p9637_p4  ;;  %s6318_s11 = scalar_lea.vmem %s6317_s19, 8192 }
  0x51   : > { %p6319_p0 = scmp.lt.s32.totalorder %s6659_s4, %s6317_s19  ;;  %p6320_p7 = scmp.lt.s32.totalorder %s6318_s11, %s6311_s26 }
  0x52   : > { %p6315_p13 = pneg %p6314_p5 }
  0x53   : > { %p6321_p9 = por %p6320_p7, %p6319_p0 }
  0x55   : > { %p6322_p12 = pnand %p6321_p9, %p6315_p13 }
  0x57   : > { %6325 = shalt.err (!%p6322_p12)
}
  0x58   : > { %5591 = dma.hbm_to_vmem [thread:$0]  (!%p6590_p10), %s6598_s9, 4096, %s6659_s4, %s6600_s10, %s9636_s3, %s9636_s3, %s9635_s12  }
  0x59   : > { %242 = sbr.rel (%p6616_p3) target bundleno = 2826 (0xb0a), region = 32 }
  0x5e   : > { %s6685_s1 = sand.u32 1, %s6426_s16  }
  0x5f   : > { %s5130_s2 = sshll.u32 %s6685_s1, 9  ;;  %s245_s20 = scalar_lea.sflag [#allocation7], %s6685_s1 }
  0x60   : > { %s6689_s23 = scalar_lea.vmem [#allocation6], %s5130_s2 }
  0x61   : > { %6397 = dma.done.wait (%p6636_p8), %s245_s20, 8192  }
  0x62   : > { %6399 = vsyncadd (%p6636_p8), %s245_s20, 4294959104  ;;  %s253_s27 = sand.u32 1, %s6540_s25   ;;  %s255_s9 = sand.u32 1, %s6414_s13  }
  0x63   : > { %s5131_s10 = sshll.u32 %s255_s9, 8  ;;  %s254_s4 = scalar_lea.sflag [#allocation10], %s253_s27 }
  0x64   : > { %s6697_s7 = scalar_lea.vmem [#allocation9], %s5131_s10 }
  0x65   : > { %6401 = dma.done.wait (%p6557_p6), %s254_s4, 8192  }
  0x66   : > { %6403 = vsyncadd (%p6557_p6), %s254_s4, 4294959104  ;;  %s6703_s5 = scalar_lea.vmem [#allocation11], %s5131_s10  ;;  %s6705_s12 = scalar_lea.vmem [#allocation12], %s5130_s2 }
  0x67   : > { %p5134_p8 = scmp.ne.s32.totalorder %s6434_s18, 0 }
  0x69   : > { %307 = sbr.rel (%p5134_p8) target bundleno = 228 (0xe4), region = 48 }
  0x6e   : > { %v308_v0 = vld [vmem:[%s6689_s23] sm:$0xff]  ;;  %v309_v1 = vld [vmem:[%s6689_s23 + $0x8] sm:$0xff]  ;;  %v6711_v2 = vld [vmem:[%s6689_s23 + $0x10] sm:$0xff]  ;;  %vm756_vm0 = vcmask 7168   ;;  %v6457_v7 = vmov -inf   ;;  %v6458_v8 = vmov 0.0  }
  0x6f   : > { %v6713_v3 = vmul.f32 0.088388346, %v308_v0  ;;  %v6715_v4 = vmul.f32 0.088388346, %v309_v1  ;;  %v6718_v5 = vld [vmem:[%s6689_s23 + $0x18] sm:$0xff]  ;;  %v6721_v6 = vld [vmem:[%s6689_s23 + $0x20] sm:$0xff] }
  0x70   : > { %757 = vst.msk [vmem:[#allocation3] sm:$0xff] %vm756_vm0, %v6457_v7  ;;  %758 = vst.msk [vmem:[#allocation3 + $0x8] sm:$0xff] %vm756_vm0, %v6457_v7  ;;  %v374_v9 = vmul.f32 0.088388346, %v6711_v2  ;;  %v375_v10 = vmul.f32 0.088388346, %v6718_v5 }
  0x71   : > { %759 = vst.msk [vmem:[#allocation3 + $0x10] sm:$0xff] %vm756_vm0, %v6457_v7  ;;  %760 = vst.msk [vmem:[#allocation3 + $0x18] sm:$0xff] %vm756_vm0, %v6457_v7  ;;  %v313_v11 = vld [vmem:[%s6689_s23 + $0x28] sm:$0xff]  ;;  %v314_v12 = vld [vmem:[%s6689_s23 + $0x30] sm:$0xff]  ;;  %v5306_v13 = vpack.c.bf16 %v6715_v4, %v6713_v3  ;;  %v376_v14 = vmul.f32 0.088388346, %v6721_v6 }
  0x72   : > { %761 = vst.msk [vmem:[#allocation3 + $0x20] sm:$0xff] %vm756_vm0, %v6457_v7  ;;  %762 = vst.msk [vmem:[#allocation3 + $0x28] sm:$0xff] %vm756_vm0, %v6457_v7  ;;  %v377_v15 = vmul.f32 0.088388346, %v313_v11  ;;  %v315_v16 = vld [vmem:[%s6689_s23 + $0x38] sm:$0xff]  ;;  %v316_v17 = vld [vmem:[%s6689_s23 + $0x40] sm:$0xff]  ;;  %v5311_v18 = vpack.c.bf16 %v375_v10, %v374_v9 }
  0x73   : > { %763 = vst.msk [vmem:[#allocation3 + $0x30] sm:$0xff] %vm756_vm0, %v6457_v7  ;;  %764 = vst.msk [vmem:[#allocation3 + $0x38] sm:$0xff] %vm756_vm0, %v6457_v7  ;;  %v378_v19 = vmul.f32 0.088388346, %v314_v12  ;;  %v379_v20 = vmul.f32 0.088388346, %v315_v16 }
  0x74   : > { %765 = vst.msk [vmem:[#allocation3 + $0x40] sm:$0xff] %vm756_vm0, %v6457_v7  ;;  %766 = vst.msk [vmem:[#allocation3 + $0x48] sm:$0xff] %vm756_vm0, %v6457_v7  ;;  %v317_v21 = vld [vmem:[%s6689_s23 + $0x48] sm:$0xff]  ;;  %v318_v22 = vld [vmem:[%s6689_s23 + $0x50] sm:$0xff]  ;;  %v5316_v23 = vpack.c.bf16 %v377_v15, %v376_v14  ;;  %v380_v24 = vmul.f32 0.088388346, %v316_v17 }
  0x75   : > { %767 = vst.msk [vmem:[#allocation3 + $0x50] sm:$0xff] %vm756_vm0, %v6457_v7  ;;  %768 = vst.msk [vmem:[#allocation3 + $0x58] sm:$0xff] %vm756_vm0, %v6457_v7  ;;  %v381_v25 = vmul.f32 0.088388346, %v317_v21  ;;  %v319_v26 = vld [vmem:[%s6689_s23 + $0x58] sm:$0xff]  ;;  %v320_v27 = vld [vmem:[%s6689_s23 + $0x60] sm:$0xff]  ;;  %v5321_v28 = vpack.c.bf16 %v379_v20, %v378_v19 }
  0x76   : > { %769 = vst.msk [vmem:[#allocation3 + $0x60] sm:$0xff] %vm756_vm0, %v6457_v7  ;;  %770 = vst.msk [vmem:[#allocation3 + $0x68] sm:$0xff] %vm756_vm0, %v6457_v7  ;;  %v382_v29 = vmul.f32 0.088388346, %v318_v22  ;;  %v383_v30 = vmul.f32 0.088388346, %v319_v26 }
  0x77   : > { %771 = vst.msk [vmem:[#allocation3 + $0x70] sm:$0xff] %vm756_vm0, %v6457_v7  ;;  %772 = vst.msk [vmem:[#allocation3 + $0x78] sm:$0xff] %vm756_vm0, %v6457_v7  ;;  %v321_v31 = vld [vmem:[%s6689_s23 + $0x68] sm:$0xff]  ;;  %v322_v32 = vld [vmem:[%s6689_s23 + $0x70] sm:$0xff]  ;;  %v5326_v33 = vpack.c.bf16 %v381_v25, %v380_v24  ;;  %v384_v34 = vmul.f32 0.088388346, %v320_v27 }
  0x78   : > { %773 = vst.msk [vmem:[#allocation3 + $0x80] sm:$0xff] %vm756_vm0, %v6457_v7  ;;  %774 = vst.msk [vmem:[#allocation3 + $0x88] sm:$0xff] %vm756_vm0, %v6457_v7  ;;  %v385_v35 = vmul.f32 0.088388346, %v321_v31  ;;  %v323_v36 = vld [vmem:[%s6689_s23 + $0x78] sm:$0xff]  ;;  %v324_v37 = vld [vmem:[%s6689_s23 + $0x80] sm:$0xff]  ;;  %v5331_v38 = vpack.c.bf16 %v383_v30, %v382_v29 }
  0x79   : > { %775 = vst.msk [vmem:[#allocation3 + $0x90] sm:$0xff] %vm756_vm0, %v6457_v7  ;;  %776 = vst.msk [vmem:[#allocation3 + $0x98] sm:$0xff] %vm756_vm0, %v6457_v7  ;;  %v386_v39 = vmul.f32 0.088388346, %v322_v32  ;;  %v387_v40 = vmul.f32 0.088388346, %v323_v36 }
  0x7a   : > { %777 = vst.msk [vmem:[#allocation3 + $0xa0] sm:$0xff] %vm756_vm0, %v6457_v7  ;;  %778 = vst.msk [vmem:[#allocation3 + $0xa8] sm:$0xff] %vm756_vm0, %v6457_v7  ;;  %v325_v41 = vld [vmem:[%s6689_s23 + $0x88] sm:$0xff]  ;;  %v326_v42 = vld [vmem:[%s6689_s23 + $0x90] sm:$0xff]  ;;  %v5336_v43 = vpack.c.bf16 %v385_v35, %v384_v34  ;;  %v388_v44 = vmul.f32 0.088388346, %v324_v37 }
  0x7b   : > { %779 = vst.msk [vmem:[#allocation3 + $0xb0] sm:$0xff] %vm756_vm0, %v6457_v7  ;;  %780 = vst.msk [vmem:[#allocation3 + $0xb8] sm:$0xff] %vm756_vm0, %v6457_v7  ;;  %v389_v45 = vmul.f32 0.088388346, %v325_v41  ;;  %v327_v46 = vld [vmem:[%s6689_s23 + $0x98] sm:$0xff]  ;;  %v328_v47 = vld [vmem:[%s6689_s23 + $0xa0] sm:$0xff]  ;;  %v5341_v48 = vpack.c.bf16 %v387_v40, %v386_v39 }
  0x7c   : > { %781 = vst.msk [vmem:[#allocation3 + $0xc0] sm:$0xff] %vm756_vm0, %v6457_v7  ;;  %782 = vst.msk [vmem:[#allocation3 + $0xc8] sm:$0xff] %vm756_vm0, %v6457_v7  ;;  %v390_v49 = vmul.f32 0.088388346, %v326_v42  ;;  %v391_v50 = vmul.f32 0.088388346, %v327_v46 }
  0x7d   : > { %783 = vst.msk [vmem:[#allocation3 + $0xd0] sm:$0xff] %vm756_vm0, %v6457_v7  ;;  %784 = vst.msk [vmem:[#allocation3 + $0xd8] sm:$0xff] %vm756_vm0, %v6457_v7  ;;  %v329_v51 = vld [vmem:[%s6689_s23 + $0xa8] sm:$0xff]  ;;  %v330_v52 = vld [vmem:[%s6689_s23 + $0xb0] sm:$0xff]  ;;  %v5346_v53 = vpack.c.bf16 %v389_v45, %v388_v44  ;;  %v392_v54 = vmul.f32 0.088388346, %v328_v47 }
  0x7e   : > { %785 = vst.msk [vmem:[#allocation3 + $0xe0] sm:$0xff] %vm756_vm0, %v6457_v7  ;;  %786 = vst.msk [vmem:[#allocation3 + $0xe8] sm:$0xff] %vm756_vm0, %v6457_v7  ;;  %v393_v55 = vmul.f32 0.088388346, %v329_v51  ;;  %v331_v56 = vld [vmem:[%s6689_s23 + $0xb8] sm:$0xff]  ;;  %v332_v57 = vld [vmem:[%s6689_s23 + $0xc0] sm:$0xff]  ;;  %v5351_v58 = vpack.c.bf16 %v391_v50, %v390_v49 }
  0x7f   : > { %787 = vst.msk [vmem:[#allocation3 + $0xf0] sm:$0xff] %vm756_vm0, %v6457_v7  ;;  %788 = vst.msk [vmem:[#allocation3 + $0xf8] sm:$0xff] %vm756_vm0, %v6457_v7  ;;  %v394_v59 = vmul.f32 0.088388346, %v330_v52  ;;  %v395_v60 = vmul.f32 0.088388346, %v331_v56 }
  0x80   : > { %789 = vst.msk [vmem:[#allocation3 + $0x100] sm:$0xff] %vm756_vm0, %v6457_v7  ;;  %790 = vst.msk [vmem:[#allocation3 + $0x108] sm:$0xff] %vm756_vm0, %v6457_v7  ;;  %v333_v61 = vld [vmem:[%s6689_s23 + $0xc8] sm:$0xff]  ;;  %v334_v62 = vld [vmem:[%s6689_s23 + $0xd0] sm:$0xff]  ;;  %v5356_v63 = vpack.c.bf16 %v393_v55, %v392_v54  ;;  %v396_v0 = vmul.f32 0.088388346, %v332_v57 }
  0x81   : > { %791 = vst.msk [vmem:[#allocation3 + $0x110] sm:$0xff] %vm756_vm0, %v6457_v7  ;;  %792 = vst.msk [vmem:[#allocation3 + $0x118] sm:$0xff] %vm756_vm0, %v6457_v7  ;;  %v397_v1 = vmul.f32 0.088388346, %v333_v61  ;;  %v335_v2 = vld [vmem:[%s6689_s23 + $0xd8] sm:$0xff]  ;;  %v336_v3 = vld [vmem:[%s6689_s23 + $0xe0] sm:$0xff]  ;;  %v5361_v4 = vpack.c.bf16 %v395_v60, %v394_v59 }
  0x82   : > { %793 = vst.msk [vmem:[#allocation3 + $0x120] sm:$0xff] %vm756_vm0, %v6457_v7  ;;  %794 = vst.msk [vmem:[#allocation3 + $0x128] sm:$0xff] %vm756_vm0, %v6457_v7  ;;  %v398_v5 = vmul.f32 0.088388346, %v334_v62  ;;  %v399_v6 = vmul.f32 0.088388346, %v335_v2 }
  0x83   : > { %795 = vst.msk [vmem:[#allocation3 + $0x130] sm:$0xff] %vm756_vm0, %v6457_v7  ;;  %796 = vst.msk [vmem:[#allocation3 + $0x138] sm:$0xff] %vm756_vm0, %v6457_v7  ;;  %v5366_v9 = vpack.c.bf16 %v397_v1, %v396_v0  ;;  %v400_v10 = vmul.f32 0.088388346, %v336_v3  ;;  %v339_v12 = vld [vmem:[%s6689_s23 + $0xf8] sm:$0xff]  ;;  %v341_v17 = vld [vmem:[%s6689_s23 + $0x108] sm:$0xff] }
  0x84   : > { %797 = vst.msk [vmem:[#allocation3 + $0x140] sm:$0xff] %vm756_vm0, %v6457_v7  ;;  %798 = vst.msk [vmem:[#allocation3 + $0x148] sm:$0xff] %vm756_vm0, %v6457_v7  ;;  %v5371_v14 = vpack.c.bf16 %v399_v6, %v398_v5  ;;  %v403_v16 = vmul.f32 0.088388346, %v339_v12  ;;  %v405_v21 = vmul.f32 0.088388346, %v341_v17 }
  0x85   : > { %799 = vst.msk [vmem:[#allocation3 + $0x150] sm:$0xff] %vm756_vm0, %v6457_v7  ;;  %800 = vst.msk [vmem:[#allocation3 + $0x158] sm:$0xff] %vm756_vm0, %v6457_v7  ;;  %v343_v22 = vld [vmem:[%s6689_s23 + $0x118] sm:$0xff]  ;;  %v345_v27 = vld [vmem:[%s6689_s23 + $0x128] sm:$0xff] }
  0x86   : > { %801 = vst.msk [vmem:[#allocation3 + $0x160] sm:$0xff] %vm756_vm0, %v6457_v7  ;;  %802 = vst.msk [vmem:[#allocation3 + $0x168] sm:$0xff] %vm756_vm0, %v6457_v7  ;;  %v407_v26 = vmul.f32 0.088388346, %v343_v22  ;;  %v409_v31 = vmul.f32 0.088388346, %v345_v27 }
  0x87   : > { %803 = vst.msk [vmem:[#allocation3 + $0x170] sm:$0xff] %vm756_vm0, %v6457_v7  ;;  %804 = vst.msk [vmem:[#allocation3 + $0x178] sm:$0xff] %vm756_vm0, %v6457_v7  ;;  %v347_v32 = vld [vmem:[%s6689_s23 + $0x138] sm:$0xff]  ;;  %v349_v37 = vld [vmem:[%s6689_s23 + $0x148] sm:$0xff] }
  0x88   : > { %805 = vst.msk [vmem:[#allocation3 + $0x180] sm:$0xff] %vm756_vm0, %v6457_v7  ;;  %806 = vst.msk [vmem:[#allocation3 + $0x188] sm:$0xff] %vm756_vm0, %v6457_v7  ;;  %v411_v36 = vmul.f32 0.088388346, %v347_v32  ;;  %v413_v41 = vmul.f32 0.088388346, %v349_v37 }
  0x89   : > { %807 = vst.msk [vmem:[#allocation3 + $0x190] sm:$0xff] %vm756_vm0, %v6457_v7  ;;  %808 = vst.msk [vmem:[#allocation3 + $0x198] sm:$0xff] %vm756_vm0, %v6457_v7  ;;  %v351_v42 = vld [vmem:[%s6689_s23 + $0x158] sm:$0xff]  ;;  %v353_v47 = vld [vmem:[%s6689_s23 + $0x168] sm:$0xff] }
  0x8a   : > { %809 = vst.msk [vmem:[#allocation3 + $0x1a0] sm:$0xff] %vm756_vm0, %v6457_v7  ;;  %810 = vst.msk [vmem:[#allocation3 + $0x1a8] sm:$0xff] %vm756_vm0, %v6457_v7  ;;  %v415_v46 = vmul.f32 0.088388346, %v351_v42  ;;  %v417_v51 = vmul.f32 0.088388346, %v353_v47 }
  0x8b   : > { %811 = vst.msk [vmem:[#allocation3 + $0x1b0] sm:$0xff] %vm756_vm0, %v6457_v7  ;;  %812 = vst.msk [vmem:[#allocation3 + $0x1b8] sm:$0xff] %vm756_vm0, %v6457_v7  ;;  %v355_v52 = vld [vmem:[%s6689_s23 + $0x178] sm:$0xff]  ;;  %v357_v57 = vld [vmem:[%s6689_s23 + $0x188] sm:$0xff] }
  0x8c   : > { %813 = vst.msk [vmem:[#allocation3 + $0x1c0] sm:$0xff] %vm756_vm0, %v6457_v7  ;;  %814 = vst.msk [vmem:[#allocation3 + $0x1c8] sm:$0xff] %vm756_vm0, %v6457_v7  ;;  %v419_v56 = vmul.f32 0.088388346, %v355_v52  ;;  %v421_v61 = vmul.f32 0.088388346, %v357_v57 }
  0x8d   : > { %815 = vst.msk [vmem:[#allocation3 + $0x1d0] sm:$0xff] %vm756_vm0, %v6457_v7  ;;  %816 = vst.msk [vmem:[#allocation3 + $0x1d8] sm:$0xff] %vm756_vm0, %v6457_v7  ;;  %v359_v62 = vld [vmem:[%s6689_s23 + $0x198] sm:$0xff]  ;;  %v361_v3 = vld [vmem:[%s6689_s23 + $0x1a8] sm:$0xff] }
  0x8e   : > { %817 = vst.msk [vmem:[#allocation3 + $0x1e0] sm:$0xff] %vm756_vm0, %v6457_v7  ;;  %818 = vst.msk [vmem:[#allocation3 + $0x1e8] sm:$0xff] %vm756_vm0, %v6457_v7  ;;  %v423_v2 = vmul.f32 0.088388346, %v359_v62 }
  0x8f   : > { %819 = vst.msk [vmem:[#allocation3 + $0x1f0] sm:$0xff] %vm756_vm0, %v6457_v7  ;;  %820 = vst.msk [vmem:[#allocation3 + $0x1f8] sm:$0xff] %vm756_vm0, %v6457_v7  ;;  %v337_v7 = vld [vmem:[%s6689_s23 + $0xe8] sm:$0xff] }
  0x90   : > { %821 = vst.msk [vmem:[#allocation4] sm:$0xff] %vm756_vm0, %v6458_v8  ;;  %822 = vst.msk [vmem:[#allocation4 + $0x8] sm:$0xff] %vm756_vm0, %v6458_v8  ;;  %v401_v11 = vmul.f32 0.088388346, %v337_v7  ;;  %v425_v7 = vmul.f32 0.088388346, %v361_v3 }
  0x91   : > { %823 = vst.msk [vmem:[#allocation4 + $0x10] sm:$0xff] %vm756_vm0, %v6458_v8  ;;  %824 = vst.msk [vmem:[#allocation4 + $0x18] sm:$0xff] %vm756_vm0, %v6458_v8 }
  0x92   : > { %825 = vst.msk [vmem:[#allocation4 + $0x20] sm:$0xff] %vm756_vm0, %v6458_v8  ;;  %826 = vst.msk [vmem:[#allocation4 + $0x28] sm:$0xff] %vm756_vm0, %v6458_v8  ;;  %v5376_v19 = vpack.c.bf16 %v401_v11, %v400_v10 }
  0x93   : > { %827 = vst.msk [vmem:[#allocation4 + $0x30] sm:$0xff] %vm756_vm0, %v6458_v8  ;;  %828 = vst.msk [vmem:[#allocation4 + $0x38] sm:$0xff] %vm756_vm0, %v6458_v8 }
  0x94   : > { %829 = vst.msk [vmem:[#allocation4 + $0x40] sm:$0xff] %vm756_vm0, %v6458_v8  ;;  %830 = vst.msk [vmem:[#allocation4 + $0x48] sm:$0xff] %vm756_vm0, %v6458_v8 }
  0x95   : > { %831 = vst.msk [vmem:[#allocation4 + $0x50] sm:$0xff] %vm756_vm0, %v6458_v8  ;;  %832 = vst.msk [vmem:[#allocation4 + $0x58] sm:$0xff] %vm756_vm0, %v6458_v8 }
  0x96   : > { %833 = vst.msk [vmem:[#allocation4 + $0x60] sm:$0xff] %vm756_vm0, %v6458_v8  ;;  %834 = vst.msk [vmem:[#allocation4 + $0x68] sm:$0xff] %vm756_vm0, %v6458_v8 }
  0x97   : > { %835 = vst.msk [vmem:[#allocation4 + $0x70] sm:$0xff] %vm756_vm0, %v6458_v8  ;;  %836 = vst.msk [vmem:[#allocation4 + $0x78] sm:$0xff] %vm756_vm0, %v6458_v8 }
  0x98   : > { %837 = vst.msk [vmem:[#allocation4 + $0x80] sm:$0xff] %vm756_vm0, %v6458_v8  ;;  %838 = vst.msk [vmem:[#allocation4 + $0x88] sm:$0xff] %vm756_vm0, %v6458_v8 }
  0x99   : > { %839 = vst.msk [vmem:[#allocation4 + $0x90] sm:$0xff] %vm756_vm0, %v6458_v8  ;;  %840 = vst.msk [vmem:[#allocation4 + $0x98] sm:$0xff] %vm756_vm0, %v6458_v8 }
  0x9a   : > { %841 = vst.msk [vmem:[#allocation4 + $0xa0] sm:$0xff] %vm756_vm0, %v6458_v8  ;;  %842 = vst.msk [vmem:[#allocation4 + $0xa8] sm:$0xff] %vm756_vm0, %v6458_v8 }
  0x9b   : > { %843 = vst.msk [vmem:[#allocation4 + $0xb0] sm:$0xff] %vm756_vm0, %v6458_v8  ;;  %844 = vst.msk [vmem:[#allocation4 + $0xb8] sm:$0xff] %vm756_vm0, %v6458_v8 }
  0x9c   : > { %845 = vst.msk [vmem:[#allocation4 + $0xc0] sm:$0xff] %vm756_vm0, %v6458_v8  ;;  %846 = vst.msk [vmem:[#allocation4 + $0xc8] sm:$0xff] %vm756_vm0, %v6458_v8 }
  0x9d   : > { %847 = vst.msk [vmem:[#allocation4 + $0xd0] sm:$0xff] %vm756_vm0, %v6458_v8  ;;  %848 = vst.msk [vmem:[#allocation4 + $0xd8] sm:$0xff] %vm756_vm0, %v6458_v8 }
  0x9e   : > { %849 = vst.msk [vmem:[#allocation4 + $0xe0] sm:$0xff] %vm756_vm0, %v6458_v8  ;;  %850 = vst.msk [vmem:[#allocation4 + $0xe8] sm:$0xff] %vm756_vm0, %v6458_v8 }
  0x9f   : > { %851 = vst.msk [vmem:[#allocation4 + $0xf0] sm:$0xff] %vm756_vm0, %v6458_v8  ;;  %852 = vst.msk [vmem:[#allocation4 + $0xf8] sm:$0xff] %vm756_vm0, %v6458_v8 }
  0xa0   : > { %853 = vst.msk [vmem:[#allocation4 + $0x100] sm:$0xff] %vm756_vm0, %v6458_v8  ;;  %854 = vst.msk [vmem:[#allocation4 + $0x108] sm:$0xff] %vm756_vm0, %v6458_v8 }
  0xa1   : > { %855 = vst.msk [vmem:[#allocation4 + $0x110] sm:$0xff] %vm756_vm0, %v6458_v8  ;;  %856 = vst.msk [vmem:[#allocation4 + $0x118] sm:$0xff] %vm756_vm0, %v6458_v8 }
  0xa2   : > { %857 = vst.msk [vmem:[#allocation4 + $0x120] sm:$0xff] %vm756_vm0, %v6458_v8  ;;  %858 = vst.msk [vmem:[#allocation4 + $0x128] sm:$0xff] %vm756_vm0, %v6458_v8 }
  0xa3   : > { %859 = vst.msk [vmem:[#allocation4 + $0x130] sm:$0xff] %vm756_vm0, %v6458_v8  ;;  %860 = vst.msk [vmem:[#allocation4 + $0x138] sm:$0xff] %vm756_vm0, %v6458_v8 }
  0xa4   : > { %861 = vst.msk [vmem:[#allocation4 + $0x140] sm:$0xff] %vm756_vm0, %v6458_v8  ;;  %862 = vst.msk [vmem:[#allocation4 + $0x148] sm:$0xff] %vm756_vm0, %v6458_v8 }
  0xa5   : > { %863 = vst.msk [vmem:[#allocation4 + $0x150] sm:$0xff] %vm756_vm0, %v6458_v8  ;;  %864 = vst.msk [vmem:[#allocation4 + $0x158] sm:$0xff] %vm756_vm0, %v6458_v8 }
  0xa6   : > { %865 = vst.msk [vmem:[#allocation4 + $0x160] sm:$0xff] %vm756_vm0, %v6458_v8  ;;  %866 = vst.msk [vmem:[#allocation4 + $0x168] sm:$0xff] %vm756_vm0, %v6458_v8 }
  0xa7   : > { %867 = vst.msk [vmem:[#allocation4 + $0x170] sm:$0xff] %vm756_vm0, %v6458_v8  ;;  %868 = vst.msk [vmem:[#allocation4 + $0x178] sm:$0xff] %vm756_vm0, %v6458_v8 }
  0xa8   : > { %869 = vst.msk [vmem:[#allocation4 + $0x180] sm:$0xff] %vm756_vm0, %v6458_v8  ;;  %870 = vst.msk [vmem:[#allocation4 + $0x188] sm:$0xff] %vm756_vm0, %v6458_v8 }
  0xa9   : > { %871 = vst.msk [vmem:[#allocation4 + $0x190] sm:$0xff] %vm756_vm0, %v6458_v8  ;;  %872 = vst.msk [vmem:[#allocation4 + $0x198] sm:$0xff] %vm756_vm0, %v6458_v8 }
  0xaa   : > { %873 = vst.msk [vmem:[#allocation4 + $0x1a0] sm:$0xff] %vm756_vm0, %v6458_v8  ;;  %874 = vst.msk [vmem:[#allocation4 + $0x1a8] sm:$0xff] %vm756_vm0, %v6458_v8 }
  0xab   : > { %875 = vst.msk [vmem:[#allocation4 + $0x1b0] sm:$0xff] %vm756_vm0, %v6458_v8  ;;  %876 = vst.msk [vmem:[#allocation4 + $0x1b8] sm:$0xff] %vm756_vm0, %v6458_v8 }
  0xac   : > { %877 = vst.msk [vmem:[#allocation4 + $0x1c0] sm:$0xff] %vm756_vm0, %v6458_v8  ;;  %878 = vst.msk [vmem:[#allocation4 + $0x1c8] sm:$0xff] %vm756_vm0, %v6458_v8 }
  0xad   : > { %879 = vst.msk [vmem:[#allocation4 + $0x1d0] sm:$0xff] %vm756_vm0, %v6458_v8  ;;  %880 = vst.msk [vmem:[#allocation4 + $0x1d8] sm:$0xff] %vm756_vm0, %v6458_v8 }
  0xae   : > { %881 = vst.msk [vmem:[#allocation4 + $0x1e0] sm:$0xff] %vm756_vm0, %v6458_v8  ;;  %882 = vst.msk [vmem:[#allocation4 + $0x1e8] sm:$0xff] %vm756_vm0, %v6458_v8 }
  0xaf   : > { %883 = vst.msk [vmem:[#allocation4 + $0x1f0] sm:$0xff] %vm756_vm0, %v6458_v8  ;;  %884 = vst.msk [vmem:[#allocation4 + $0x1f8] sm:$0xff] %vm756_vm0, %v6458_v8 }
  0xb0   : > { %885 = vst [vmem:[#allocation5 + $0xb0] sm:$0xff] %v6458_v8  ;;  %886 = vst [vmem:[#allocation5 + $0x1b0] sm:$0xff] %v6458_v8 }
  0xb1   : > { %887 = vst [vmem:[#allocation5 + $0xd8] sm:$0xff] %v6458_v8  ;;  %888 = vst [vmem:[#allocation5 + $0x18] sm:$0xff] %v6458_v8 }
  0xb2   : > { %889 = vst [vmem:[#allocation5 + $0x50] sm:$0xff] %v6458_v8  ;;  %890 = vst [vmem:[#allocation5 + $0x168] sm:$0xff] %v6458_v8 }
  0xb3   : > { %891 = vst [vmem:[#allocation5 + $0x130] sm:$0xff] %v6458_v8  ;;  %892 = vst [vmem:[#allocation5 + $0x48] sm:$0xff] %v6458_v8 }
  0xb4   : > { %893 = vst [vmem:[#allocation5 + $0x180] sm:$0xff] %v6458_v8  ;;  %894 = vst [vmem:[#allocation5 + $0x110] sm:$0xff] %v6458_v8 }
  0xb5   : > { %895 = vst [vmem:[#allocation5 + $0x118] sm:$0xff] %v6458_v8  ;;  %896 = vst [vmem:[#allocation5 + $0x98] sm:$0xff] %v6458_v8 }
  0xb6   : > { %897 = vst [vmem:[#allocation5 + $0x120] sm:$0xff] %v6458_v8  ;;  %898 = vst [vmem:[#allocation5 + $0x150] sm:$0xff] %v6458_v8 }
  0xb7   : > { %899 = vst [vmem:[#allocation5 + $0x108] sm:$0xff] %v6458_v8  ;;  %900 = vst [vmem:[#allocation5 + $0x60] sm:$0xff] %v6458_v8 }
  0xb8   : > { %901 = vst [vmem:[#allocation5 + $0xe0] sm:$0xff] %v6458_v8  ;;  %902 = vst [vmem:[#allocation5 + $0x188] sm:$0xff] %v6458_v8 }
  0xb9   : > { %903 = vst [vmem:[#allocation5 + $0x138] sm:$0xff] %v6458_v8  ;;  %904 = vst [vmem:[#allocation5 + $0x140] sm:$0xff] %v6458_v8 }
  0xba   : > { %905 = vst [vmem:[#allocation5 + $0x80] sm:$0xff] %v6458_v8  ;;  %906 = vst [vmem:[#allocation5 + $0x1a8] sm:$0xff] %v6458_v8 }
  0xbb   : > { %907 = vst [vmem:[#allocation5 + $0x1b8] sm:$0xff] %v6458_v8  ;;  %908 = vst [vmem:[#allocation5 + $0x28] sm:$0xff] %v6458_v8 }
  0xbc   : > { %909 = vst [vmem:[#allocation5 + $0x1e8] sm:$0xff] %v6458_v8  ;;  %910 = vst [vmem:[#allocation5 + $0xf8] sm:$0xff] %v6458_v8 }
  0xbd   : > { %911 = vst [vmem:[#allocation5 + $0x160] sm:$0xff] %v6458_v8  ;;  %912 = vst [vmem:[#allocation5 + $0x30] sm:$0xff] %v6458_v8 }
  0xbe   : > { %913 = vst [vmem:[#allocation5 + $0x1e0] sm:$0xff] %v6458_v8  ;;  %914 = vst [vmem:[#allocation5] sm:$0xff] %v6458_v8 }
  0xbf   : > { %915 = vst [vmem:[#allocation5 + $0xf0] sm:$0xff] %v6458_v8  ;;  %916 = vst [vmem:[#allocation5 + $0x8] sm:$0xff] %v6458_v8 }
  0xc0   : > { %917 = vst [vmem:[#allocation5 + $0x148] sm:$0xff] %v6458_v8  ;;  %918 = vst [vmem:[#allocation5 + $0x1d0] sm:$0xff] %v6458_v8 }
  0xc1   : > { %919 = vst [vmem:[#allocation5 + $0x100] sm:$0xff] %v6458_v8  ;;  %920 = vst [vmem:[#allocation5 + $0xc8] sm:$0xff] %v6458_v8 }
  0xc2   : > { %921 = vst [vmem:[#allocation5 + $0x40] sm:$0xff] %v6458_v8  ;;  %922 = vst [vmem:[#allocation5 + $0x1f8] sm:$0xff] %v6458_v8 }
  0xc3   : > { %923 = vst [vmem:[#allocation5 + $0x20] sm:$0xff] %v6458_v8  ;;  %924 = vst [vmem:[#allocation5 + $0x128] sm:$0xff] %v6458_v8 }
  0xc4   : > { %925 = vst [vmem:[#allocation5 + $0x1a0] sm:$0xff] %v6458_v8  ;;  %926 = vst [vmem:[#allocation5 + $0x1f0] sm:$0xff] %v6458_v8 }
  0xc5   : > { %927 = vst [vmem:[#allocation5 + $0xe8] sm:$0xff] %v6458_v8  ;;  %928 = vst [vmem:[#allocation5 + $0x78] sm:$0xff] %v6458_v8 }
  0xc6   : > { %929 = vst [vmem:[#allocation5 + $0x70] sm:$0xff] %v6458_v8  ;;  %930 = vst [vmem:[#allocation5 + $0x90] sm:$0xff] %v6458_v8 }
  0xc7   : > { %931 = vst [vmem:[#allocation5 + $0x1d8] sm:$0xff] %v6458_v8  ;;  %932 = vst [vmem:[#allocation5 + $0xd0] sm:$0xff] %v6458_v8 }
  0xc8   : > { %933 = vst [vmem:[#allocation5 + $0xb8] sm:$0xff] %v6458_v8  ;;  %934 = vst [vmem:[#allocation5 + $0x88] sm:$0xff] %v6458_v8 }
  0xc9   : > { %935 = vst [vmem:[#allocation5 + $0xa8] sm:$0xff] %v6458_v8  ;;  %936 = vst [vmem:[#allocation5 + $0x1c8] sm:$0xff] %v6458_v8 }
  0xca   : > { %937 = vst [vmem:[#allocation5 + $0x170] sm:$0xff] %v6458_v8  ;;  %938 = vst [vmem:[#allocation5 + $0x178] sm:$0xff] %v6458_v8 }
  0xcb   : > { %939 = vst [vmem:[#allocation5 + $0x68] sm:$0xff] %v6458_v8  ;;  %940 = vst [vmem:[#allocation5 + $0x190] sm:$0xff] %v6458_v8 }
  0xcc   : > { %941 = vst [vmem:[#allocation5 + $0x198] sm:$0xff] %v6458_v8  ;;  %942 = vst [vmem:[#allocation5 + $0x38] sm:$0xff] %v6458_v8 }
  0xcd   : > { %943 = vst [vmem:[#allocation5 + $0xc0] sm:$0xff] %v6458_v8  ;;  %944 = vst [vmem:[#allocation5 + $0x1c0] sm:$0xff] %v6458_v8 }
  0xce   : > { %945 = vst [vmem:[#allocation5 + $0x158] sm:$0xff] %v6458_v8  ;;  %946 = vst [vmem:[#allocation5 + $0x10] sm:$0xff] %v6458_v8 }
  0xcf   : > { %947 = vst [vmem:[#allocation5 + $0x58] sm:$0xff] %v6458_v8  ;;  %948 = vst [vmem:[#allocation5 + $0xa0] sm:$0xff] %v6458_v8  ;;  %v338_v8 = vld [vmem:[%s6689_s23 + $0xf0] sm:$0xff] }
  0xd0   : > { %5307 = vst [vmem:[#allocation2] sm:$0xff] %v5306_v13   ;;  %5463 = vst [vmem:[#allocation2 + $0x8] sm:$0xff] %v5311_v18   ;;  %v340_v13 = vld [vmem:[%s6689_s23 + $0x100] sm:$0xff]  ;;  %v402_v15 = vmul.f32 0.088388346, %v338_v8  ;;  %v342_v18 = vld [vmem:[%s6689_s23 + $0x110] sm:$0xff] }
  0xd1   : > { %5464 = vst [vmem:[#allocation2 + $0x10] sm:$0xff] %v5316_v23   ;;  %5465 = vst [vmem:[#allocation2 + $0x18] sm:$0xff] %v5321_v28   ;;  %v404_v20 = vmul.f32 0.088388346, %v340_v13  ;;  %v344_v23 = vld [vmem:[%s6689_s23 + $0x120] sm:$0xff]  ;;  %v346_v28 = vld [vmem:[%s6689_s23 + $0x130] sm:$0xff] }
  0xd2   : > { %5466 = vst [vmem:[#allocation2 + $0x20] sm:$0xff] %v5326_v33   ;;  %5467 = vst [vmem:[#allocation2 + $0x28] sm:$0xff] %v5331_v38   ;;  %v5381_v24 = vpack.c.bf16 %v403_v16, %v402_v15  ;;  %v406_v25 = vmul.f32 0.088388346, %v342_v18  ;;  %v408_v30 = vmul.f32 0.088388346, %v344_v23 }
  0xd3   : > { %5468 = vst [vmem:[#allocation2 + $0x30] sm:$0xff] %v5336_v43   ;;  %5469 = vst [vmem:[#allocation2 + $0x38] sm:$0xff] %v5341_v48   ;;  %v5386_v29 = vpack.c.bf16 %v405_v21, %v404_v20  ;;  %v348_v33 = vld [vmem:[%s6689_s23 + $0x140] sm:$0xff]  ;;  %v410_v35 = vmul.f32 0.088388346, %v346_v28  ;;  %v350_v38 = vld [vmem:[%s6689_s23 + $0x150] sm:$0xff] }
  0xd4   : > { %5470 = vst [vmem:[#allocation2 + $0x40] sm:$0xff] %v5346_v53   ;;  %5471 = vst [vmem:[#allocation2 + $0x48] sm:$0xff] %v5351_v58   ;;  %v5391_v34 = vpack.c.bf16 %v407_v26, %v406_v25  ;;  %v5396_v39 = vpack.c.bf16 %v409_v31, %v408_v30  ;;  %v412_v40 = vmul.f32 0.088388346, %v348_v33  ;;  %v352_v43 = vld [vmem:[%s6689_s23 + $0x160] sm:$0xff]  ;;  %v354_v48 = vld [vmem:[%s6689_s23 + $0x170] sm:$0xff] }
  0xd5   : > { %5472 = vst [vmem:[#allocation2 + $0x50] sm:$0xff] %v5356_v63   ;;  %5473 = vst [vmem:[#allocation2 + $0x58] sm:$0xff] %v5361_v4   ;;  %v5401_v44 = vpack.c.bf16 %v411_v36, %v410_v35  ;;  %v414_v45 = vmul.f32 0.088388346, %v350_v38  ;;  %v416_v50 = vmul.f32 0.088388346, %v352_v43 }
  0xd6   : > { %5474 = vst [vmem:[#allocation2 + $0x60] sm:$0xff] %v5366_v9   ;;  %5475 = vst [vmem:[#allocation2 + $0x68] sm:$0xff] %v5371_v14   ;;  %v5406_v49 = vpack.c.bf16 %v413_v41, %v412_v40  ;;  %v356_v53 = vld [vmem:[%s6689_s23 + $0x180] sm:$0xff]  ;;  %v418_v55 = vmul.f32 0.088388346, %v354_v48  ;;  %v358_v58 = vld [vmem:[%s6689_s23 + $0x190] sm:$0xff] }
  0xd7   : > { %5476 = vst [vmem:[#allocation2 + $0x70] sm:$0xff] %v5376_v19   ;;  %5477 = vst [vmem:[#allocation2 + $0x78] sm:$0xff] %v5381_v24   ;;  %v5411_v54 = vpack.c.bf16 %v415_v46, %v414_v45  ;;  %v5416_v59 = vpack.c.bf16 %v417_v51, %v416_v50  ;;  %v420_v60 = vmul.f32 0.088388346, %v356_v53  ;;  %v360_v63 = vld [vmem:[%s6689_s23 + $0x1a0] sm:$0xff]  ;;  %v362_v4 = vld [vmem:[%s6689_s23 + $0x1b0] sm:$0xff] }
  0xd8   : > { %5478 = vst [vmem:[#allocation2 + $0x80] sm:$0xff] %v5386_v29   ;;  %5479 = vst [vmem:[#allocation2 + $0x88] sm:$0xff] %v5391_v34   ;;  %v5421_v0 = vpack.c.bf16 %v419_v56, %v418_v55  ;;  %v422_v1 = vmul.f32 0.088388346, %v358_v58  ;;  %v424_v6 = vmul.f32 0.088388346, %v360_v63 }
  0xd9   : > { %5480 = vst [vmem:[#allocation2 + $0x90] sm:$0xff] %v5396_v39   ;;  %5481 = vst [vmem:[#allocation2 + $0x98] sm:$0xff] %v5401_v44   ;;  %v5426_v5 = vpack.c.bf16 %v421_v61, %v420_v60  ;;  %v363_v8 = vld [vmem:[%s6689_s23 + $0x1b8] sm:$0xff]  ;;  %v364_v9 = vld [vmem:[%s6689_s23 + $0x1c0] sm:$0xff]  ;;  %v426_v11 = vmul.f32 0.088388346, %v362_v4 }
  0xda   : > { %5482 = vst [vmem:[#allocation2 + $0xa0] sm:$0xff] %v5406_v49   ;;  %5483 = vst [vmem:[#allocation2 + $0xa8] sm:$0xff] %v5411_v54   ;;  %v5431_v10 = vpack.c.bf16 %v423_v2, %v422_v1  ;;  %v427_v12 = vmul.f32 0.088388346, %v363_v8  ;;  %v365_v13 = vld [vmem:[%s6689_s23 + $0x1c8] sm:$0xff]  ;;  %v366_v14 = vld [vmem:[%s6689_s23 + $0x1d0] sm:$0xff]  ;;  %v5436_v15 = vpack.c.bf16 %v425_v7, %v424_v6 }
  0xdb   : > { %5484 = vst [vmem:[#allocation2 + $0xb0] sm:$0xff] %v5416_v59   ;;  %5485 = vst [vmem:[#allocation2 + $0xb8] sm:$0xff] %v5421_v0   ;;  %v428_v16 = vmul.f32 0.088388346, %v364_v9  ;;  %v429_v17 = vmul.f32 0.088388346, %v365_v13 }
  0xdc   : > { %5486 = vst [vmem:[#allocation2 + $0xc0] sm:$0xff] %v5426_v5   ;;  %v367_v18 = vld [vmem:[%s6689_s23 + $0x1d8] sm:$0xff]  ;;  %v368_v19 = vld [vmem:[%s6689_s23 + $0x1e0] sm:$0xff]  ;;  %5487 = vst [vmem:[#allocation2 + $0xc8] sm:$0xff] %v5431_v10   ;;  %v5441_v20 = vpack.c.bf16 %v427_v12, %v426_v11  ;;  %v430_v21 = vmul.f32 0.088388346, %v366_v14 }
  0xdd   : > { %v431_v22 = vmul.f32 0.088388346, %v367_v18  ;;  %v369_v23 = vld [vmem:[%s6689_s23 + $0x1e8] sm:$0xff]  ;;  %v370_v24 = vld [vmem:[%s6689_s23 + $0x1f0] sm:$0xff]  ;;  %5488 = vst [vmem:[#allocation2 + $0xd0] sm:$0xff] %v5436_v15   ;;  %v5446_v25 = vpack.c.bf16 %v429_v17, %v428_v16  ;;  %v371_v28 = vld [vmem:[%s6689_s23 + $0x1f8] sm:$0xff] }
  0xde   : > { %v432_v26 = vmul.f32 0.088388346, %v368_v19  ;;  %v433_v27 = vmul.f32 0.088388346, %v369_v23  ;;  %5489 = vst [vmem:[#allocation2 + $0xd8] sm:$0xff] %v5441_v20  }
  0xdf   : > { %v5451_v29 = vpack.c.bf16 %v431_v22, %v430_v21  ;;  %v434_v30 = vmul.f32 0.088388346, %v370_v24  ;;  %v435_v31 = vmul.f32 0.088388346, %v371_v28  ;;  %5490 = vst [vmem:[#allocation2 + $0xe0] sm:$0xff] %v5446_v25  }
  0xe0   : > { %v5456_v32 = vpack.c.bf16 %v433_v27, %v432_v26 }
  0xe1   : > { %5491 = vst [vmem:[#allocation2 + $0xe8] sm:$0xff] %v5451_v29   ;;  %v5461_v33 = vpack.c.bf16 %v435_v31, %v434_v30 }
  0xe2   : > { %5492 = vst [vmem:[#allocation2 + $0xf0] sm:$0xff] %v5456_v32  }
  0xe3   : > { %5493 = vst [vmem:[#allocation2 + $0xf8] sm:$0xff] %v5461_v33  }
  0xe4 PF: > { %v1043_v34 = vld [vmem:[%s6697_s7 + $0xf0] sm:$0xff]  ;;  %v1044_v35 = vld [vmem:[%s6697_s7 + $0xf8] sm:$0xff]  ;;  %v1041_v39 = vld [vmem:[%s6697_s7 + $0xe0] sm:$0xff]  ;;  %vm3254_vm1 = vcmask 7168   ;;  %p5231_p6 = scmp.ne.s32.totalorder %s6434_s18, 1 }
  0xe5   : > { %v1027_v36 = vld [vmem:[%s6697_s7 + $0x70] sm:$0xff]  ;;  %v1060_v37 = vpack.c.bf16 %v1044_v35, %v1043_v34  ;;  %v1028_v38 = vld [vmem:[%s6697_s7 + $0x78] sm:$0xff]  ;;  %v1042_v40 = vld [vmem:[%s6697_s7 + $0xe8] sm:$0xff] }
  0xe6   : > { %v1052_v41 = vpack.c.bf16 %v1028_v38, %v1027_v36  ;;  %v1059_v42 = vpack.c.bf16 %v1042_v40, %v1041_v39  ;;  %v1025_v43 = vld [vmem:[%s6697_s7 + $0x60] sm:$0xff]  ;;  %v1026_v44 = vld [vmem:[%s6697_s7 + $0x68] sm:$0xff]  ;;  %v1039_v45 = vld [vmem:[%s6697_s7 + $0xd0] sm:$0xff] }
  0xe7   : > { %5494 = vmatprep.subr.bf16.mxu0 %v1060_v37  ;;  %v1040_v46 = vld [vmem:[%s6697_s7 + $0xd8] sm:$0xff]  ;;  %v1051_v47 = vpack.c.bf16 %v1026_v44, %v1025_v43  ;;  %v1023_v49 = vld [vmem:[%s6697_s7 + $0x50] sm:$0xff]  ;;  %v5696_v50 = vld [vmem:[#allocation2] sm:$0xff]  }
  0xe8   : > { %5495 = vmatpush3.bf16.xpose.msra.mxu0 %v1052_v41  ;;  %v1058_v48 = vpack.c.bf16 %v1040_v46, %v1039_v45  ;;  %v1024_v51 = vld [vmem:[%s6697_s7 + $0x58] sm:$0xff]  ;;  %v1037_v52 = vld [vmem:[%s6697_s7 + $0xc0] sm:$0xff]  ;;  %5510 = vmatprep.mubr.bf16.mxu0 %v5696_v50  ;;  %v1038_v53 = vld [vmem:[%s6697_s7 + $0xc8] sm:$0xff] }
  0xe9   : > { %5496 = vmatprep.subr.bf16.mxu0 %v1059_v42  ;;  %v1050_v54 = vpack.c.bf16 %v1024_v51, %v1023_v49  ;;  %v1057_v55 = vpack.c.bf16 %v1038_v53, %v1037_v52  ;;  %v1021_v56 = vld [vmem:[%s6697_s7 + $0x40] sm:$0xff]  ;;  %v1022_v57 = vld [vmem:[%s6697_s7 + $0x48] sm:$0xff]  ;;  %v1035_v58 = vld [vmem:[%s6697_s7 + $0xb0] sm:$0xff] }
  0xea   : > { %v1036_v59 = vld [vmem:[%s6697_s7 + $0xb8] sm:$0xff]  ;;  %v1049_v60 = vpack.c.bf16 %v1022_v57, %v1021_v56  ;;  %v1019_v62 = vld [vmem:[%s6697_s7 + $0x30] sm:$0xff]  ;;  %v1033_v0 = vld [vmem:[%s6697_s7 + $0xa0] sm:$0xff] }
  0xeb   : > { %v1056_v61 = vpack.c.bf16 %v1036_v59, %v1035_v58  ;;  %v1020_v63 = vld [vmem:[%s6697_s7 + $0x38] sm:$0xff]  ;;  %v1034_v1 = vld [vmem:[%s6697_s7 + $0xa8] sm:$0xff]  ;;  %v1017_v4 = vld [vmem:[%s6697_s7 + $0x20] sm:$0xff] }
  0xec   : > { %v1048_v2 = vpack.c.bf16 %v1020_v63, %v1019_v62  ;;  %v1055_v3 = vpack.c.bf16 %v1034_v1, %v1033_v0  ;;  %v1018_v5 = vld [vmem:[%s6697_s7 + $0x28] sm:$0xff]  ;;  %v1031_v6 = vld [vmem:[%s6697_s7 + $0x90] sm:$0xff]  ;;  %v1032_v7 = vld [vmem:[%s6697_s7 + $0x98] sm:$0xff] }
  0xed   : > { %v1047_v8 = vpack.c.bf16 %v1018_v5, %v1017_v4  ;;  %v1054_v9 = vpack.c.bf16 %v1032_v7, %v1031_v6  ;;  %v1015_v10 = vld [vmem:[%s6697_s7 + $0x10] sm:$0xff]  ;;  %v1016_v11 = vld [vmem:[%s6697_s7 + $0x18] sm:$0xff]  ;;  %v1029_v12 = vld [vmem:[%s6697_s7 + $0x80] sm:$0xff] }
  0xee   : > { %v1030_v13 = vld [vmem:[%s6697_s7 + $0x88] sm:$0xff]  ;;  %v1046_v14 = vpack.c.bf16 %v1016_v11, %v1015_v10  ;;  %v1013_v16 = vld [vmem:[%s6697_s7] sm:$0xff]  ;;  %v5698_v20 = vld [vmem:[#allocation2 + $0x10] sm:$0xff]  }
  0xef   : > { %v1053_v15 = vpack.c.bf16 %v1030_v13, %v1029_v12  ;;  %v1014_v17 = vld [vmem:[%s6697_s7 + $0x8] sm:$0xff]  ;;  %v5699_v21 = vld [vmem:[#allocation2 + $0x18] sm:$0xff]   ;;  %v5700_v22 = vld [vmem:[#allocation2 + $0x20] sm:$0xff]  }
  0xf0   : > { %5497 = vmatpush3.bf16.xpose.msra.mxu0 %v1051_v47  ;;  %v1045_v18 = vpack.c.bf16 %v1014_v17, %v1013_v16  ;;  %v5697_v19 = vld [vmem:[#allocation2 + $0x8] sm:$0xff]   ;;  %v5702_v24 = vld [vmem:[#allocation2 + $0x30] sm:$0xff]   ;;  %v5703_v25 = vld [vmem:[#allocation2 + $0x38] sm:$0xff]  }
  0xf1   : > { %5498 = vmatprep.subr.bf16.mxu0 %v1058_v48  ;;  %v5701_v23 = vld [vmem:[#allocation2 + $0x28] sm:$0xff]   ;;  %v5704_v26 = vld [vmem:[#allocation2 + $0x40] sm:$0xff]   ;;  %v5706_v28 = vld [vmem:[#allocation2 + $0x50] sm:$0xff]  }
  0xf2   : > { %v5705_v27 = vld [vmem:[#allocation2 + $0x48] sm:$0xff]   ;;  %v5707_v29 = vld [vmem:[#allocation2 + $0x58] sm:$0xff]   ;;  %v5708_v30 = vld [vmem:[#allocation2 + $0x60] sm:$0xff]  }
  0xf3   : > { %v5709_v31 = vld [vmem:[#allocation2 + $0x68] sm:$0xff]   ;;  %v5710_v32 = vld [vmem:[#allocation2 + $0x70] sm:$0xff]   ;;  %v5711_v33 = vld [vmem:[#allocation2 + $0x78] sm:$0xff]  }
  0xf4   : > { %v5712_v34 = vld [vmem:[#allocation2 + $0x80] sm:$0xff]   ;;  %v5713_v35 = vld [vmem:[#allocation2 + $0x88] sm:$0xff]   ;;  %v5714_v36 = vld [vmem:[#allocation2 + $0x90] sm:$0xff]  }
  0xf5   : > { %v5715_v37 = vld [vmem:[#allocation2 + $0x98] sm:$0xff]   ;;  %v5716_v38 = vld [vmem:[#allocation2 + $0xa0] sm:$0xff]   ;;  %v5717_v39 = vld [vmem:[#allocation2 + $0xa8] sm:$0xff]  }
  0xf6   : > { %v5718_v40 = vld [vmem:[#allocation2 + $0xb0] sm:$0xff]   ;;  %v5719_v6 = vld [vmem:[#allocation2 + $0xb8] sm:$0xff]  }
  0xf8   : > { %5499 = vmatpush3.bf16.xpose.msra.mxu0 %v1050_v54 }
  0xf9   : > { %5500 = vmatprep.subr.bf16.mxu0 %v1057_v55 }
 0x100   : > { %5501 = vmatpush3.bf16.xpose.msra.mxu0 %v1049_v60 }
 0x101   : > { %5502 = vmatprep.subr.bf16.mxu0 %v1056_v61 }
 0x108   : > { %5503 = vmatpush3.bf16.xpose.msra.mxu0 %v1048_v2  ;;  %v9313_v2 = vmov 0  }
 0x109   : > { %5504 = vmatprep.subr.bf16.mxu0 %v1055_v3  ;;  %5694 = vset.pattern.permute.xlu0 %v9313_v2 }
 0x10a   : > { %5695 = vset.pattern.permute.xlu1 %v9313_v2  ;;  %3831 = vmatprep.subr.bf16.mxu1 %v9313_v2 }
 0x110   : > { %5505 = vmatpush3.bf16.xpose.msra.mxu0 %v1047_v8 }
 0x111   : > { %5506 = vmatprep.subr.bf16.mxu0 %v1054_v9 }
 0x118   : > { %5507 = vmatpush3.bf16.xpose.msra.mxu0 %v1046_v14 }
 0x119   : > { %5508 = vmatprep.subr.bf16.mxu0 %v1053_v15 }
 0x120   : > { %5509 = vmatpush3.bf16.xpose.msra.mxu0 %v1045_v18 }
 0x127   : > { %5511 = vmatmul.mubr.bf16.vlgmr.msra.gmra.mxu0 %v5696_v50 }
 0x128   : > { %5512 = vmatprep.mubr.bf16.mxu0 %v5697_v19 }
 0x12f   : > { %5513 = vmatmul.mubr.bf16.gmra.mxu0 %v5697_v19 }
 0x130   : > { %5514 = vmatprep.mubr.bf16.mxu0 %v5698_v20 }
 0x137   : > { %5515 = vmatmul.mubr.bf16.gmra.mxu0 %v5698_v20 }
 0x138   : > { %5516 = vmatprep.mubr.bf16.mxu0 %v5699_v21 }
 0x13f   : > { %5517 = vmatmul.mubr.bf16.gmra.mxu0 %v5699_v21 }
 0x140   : > { %5518 = vmatprep.mubr.bf16.mxu0 %v5700_v22 }
 0x147   : > { %5519 = vmatmul.mubr.bf16.gmra.mxu0 %v5700_v22 }
 0x148   : > { %5520 = vmatprep.mubr.bf16.mxu0 %v5701_v23 }
 0x14f   : > { %5521 = vmatmul.mubr.bf16.gmra.mxu0 %v5701_v23 }
 0x150   : > { %5522 = vmatprep.mubr.bf16.mxu0 %v5702_v24 }
 0x157   : > { %5523 = vmatmul.mubr.bf16.gmra.mxu0 %v5702_v24 }
 0x158   : > { %5524 = vmatprep.mubr.bf16.mxu0 %v5703_v25 }
 0x15f   : > { %5525 = vmatmul.mubr.bf16.gmra.mxu0 %v5703_v25 }
 0x160   : > { %5526 = vmatprep.mubr.bf16.mxu0 %v5704_v26 }
 0x167   : > { %5527 = vmatmul.mubr.bf16.gmra.mxu0 %v5704_v26 }
 0x168   : > { %5528 = vmatprep.mubr.bf16.mxu0 %v5705_v27 }
 0x16f   : > { %5529 = vmatmul.mubr.bf16.gmra.mxu0 %v5705_v27 }
 0x170   : > { %5530 = vmatprep.mubr.bf16.mxu0 %v5706_v28 }
 0x177   : > { %5531 = vmatmul.mubr.bf16.gmra.mxu0 %v5706_v28 }
 0x178   : > { %5532 = vmatprep.mubr.bf16.mxu0 %v5707_v29 }
 0x17f   : > { %5533 = vmatmul.mubr.bf16.gmra.mxu0 %v5707_v29 }
 0x180   : > { %5534 = vmatprep.mubr.bf16.mxu0 %v5708_v30 }
 0x187   : > { %5535 = vmatmul.mubr.bf16.gmra.mxu0 %v5708_v30 }
 0x188   : > { %5536 = vmatprep.mubr.bf16.mxu0 %v5709_v31 }
 0x18f   : > { %5537 = vmatmul.mubr.bf16.gmra.mxu0 %v5709_v31 }
 0x190   : > { %5538 = vmatprep.mubr.bf16.mxu0 %v5710_v32 }
 0x197   : > { %5539 = vmatmul.mubr.bf16.gmra.mxu0 %v5710_v32 }
 0x198   : > { %5540 = vmatprep.mubr.bf16.mxu0 %v5711_v33 }
 0x19f   : > { %5541 = vmatmul.mubr.bf16.gmra.mxu0 %v5711_v33 }
 0x1a0   : > { %5542 = vmatprep.mubr.bf16.mxu0 %v5712_v34 }
 0x1a7   : > { %5543 = vmatmul.mubr.bf16.gmra.mxu0 %v5712_v34 }
 0x1a8   : > { %5544 = vmatprep.mubr.bf16.mxu0 %v5713_v35 }
 0x1af   : > { %5545 = vmatmul.mubr.bf16.gmra.mxu0 %v5713_v35 }
 0x1b0   : > { %5546 = vmatprep.mubr.bf16.mxu0 %v5714_v36 }
 0x1b7   : > { %5547 = vmatmul.mubr.bf16.gmra.mxu0 %v5714_v36 }
 0x1b8   : > { %5548 = vmatprep.mubr.bf16.mxu0 %v5715_v37 }
 0x1bf   : > { %5549 = vmatmul.mubr.bf16.gmra.mxu0 %v5715_v37 }
 0x1c0   : > { %5550 = vmatprep.mubr.bf16.mxu0 %v5716_v38 }
 0x1c7   : > { %5551 = vmatmul.mubr.bf16.gmra.mxu0 %v5716_v38 }
 0x1c8   : > { %5552 = vmatprep.mubr.bf16.mxu0 %v5717_v39 }
 0x1cf   : > { %5553 = vmatmul.mubr.bf16.gmra.mxu0 %v5717_v39 }
 0x1d0   : > { %5554 = vmatprep.mubr.bf16.mxu0 %v5718_v40 }
 0x1d7   : > { %5555 = vmatmul.mubr.bf16.gmra.mxu0 %v5718_v40 }
 0x1d8   : > { %5556 = vmatprep.mubr.bf16.mxu0 %v5719_v6 }
 0x1df   : > { %5557 = vmatmul.mubr.bf16.gmra.mxu0 %v5719_v6  ;;  %v5720_v6 = vld [vmem:[#allocation2 + $0xc0] sm:$0xff]  }
 0x1e0   : > { %5558 = vmatprep.mubr.bf16.mxu0 %v5720_v6 }
 0x1e7   : > { %v7139_v41 = vpop.f32.mrf.mxu0  ;;  %5559 = vmatmul.mubr.bf16.gmra.mxu0 %v5720_v6 }
 0x1e9   : > { %v7141_v42 = vpop.f32.mrf.mxu0 }
 0x1ea   : > { %v1718_v43 = vmax.f32 %v7139_v41, %v7141_v42 }
 0x1eb   : > { %v7145_v44 = vpop.f32.mrf.mxu0 }
 0x1ec   : > { %1719 = vmax.xlane.f32.xlu0 %v1718_v43 }
 0x1ed   : > { %v7147_v45 = vpop.f32.mrf.mxu0 }
 0x1ee   : > { %v1721_v46 = vmax.f32 %v7145_v44, %v7147_v45 }
 0x1ef   : > { %v7151_v47 = vpop.f32.mrf.mxu0 }
 0x1f0   : > { %1722 = vmax.xlane.f32.xlu0 %v1721_v46 }
 0x1f1   : > { %v7153_v48 = vpop.f32.mrf.mxu0 }
 0x1f2   : > { %v1724_v49 = vmax.f32 %v7151_v47, %v7153_v48 }
 0x1f3   : > { %v7157_v50 = vpop.f32.mrf.mxu0 }
 0x1f4   : > { %1725 = vmax.xlane.f32.xlu1 %v1724_v49 }
 0x1f5   : > { %v7159_v51 = vpop.f32.mrf.mxu0 }
 0x1f6   : > { %v1727_v52 = vmax.f32 %v7157_v50, %v7159_v51 }
 0x1f7   : > { %v7163_v53 = vpop.f32.mrf.mxu0 }
 0x1f8   : > { %1728 = vmax.xlane.f32.xlu1 %v1727_v52 }
 0x1f9   : > { %v7165_v54 = vpop.f32.mrf.mxu0 }
 0x1fa   : > { %v1730_v55 = vmax.f32 %v7163_v53, %v7165_v54 }
 0x1fb   : > { %v7169_v56 = vpop.f32.mrf.mxu0 }
 0x1fc   : > { %1731 = vmax.xlane.f32.xlu0 %v1730_v55 }
 0x1fd   : > { %v7171_v57 = vpop.f32.mrf.mxu0 }
 0x1fe   : > { %v1733_v58 = vmax.f32 %v7169_v56, %v7171_v57 }
 0x1ff   : > { %v7175_v59 = vpop.f32.mrf.mxu0 }
 0x200   : > { %1734 = vmax.xlane.f32.xlu1 %v1733_v58 }
 0x201   : > { %v7177_v60 = vpop.f32.mrf.mxu0 }
 0x202   : > { %v1736_v61 = vmax.f32 %v7175_v59, %v7177_v60 }
 0x203   : > { %v7181_v62 = vpop.f32.mrf.mxu0 }
 0x204   : > { %1737 = vmax.xlane.f32.xlu0 %v1736_v61 }
 0x205   : > { %v7183_v63 = vpop.f32.mrf.mxu0 }
 0x206   : > { %v1739_v0 = vmax.f32 %v7181_v62, %v7183_v63 }
 0x207   : > { %v7187_v1 = vpop.f32.mrf.mxu0 }
 0x208   : > { %1740 = vmax.xlane.f32.xlu1 %v1739_v0 }
 0x209   : > { %v7190_v3 = vpop.f32.mrf.mxu0 }
 0x20a   : > { %v1742_v4 = vmax.f32 %v7187_v1, %v7190_v3 }
 0x20b   : > { %v7196_v5 = vpop.f32.mrf.mxu0 }
 0x20c   : > { %1743 = vmax.xlane.f32.xlu0 %v1742_v4 }
 0x20d   : > { %v7198_v7 = vpop.f32.mrf.mxu0 }
 0x20e   : > { %v1745_v8 = vmax.f32 %v7196_v5, %v7198_v7 }
 0x20f   : > { %v7202_v9 = vpop.f32.mrf.mxu0 }
 0x210   : > { %9638 = vst [vmem:[#allocation21_spill] sm:$0xff] %v7202_v9  ;;  %1746 = vmax.xlane.f32.xlu1 %v1745_v8 }
 0x211   : > { %v7204_v10 = vpop.f32.mrf.mxu0 }
 0x212   : > { %9639 = vst [vmem:[#allocation22_spill] sm:$0xff] %v7204_v10  ;;  %v1748_v11 = vmax.f32 %v7202_v9, %v7204_v10 }
 0x213   : > { %v7208_v12 = vpop.f32.mrf.mxu0 }
 0x214   : > { %9640 = vst [vmem:[#allocation23_spill] sm:$0xff] %v7208_v12  ;;  %1749 = vmax.xlane.f32.xlu0 %v1748_v11 }
 0x215   : > { %v7210_v13 = vpop.f32.mrf.mxu0 }
 0x216   : > { %9641 = vst [vmem:[#allocation24_spill] sm:$0xff] %v7210_v13  ;;  %v1751_v14 = vmax.f32 %v7208_v12, %v7210_v13  ;;  %v7641_v12 = vld [vmem:[#allocation3 + $0xd8] sm:$0xff] }
 0x217   : > { %v7214_v15 = vpop.f32.mrf.mxu0 }
 0x218   : > { %9642 = vst [vmem:[#allocation25_spill] sm:$0xff] %v7214_v15  ;;  %1752 = vmax.xlane.f32.xlu1 %v1751_v14 }
 0x219   : > { %v7216_v16 = vpop.f32.mrf.mxu0 }
 0x21a   : > { %9643 = vst [vmem:[#allocation26_spill] sm:$0xff] %v7216_v16  ;;  %v1754_v17 = vmax.f32 %v7214_v15, %v7216_v16 }
 0x21b   : > { %v7220_v18 = vpop.f32.mrf.mxu0 }
 0x21c   : > { %9644 = vst [vmem:[#allocation27_spill] sm:$0xff] %v7220_v18  ;;  %1755 = vmax.xlane.f32.xlu0 %v1754_v17 }
 0x21d   : > { %v7222_v19 = vpop.f32.mrf.mxu0 }
 0x21e   : > { %9645 = vst [vmem:[#allocation28_spill] sm:$0xff] %v7222_v19  ;;  %v1757_v20 = vmax.f32 %v7220_v18, %v7222_v19  ;;  %v7585_v18 = vld [vmem:[#allocation3 + $0xa8] sm:$0xff] }
 0x21f   : > { %v7226_v21 = vpop.f32.mrf.mxu0  ;;  %9711 = vst [vmem:[#allocation93_spill] sm:$0xff] %v7585_v18 }
 0x220   : > { %9646 = vst [vmem:[#allocation29_spill] sm:$0xff] %v7226_v21  ;;  %1758 = vmax.xlane.f32.xlu1 %v1757_v20 }
 0x221   : > { %v7228_v22 = vpop.f32.mrf.mxu0 }
 0x222   : > { %9647 = vst [vmem:[#allocation30_spill] sm:$0xff] %v7228_v22  ;;  %v1760_v23 = vmax.f32 %v7226_v21, %v7228_v22 }
 0x223   : > { %v7232_v24 = vpop.f32.mrf.mxu0 }
 0x224   : > { %9648 = vst [vmem:[#allocation31_spill] sm:$0xff] %v7232_v24  ;;  %1761 = vmax.xlane.f32.xlu0 %v1760_v23 }
 0x225   : > { %v7234_v25 = vpop.f32.mrf.mxu0 }
 0x226   : > { %9649 = vst [vmem:[#allocation32_spill] sm:$0xff] %v7234_v25  ;;  %v1763_v26 = vmax.f32 %v7232_v24, %v7234_v25  ;;  %v7514_v25 = vld [vmem:[#allocation3 + $0x68] sm:$0xff] }
 0x227   : > { %v7238_v27 = vpop.f32.mrf.mxu0 }
 0x228   : > { %9650 = vst [vmem:[#allocation33_spill] sm:$0xff] %v7238_v27  ;;  %1764 = vmax.xlane.f32.xlu1 %v1763_v26 }
 0x229   : > { %v7240_v28 = vpop.f32.mrf.mxu0 }
 0x22a   : > { %9651 = vst [vmem:[#allocation34_spill] sm:$0xff] %v7240_v28  ;;  %v1766_v29 = vmax.f32 %v7238_v27, %v7240_v28  ;;  %v7475_v28 = vld [vmem:[#allocation3 + $0x48] sm:$0xff]  ;;  %v7485_v27 = vld [vmem:[#allocation3 + $0x50] sm:$0xff] }
 0x22b   : > { %v7244_v30 = vpop.f32.mrf.mxu0 }
 0x22c   : > { %9652 = vst [vmem:[#allocation35_spill] sm:$0xff] %v7244_v30  ;;  %1767 = vmax.xlane.f32.xlu0 %v1766_v29 }
 0x22d   : > { %v7246_v31 = vpop.f32.mrf.mxu0 }
 0x22e   : > { %9653 = vst [vmem:[#allocation36_spill] sm:$0xff] %v7246_v31  ;;  %v1769_v32 = vmax.f32 %v7244_v30, %v7246_v31  ;;  %v7505_v30 = vld [vmem:[#allocation3 + $0x60] sm:$0xff] }
 0x22f   : > { %v7250_v33 = vpop.f32.mrf.mxu0  ;;  %9696 = vst [vmem:[#allocation78_spill] sm:$0xff] %v7505_v30 }
 0x230   : > { %9654 = vst [vmem:[#allocation37_spill] sm:$0xff] %v7250_v33  ;;  %1770 = vmax.xlane.f32.xlu1 %v1769_v32 }
 0x231   : > { %v7252_v34 = vpop.f32.mrf.mxu0 }
 0x232   : > { %9655 = vst [vmem:[#allocation38_spill] sm:$0xff] %v7252_v34  ;;  %v1772_v35 = vmax.f32 %v7250_v33, %v7252_v34  ;;  %v1080_v34 = vld [vmem:[%s6703_s5 + $0x98] sm:$0xff] }
 0x233   : > { %v7256_v36 = vpop.f32.mrf.mxu0 }
 0x234   : > { %9656 = vst [vmem:[#allocation39_spill] sm:$0xff] %v7256_v36  ;;  %1773 = vmax.xlane.f32.xlu0 %v1772_v35 }
 0x235   : > { %v7258_v37 = vpop.f32.mrf.mxu0 }
 0x236   : > { %9657 = vst [vmem:[#allocation40_spill] sm:$0xff] %v7258_v37  ;;  %v1775_v38 = vmax.f32 %v7256_v36, %v7258_v37 }
 0x237   : > { %v7262_v39 = vpop.f32.mrf.mxu0 }
 0x238   : > { %9658 = vst [vmem:[#allocation41_spill] sm:$0xff] %v7262_v39  ;;  %1776 = vmax.xlane.f32.xlu1 %v1775_v38 }
 0x239   : > { %v7264_v40 = vpop.f32.mrf.mxu0 }
 0x23a   : > { %9659 = vst [vmem:[#allocation42_spill] sm:$0xff] %v7264_v40  ;;  %v1778_v43 = vmax.f32 %v7262_v39, %v7264_v40 }
 0x23b   : > { %v7268_v46 = vpop.f32.mrf.mxu0 }
 0x23c   : > { %9660 = vst [vmem:[#allocation43_spill] sm:$0xff] %v7268_v46  ;;  %1779 = vmax.xlane.f32.xlu0 %v1778_v43 }
 0x23d   : > { %v7270_v49 = vpop.f32.mrf.mxu0 }
 0x23e   : > { %9661 = vst [vmem:[#allocation44_spill] sm:$0xff] %v7270_v49  ;;  %v1781_v52 = vmax.f32 %v7268_v46, %v7270_v49  ;;  %v7453_v49 = vld [vmem:[#allocation3 + $0x38] sm:$0xff]  ;;  %v1079_v46 = vld [vmem:[%s6703_s5 + $0x90] sm:$0xff] }
 0x23f   : > { %v7274_v55 = vpop.f32.mrf.mxu0 }
 0x240   : > { %9662 = vst [vmem:[#allocation45_spill] sm:$0xff] %v7274_v55  ;;  %1782 = vmax.xlane.f32.xlu1 %v1781_v52 }
 0x241   : > { %v7276_v58 = vpop.f32.mrf.mxu0 }
 0x242   : > { %9663 = vst [vmem:[#allocation46_spill] sm:$0xff] %v7276_v58  ;;  %v1784_v61 = vmax.f32 %v7274_v55, %v7276_v58  ;;  %v7420_v58 = vld [vmem:[#allocation3 + $0x20] sm:$0xff] }
 0x243   : > { %v7280_v0 = vpop.f32.mrf.mxu0 }
 0x244   : > { %9664 = vst [vmem:[#allocation47_spill] sm:$0xff] %v7280_v0  ;;  %1785 = vmax.xlane.f32.xlu0 %v1784_v61 }
 0x245   : > { %v7282_v4 = vpop.f32.mrf.mxu0 }
 0x246   : > { %9665 = vst [vmem:[#allocation48_spill] sm:$0xff] %v7282_v4  ;;  %v1787_v8 = vmax.f32 %v7280_v0, %v7282_v4  ;;  %v1083_v4 = vld [vmem:[%s6703_s5 + $0xb0] sm:$0xff]  ;;  %v1084_v0 = vld [vmem:[%s6703_s5 + $0xb8] sm:$0xff] }
 0x247   : > { %v7286_v11 = vpop.f32.mrf.mxu0  ;;  %v1104_v39 = vpack.c.bf16 %v1084_v0, %v1083_v4  ;;  %v7463_v4 = vld [vmem:[#allocation3 + $0x40] sm:$0xff] }
 0x248   : > { %9666 = vst [vmem:[#allocation49_spill] sm:$0xff] %v7286_v11  ;;  %1788 = vmax.xlane.f32.xlu1 %v1787_v8  ;;  %v1075_v8 = vld [vmem:[%s6703_s5 + $0x70] sm:$0xff] }
 0x249   : > { %v7288_v14 = vpop.f32.mrf.mxu0 }
 0x24a   : > { %9667 = vst [vmem:[#allocation50_spill] sm:$0xff] %v7288_v14  ;;  %v1790_v17 = vmax.f32 %v7286_v11, %v7288_v14 }
 0x24b   : > { %v7292_v20 = vpop.f32.mrf.mxu0 }
 0x24c   : > { %9668 = vst [vmem:[#allocation51_spill] sm:$0xff] %v7292_v20  ;;  %1791 = vmax.xlane.f32.xlu0 %v1790_v17  ;;  %v1076_v17 = vld [vmem:[%s6703_s5 + $0x78] sm:$0xff] }
 0x24d   : > { %v7294_v23 = vpop.f32.mrf.mxu0  ;;  %v1100_v2 = vpack.c.bf16 %v1076_v17, %v1075_v8  ;;  %v1072_v17 = vld [vmem:[%s6703_s5 + $0x58] sm:$0xff] }
 0x24e   : > { %9669 = vst [vmem:[#allocation52_spill] sm:$0xff] %v7294_v23  ;;  %v1793_v26 = vmax.f32 %v7292_v20, %v7294_v23  ;;  %v1088_v20 = vld [vmem:[%s6703_s5 + $0xd8] sm:$0xff] }
 0x24f   : > { %v7298_v29 = vpop.f32.mrf.mxu0  ;;  %3832 = vmatpush1.bf16.msra.mxu1 %v1100_v2  ;;  %v1071_v2 = vld [vmem:[%s6703_s5 + $0x50] sm:$0xff] }
 0x250   : > { %9670 = vst [vmem:[#allocation53_spill] sm:$0xff] %v7298_v29  ;;  %1794 = vmax.xlane.f32.xlu1 %v1793_v26 }
 0x251   : > { %v7300_v32 = vpop.f32.mrf.mxu0 }
 0x252   : > { %9671 = vst [vmem:[#allocation54_spill] sm:$0xff] %v7300_v32  ;;  %v1796_v35 = vmax.f32 %v7298_v29, %v7300_v32  ;;  %v9678_v29 = vmov 0  }
 0x253   : > { %v7304_v38 = vpop.f32.mrf.mxu0  ;;  %3833 = vmatprep.subr.bf16.mxu1 %v9678_v29 }
 0x254   : > { %9672 = vst [vmem:[#allocation55_spill] sm:$0xff] %v7304_v38  ;;  %1797 = vmax.xlane.f32.xlu0 %v1796_v35 }
 0x255   : > { %v7306_v43 = vpop.f32.mrf.mxu0 }
 0x256   : > { %9673 = vst [vmem:[#allocation56_spill] sm:$0xff] %v7306_v43  ;;  %v1799_v52 = vmax.f32 %v7304_v38, %v7306_v43  ;;  %v1073_v43 = vld [vmem:[%s6703_s5 + $0x60] sm:$0xff] }
 0x257   : > { %v7310_v61 = vpop.f32.mrf.mxu0 }
 0x258   : > { %9674 = vst [vmem:[#allocation57_spill] sm:$0xff] %v7310_v61  ;;  %1800 = vmax.xlane.f32.xlu1 %v1799_v52  ;;  %v1074_v52 = vld [vmem:[%s6703_s5 + $0x68] sm:$0xff] }
 0x259   : > { %v7312_v6 = vpop.f32.mrf.mxu0  ;;  %v1099_v14 = vpack.c.bf16 %v1074_v52, %v1073_v43 }
 0x25a   : > { %9675 = vst [vmem:[#allocation58_spill] sm:$0xff] %v7312_v6  ;;  %v1802_v26 = vmax.f32 %v7310_v61, %v7312_v6  ;;  %v1098_v61 = vpack.c.bf16 %v1072_v17, %v1071_v2  ;;  %v1068_v17 = vld [vmem:[%s6703_s5 + $0x38] sm:$0xff] }
 0x25b   : > { %v7318_v35 = vpop.f32.mrf.mxu0  ;;  %3834 = vmatpush1.bf16.msra.mxu1 %v1099_v14  ;;  %v1069_v14 = vld [vmem:[%s6703_s5 + $0x40] sm:$0xff] }
 0x25c   : > { %9676 = vst [vmem:[#allocation59_spill] sm:$0xff] %v7318_v35  ;;  %1803 = vmax.xlane.f32.xlu0 %v1802_v26  ;;  %3835 = vmatprep.subr.bf16.mxu1 %v9678_v29 }
 0x25d   : > { %v7320_v32 = vpop.f32.mrf.mxu0 }
 0x25e   : > { %9677 = vst [vmem:[#allocation60_spill] sm:$0xff] %v7320_v32  ;;  %v1805_v38 = vmax.f32 %v7318_v35, %v7320_v32 }
 0x25f   : > { %v7327_v6 = vpop.f32.mrf.mxu0  ;;  %3836 = vmatpush1.bf16.msra.mxu1 %v1098_v61  ;;  %v1067_v61 = vld [vmem:[%s6703_s5 + $0x30] sm:$0xff] }
 0x260   : > { %9679 = vst [vmem:[#allocation61_spill] sm:$0xff] %v7327_v6  ;;  %1806 = vmax.xlane.f32.xlu1 %v1805_v38  ;;  %3837 = vmatprep.subr.bf16.mxu1 %v9678_v29  ;;  %v1070_v38 = vld [vmem:[%s6703_s5 + $0x48] sm:$0xff] }
 0x261   : > { %v7329_v8 = vpop.f32.mrf.mxu0  ;;  %v1097_v35 = vpack.c.bf16 %v1070_v38, %v1069_v14  ;;  %v1066_v38 = vld [vmem:[%s6703_s5 + $0x28] sm:$0xff] }
 0x262   : > { %9680 = vst [vmem:[#allocation62_spill] sm:$0xff] %v7329_v8  ;;  %v1808_v26 = vmax.f32 %v7327_v6, %v7329_v8  ;;  %v1096_v6 = vpack.c.bf16 %v1068_v17, %v1067_v61  ;;  %v1064_v17 = vld [vmem:[%s6703_s5 + $0x18] sm:$0xff] }
 0x263   : > { %v7336_v32 = vpop.f32.mrf.mxu0  ;;  %3838 = vmatpush1.bf16.msra.mxu1 %v1097_v35  ;;  %v1065_v35 = vld [vmem:[%s6703_s5 + $0x20] sm:$0xff] }
 0x264   : > { %9681 = vst [vmem:[#allocation63_spill] sm:$0xff] %v7336_v32  ;;  %1809 = vmax.xlane.f32.xlu0 %v1808_v26  ;;  %3839 = vmatprep.subr.bf16.mxu1 %v9678_v29 }
 0x265   : > { %v7338_v43 = vpop.f32.mrf.mxu0 }
 0x266   : > { %9682 = vst [vmem:[#allocation64_spill] sm:$0xff] %v7338_v43  ;;  %v1811_v52 = vmax.f32 %v7336_v32, %v7338_v43  ;;  %v1095_v32 = vpack.c.bf16 %v1066_v38, %v1065_v35  ;;  %v1061_v38 = vld [vmem:[%s6703_s5] sm:$0xff] }
 0x267   : > { %v7345_v8 = vpop.f32.mrf.mxu0  ;;  %3840 = vmatpush1.bf16.msra.mxu1 %v1096_v6  ;;  %v1063_v6 = vld [vmem:[%s6703_s5 + $0x10] sm:$0xff] }
 0x268   : > { %9683 = vst [vmem:[#allocation65_spill] sm:$0xff] %v7345_v8  ;;  %1812 = vmax.xlane.f32.xlu1 %v1811_v52  ;;  %3841 = vmatprep.subr.bf16.mxu1 %v9678_v29 }
 0x269   : > { %v7347_v2 = vpop.f32.mrf.mxu0 }
 0x26a   : > { %9684 = vst [vmem:[#allocation66_spill] sm:$0xff] %v7347_v2  ;;  %v1814_v26 = vmax.f32 %v7345_v8, %v7347_v2  ;;  %v1094_v2 = vpack.c.bf16 %v1064_v17, %v1063_v6 }
 0x26b   : > { %v7354_v43 = vpop.f32.mrf.mxu0  ;;  %3842 = vmatpush1.bf16.msra.mxu1 %v1095_v32 }
 0x26c   : > { %9685 = vst [vmem:[#allocation67_spill] sm:$0xff] %v7354_v43  ;;  %1815 = vmax.xlane.f32.xlu0 %v1814_v26  ;;  %3843 = vmatprep.subr.bf16.mxu1 %v9678_v29 }
 0x26d   : > { %v7356_v14 = vpop.f32.mrf.mxu0 }
 0x26e   : > { %9686 = vst [vmem:[#allocation68_spill] sm:$0xff] %v7356_v14  ;;  %v1817_v52 = vmax.f32 %v7354_v43, %v7356_v14  ;;  %v7374_v14 = vld [vmem:[#allocation3] sm:$0xff] }
 0x26f   : > { %v7363_v11 = vpop.f32.mrf.mxu0  ;;  %3844 = vmatpush1.bf16.msra.mxu1 %v1094_v2 }
 0x270   : > { %9687 = vst [vmem:[#allocation69_spill] sm:$0xff] %v7363_v11  ;;  %1818 = vmax.xlane.f32.xlu1 %v1817_v52  ;;  %3845 = vmatprep.subr.bf16.mxu1 %v9678_v29  ;;  %v1062_v52 = vld [vmem:[%s6703_s5 + $0x8] sm:$0xff] }
 0x271   : > { %v7365_v61 = vpop.f32.mrf.mxu0  ;;  %v1093_v17 = vpack.c.bf16 %v1062_v52, %v1061_v38 }
 0x272   : > { %9688 = vst [vmem:[#allocation70_spill] sm:$0xff] %v7365_v61  ;;  %v1820_v26 = vmax.f32 %v7363_v11, %v7365_v61  ;;  %v7386_v61 = vld [vmem:[#allocation3 + $0x8] sm:$0xff]  ;;  %v1092_v11 = vld [vmem:[%s6703_s5 + $0xf8] sm:$0xff] }
 0x273   : > { %v7372_v8 = vpop.f32.mrf.mxu0  ;;  %3846 = vmatpush1.bf16.msra.mxu1 %v1093_v17  ;;  %v1090_v17 = vld [vmem:[%s6703_s5 + $0xe8] sm:$0xff] }
 0x274   : > { %9689 = vst [vmem:[#allocation71_spill] sm:$0xff] %v7372_v8  ;;  %1821 = vmax.xlane.f32.xlu0 %v1820_v26  ;;  %3847 = vmatprep.subr.bf16.mxu1 %v9678_v29  ;;  %v1091_v26 = vld [vmem:[%s6703_s5 + $0xf0] sm:$0xff] }
 0x275   : > { %v1720_v32 = vpop.xlane.xlu0 %1719  ;;  %v7376_v35 = vpop.f32.mrf.mxu0  ;;  %v1108_v23 = vpack.c.bf16 %v1092_v11, %v1091_v26  ;;  %v5721_v11 = vld [vmem:[#allocation2 + $0xc8] sm:$0xff]  }
 0x276   : > { %9690 = vst [vmem:[#allocation72_spill] sm:$0xff] %v7376_v35  ;;  %v7382_v43 = vmax.f32 %v7374_v14, %v1720_v32  ;;  %v1823_v6 = vmax.f32 %v7372_v8, %v7376_v35  ;;  %v7396_v35 = vld [vmem:[#allocation3 + $0x10] sm:$0xff]  ;;  %v7408_v8 = vld [vmem:[#allocation3 + $0x18] sm:$0xff]  ;;  %5560 = vmatprep.mubr.bf16.mxu0 %v5721_v11 }
 0x277   : > { %3848 = vmatpush2.bf16.msra.mxu1 %v1108_v23  ;;  %5561 = vmatmul.mubr.bf16.gmra.mxu0 %v5721_v11 }
 0x278   : > { %4248 = vst.msk [vmem:[#allocation3] sm:$0xff] %vm3254_vm1, %v7382_v43  ;;  %1824 = vmax.xlane.f32.xlu1 %v1823_v6  ;;  %3849 = vmatprep.subr.bf16.mxu1 %v9678_v29  ;;  %v1089_v6 = vld [vmem:[%s6703_s5 + $0xe0] sm:$0xff] }
 0x279   : > { %v1723_v2 = vpop.xlane.xlu0 %1722  ;;  %v1107_v26 = vpack.c.bf16 %v1090_v17, %v1089_v6 }
 0x27a   : > { %v7394_v32 = vmax.f32 %v7386_v61, %v1723_v2 }
 0x27b   : > { %3850 = vmatpush2.bf16.msra.mxu1 %v1107_v26 }
 0x27c   : > { %4249 = vst.msk [vmem:[#allocation3 + $0x8] sm:$0xff] %vm3254_vm1, %v7394_v32  ;;  %3851 = vmatprep.subr.bf16.mxu1 %v9678_v29 }
 0x27d   : > { %v1726_v52 = vpop.xlane.xlu1 %1725 }
 0x27e   : > { %v7406_v2 = vmax.f32 %v7396_v35, %v1726_v52  ;;  %v1087_v52 = vld [vmem:[%s6703_s5 + $0xd0] sm:$0xff] }
 0x27f   : > { %v1106_v17 = vpack.c.bf16 %v1088_v20, %v1087_v52  ;;  %v1085_v20 = vld [vmem:[%s6703_s5 + $0xc0] sm:$0xff]  ;;  %v1086_v52 = vld [vmem:[%s6703_s5 + $0xc8] sm:$0xff] }
 0x280   : > { %4250 = vst.msk [vmem:[#allocation3 + $0x10] sm:$0xff] %vm3254_vm1, %v7406_v2 }
 0x281   : > { %v1729_v23 = vpop.xlane.xlu1 %1728  ;;  %3852 = vmatpush2.bf16.msra.mxu1 %v1106_v17  ;;  %v1105_v17 = vpack.c.bf16 %v1086_v52, %v1085_v20  ;;  %v1081_v20 = vld [vmem:[%s6703_s5 + $0xa0] sm:$0xff]  ;;  %v1082_v52 = vld [vmem:[%s6703_s5 + $0xa8] sm:$0xff] }
 0x282   : > { %v7418_v6 = vmax.f32 %v7408_v8, %v1729_v23  ;;  %3853 = vmatprep.subr.bf16.mxu1 %v9678_v29  ;;  %v7430_v23 = vld [vmem:[#allocation3 + $0x28] sm:$0xff] }
 0x284   : > { %4251 = vst.msk [vmem:[#allocation3 + $0x18] sm:$0xff] %vm3254_vm1, %v7418_v6 }
 0x285   : > { %v1732_v26 = vpop.xlane.xlu0 %1731  ;;  %3854 = vmatpush2.bf16.msra.mxu1 %v1105_v17  ;;  %v1103_v17 = vpack.c.bf16 %v1082_v52, %v1081_v20  ;;  %v1077_v20 = vld [vmem:[%s6703_s5 + $0x80] sm:$0xff]  ;;  %v1078_v52 = vld [vmem:[%s6703_s5 + $0x88] sm:$0xff] }
 0x286   : > { %v7428_v11 = vmax.f32 %v7420_v58, %v1732_v26  ;;  %v7441_v26 = vld [vmem:[#allocation3 + $0x30] sm:$0xff]  ;;  %3855 = vmatprep.subr.bf16.mxu1 %v9678_v29 }
 0x288   : > { %4252 = vst.msk [vmem:[#allocation3 + $0x20] sm:$0xff] %vm3254_vm1, %v7428_v11 }
 0x289   : > { %v1735_v38 = vpop.xlane.xlu1 %1734  ;;  %2173 = vperm.xlu1 %5695, %v7394_v32   ;;  %3856 = vmatpush2.bf16.msra.mxu1 %v1104_v39  ;;  %v7467_v39 = vpop.f32.mrf.mxu0 }
 0x28a   : > { %v7438_v55 = vmax.f32 %v7430_v23, %v1735_v38  ;;  %2168 = vperm.xlu0 %5694, %v7382_v43   ;;  %3857 = vmatprep.subr.bf16.mxu1 %v9678_v29  ;;  %9691 = vst [vmem:[#allocation73_spill] sm:$0xff] %v7467_v39 }
 0x28c   : > { %4253 = vst.msk [vmem:[#allocation3 + $0x28] sm:$0xff] %vm3254_vm1, %v7438_v55 }
 0x28d   : > { %v1738_v40 = vpop.xlane.xlu0 %1737  ;;  %3858 = vmatpush2.bf16.msra.mxu1 %v1103_v17 }
 0x28e   : > { %v7451_v38 = vmax.f32 %v7441_v26, %v1738_v40  ;;  %v1102_v40 = vpack.c.bf16 %v1080_v34, %v1079_v46  ;;  %3859 = vmatprep.subr.bf16.mxu1 %v9678_v29  ;;  %v7479_v34 = vpop.f32.mrf.mxu0 }
 0x28f   : > { %9692 = vst [vmem:[#allocation74_spill] sm:$0xff] %v7479_v34  ;;  %v1826_v24 = vmax.f32 %v7467_v39, %v7479_v34  ;;  %v1974_v34 = vsub.f32 %v7374_v14, %v7382_v43  ;;  %v7550_v43 = vld [vmem:[#allocation3 + $0x88] sm:$0xff] }
 0x290   : > { %4254 = vst.msk [vmem:[#allocation3 + $0x30] sm:$0xff] %vm3254_vm1, %v7451_v38  ;;  %9702 = vst [vmem:[#allocation84_spill] sm:$0xff] %v7550_v43 }
 0x291   : > { %v1741_v33 = vpop.xlane.xlu1 %1740  ;;  %3860 = vmatpush2.bf16.msra.mxu1 %v1102_v40 }
 0x292   : > { %v7461_v0 = vmax.f32 %v7453_v49, %v1741_v33  ;;  %v1101_v33 = vpack.c.bf16 %v1078_v52, %v1077_v20  ;;  %3861 = vmatprep.subr.bf16.mxu1 %v9678_v29  ;;  %v7494_v52 = vld [vmem:[#allocation3 + $0x58] sm:$0xff] }
 0x294   : > { %4255 = vst.msk [vmem:[#allocation3 + $0x38] sm:$0xff] %vm3254_vm1, %v7461_v0 }
 0x295   : > { %v1744_v37 = vpop.xlane.xlu0 %1743  ;;  %3862 = vmatpush2.bf16.msra.mxu1 %v1101_v33 }
 0x296   : > { %v7473_v36 = vmax.f32 %v7463_v4, %v1744_v37  ;;  %v7489_v37 = vpop.f32.mrf.mxu0 }
 0x297   : > { %9693 = vst [vmem:[#allocation75_spill] sm:$0xff] %v7489_v37 }
 0x298   : > { %4256 = vst.msk [vmem:[#allocation3 + $0x40] sm:$0xff] %vm3254_vm1, %v7473_v36  ;;  %v7498_v29 = vpop.f32.mrf.mxu0 }
 0x299   : > { %v1747_v46 = vpop.xlane.xlu1 %1746  ;;  %9694 = vst [vmem:[#allocation76_spill] sm:$0xff] %v7498_v29  ;;  %v1829_v19 = vmax.f32 %v7489_v37, %v7498_v29  ;;  %v7543_v29 = vld [vmem:[#allocation3 + $0x80] sm:$0xff] }
 0x29a   : > { %v7483_v17 = vmax.f32 %v7475_v28, %v1747_v46  ;;  %v7503_v33 = vpop.f32.mrf.mxu0  ;;  %9700 = vst [vmem:[#allocation82_spill] sm:$0xff] %v7543_v29 }
 0x29b   : > { %9695 = vst [vmem:[#allocation77_spill] sm:$0xff] %v7503_v33 }
 0x29c   : > { %4257 = vst.msk [vmem:[#allocation3 + $0x48] sm:$0xff] %vm3254_vm1, %v7483_v17  ;;  %v7512_v21 = vpop.f32.mrf.mxu0 }
 0x29d   : > { %v1750_v40 = vpop.xlane.xlu0 %1749  ;;  %9697 = vst [vmem:[#allocation79_spill] sm:$0xff] %v7512_v21  ;;  %v1832_v16 = vmax.f32 %v7503_v33, %v7512_v21  ;;  %v7536_v21 = vld [vmem:[#allocation3 + $0x78] sm:$0xff] }
 0x29e   : > { %v7492_v20 = vmax.f32 %v7485_v27, %v1750_v40  ;;  %9699 = vst [vmem:[#allocation81_spill] sm:$0xff] %v7536_v21 }
 0x2a0   : > { %4258 = vst.msk [vmem:[#allocation3 + $0x50] sm:$0xff] %vm3254_vm1, %v7492_v20 }
 0x2a1   : > { %v1753_v46 = vpop.xlane.xlu1 %1752 }
 0x2a2   : > { %v7501_v31 = vmax.f32 %v7494_v52, %v1753_v46 }
 0x2a4   : > { %4259 = vst.msk [vmem:[#allocation3 + $0x58] sm:$0xff] %vm3254_vm1, %v7501_v31 }
 0x2a5   : > { %v1756_v40 = vpop.xlane.xlu0 %1755 }
 0x2a6   : > { %v7510_v22 = vmax.f32 %v7505_v30, %v1756_v40  ;;  %v7525_v40 = vld [vmem:[#allocation3 + $0x70] sm:$0xff] }
 0x2a7   : > { %9698 = vst [vmem:[#allocation80_spill] sm:$0xff] %v7525_v40 }
 0x2a8   : > { %4260 = vst.msk [vmem:[#allocation3 + $0x60] sm:$0xff] %vm3254_vm1, %v7510_v22 }
 0x2a9   : > { %v1759_v46 = vpop.xlane.xlu1 %1758  ;;  %1827 = vmax.xlane.f32.xlu0 %v1826_v24 }
 0x2aa   : > { %v7523_v15 = vmax.f32 %v7514_v25, %v1759_v46  ;;  %v2038_v46 = vmul.f32 1.442695, %v1974_v34  ;;  %v5722_v34 = vld [vmem:[#allocation2 + $0xd0] sm:$0xff]  }
 0x2ab   : > { %5562 = vmatprep.mubr.bf16.mxu0 %v5722_v34 }
 0x2ac   : > { %4261 = vst.msk [vmem:[#allocation3 + $0x68] sm:$0xff] %vm3254_vm1, %v7523_v15  ;;  %5728 = vpow2.f32 %v2038_v46  ;;  %5563 = vmatmul.mubr.bf16.gmra.mxu0 %v5722_v34  ;;  %v7576_v34 = vld [vmem:[#allocation3 + $0xa0] sm:$0xff] }
 0x2ad   : > { %v1762_v39 = vpop.xlane.xlu0 %1761  ;;  %1830 = vmax.xlane.f32.xlu1 %v1829_v19  ;;  %1833 = vmax.xlane.f32.xlu0 %v1832_v16  ;;  %9708 = vst [vmem:[#allocation90_spill] sm:$0xff] %v7576_v34 }
 0x2ae   : > { %v7534_v24 = vmax.f32 %v7525_v40, %v1762_v39 }
 0x2b0   : > { %4262 = vst.msk [vmem:[#allocation3 + $0x70] sm:$0xff] %vm3254_vm1, %v7534_v24 }
 0x2b1   : > { %v1765_v33 = vpop.xlane.xlu1 %1764 }
 0x2b2   : > { %v7541_v37 = vmax.f32 %v7536_v21, %v1765_v33  ;;  %v7557_v33 = vld [vmem:[#allocation3 + $0x90] sm:$0xff] }
 0x2b3   : > { %9703 = vst [vmem:[#allocation85_spill] sm:$0xff] %v7557_v33 }
 0x2b4   : > { %4263 = vst.msk [vmem:[#allocation3 + $0x78] sm:$0xff] %vm3254_vm1, %v7541_v37 }
 0x2b5   : > { %v1768_v16 = vpop.xlane.xlu0 %1767 }
 0x2b6   : > { %v7548_v19 = vmax.f32 %v7543_v29, %v1768_v16  ;;  %v7565_v29 = vld [vmem:[#allocation3 + $0x98] sm:$0xff] }
 0x2b7   : > { %9705 = vst [vmem:[#allocation87_spill] sm:$0xff] %v7565_v29 }
 0x2b8   : > { %9701 = vst [vmem:[#allocation83_spill] sm:$0xff] %v7548_v19  ;;  %4264 = vst.msk [vmem:[#allocation3 + $0x80] sm:$0xff] %vm3254_vm1, %v7548_v19 }
 0x2b9   : > { %v1771_v14 = vpop.xlane.xlu1 %1770  ;;  %v7569_v40 = vpop.eup %5728 }
 0x2ba   : > { %v7555_v39 = vmax.f32 %v7550_v43, %v1771_v14  ;;  %9706 = vst [vmem:[#allocation88_spill] sm:$0xff] %v7569_v40 }
 0x2bc   : > { %4265 = vst.msk [vmem:[#allocation3 + $0x88] sm:$0xff] %vm3254_vm1, %v7555_v39 }
 0x2bd   : > { %v1774_v46 = vpop.xlane.xlu0 %1773 }
 0x2be   : > { %v7562_v16 = vmax.f32 %v7557_v33, %v1774_v46  ;;  %2178 = vperm.xlu1 %5695, %v7406_v2   ;;  %v7578_v46 = vpop.f32.mrf.mxu0 }
 0x2bf   : > { %9709 = vst [vmem:[#allocation91_spill] sm:$0xff] %v7578_v46 }
 0x2c0   : > { %9704 = vst [vmem:[#allocation86_spill] sm:$0xff] %v7562_v16  ;;  %4266 = vst.msk [vmem:[#allocation3 + $0x90] sm:$0xff] %vm3254_vm1, %v7562_v16  ;;  %v7587_v19 = vpop.f32.mrf.mxu0 }
 0x2c1   : > { %v1777_v14 = vpop.xlane.xlu1 %1776  ;;  %9712 = vst [vmem:[#allocation94_spill] sm:$0xff] %v7587_v19 }
 0x2c2   : > { %v7572_v43 = vmax.f32 %v7565_v29, %v1777_v14  ;;  %2183 = vperm.xlu1 %5695, %v7418_v6   ;;  %v7594_v29 = vld [vmem:[#allocation3 + $0xb0] sm:$0xff]  ;;  %v7596_v30 = vpop.f32.mrf.mxu0 }
 0x2c3   : > { %3385 = vperm.xlu0 %5694, %v7569_v40   ;;  %9714 = vst [vmem:[#allocation96_spill] sm:$0xff] %v7594_v29  ;;  %9715 = vst [vmem:[#allocation97_spill] sm:$0xff] %v7596_v30 }
 0x2c4   : > { %9707 = vst [vmem:[#allocation89_spill] sm:$0xff] %v7572_v43  ;;  %4267 = vst.msk [vmem:[#allocation3 + $0x98] sm:$0xff] %vm3254_vm1, %v7572_v43  ;;  %v7603_v43 = vld [vmem:[#allocation3 + $0xb8] sm:$0xff]  ;;  %v7605_v21 = vpop.f32.mrf.mxu0 }
 0x2c5   : > { %v1780_v33 = vpop.xlane.xlu0 %1779  ;;  %9717 = vst [vmem:[#allocation99_spill] sm:$0xff] %v7603_v43  ;;  %9718 = vst [vmem:[#allocation100_spill] sm:$0xff] %v7605_v21 }
 0x2c6   : > { %v7583_v16 = vmax.f32 %v7576_v34, %v1780_v33  ;;  %v7614_v10 = vpop.f32.mrf.mxu0 }
 0x2c8   : > { %9710 = vst [vmem:[#allocation92_spill] sm:$0xff] %v7583_v16  ;;  %4268 = vst.msk [vmem:[#allocation3 + $0xa0] sm:$0xff] %vm3254_vm1, %v7583_v16  ;;  %v7612_v16 = vld [vmem:[#allocation3 + $0xc0] sm:$0xff]  ;;  %v7623_v9 = vpop.f32.mrf.mxu0 }
 0x2c9   : > { %v1783_v14 = vpop.xlane.xlu1 %1782  ;;  %9720 = vst [vmem:[#allocation102_spill] sm:$0xff] %v7612_v16  ;;  %9723 = vst [vmem:[#allocation105_spill] sm:$0xff] %v7623_v9 }
 0x2ca   : > { %v7592_v40 = vmax.f32 %v7585_v18, %v1783_v14  ;;  %v7632_v13 = vpop.f32.mrf.mxu0 }
 0x2cb   : > { %9726 = vst [vmem:[#allocation108_spill] sm:$0xff] %v7632_v13 }
 0x2cc   : > { %9713 = vst [vmem:[#allocation95_spill] sm:$0xff] %v7592_v40  ;;  %4269 = vst.msk [vmem:[#allocation3 + $0xa8] sm:$0xff] %vm3254_vm1, %v7592_v40  ;;  %v7621_v40 = vld [vmem:[#allocation3 + $0xc8] sm:$0xff] }
 0x2cd   : > { %v1786_v33 = vpop.xlane.xlu0 %1785  ;;  %9722 = vst [vmem:[#allocation104_spill] sm:$0xff] %v7621_v40 }
 0x2ce   : > { %v7601_v34 = vmax.f32 %v7594_v29, %v1786_v33 }
 0x2d0   : > { %9716 = vst [vmem:[#allocation98_spill] sm:$0xff] %v7601_v34  ;;  %4270 = vst.msk [vmem:[#allocation3 + $0xb0] sm:$0xff] %vm3254_vm1, %v7601_v34  ;;  %v7630_v34 = vld [vmem:[#allocation3 + $0xd0] sm:$0xff] }
 0x2d1   : > { %v1789_v14 = vpop.xlane.xlu1 %1788  ;;  %9725 = vst [vmem:[#allocation107_spill] sm:$0xff] %v7630_v34 }
 0x2d2   : > { %v7610_v18 = vmax.f32 %v7603_v43, %v1789_v14 }
 0x2d4   : > { %9719 = vst [vmem:[#allocation101_spill] sm:$0xff] %v7610_v18  ;;  %4271 = vst.msk [vmem:[#allocation3 + $0xb8] sm:$0xff] %vm3254_vm1, %v7610_v18  ;;  %v1838_v18 = vmax.f32 %v7596_v30, %v7605_v21  ;;  %v1835_v21 = vmax.f32 %v7578_v46, %v7587_v19  ;;  %v7671_v19 = vld [vmem:[#allocation3 + $0xf0] sm:$0xff] }
 0x2d5   : > { %v1792_v33 = vpop.xlane.xlu0 %1791  ;;  %9732 = vst [vmem:[#allocation113_spill] sm:$0xff] %v7671_v19 }
 0x2d6   : > { %v7619_v29 = vmax.f32 %v7612_v16, %v1792_v33 }
 0x2d8   : > { %9721 = vst [vmem:[#allocation103_spill] sm:$0xff] %v7619_v29  ;;  %4272 = vst.msk [vmem:[#allocation3 + $0xc0] sm:$0xff] %vm3254_vm1, %v7619_v29  ;;  %v7643_v29 = vpop.f32.mrf.mxu0 }
 0x2d9   : > { %v1795_v14 = vpop.xlane.xlu1 %1794  ;;  %9728 = vst [vmem:[#allocation110_spill] sm:$0xff] %v7643_v29 }
 0x2da   : > { %v7628_v43 = vmax.f32 %v7621_v40, %v1795_v14 }
 0x2dc   : > { %9724 = vst [vmem:[#allocation106_spill] sm:$0xff] %v7628_v43  ;;  %4273 = vst.msk [vmem:[#allocation3 + $0xc8] sm:$0xff] %vm3254_vm1, %v7628_v43  ;;  %v1844_v43 = vmax.f32 %v7632_v13, %v7643_v29  ;;  %v9731_v29 = vsub.f32 %v7408_v8, %v7418_v6 }
 0x2dd   : > { %v1798_v33 = vpop.xlane.xlu0 %1797 }
 0x2de   : > { %v7637_v16 = vmax.f32 %v7630_v34, %v1798_v33  ;;  %v7652_v33 = vld [vmem:[#allocation3 + $0xe0] sm:$0xff]  ;;  %v2044_v13 = vmul.f32 1.442695, %v9731_v29 }
 0x2df   : > { %9729 = vst [vmem:[#allocation111_spill] sm:$0xff] %v7652_v33  ;;  %v7688_v29 = vld [vmem:[#allocation3 + $0x100] sm:$0xff] }
 0x2e0   : > { %9727 = vst [vmem:[#allocation109_spill] sm:$0xff] %v7637_v16  ;;  %4274 = vst.msk [vmem:[#allocation3 + $0xd0] sm:$0xff] %vm3254_vm1, %v7637_v16  ;;  %5730 = vpow2.f32 %v2044_v13 }
 0x2e1   : > { %v1801_v14 = vpop.xlane.xlu1 %1800  ;;  %9736 = vst [vmem:[#allocation116_spill] sm:$0xff] %v7688_v29 }
 0x2e2   : > { %v7648_v40 = vmax.f32 %v7641_v12, %v1801_v14  ;;  %1839 = vmax.xlane.f32.xlu0 %v1838_v18  ;;  %v7661_v14 = vld [vmem:[#allocation3 + $0xe8] sm:$0xff] }
 0x2e4   : > { %4275 = vst.msk [vmem:[#allocation3 + $0xd8] sm:$0xff] %vm3254_vm1, %v7648_v40 }
 0x2e5   : > { %v1804_v30 = vpop.xlane.xlu0 %1803 }
 0x2e6   : > { %v7659_v34 = vmax.f32 %v7652_v33, %v1804_v30  ;;  %1836 = vmax.xlane.f32.xlu1 %v1835_v21  ;;  %1845 = vmax.xlane.f32.xlu0 %v1844_v43  ;;  %v9733_v21 = vsub.f32 %v7386_v61, %v7394_v32  ;;  %v7681_v33 = vld [vmem:[#allocation3 + $0xf8] sm:$0xff]  ;;  %v7696_v32 = vld [vmem:[#allocation3 + $0x108] sm:$0xff] }
 0x2e7   : > { %9735 = vst [vmem:[#allocation115_spill] sm:$0xff] %v7681_v33  ;;  %9738 = vst [vmem:[#allocation118_spill] sm:$0xff] %v7696_v32 }
 0x2e8   : > { %9730 = vst [vmem:[#allocation112_spill] sm:$0xff] %v7659_v34  ;;  %4276 = vst.msk [vmem:[#allocation3 + $0xe0] sm:$0xff] %vm3254_vm1, %v7659_v34  ;;  %v2040_v30 = vmul.f32 1.442695, %v9733_v21 }
 0x2e9   : > { %v1807_v18 = vpop.xlane.xlu1 %1806 }
 0x2ea   : > { %v7669_v16 = vmax.f32 %v7661_v14, %v1807_v18  ;;  %5732 = vpow2.f32 %v2040_v30  ;;  %v5723_v18 = vld [vmem:[#allocation2 + $0xd8] sm:$0xff]  }
 0x2eb   : > { %5564 = vmatprep.mubr.bf16.mxu0 %v5723_v18 }
 0x2ec   : > { %4277 = vst.msk [vmem:[#allocation3 + $0xe8] sm:$0xff] %vm3254_vm1, %v7669_v16  ;;  %5565 = vmatmul.mubr.bf16.gmra.mxu0 %v5723_v18 }
 0x2ed   : > { %v1810_v43 = vpop.xlane.xlu0 %1809 }
 0x2ee   : > { %v7679_v46 = vmax.f32 %v7671_v19, %v1810_v43  ;;  %v7703_v43 = vpop.eup %5730 }
 0x2ef   : > { %9740 = vst [vmem:[#allocation120_spill] sm:$0xff] %v7703_v43 }
 0x2f0   : > { %9734 = vst [vmem:[#allocation114_spill] sm:$0xff] %v7679_v46  ;;  %4278 = vst.msk [vmem:[#allocation3 + $0xf0] sm:$0xff] %vm3254_vm1, %v7679_v46 }
 0x2f1   : > { %v1813_v8 = vpop.xlane.xlu1 %1812 }
 0x2f2   : > { %v7686_v6 = vmax.f32 %v7681_v33, %v1813_v8  ;;  %v7706_v8 = vld [vmem:[#allocation3 + $0x110] sm:$0xff]  ;;  %v7730_v33 = vpop.f32.mrf.mxu0 }
 0x2f3   : > { %9741 = vst [vmem:[#allocation121_spill] sm:$0xff] %v7706_v8  ;;  %9746 = vst [vmem:[#allocation126_spill] sm:$0xff] %v7730_v33 }
 0x2f4   : > { %4279 = vst.msk [vmem:[#allocation3 + $0xf8] sm:$0xff] %vm3254_vm1, %v7686_v6 }
 0x2f5   : > { %v1816_v13 = vpop.xlane.xlu0 %1815 }
 0x2f6   : > { %v7693_v61 = vmax.f32 %v7688_v29, %v1816_v13 }
 0x2f7   : > { %2188 = vperm.xlu1 %5695, %v7428_v11   ;;  %v7711_v13 = vpop.eup %5732 }
 0x2f8   : > { %9737 = vst [vmem:[#allocation117_spill] sm:$0xff] %v7693_v61  ;;  %4280 = vst.msk [vmem:[#allocation3 + $0x100] sm:$0xff] %vm3254_vm1, %v7693_v61 }
 0x2f9   : > { %v1819_v21 = vpop.xlane.xlu1 %1818  ;;  %9742 = vst [vmem:[#allocation122_spill] sm:$0xff] %v7711_v13 }
 0x2fa   : > { %v7701_v30 = vmax.f32 %v7696_v32, %v1819_v21  ;;  %v7717_v21 = vld [vmem:[#allocation3 + $0x118] sm:$0xff] }
 0x2fb   : > { %2193 = vperm.xlu1 %5695, %v7438_v55   ;;  %9744 = vst [vmem:[#allocation124_spill] sm:$0xff] %v7717_v21 }
 0x2fc   : > { %9739 = vst [vmem:[#allocation119_spill] sm:$0xff] %v7701_v30  ;;  %4281 = vst.msk [vmem:[#allocation3 + $0x108] sm:$0xff] %vm3254_vm1, %v7701_v30  ;;  %3400 = vperm.xlu0 %5694, %v7703_v43  }
 0x2fd   : > { %v1822_v18 = vpop.xlane.xlu0 %1821 }
 0x2fe   : > { %v7714_v29 = vmax.f32 %v7706_v8, %v1822_v18 }
 0x2ff   : > { %3390 = vperm.xlu1 %5695, %v7711_v13  }
 0x300   : > { %9743 = vst [vmem:[#allocation123_spill] sm:$0xff] %v7714_v29  ;;  %4282 = vst.msk [vmem:[#allocation3 + $0x110] sm:$0xff] %vm3254_vm1, %v7714_v29 }
 0x301   : > { %v1825_v61 = vpop.xlane.xlu1 %1824 }
 0x302   : > { %v7722_v19 = vmax.f32 %v7717_v21, %v1825_v61  ;;  %v7732_v21 = vpop.f32.mrf.mxu0 }
 0x303   : > { %9747 = vst [vmem:[#allocation127_spill] sm:$0xff] %v7732_v21 }
 0x304   : > { %9745 = vst [vmem:[#allocation125_spill] sm:$0xff] %v7722_v19  ;;  %4283 = vst.msk [vmem:[#allocation3 + $0x118] sm:$0xff] %vm3254_vm1, %v7722_v19  ;;  %v7734_v19 = vpop.f32.mrf.mxu0 }
 0x305   : > { %v2169_v43 = vpop.permute.xlu0 %2168  ;;  %v2174_v46 = vpop.permute.xlu1 %2173  ;;  %9748 = vst [vmem:[#allocation128_spill] sm:$0xff] %v7734_v19 }
 0x306   : > { %v2486_v34 = vsub.f32 %v7139_v41, %v2169_v43  ;;  %v2487_v18 = vsub.f32 %v7141_v42, %v2169_v43  ;;  %v2488_v13 = vsub.f32 %v7145_v44, %v2174_v46  ;;  %v2489_v8 = vsub.f32 %v7147_v45, %v2174_v46  ;;  %v7736_v41 = vpop.f32.mrf.mxu0 }
 0x307   : > { %9749 = vst [vmem:[#allocation129_spill] sm:$0xff] %v7736_v41  ;;  %v1850_v44 = vmax.f32 %v7734_v19, %v7736_v41 }
 0x308   : > { %v2614_v32 = vmul.f32 1.442695, %v2486_v34  ;;  %v2616_v30 = vmul.f32 1.442695, %v2487_v18  ;;  %v2618_v29 = vmul.f32 1.442695, %v2488_v13  ;;  %v1841_v13 = vmax.f32 %v7614_v10, %v7623_v9  ;;  %v7785_v19 = vpop.f32.mrf.mxu0 }
 0x309   : > { %v2620_v61 = vmul.f32 1.442695, %v2489_v8  ;;  %9755 = vst [vmem:[#allocation134_spill] sm:$0xff] %v7785_v19  ;;  %v1978_v9 = vsub.f32 %v7420_v58, %v7428_v11  ;;  %v7815_v58 = vld [vmem:[#allocation3 + $0x138] sm:$0xff]  ;;  %v7817_v11 = vld [vmem:[#allocation3 + $0x150] sm:$0xff] }
 0x30a   : > { %5734 = vpow2.f32 %v2614_v32  ;;  %9762 = vst [vmem:[#allocation141_spill] sm:$0xff] %v7815_v58  ;;  %9763 = vst [vmem:[#allocation142_spill] sm:$0xff] %v7817_v11 }
 0x30b   : > { %5736 = vpow2.f32 %v2616_v30  ;;  %v1979_v30 = vsub.f32 %v7430_v23, %v7438_v55 }
 0x30c   : > { %5738 = vpow2.f32 %v2618_v29 }
 0x30d   : > { %5740 = vpow2.f32 %v2620_v61  ;;  %v2048_v18 = vmul.f32 1.442695, %v1979_v30  ;;  %v9750_v61 = vsub.f32 %v7396_v35, %v7406_v2  ;;  %v7762_v35 = vld [vmem:[#allocation3 + $0x130] sm:$0xff] }
 0x30e   : > { %9753 = vst [vmem:[#allocation132_spill] sm:$0xff] %v7762_v35 }
 0x30f   : > { %v2042_v41 = vmul.f32 1.442695, %v9750_v61  ;;  %5742 = vpow2.f32 %v2048_v18 }
 0x311   : > { %5744 = vpow2.f32 %v2042_v41 }
 0x317   : > { %v5735_v42 = vpop.eup %5734 }
 0x318   : > { %v5737_v45 = vpop.eup %5736 }
 0x319   : > { %v5739_v34 = vpop.eup %5738  ;;  %v7740_v46 = vadd.f32 %v5737_v45, %v5735_v42 }
 0x31a   : > { %v5741_v43 = vpop.eup %5740  ;;  %v3767_v8 = vpack.c.bf16 %v5739_v34, %v5735_v42  ;;  %v5724_v42 = vld [vmem:[#allocation2 + $0xe0] sm:$0xff]  }
 0x31b   : > { %v3768_v32 = vpack.c.bf16 %v5741_v43, %v5737_v45  ;;  %1851 = vmax.xlane.f32.xlu0 %v1850_v44  ;;  %v7742_v29 = vadd.f32 %v5741_v43, %v5739_v34  ;;  %5566 = vmatprep.mubr.bf16.mxu0 %v5724_v42  ;;  %v7751_v44 = vld [vmem:[#allocation3 + $0x120] sm:$0xff]  ;;  %v7760_v34 = vld [vmem:[#allocation3 + $0x128] sm:$0xff] }
 0x31c   : > { %5567 = vmatmul.mubr.bf16.gmra.mxu0 %v5724_v42  ;;  %v7757_v23 = vpop.eup %5742  ;;  %9752 = vst [vmem:[#allocation131_spill] sm:$0xff] %v7760_v34 }
 0x31d   : > { %3863 = vmatprep.mubr.bf16.mxu1 %v3768_v32  ;;  %9751 = vst [vmem:[#allocation130_spill] sm:$0xff] %v7757_v23 }
 0x31e   : > { %3864 = vmatmul.mubr.bf16.vlgmr.msra.gmra.mxu1 %v3767_v8  ;;  %v7767_v43 = vpop.eup %5744 }
 0x323   : > { %1842 = vmax.xlane.f32.xlu1 %v1841_v13 }
 0x331   : > { %2213 = vperm.xlu0 %5694, %v7483_v17  }
 0x332   : > { %v1828_v45 = vpop.xlane.xlu0 %1827 }
 0x333   : > { %v7755_v55 = vmax.f32 %v7751_v44, %v1828_v45 }
 0x334   : > { %2198 = vperm.xlu1 %5695, %v7451_v38  }
 0x335   : > { %4284 = vst.msk [vmem:[#allocation3 + $0x120] sm:$0xff] %vm3254_vm1, %v7755_v55  ;;  %3410 = vperm.xlu0 %5694, %v7757_v23   ;;  %v1847_v23 = vmax.f32 %v7730_v33, %v7732_v21  ;;  %v1980_v21 = vsub.f32 %v7441_v26, %v7451_v38  ;;  %v7876_v38 = vld [vmem:[#allocation3 + $0x148] sm:$0xff] }
 0x336   : > { %v1831_v2 = vpop.xlane.xlu1 %1830  ;;  %v1834_v41 = vpop.xlane.xlu0 %1833  ;;  %9771 = vst [vmem:[#allocation150_spill] sm:$0xff] %v7876_v38 }
 0x337   : > { %v7770_v8 = vmax.f32 %v7760_v34, %v1831_v2  ;;  %v7773_v32 = vmax.f32 %v7762_v35, %v1834_v41 }
 0x338   : > { %3395 = vperm.xlu1 %5695, %v7767_v43  }
 0x339   : > { %9754 = vst [vmem:[#allocation133_spill] sm:$0xff] %v7770_v8  ;;  %4285 = vst.msk [vmem:[#allocation3 + $0x128] sm:$0xff] %vm3254_vm1, %v7770_v8 }
 0x33a   : > { %4286 = vst.msk [vmem:[#allocation3 + $0x130] sm:$0xff] %vm3254_vm1, %v7773_v32  ;;  %v2179_v30 = vpop.permute.xlu1 %2178 }
 0x33b   : > { %v2490_v13 = vsub.f32 %v7151_v47, %v2179_v30  ;;  %v2491_v18 = vsub.f32 %v7153_v48, %v2179_v30  ;;  %v7787_v47 = vpop.f32.mrf.mxu0 }
 0x33c   : > { %2203 = vperm.xlu1 %5695, %v7461_v0   ;;  %9756 = vst [vmem:[#allocation135_spill] sm:$0xff] %v7787_v47 }
 0x33d   : > { %v2622_v61 = vmul.f32 1.442695, %v2490_v13  ;;  %v2624_v42 = vmul.f32 1.442695, %v2491_v18  ;;  %v7789_v48 = vpop.f32.mrf.mxu0 }
 0x33e   : > { %v2184_v45 = vpop.permute.xlu1 %2183  ;;  %9757 = vst [vmem:[#allocation136_spill] sm:$0xff] %v7789_v48 }
 0x33f   : > { %5746 = vpow2.f32 %v2622_v61  ;;  %v2492_v2 = vsub.f32 %v7157_v50, %v2184_v45  ;;  %v2493_v41 = vsub.f32 %v7159_v51, %v2184_v45  ;;  %v7791_v18 = vpop.f32.mrf.mxu0 }
 0x340   : > { %5748 = vpow2.f32 %v2624_v42  ;;  %9758 = vst [vmem:[#allocation137_spill] sm:$0xff] %v7791_v18  ;;  %v1856_v51 = vmax.f32 %v7789_v48, %v7791_v18  ;;  %v2046_v18 = vmul.f32 1.442695, %v1978_v9 }
 0x341   : > { %v2626_v35 = vmul.f32 1.442695, %v2492_v2  ;;  %v2628_v34 = vmul.f32 1.442695, %v2493_v41  ;;  %v7840_v48 = vpop.f32.mrf.mxu0 }
 0x342   : > { %9765 = vst [vmem:[#allocation144_spill] sm:$0xff] %v7840_v48 }
 0x343   : > { %5750 = vpow2.f32 %v2626_v35 }
 0x344   : > { %5752 = vpow2.f32 %v2628_v34  ;;  %v1981_v34 = vsub.f32 %v7453_v49, %v7461_v0 }
 0x346   : > { %v2052_v35 = vmul.f32 1.442695, %v1981_v34 }
 0x348   : > { %5754 = vpow2.f32 %v2052_v35 }
 0x349   : > { %5756 = vpow2.f32 %v2046_v18 }
 0x34c   : > { %v5747_v30 = vpop.eup %5746 }
 0x34d   : > { %v5749_v13 = vpop.eup %5748 }
 0x34e   : > { %v7793_v61 = vadd.f32 %v5749_v13, %v5747_v30 }
 0x350   : > { %v5751_v50 = vpop.eup %5750 }
 0x351   : > { %v5753_v42 = vpop.eup %5752  ;;  %v3769_v45 = vpack.c.bf16 %v5751_v50, %v5747_v30  ;;  %v5725_v30 = vld [vmem:[#allocation2 + $0xe8] sm:$0xff]  }
 0x352   : > { %v3770_v2 = vpack.c.bf16 %v5753_v42, %v5749_v13  ;;  %v7797_v41 = vadd.f32 %v5753_v42, %v5751_v50  ;;  %v7805_v13 = vpop.permute.xlu0 %3385  ;;  %5568 = vmatprep.mubr.bf16.mxu0 %v5725_v30  ;;  %v7807_v50 = vld [vmem:[#allocation3 + $0x140] sm:$0xff] }
 0x353   : > { %5569 = vmatmul.mubr.bf16.gmra.mxu0 %v5725_v30  ;;  %9759 = vst [vmem:[#allocation138_spill] sm:$0xff] %v7807_v50 }
 0x354   : > { %3871 = vmatprep.mubr.bf16.mxu1 %v3770_v2  ;;  %1857 = vmax.xlane.f32.xlu0 %v1856_v51 }
 0x355   : > { %3872 = vmatmul.mubr.bf16.gmra.mxu1 %v3769_v45  ;;  %v7813_v51 = vpop.eup %5754 }
 0x356   : > { %9761 = vst [vmem:[#allocation140_spill] sm:$0xff] %v7813_v51  ;;  %v7833_v2 = vpop.eup %5756 }
 0x360   : > { %1848 = vmax.xlane.f32.xlu1 %v1847_v23 }
 0x36a   : > { %2223 = vperm.xlu0 %5694, %v7501_v31  }
 0x36b   : > { %v1840_v49 = vpop.xlane.xlu0 %1839 }
 0x36c   : > { %v7811_v0 = vmax.f32 %v7807_v50, %v1840_v49 }
 0x36e   : > { %9760 = vst [vmem:[#allocation139_spill] sm:$0xff] %v7811_v0  ;;  %3420 = vperm.xlu0 %5694, %v7813_v51   ;;  %4288 = vst.msk [vmem:[#allocation3 + $0x140] sm:$0xff] %vm3254_vm1, %v7811_v0  ;;  %v1853_v51 = vmax.f32 %v7785_v19, %v7787_v47  ;;  %v5727_v19 = vld [vmem:[#allocation2 + $0xf8] sm:$0xff]  }
 0x36f   : > { %v1837_v9 = vpop.xlane.xlu1 %1836  ;;  %v1846_v23 = vpop.xlane.xlu0 %1845 }
 0x370   : > { %v7823_v18 = vmax.f32 %v7815_v58, %v1837_v9  ;;  %v7826_v42 = vmax.f32 %v7817_v11, %v1846_v23 }
 0x371   : > { %2208 = vperm.xlu1 %5695, %v7473_v36  }
 0x372   : > { %9764 = vst [vmem:[#allocation143_spill] sm:$0xff] %v7823_v18  ;;  %4287 = vst.msk [vmem:[#allocation3 + $0x138] sm:$0xff] %vm3254_vm1, %v7823_v18 }
 0x373   : > { %4290 = vst.msk [vmem:[#allocation3 + $0x150] sm:$0xff] %vm3254_vm1, %v7826_v42  ;;  %v2189_v45 = vpop.permute.xlu1 %2188 }
 0x374   : > { %v2494_v34 = vsub.f32 %v7163_v53, %v2189_v45  ;;  %v2495_v35 = vsub.f32 %v7165_v54, %v2189_v45  ;;  %v7842_v53 = vpop.f32.mrf.mxu0 }
 0x375   : > { %3405 = vperm.xlu1 %5695, %v7833_v2   ;;  %9766 = vst [vmem:[#allocation145_spill] sm:$0xff] %v7842_v53 }
 0x376   : > { %v2630_v30 = vmul.f32 1.442695, %v2494_v34  ;;  %v2632_v49 = vmul.f32 1.442695, %v2495_v35  ;;  %v7844_v54 = vpop.f32.mrf.mxu0 }
 0x377   : > { %v2194_v9 = vpop.permute.xlu1 %2193  ;;  %9767 = vst [vmem:[#allocation146_spill] sm:$0xff] %v7844_v54 }
 0x378   : > { %5758 = vpow2.f32 %v2630_v30  ;;  %v2496_v23 = vsub.f32 %v7169_v56, %v2194_v9  ;;  %v2497_v11 = vsub.f32 %v7171_v57, %v2194_v9  ;;  %v7846_v35 = vpop.f32.mrf.mxu0 }
 0x379   : > { %5760 = vpow2.f32 %v2632_v49  ;;  %9768 = vst [vmem:[#allocation147_spill] sm:$0xff] %v7846_v35  ;;  %v1862_v57 = vmax.f32 %v7844_v54, %v7846_v35  ;;  %v2050_v35 = vmul.f32 1.442695, %v1980_v21 }
 0x37a   : > { %v2634_v50 = vmul.f32 1.442695, %v2496_v23  ;;  %v2636_v58 = vmul.f32 1.442695, %v2497_v11 }
 0x37b   : > { %v7873_v26 = vpop.permute.xlu1 %3390 }
 0x37c   : > { %5762 = vpow2.f32 %v2634_v50  ;;  %v1983_v50 = vsub.f32 %v7475_v28, %v7483_v17 }
 0x37d   : > { %5764 = vpow2.f32 %v2636_v58 }
 0x37e   : > { %v2056_v58 = vmul.f32 1.442695, %v1983_v50 }
 0x380   : > { %5766 = vpow2.f32 %v2056_v58 }
 0x381   : > { %5768 = vpow2.f32 %v2050_v35 }
 0x385   : > { %v5759_v45 = vpop.eup %5758 }
 0x386   : > { %v5761_v34 = vpop.eup %5760 }
 0x387   : > { %v7848_v30 = vadd.f32 %v5761_v34, %v5759_v45 }
 0x389   : > { %v5763_v56 = vpop.eup %5762 }
 0x38a   : > { %v5765_v49 = vpop.eup %5764  ;;  %v3771_v11 = vpack.c.bf16 %v5763_v56, %v5759_v45  ;;  %v5726_v45 = vld [vmem:[#allocation2 + $0xf0] sm:$0xff]  }
 0x38b   : > { %v3772_v9 = vpack.c.bf16 %v5765_v49, %v5761_v34  ;;  %v7852_v23 = vadd.f32 %v5765_v49, %v5763_v56  ;;  %5570 = vmatprep.mubr.bf16.mxu0 %v5726_v45  ;;  %v7860_v34 = vpop.permute.xlu0 %3400  ;;  %v7862_v56 = vld [vmem:[#allocation3 + $0x160] sm:$0xff] }
 0x38c   : > { %5571 = vmatmul.mubr.bf16.gmra.mxu0 %v5726_v45  ;;  %9769 = vst [vmem:[#allocation148_spill] sm:$0xff] %v7862_v56  ;;  %v7888_v45 = vpop.f32.mrf.mxu0 }
 0x38d   : > { %3879 = vmatprep.mubr.bf16.mxu1 %v3772_v9  ;;  %1863 = vmax.xlane.f32.xlu0 %v1862_v57  ;;  %v7868_v57 = vpop.eup %5766  ;;  %9773 = vst [vmem:[#allocation152_spill] sm:$0xff] %v7888_v45 }
 0x38e   : > { %3880 = vmatmul.mubr.bf16.gmra.mxu1 %v3771_v11  ;;  %9770 = vst [vmem:[#allocation149_spill] sm:$0xff] %v7868_v57  ;;  %5572 = vmatprep.mubr.bf16.mxu0 %v5727_v19 }
 0x394   : > { %5573 = vmatmul.mubr.bf16.gmra.mxu0 %v5727_v19 }
 0x399   : > { %1854 = vmax.xlane.f32.xlu1 %v1853_v51  ;;  %v7878_v51 = vpop.eup %5768 }
 0x3a3   : > { %2233 = vperm.xlu0 %5694, %v7523_v15  }
 0x3a4   : > { %v1852_v28 = vpop.xlane.xlu0 %1851 }
 0x3a5   : > { %v7866_v17 = vmax.f32 %v7862_v56, %v1852_v28 }
 0x3a7   : > { %3430 = vperm.xlu0 %5694, %v7868_v57   ;;  %4292 = vst.msk [vmem:[#allocation3 + $0x160] sm:$0xff] %vm3254_vm1, %v7866_v17 }
 0x3aa   : > { %2218 = vperm.xlu1 %5695, %v7492_v20  }
 0x3ac   : > { %v1843_v21 = vpop.xlane.xlu1 %1842 }
 0x3ad   : > { %v7881_v35 = vmax.f32 %v7876_v38, %v1843_v21  ;;  %v7892_v21 = vpop.f32.mrf.mxu0 }
 0x3ae   : > { %3415 = vperm.xlu1 %5695, %v7878_v51   ;;  %9774 = vst [vmem:[#allocation153_spill] sm:$0xff] %v7892_v21 }
 0x3af   : > { %9772 = vst [vmem:[#allocation151_spill] sm:$0xff] %v7881_v35  ;;  %4289 = vst.msk [vmem:[#allocation3 + $0x148] sm:$0xff] %vm3254_vm1, %v7881_v35 }
 0x3b0   : > { %v2199_v49 = vpop.permute.xlu1 %2198 }
 0x3b1   : > { %v2498_v11 = vsub.f32 %v7175_v59, %v2199_v49  ;;  %v2499_v9 = vsub.f32 %v7177_v60, %v2199_v49  ;;  %v7896_v59 = vpop.f32.mrf.mxu0 }
 0x3b2   : > { %9775 = vst [vmem:[#allocation154_spill] sm:$0xff] %v7896_v59 }
 0x3b3   : > { %v2638_v50 = vmul.f32 1.442695, %v2498_v11  ;;  %v2640_v58 = vmul.f32 1.442695, %v2499_v9  ;;  %v7898_v60 = vpop.f32.mrf.mxu0 }
 0x3b4   : > { %v7890_v28 = vpop.permute.xlu1 %3395  ;;  %9776 = vst [vmem:[#allocation155_spill] sm:$0xff] %v7898_v60  ;;  %v1868_v11 = vmax.f32 %v7896_v59, %v7898_v60  ;;  %v1982_v60 = vsub.f32 %v7463_v4, %v7473_v36 }
 0x3b5   : > { %5770 = vpow2.f32 %v2638_v50 }
 0x3b6   : > { %5772 = vpow2.f32 %v2640_v58  ;;  %v2054_v59 = vmul.f32 1.442695, %v1982_v60 }
 0x3b8   : > { %v2204_v56 = vpop.permute.xlu1 %2203 }
 0x3b9   : > { %v2500_v38 = vsub.f32 %v7181_v62, %v2204_v56  ;;  %v2501_v54 = vsub.f32 %v7183_v63, %v2204_v56  ;;  %v1985_v62 = vsub.f32 %v7494_v52, %v7501_v31  ;;  %v3319_v52 = vld [vmem:[#allocation5 + $0xb0] sm:$0xff] }
 0x3bb   : > { %v2642_v57 = vmul.f32 1.442695, %v2500_v38  ;;  %v2644_v47 = vmul.f32 1.442695, %v2501_v54 }
 0x3bd   : > { %5774 = vpow2.f32 %v2642_v57  ;;  %v1859_v57 = vmax.f32 %v7840_v48, %v7842_v53  ;;  %v3323_v53 = vld [vmem:[#allocation5 + $0x50] sm:$0xff] }
 0x3be   : > { %5776 = vpow2.f32 %v2644_v47  ;;  %v2060_v47 = vmul.f32 1.442695, %v1985_v62  ;;  %v3320_v62 = vld [vmem:[#allocation5 + $0x1b0] sm:$0xff] }
 0x3bf   : > { %v3704_v19 = vmul.f32 %v7873_v26, %v3320_v62  ;;  %v8022_v48 = vld [vmem:[#allocation3 + $0x190] sm:$0xff] }
 0x3c0   : > { %5778 = vpow2.f32 %v2060_v47 }
 0x3c1   : > { %5780 = vpow2.f32 %v2054_v59 }
 0x3c2   : > { %v5771_v49 = vpop.eup %5770 }
 0x3c3   : > { %v5773_v9 = vpop.eup %5772 }
 0x3c4   : > { %v7902_v50 = vadd.f32 %v5773_v9, %v5771_v49 }
 0x3c6   : > { %1869 = vmax.xlane.f32.xlu0 %v1868_v11  ;;  %v2214_v11 = vpop.permute.xlu0 %2213 }
 0x3ca   : > { %v5775_v58 = vpop.eup %5774  ;;  %v7912_v31 = vpop.permute.xlu0 %3410 }
 0x3cb   : > { %v5777_v63 = vpop.eup %5776  ;;  %v3773_v54 = vpack.c.bf16 %v5775_v58, %v5771_v49  ;;  %v7914_v49 = vld [vmem:[#allocation3 + $0x170] sm:$0xff] }
 0x3cc   : > { %v3774_v56 = vpack.c.bf16 %v5777_v63, %v5773_v9  ;;  %v7906_v38 = vadd.f32 %v5777_v63, %v5775_v58  ;;  %9777 = vst [vmem:[#allocation156_spill] sm:$0xff] %v7914_v49  ;;  %v3703_v9 = vmul.f32 %v7805_v13, %v3319_v52  ;;  %v2504_v52 = vsub.f32 %v7196_v5, %v2214_v11 }
 0x3cd   : > { %v7921_v60 = vpop.eup %5778 }
 0x3ce   : > { %3887 = vmatprep.mubr.bf16.mxu1 %v3774_v56  ;;  %9778 = vst [vmem:[#allocation157_spill] sm:$0xff] %v7921_v60  ;;  %v7928_v47 = vpop.eup %5780  ;;  %v2650_v62 = vmul.f32 1.442695, %v2504_v52 }
 0x3cf   : > { %3888 = vmatmul.mubr.bf16.gmra.mxu1 %v3773_v54 }
 0x3d0   : > { %5782 = vpow2.f32 %v2650_v62 }
 0x3d2   : > { %1860 = vmax.xlane.f32.xlu1 %v1859_v57  ;;  %v7931_v57 = vld [vmem:[#allocation3 + $0x158] sm:$0xff] }
 0x3d3   : > { %9779 = vst [vmem:[#allocation158_spill] sm:$0xff] %v7931_v57 }
 0x3dc   : > { %2243 = vperm.xlu0 %5694, %v7541_v37  }
 0x3dd   : > { %v1858_v58 = vpop.xlane.xlu0 %1857 }
 0x3de   : > { %v3865_v36 = vpop.f32.mrf.mxu1  ;;  %v7919_v4 = vmax.f32 %v7914_v49, %v1858_v58 }
 0x3df   : > { %v4120_v63 = vadd.f32 %v3865_v36, %v3703_v9  ;;  %v2505_v9 = vsub.f32 %v7198_v7, %v2214_v11  ;;  %v7940_v36 = vpop.f32.mrf.mxu0 }
 0x3e0   : > { %v3867_v59 = vpop.f32.mrf.mxu1  ;;  %3440 = vperm.xlu0 %5694, %v7921_v60   ;;  %4294 = vst.msk [vmem:[#allocation3 + $0x170] sm:$0xff] %vm3254_vm1, %v7919_v4  ;;  %9780 = vst [vmem:[#allocation159_spill] sm:$0xff] %v7940_v36 }
 0x3e1   : > { %4184 = vst [vmem:[#allocation5 + $0xb0] sm:$0xff] %v4120_v63  ;;  %v2652_v63 = vmul.f32 1.442695, %v2505_v9  ;;  %v7944_v7 = vpop.f32.mrf.mxu0  ;;  %v7952_v9 = vpop.eup %5782 }
 0x3e2   : > { %v3868_v54 = vpop.f32.mrf.mxu1  ;;  %9781 = vst [vmem:[#allocation160_spill] sm:$0xff] %v7944_v7 }
 0x3e3   : > { %v4121_v13 = vadd.f32 %v3868_v54, %v3704_v19  ;;  %2228 = vperm.xlu1 %5695, %v7510_v22   ;;  %5784 = vpow2.f32 %v2652_v63  ;;  %v7946_v11 = vpop.f32.mrf.mxu0 }
 0x3e4   : > { %v3870_v56 = vpop.f32.mrf.mxu1  ;;  %9782 = vst [vmem:[#allocation161_spill] sm:$0xff] %v7946_v11 }
 0x3e5   : > { %4185 = vst [vmem:[#allocation5 + $0x1b0] sm:$0xff] %v4121_v13  ;;  %v7948_v56 = vpop.f32.mrf.mxu0 }
 0x3e6   : > { %9783 = vst [vmem:[#allocation162_spill] sm:$0xff] %v7948_v56  ;;  %v1874_v52 = vmax.f32 %v7946_v11, %v7948_v56 }
 0x3e7   : > { %3425 = vperm.xlu1 %5695, %v7928_v47  }
 0x3e9   : > { %v1849_v58 = vpop.xlane.xlu1 %1848 }
 0x3ea   : > { %v7936_v26 = vmax.f32 %v7931_v57, %v1849_v58  ;;  %v3321_v57 = vld [vmem:[#allocation5 + $0xd8] sm:$0xff] }
 0x3ec   : > { %4291 = vst.msk [vmem:[#allocation3 + $0x158] sm:$0xff] %vm3254_vm1, %v7936_v26 }
 0x3ed   : > { %v2209_v59 = vpop.permute.xlu1 %2208 }
 0x3ee   : > { %v2502_v19 = vsub.f32 %v7187_v1, %v2209_v59  ;;  %v2503_v54 = vsub.f32 %v7190_v3, %v2209_v59 }
 0x3f0   : > { %v2646_v5 = vmul.f32 1.442695, %v2502_v19  ;;  %v2648_v13 = vmul.f32 1.442695, %v2503_v54  ;;  %v7954_v1 = vpop.eup %5784  ;;  %v1987_v19 = vsub.f32 %v7514_v25, %v7523_v15  ;;  %v7969_v15 = vld [vmem:[#allocation3 + $0x180] sm:$0xff]  ;;  %v3322_v25 = vld [vmem:[#allocation5 + $0x18] sm:$0xff] }
 0x3f1   : > { %9784 = vst [vmem:[#allocation163_spill] sm:$0xff] %v7969_v15 }
 0x3f2   : > { %5786 = vpow2.f32 %v2646_v5  ;;  %v2064_v54 = vmul.f32 1.442695, %v1987_v19  ;;  %v1865_v5 = vmax.f32 %v7888_v45, %v7892_v21 }
 0x3f3   : > { %5788 = vpow2.f32 %v2648_v13  ;;  %v1984_v13 = vsub.f32 %v7485_v27, %v7492_v20 }
 0x3f4   : > { %5790 = vpow2.f32 %v2064_v54 }
 0x3f5   : > { %v2058_v49 = vmul.f32 1.442695, %v1984_v13  ;;  %v7985_v13 = vld [vmem:[#allocation3 + $0x168] sm:$0xff] }
 0x3f6   : > { %9788 = vst [vmem:[#allocation167_spill] sm:$0xff] %v7985_v13 }
 0x3f7   : > { %5792 = vpow2.f32 %v2058_v49  ;;  %v3706_v49 = vmul.f32 %v7860_v34, %v3322_v25  ;;  %v9789_v34 = vld [vmem:[#allocation23_spill] sm:$0xff]  ;;  %v9790_v25 = vld [vmem:[#allocation24_spill] sm:$0xff] }
 0x3ff   : > { %v5787_v3 = vpop.eup %5786  ;;  %1875 = vmax.xlane.f32.xlu0 %v1874_v52  ;;  %v2224_v52 = vpop.permute.xlu0 %2223 }
 0x400   : > { %v5789_v58 = vpop.eup %5788  ;;  %v3775_v62 = vpack.c.bf16 %v7952_v9, %v5787_v3 }
 0x401   : > { %v3776_v63 = vpack.c.bf16 %v7954_v1, %v5789_v58  ;;  %v7958_v59 = vadd.f32 %v5789_v58, %v5787_v3  ;;  %v3705_v58 = vmul.f32 %v7890_v28, %v3321_v57  ;;  %v7975_v20 = vpop.eup %5790 }
 0x402   : > { %9786 = vst [vmem:[#allocation165_spill] sm:$0xff] %v7975_v20 }
 0x403   : > { %3895 = vmatprep.mubr.bf16.mxu1 %v3776_v63  ;;  %v7966_v3 = vpop.permute.xlu0 %3420 }
 0x404   : > { %3896 = vmatmul.mubr.bf16.gmra.mxu1 %v3775_v62 }
 0x40b   : > { %1866 = vmax.xlane.f32.xlu1 %v1865_v5  ;;  %v7982_v5 = vpop.eup %5792 }
 0x40c   : > { %9787 = vst [vmem:[#allocation166_spill] sm:$0xff] %v7982_v5 }
 0x415   : > { %v3873_v62 = vpop.f32.mrf.mxu1  ;;  %2253 = vperm.xlu0 %5694, %v7555_v39  }
 0x416   : > { %v4122_v63 = vadd.f32 %v3873_v62, %v3705_v58  ;;  %v1864_v19 = vpop.xlane.xlu0 %1863  ;;  %v2508_v58 = vsub.f32 %v9789_v34, %v2224_v52  ;;  %v2509_v62 = vsub.f32 %v9790_v25, %v2224_v52 }
 0x417   : > { %v3875_v56 = vpop.f32.mrf.mxu1  ;;  %v7973_v27 = vmax.f32 %v7969_v15, %v1864_v19  ;;  %v9792_v15 = vld [vmem:[#allocation21_spill] sm:$0xff] }
 0x418   : > { %4186 = vst [vmem:[#allocation5 + $0xd8] sm:$0xff] %v4122_v63  ;;  %v3406_v56 = vpop.permute.xlu1 %3405 }
 0x419   : > { %9785 = vst [vmem:[#allocation164_spill] sm:$0xff] %v7973_v27  ;;  %v3876_v54 = vpop.f32.mrf.mxu1  ;;  %3450 = vperm.xlu0 %5694, %v7975_v20   ;;  %4296 = vst.msk [vmem:[#allocation3 + $0x180] sm:$0xff] %vm3254_vm1, %v7973_v27  ;;  %v9793_v20 = vld [vmem:[#allocation22_spill] sm:$0xff] }
 0x41a   : > { %v4123_v28 = vadd.f32 %v3876_v54, %v3706_v49  ;;  %v2658_v49 = vmul.f32 1.442695, %v2508_v58  ;;  %v7994_v54 = vpop.f32.mrf.mxu0 }
 0x41b   : > { %v3878_v57 = vpop.f32.mrf.mxu1  ;;  %9791 = vst [vmem:[#allocation23_spill] sm:$0xff] %v7994_v54 }
 0x41c   : > { %4187 = vst [vmem:[#allocation5 + $0x18] sm:$0xff] %v4123_v28  ;;  %2238 = vperm.xlu1 %5695, %v7534_v24   ;;  %v2660_v28 = vmul.f32 1.442695, %v2509_v62  ;;  %5794 = vpow2.f32 %v2658_v49  ;;  %v7998_v52 = vpop.f32.mrf.mxu0 }
 0x41d   : > { %9794 = vst [vmem:[#allocation24_spill] sm:$0xff] %v7998_v52 }
 0x41e   : > { %5796 = vpow2.f32 %v2660_v28  ;;  %v8000_v58 = vpop.f32.mrf.mxu0 }
 0x41f   : > { %9795 = vst [vmem:[#allocation21_spill] sm:$0xff] %v8000_v58 }
 0x420   : > { %3435 = vperm.xlu1 %5695, %v7982_v5   ;;  %v8002_v25 = vpop.f32.mrf.mxu0 }
 0x421   : > { %9796 = vst [vmem:[#allocation22_spill] sm:$0xff] %v8002_v25  ;;  %v1880_v62 = vmax.f32 %v8000_v58, %v8002_v25  ;;  %v9800_v25 = vld [vmem:[#allocation78_spill] sm:$0xff] }
 0x422   : > { %v1855_v63 = vpop.xlane.xlu1 %1854  ;;  %v1986_v58 = vsub.f32 %v9800_v25, %v7510_v22  ;;  %v9805_v25 = vld [vmem:[#allocation83_spill] sm:$0xff] }
 0x423   : > { %v7990_v19 = vmax.f32 %v7985_v13, %v1855_v63  ;;  %v1871_v13 = vmax.f32 %v7940_v36, %v7944_v7 }
 0x424   : > { %v2062_v45 = vmul.f32 1.442695, %v1986_v58 }
 0x425   : > { %4293 = vst.msk [vmem:[#allocation3 + $0x168] sm:$0xff] %vm3254_vm1, %v7990_v19 }
 0x426   : > { %v2219_v57 = vpop.permute.xlu1 %2218 }
 0x427   : > { %v2506_v11 = vsub.f32 %v9792_v15, %v2219_v57  ;;  %v2507_v21 = vsub.f32 %v9793_v20, %v2219_v57 }
 0x429   : > { %v2654_v34 = vmul.f32 1.442695, %v2506_v11  ;;  %v2656_v60 = vmul.f32 1.442695, %v2507_v21  ;;  %v8006_v63 = vpop.eup %5794 }
 0x42a   : > { %9797 = vst [vmem:[#allocation168_spill] sm:$0xff] %v8006_v63 }
 0x42b   : > { %5798 = vpow2.f32 %v2654_v34  ;;  %v8008_v15 = vpop.eup %5796 }
 0x42c   : > { %5800 = vpow2.f32 %v2656_v60  ;;  %9798 = vst [vmem:[#allocation169_spill] sm:$0xff] %v8008_v15  ;;  %v9799_v60 = vld [vmem:[#allocation81_spill] sm:$0xff] }
 0x42d   : > { %v1989_v57 = vsub.f32 %v9799_v60, %v7541_v37  ;;  %9801 = vst [vmem:[#allocation81_spill] sm:$0xff] %v8022_v48  ;;  %v3324_v37 = vld [vmem:[#allocation5 + $0x168] sm:$0xff] }
 0x42e   : > { %v3708_v58 = vmul.f32 %v7912_v31, %v3324_v37  ;;  %v9808_v31 = vld [vmem:[#allocation27_spill] sm:$0xff] }
 0x42f   : > { %v2068_v34 = vmul.f32 1.442695, %v1989_v57 }
 0x431   : > { %5802 = vpow2.f32 %v2068_v34 }
 0x432   : > { %5804 = vpow2.f32 %v2062_v45 }
 0x438   : > { %v5799_v20 = vpop.eup %5798  ;;  %1881 = vmax.xlane.f32.xlu0 %v1880_v62  ;;  %v2234_v62 = vpop.permute.xlu0 %2233 }
 0x439   : > { %v5801_v11 = vpop.eup %5800  ;;  %v3777_v21 = vpack.c.bf16 %v8006_v63, %v5799_v20  ;;  %v2512_v37 = vsub.f32 %v9808_v31, %v2234_v62 }
 0x43a   : > { %v3778_v49 = vpack.c.bf16 %v8008_v15, %v5801_v11  ;;  %v8012_v28 = vadd.f32 %v5801_v11, %v5799_v20  ;;  %v3707_v11 = vmul.f32 %v3406_v56, %v3323_v53 }
 0x43c   : > { %3903 = vmatprep.mubr.bf16.mxu1 %v3778_v49  ;;  %v8020_v20 = vpop.permute.xlu0 %3430  ;;  %v9802_v49 = vld [vmem:[#allocation89_spill] sm:$0xff] }
 0x43d   : > { %3904 = vmatmul.mubr.bf16.gmra.mxu1 %v3777_v21 }
 0x444   : > { %1872 = vmax.xlane.f32.xlu1 %v1871_v13  ;;  %v8028_v13 = vpop.eup %5802 }
 0x445   : > { %9804 = vst [vmem:[#allocation89_spill] sm:$0xff] %v8028_v13  ;;  %v8035_v34 = vpop.eup %5804 }
 0x446   : > { %9806 = vst [vmem:[#allocation83_spill] sm:$0xff] %v8035_v34 }
 0x44e   : > { %v3881_v21 = vpop.f32.mrf.mxu1  ;;  %2263 = vperm.xlu0 %5694, %v9802_v49  }
 0x44f   : > { %v4124_v60 = vadd.f32 %v3881_v21, %v3707_v11  ;;  %v1870_v57 = vpop.xlane.xlu0 %1869  ;;  %v8038_v11 = vld [vmem:[#allocation3 + $0x178] sm:$0xff] }
 0x450   : > { %v3883_v7 = vpop.f32.mrf.mxu1  ;;  %v8026_v22 = vmax.f32 %v8022_v48, %v1870_v57  ;;  %9807 = vst [vmem:[#allocation170_spill] sm:$0xff] %v8038_v11  ;;  %v9809_v21 = vld [vmem:[#allocation28_spill] sm:$0xff] }
 0x451   : > { %4188 = vst [vmem:[#allocation5 + $0x50] sm:$0xff] %v4124_v60  ;;  %v3416_v7 = vpop.permute.xlu1 %3415  ;;  %v2513_v60 = vsub.f32 %v9809_v21, %v2234_v62 }
 0x452   : > { %9803 = vst [vmem:[#allocation78_spill] sm:$0xff] %v8026_v22  ;;  %v3884_v45 = vpop.f32.mrf.mxu1  ;;  %3460 = vperm.xlu0 %5694, %v8028_v13   ;;  %4298 = vst.msk [vmem:[#allocation3 + $0x190] sm:$0xff] %vm3254_vm1, %v8026_v22  ;;  %v9811_v13 = vld [vmem:[#allocation25_spill] sm:$0xff]  ;;  %v9812_v22 = vld [vmem:[#allocation26_spill] sm:$0xff] }
 0x453   : > { %v4125_v53 = vadd.f32 %v3884_v45, %v3708_v58  ;;  %v2666_v58 = vmul.f32 1.442695, %v2512_v37  ;;  %v8047_v45 = vpop.f32.mrf.mxu0 }
 0x454   : > { %v3886_v56 = vpop.f32.mrf.mxu1  ;;  %9810 = vst [vmem:[#allocation27_spill] sm:$0xff] %v8047_v45 }
 0x455   : > { %4189 = vst [vmem:[#allocation5 + $0x168] sm:$0xff] %v4125_v53  ;;  %2248 = vperm.xlu1 %5695, %v9805_v25   ;;  %v2668_v53 = vmul.f32 1.442695, %v2513_v60  ;;  %5806 = vpow2.f32 %v2666_v58  ;;  %v8051_v62 = vpop.f32.mrf.mxu0 }
 0x456   : > { %9813 = vst [vmem:[#allocation28_spill] sm:$0xff] %v8051_v62 }
 0x457   : > { %5808 = vpow2.f32 %v2668_v53  ;;  %v8053_v37 = vpop.f32.mrf.mxu0 }
 0x458   : > { %9814 = vst [vmem:[#allocation25_spill] sm:$0xff] %v8053_v37 }
 0x459   : > { %3445 = vperm.xlu1 %5695, %v8035_v34   ;;  %v8055_v21 = vpop.f32.mrf.mxu0 }
 0x45a   : > { %9815 = vst [vmem:[#allocation26_spill] sm:$0xff] %v8055_v21  ;;  %v1886_v60 = vmax.f32 %v8053_v37, %v8055_v21  ;;  %v1877_v21 = vmax.f32 %v7994_v54, %v7998_v52  ;;  %v9819_v37 = vld [vmem:[#allocation80_spill] sm:$0xff] }
 0x45b   : > { %v1861_v57 = vpop.xlane.xlu1 %1860 }
 0x45c   : > { %v8043_v48 = vmax.f32 %v8038_v11, %v1861_v57  ;;  %v1988_v11 = vsub.f32 %v9819_v37, %v7534_v24  ;;  %v3326_v37 = vld [vmem:[#allocation5 + $0x48] sm:$0xff] }
 0x45e   : > { %4295 = vst.msk [vmem:[#allocation3 + $0x178] sm:$0xff] %vm3254_vm1, %v8043_v48 }
 0x45f   : > { %v2229_v56 = vpop.permute.xlu1 %2228 }
 0x460   : > { %v2510_v36 = vsub.f32 %v9811_v13, %v2229_v56  ;;  %v2511_v34 = vsub.f32 %v9812_v22, %v2229_v56 }
 0x462   : > { %v2662_v31 = vmul.f32 1.442695, %v2510_v36  ;;  %v2664_v27 = vmul.f32 1.442695, %v2511_v34  ;;  %v8059_v57 = vpop.eup %5806 }
 0x463   : > { %9816 = vst [vmem:[#allocation171_spill] sm:$0xff] %v8059_v57 }
 0x464   : > { %5810 = vpow2.f32 %v2662_v31  ;;  %v8061_v13 = vpop.eup %5808 }
 0x465   : > { %5812 = vpow2.f32 %v2664_v27  ;;  %9817 = vst [vmem:[#allocation172_spill] sm:$0xff] %v8061_v13  ;;  %v9818_v27 = vld [vmem:[#allocation84_spill] sm:$0xff] }
 0x466   : > { %v1991_v56 = vsub.f32 %v9818_v27, %v7555_v39  ;;  %v3325_v27 = vld [vmem:[#allocation5 + $0x130] sm:$0xff] }
 0x467   : > { %v3709_v24 = vmul.f32 %v3416_v7, %v3325_v27  ;;  %v9828_v7 = vld [vmem:[#allocation32_spill] sm:$0xff] }
 0x468   : > { %v2072_v31 = vmul.f32 1.442695, %v1991_v56 }
 0x46a   : > { %5814 = vpow2.f32 %v2072_v31 }
 0x471   : > { %v5811_v22 = vpop.eup %5810  ;;  %1887 = vmax.xlane.f32.xlu0 %v1886_v60  ;;  %v2244_v60 = vpop.permute.xlu0 %2243 }
 0x472   : > { %v5813_v36 = vpop.eup %5812  ;;  %v3779_v34 = vpack.c.bf16 %v8059_v57, %v5811_v22  ;;  %v2066_v57 = vmul.f32 1.442695, %v1988_v11  ;;  %v9824_v11 = vld [vmem:[#allocation86_spill] sm:$0xff]  ;;  %v2517_v27 = vsub.f32 %v9828_v7, %v2244_v60 }
 0x473   : > { %v3780_v58 = vpack.c.bf16 %v8061_v13, %v5813_v36  ;;  %v8065_v53 = vadd.f32 %v5813_v36, %v5811_v22  ;;  %v8075_v22 = vld [vmem:[#allocation3 + $0x1a0] sm:$0xff]  ;;  %v9821_v36 = vld [vmem:[#allocation95_spill] sm:$0xff] }
 0x474   : > { %5816 = vpow2.f32 %v2066_v57  ;;  %9820 = vst [vmem:[#allocation84_spill] sm:$0xff] %v8075_v22  ;;  %v3426_v57 = vpop.permute.xlu1 %3425 }
 0x475   : > { %3911 = vmatprep.mubr.bf16.mxu1 %v3780_v58  ;;  %v8073_v13 = vpop.permute.xlu0 %3440 }
 0x476   : > { %3912 = vmatmul.mubr.bf16.gmra.mxu1 %v3779_v34 }
 0x477   : > { %v8081_v58 = vpop.eup %5814 }
 0x478   : > { %9823 = vst [vmem:[#allocation95_spill] sm:$0xff] %v8081_v58 }
 0x47d   : > { %1878 = vmax.xlane.f32.xlu1 %v1877_v21 }
 0x481   : > { %v8087_v31 = vpop.eup %5816 }
 0x482   : > { %9825 = vst [vmem:[#allocation86_spill] sm:$0xff] %v8087_v31 }
 0x487   : > { %2273 = vperm.xlu0 %5694, %v9821_v36  }
 0x488   : > { %v1876_v39 = vpop.xlane.xlu0 %1875 }
 0x489   : > { %v8079_v34 = vmax.f32 %v8075_v22, %v1876_v39  ;;  %v3710_v39 = vmul.f32 %v7966_v3, %v3326_v37  ;;  %v8091_v22 = vld [vmem:[#allocation3 + $0x188] sm:$0xff]  ;;  %v8100_v3 = vpop.f32.mrf.mxu0  ;;  %v2676_v37 = vmul.f32 1.442695, %v2517_v27 }
 0x48a   : > { %9826 = vst [vmem:[#allocation173_spill] sm:$0xff] %v8091_v22 }
 0x48b   : > { %9822 = vst [vmem:[#allocation80_spill] sm:$0xff] %v8079_v34  ;;  %3470 = vperm.xlu0 %5694, %v8081_v58   ;;  %4300 = vst.msk [vmem:[#allocation3 + $0x1a0] sm:$0xff] %vm3254_vm1, %v8079_v34  ;;  %v9827_v58 = vld [vmem:[#allocation31_spill] sm:$0xff] }
 0x48c   : > { %v2516_v54 = vsub.f32 %v9827_v58, %v2244_v60  ;;  %9829 = vst [vmem:[#allocation31_spill] sm:$0xff] %v8100_v3 }
 0x48e   : > { %2258 = vperm.xlu1 %5695, %v9824_v11  }
 0x48f   : > { %v3889_v21 = vpop.f32.mrf.mxu1 }
 0x490   : > { %v4126_v56 = vadd.f32 %v3889_v21, %v3709_v24 }
 0x491   : > { %v3891_v52 = vpop.f32.mrf.mxu1 }
 0x492   : > { %4190 = vst [vmem:[#allocation5 + $0x130] sm:$0xff] %v4126_v56  ;;  %3455 = vperm.xlu1 %5695, %v8087_v31   ;;  %v2674_v52 = vmul.f32 1.442695, %v2516_v54  ;;  %v9830_v56 = vld [vmem:[#allocation29_spill] sm:$0xff]  ;;  %v9831_v31 = vld [vmem:[#allocation30_spill] sm:$0xff] }
 0x493   : > { %v3892_v34 = vpop.f32.mrf.mxu1 }
 0x494   : > { %v4127_v5 = vadd.f32 %v3892_v34, %v3710_v39  ;;  %v1867_v15 = vpop.xlane.xlu1 %1866  ;;  %5818 = vpow2.f32 %v2674_v52 }
 0x495   : > { %v3894_v63 = vpop.f32.mrf.mxu1  ;;  %v8096_v24 = vmax.f32 %v8091_v22, %v1867_v15  ;;  %5820 = vpow2.f32 %v2676_v37 }
 0x496   : > { %4191 = vst [vmem:[#allocation5 + $0x48] sm:$0xff] %v4127_v5  ;;  %v8104_v63 = vpop.f32.mrf.mxu0 }
 0x497   : > { %4297 = vst.msk [vmem:[#allocation3 + $0x188] sm:$0xff] %vm3254_vm1, %v8096_v24  ;;  %9832 = vst [vmem:[#allocation32_spill] sm:$0xff] %v8104_v63 }
 0x498   : > { %v2239_v21 = vpop.permute.xlu1 %2238  ;;  %v8106_v5 = vpop.f32.mrf.mxu0 }
 0x499   : > { %v2514_v58 = vsub.f32 %v9830_v56, %v2239_v21  ;;  %v2515_v33 = vsub.f32 %v9831_v31, %v2239_v21  ;;  %9833 = vst [vmem:[#allocation29_spill] sm:$0xff] %v8106_v5  ;;  %v9837_v21 = vld [vmem:[#allocation87_spill] sm:$0xff] }
 0x49a   : > { %v8108_v54 = vpop.f32.mrf.mxu0  ;;  %v1993_v56 = vsub.f32 %v9837_v21, %v9802_v49  ;;  %v9840_v49 = vld [vmem:[#allocation101_spill] sm:$0xff] }
 0x49b   : > { %v2670_v60 = vmul.f32 1.442695, %v2514_v58  ;;  %v2672_v34 = vmul.f32 1.442695, %v2515_v33  ;;  %9834 = vst [vmem:[#allocation30_spill] sm:$0xff] %v8108_v54  ;;  %v1892_v15 = vmax.f32 %v8106_v5, %v8108_v54 }
 0x49c   : > { %v2076_v58 = vmul.f32 1.442695, %v1993_v56 }
 0x49d   : > { %5822 = vpow2.f32 %v2670_v60  ;;  %v1883_v60 = vmax.f32 %v8047_v45, %v8051_v62 }
 0x49e   : > { %5824 = vpow2.f32 %v2672_v34  ;;  %v9838_v34 = vld [vmem:[#allocation82_spill] sm:$0xff] }
 0x49f   : > { %v1990_v54 = vsub.f32 %v9838_v34, %v9805_v25  ;;  %5826 = vpow2.f32 %v2076_v58  ;;  %v3328_v25 = vld [vmem:[#allocation5 + $0x110] sm:$0xff]  ;;  %v9843_v34 = vld [vmem:[#allocation92_spill] sm:$0xff] }
 0x4a1   : > { %v8112_v39 = vpop.eup %5818  ;;  %v2070_v5 = vmul.f32 1.442695, %v1990_v54 }
 0x4a2   : > { %9835 = vst [vmem:[#allocation174_spill] sm:$0xff] %v8112_v39  ;;  %v8114_v7 = vpop.eup %5820 }
 0x4a3   : > { %9836 = vst [vmem:[#allocation175_spill] sm:$0xff] %v8114_v7  ;;  %5828 = vpow2.f32 %v2070_v5 }
 0x4aa   : > { %v5823_v31 = vpop.eup %5822  ;;  %1893 = vmax.xlane.f32.xlu0 %v1892_v15  ;;  %v2254_v15 = vpop.permute.xlu0 %2253 }
 0x4ab   : > { %v5825_v27 = vpop.eup %5824  ;;  %v3781_v33 = vpack.c.bf16 %v8112_v39, %v5823_v31 }
 0x4ac   : > { %v3782_v52 = vpack.c.bf16 %v8114_v7, %v5825_v27  ;;  %v8118_v37 = vadd.f32 %v5825_v27, %v5823_v31  ;;  %v8128_v31 = vld [vmem:[#allocation3 + $0x1b0] sm:$0xff]  ;;  %v3327_v27 = vld [vmem:[#allocation5 + $0x180] sm:$0xff]  ;;  %v8134_v21 = vpop.eup %5826 }
 0x4ad   : > { %9839 = vst [vmem:[#allocation87_spill] sm:$0xff] %v8128_v31  ;;  %9842 = vst [vmem:[#allocation101_spill] sm:$0xff] %v8134_v21  ;;  %v3711_v56 = vmul.f32 %v3426_v57, %v3327_v27  ;;  %v8144_v27 = vld [vmem:[#allocation3 + $0x198] sm:$0xff] }
 0x4ae   : > { %3919 = vmatprep.mubr.bf16.mxu1 %v3782_v52  ;;  %v8126_v22 = vpop.permute.xlu0 %3450  ;;  %9845 = vst [vmem:[#allocation176_spill] sm:$0xff] %v8144_v27 }
 0x4af   : > { %3920 = vmatmul.mubr.bf16.gmra.mxu1 %v3781_v33 }
 0x4b0   : > { %v8141_v45 = vpop.eup %5828 }
 0x4b1   : > { %9844 = vst [vmem:[#allocation92_spill] sm:$0xff] %v8141_v45 }
 0x4b6   : > { %1884 = vmax.xlane.f32.xlu1 %v1883_v60  ;;  %v3712_v60 = vmul.f32 %v8020_v20, %v3328_v25 }
 0x4c0   : > { %2283 = vperm.xlu0 %5694, %v9840_v49  }
 0x4c1   : > { %v1882_v33 = vpop.xlane.xlu0 %1881 }
 0x4c2   : > { %v8132_v52 = vmax.f32 %v8128_v31, %v1882_v33  ;;  %v3436_v33 = vpop.permute.xlu1 %3435 }
 0x4c4   : > { %9841 = vst [vmem:[#allocation82_spill] sm:$0xff] %v8132_v52  ;;  %v3897_v58 = vpop.f32.mrf.mxu1  ;;  %3480 = vperm.xlu0 %5694, %v8134_v21   ;;  %4302 = vst.msk [vmem:[#allocation3 + $0x1b0] sm:$0xff] %vm3254_vm1, %v8132_v52  ;;  %v9846_v21 = vld [vmem:[#allocation35_spill] sm:$0xff] }
 0x4c5   : > { %v4128_v5 = vadd.f32 %v3897_v58, %v3711_v56  ;;  %v2520_v52 = vsub.f32 %v9846_v21, %v2254_v15  ;;  %v9847_v56 = vld [vmem:[#allocation36_spill] sm:$0xff] }
 0x4c6   : > { %v3899_v54 = vpop.f32.mrf.mxu1  ;;  %v2521_v58 = vsub.f32 %v9847_v56, %v2254_v15 }
 0x4c7   : > { %4192 = vst [vmem:[#allocation5 + $0x180] sm:$0xff] %v4128_v5  ;;  %2268 = vperm.xlu1 %5695, %v9843_v34   ;;  %v2682_v25 = vmul.f32 1.442695, %v2520_v52 }
 0x4c8   : > { %v3900_v62 = vpop.f32.mrf.mxu1  ;;  %v2684_v5 = vmul.f32 1.442695, %v2521_v58 }
 0x4c9   : > { %v4129_v31 = vadd.f32 %v3900_v62, %v3712_v60  ;;  %v8153_v62 = vpop.f32.mrf.mxu0  ;;  %v9850_v60 = vld [vmem:[#allocation33_spill] sm:$0xff]  ;;  %5830 = vpow2.f32 %v2682_v25 }
 0x4ca   : > { %v3902_v57 = vpop.f32.mrf.mxu1  ;;  %9849 = vst [vmem:[#allocation36_spill] sm:$0xff] %v8153_v62  ;;  %5832 = vpow2.f32 %v2684_v5 }
 0x4cb   : > { %4193 = vst [vmem:[#allocation5 + $0x110] sm:$0xff] %v4129_v31  ;;  %3465 = vperm.xlu1 %5695, %v8141_v45   ;;  %v9851_v45 = vld [vmem:[#allocation34_spill] sm:$0xff]  ;;  %v8157_v15 = vpop.f32.mrf.mxu0 }
 0x4cc   : > { %9852 = vst [vmem:[#allocation33_spill] sm:$0xff] %v8157_v15 }
 0x4cd   : > { %v1873_v54 = vpop.xlane.xlu1 %1872  ;;  %v8159_v52 = vpop.f32.mrf.mxu0 }
 0x4ce   : > { %v8149_v20 = vmax.f32 %v8144_v27, %v1873_v54  ;;  %9853 = vst [vmem:[#allocation34_spill] sm:$0xff] %v8159_v52 }
 0x4cf   : > { %v8161_v56 = vpop.f32.mrf.mxu0 }
 0x4d0   : > { %9848 = vst [vmem:[#allocation35_spill] sm:$0xff] %v8149_v20  ;;  %4299 = vst.msk [vmem:[#allocation3 + $0x198] sm:$0xff] %vm3254_vm1, %v8149_v20  ;;  %v1898_v58 = vmax.f32 %v8159_v52, %v8161_v56  ;;  %v9859_v52 = vld [vmem:[#allocation85_spill] sm:$0xff] }
 0x4d1   : > { %v2249_v31 = vpop.permute.xlu1 %2248  ;;  %9854 = vst [vmem:[#allocation177_spill] sm:$0xff] %v8161_v56  ;;  %v1889_v56 = vmax.f32 %v8100_v3, %v8104_v63  ;;  %v1992_v27 = vsub.f32 %v9859_v52, %v9824_v11  ;;  %v3330_v11 = vld [vmem:[#allocation5 + $0x98] sm:$0xff] }
 0x4d2   : > { %v2518_v57 = vsub.f32 %v9850_v60, %v2249_v31  ;;  %v2519_v7 = vsub.f32 %v9851_v45, %v2249_v31 }
 0x4d4   : > { %v2678_v21 = vmul.f32 1.442695, %v2518_v57  ;;  %v2680_v39 = vmul.f32 1.442695, %v2519_v7 }
 0x4d6   : > { %5834 = vpow2.f32 %v2678_v21  ;;  %v8165_v54 = vpop.eup %5830 }
 0x4d7   : > { %5836 = vpow2.f32 %v2680_v39  ;;  %9855 = vst [vmem:[#allocation178_spill] sm:$0xff] %v8165_v54  ;;  %v8167_v60 = vpop.eup %5832  ;;  %v9858_v39 = vld [vmem:[#allocation93_spill] sm:$0xff] }
 0x4d8   : > { %9856 = vst [vmem:[#allocation179_spill] sm:$0xff] %v8167_v60  ;;  %v1995_v57 = vsub.f32 %v9858_v39, %v9821_v36  ;;  %v9861_v36 = vld [vmem:[#allocation106_spill] sm:$0xff] }
 0x4da   : > { %v2080_v21 = vmul.f32 1.442695, %v1995_v57 }
 0x4dc   : > { %5838 = vpow2.f32 %v2080_v21  ;;  %v9864_v21 = vld [vmem:[#allocation98_spill] sm:$0xff] }
 0x4e3   : > { %v5835_v45 = vpop.eup %5834  ;;  %1899 = vmax.xlane.f32.xlu0 %v1898_v58  ;;  %v2264_v58 = vpop.permute.xlu0 %2263 }
 0x4e4   : > { %v5837_v25 = vpop.eup %5836  ;;  %v3783_v7 = vpack.c.bf16 %v8165_v54, %v5835_v45  ;;  %v2074_v54 = vmul.f32 1.442695, %v1992_v27 }
 0x4e5   : > { %v3784_v5 = vpack.c.bf16 %v8167_v60, %v5837_v25  ;;  %v8171_v31 = vadd.f32 %v5837_v25, %v5835_v45  ;;  %v8181_v45 = vld [vmem:[#allocation3 + $0x1c0] sm:$0xff]  ;;  %v3329_v25 = vld [vmem:[#allocation5 + $0x118] sm:$0xff] }
 0x4e6   : > { %5840 = vpow2.f32 %v2074_v54  ;;  %9860 = vst [vmem:[#allocation93_spill] sm:$0xff] %v8181_v45  ;;  %v3713_v57 = vmul.f32 %v3436_v33, %v3329_v25  ;;  %v3714_v54 = vmul.f32 %v8073_v13, %v3330_v11  ;;  %v8197_v25 = vld [vmem:[#allocation3 + $0x1a8] sm:$0xff] }
 0x4e7   : > { %9857 = vst [vmem:[#allocation180_spill] sm:$0xff] %v8171_v31  ;;  %3927 = vmatprep.mubr.bf16.mxu1 %v3784_v5  ;;  %v8179_v60 = vpop.permute.xlu0 %3460  ;;  %9866 = vst [vmem:[#allocation181_spill] sm:$0xff] %v8197_v25 }
 0x4e8   : > { %3928 = vmatmul.mubr.bf16.gmra.mxu1 %v3783_v7 }
 0x4e9   : > { %v8187_v39 = vpop.eup %5838 }
 0x4ea   : > { %9863 = vst [vmem:[#allocation106_spill] sm:$0xff] %v8187_v39 }
 0x4ef   : > { %1890 = vmax.xlane.f32.xlu1 %v1889_v56 }
 0x4f3   : > { %v8194_v3 = vpop.eup %5840 }
 0x4f4   : > { %9865 = vst [vmem:[#allocation98_spill] sm:$0xff] %v8194_v3 }
 0x4f9   : > { %2293 = vperm.xlu0 %5694, %v9861_v36  }
 0x4fa   : > { %v1888_v7 = vpop.xlane.xlu0 %1887 }
 0x4fb   : > { %v8185_v5 = vmax.f32 %v8181_v45, %v1888_v7  ;;  %v3446_v7 = vpop.permute.xlu1 %3445 }
 0x4fd   : > { %9862 = vst [vmem:[#allocation85_spill] sm:$0xff] %v8185_v5  ;;  %v3905_v52 = vpop.f32.mrf.mxu1  ;;  %3490 = vperm.xlu0 %5694, %v8187_v39   ;;  %4304 = vst.msk [vmem:[#allocation3 + $0x1c0] sm:$0xff] %vm3254_vm1, %v8185_v5  ;;  %v9867_v39 = vld [vmem:[#allocation39_spill] sm:$0xff] }
 0x4fe   : > { %v4130_v27 = vadd.f32 %v3905_v52, %v3713_v57  ;;  %v2524_v5 = vsub.f32 %v9867_v39, %v2264_v58  ;;  %v9868_v57 = vld [vmem:[#allocation40_spill] sm:$0xff] }
 0x4ff   : > { %v3907_v56 = vpop.f32.mrf.mxu1  ;;  %v2525_v52 = vsub.f32 %v9868_v57, %v2264_v58 }
 0x500   : > { %4194 = vst [vmem:[#allocation5 + $0x118] sm:$0xff] %v4130_v27  ;;  %2278 = vperm.xlu1 %5695, %v9864_v21   ;;  %v2690_v11 = vmul.f32 1.442695, %v2524_v5 }
 0x501   : > { %v3908_v63 = vpop.f32.mrf.mxu1  ;;  %v2692_v27 = vmul.f32 1.442695, %v2525_v52 }
 0x502   : > { %v4131_v45 = vadd.f32 %v3908_v63, %v3714_v54  ;;  %v8206_v63 = vpop.f32.mrf.mxu0  ;;  %v9870_v54 = vld [vmem:[#allocation37_spill] sm:$0xff]  ;;  %5842 = vpow2.f32 %v2690_v11 }
 0x503   : > { %v3910_v33 = vpop.f32.mrf.mxu1  ;;  %9869 = vst [vmem:[#allocation39_spill] sm:$0xff] %v8206_v63  ;;  %5844 = vpow2.f32 %v2692_v27 }
 0x504   : > { %4195 = vst [vmem:[#allocation5 + $0x98] sm:$0xff] %v4131_v45  ;;  %3475 = vperm.xlu1 %5695, %v8194_v3   ;;  %v9871_v3 = vld [vmem:[#allocation38_spill] sm:$0xff]  ;;  %v8210_v58 = vpop.f32.mrf.mxu0 }
 0x505   : > { %9872 = vst [vmem:[#allocation40_spill] sm:$0xff] %v8210_v58 }
 0x506   : > { %v1879_v56 = vpop.xlane.xlu1 %1878  ;;  %v8212_v5 = vpop.f32.mrf.mxu0 }
 0x507   : > { %v8202_v13 = vmax.f32 %v8197_v25, %v1879_v56  ;;  %9873 = vst [vmem:[#allocation37_spill] sm:$0xff] %v8212_v5 }
 0x508   : > { %v8214_v57 = vpop.f32.mrf.mxu0 }
 0x509   : > { %4301 = vst.msk [vmem:[#allocation3 + $0x1a8] sm:$0xff] %vm3254_vm1, %v8202_v13  ;;  %9874 = vst [vmem:[#allocation38_spill] sm:$0xff] %v8214_v57  ;;  %v1904_v52 = vmax.f32 %v8212_v5, %v8214_v57  ;;  %v1895_v57 = vmax.f32 %v8153_v62, %v8157_v15  ;;  %v9879_v5 = vld [vmem:[#allocation90_spill] sm:$0xff] }
 0x50a   : > { %v2259_v45 = vpop.permute.xlu1 %2258  ;;  %v1994_v25 = vsub.f32 %v9879_v5, %v9843_v34 }
 0x50b   : > { %v2522_v33 = vsub.f32 %v9870_v54, %v2259_v45  ;;  %v2523_v31 = vsub.f32 %v9871_v3, %v2259_v45 }
 0x50d   : > { %v2686_v39 = vmul.f32 1.442695, %v2522_v33  ;;  %v2688_v20 = vmul.f32 1.442695, %v2523_v31 }
 0x50f   : > { %5846 = vpow2.f32 %v2686_v39  ;;  %v8218_v56 = vpop.eup %5842 }
 0x510   : > { %5848 = vpow2.f32 %v2688_v20  ;;  %9875 = vst [vmem:[#allocation182_spill] sm:$0xff] %v8218_v56  ;;  %v8220_v54 = vpop.eup %5844  ;;  %v9878_v20 = vld [vmem:[#allocation99_spill] sm:$0xff] }
 0x511   : > { %9876 = vst [vmem:[#allocation183_spill] sm:$0xff] %v8220_v54  ;;  %v1997_v33 = vsub.f32 %v9878_v20, %v9840_v49  ;;  %v2001_v49 = vsub.f32 %v7641_v12, %v7648_v40 }
 0x513   : > { %v2084_v39 = vmul.f32 1.442695, %v1997_v33  ;;  %v2092_v5 = vmul.f32 1.442695, %v2001_v49 }
 0x515   : > { %5850 = vpow2.f32 %v2084_v39 }
 0x51c   : > { %v5847_v3 = vpop.eup %5846  ;;  %1905 = vmax.xlane.f32.xlu0 %v1904_v52  ;;  %v9880_v52 = vld [vmem:[#allocation104_spill] sm:$0xff] }
 0x51d   : > { %v5849_v11 = vpop.eup %5848  ;;  %v3785_v31 = vpack.c.bf16 %v8218_v56, %v5847_v3  ;;  %v1999_v56 = vsub.f32 %v9880_v52, %v9861_v36  ;;  %v9884_v52 = vld [vmem:[#allocation103_spill] sm:$0xff] }
 0x51e   : > { %v3786_v27 = vpack.c.bf16 %v8220_v54, %v5849_v11  ;;  %v8224_v45 = vadd.f32 %v5849_v11, %v5847_v3  ;;  %v2274_v54 = vpop.permute.xlu0 %2273  ;;  %v2078_v3 = vmul.f32 1.442695, %v1994_v25 }
 0x51f   : > { %v2088_v11 = vmul.f32 1.442695, %v1999_v56  ;;  %v3332_v56 = vld [vmem:[#allocation5 + $0x150] sm:$0xff] }
 0x520   : > { %9877 = vst [vmem:[#allocation184_spill] sm:$0xff] %v8224_v45  ;;  %3935 = vmatprep.mubr.bf16.mxu1 %v3786_v27  ;;  %5852 = vpow2.f32 %v2078_v3  ;;  %v3331_v27 = vld [vmem:[#allocation5 + $0x120] sm:$0xff]  ;;  %v3716_v39 = vmul.f32 %v8126_v22, %v3332_v56  ;;  %v8261_v22 = vld [vmem:[#allocation3 + $0x1b8] sm:$0xff]  ;;  %v9889_v56 = vld [vmem:[#allocation43_spill] sm:$0xff] }
 0x521   : > { %3936 = vmatmul.mubr.bf16.gmra.mxu1 %v3785_v31  ;;  %5854 = vpow2.f32 %v2088_v11  ;;  %v8238_v31 = vld [vmem:[#allocation3 + $0x1d0] sm:$0xff]  ;;  %v3715_v25 = vmul.f32 %v3446_v7, %v3331_v27  ;;  %v3456_v7 = vpop.permute.xlu1 %3455 }
 0x522   : > { %v8234_v45 = vpop.permute.xlu0 %3470  ;;  %9881 = vst [vmem:[#allocation99_spill] sm:$0xff] %v8238_v31  ;;  %5856 = vpow2.f32 %v2092_v5  ;;  %v9887_v5 = vld [vmem:[#allocation115_spill] sm:$0xff] }
 0x523   : > { %9888 = vst [vmem:[#allocation115_spill] sm:$0xff] %v8261_v22 }
 0x528   : > { %1896 = vmax.xlane.f32.xlu1 %v1895_v57  ;;  %v8244_v57 = vpop.eup %5850 }
 0x529   : > { %9883 = vst [vmem:[#allocation104_spill] sm:$0xff] %v8244_v57 }
 0x52d   : > { %v8254_v49 = vpop.eup %5852 }
 0x52e   : > { %9885 = vst [vmem:[#allocation103_spill] sm:$0xff] %v8254_v49 }
 0x532   : > { %2303 = vperm.xlu0 %5694, %v7648_v40   ;;  %v2003_v40 = vsub.f32 %v7661_v14, %v7669_v16  ;;  %v2005_v14 = vsub.f32 %v9887_v5, %v7686_v6  ;;  %v9891_v5 = vld [vmem:[#allocation41_spill] sm:$0xff] }
 0x533   : > { %v1894_v34 = vpop.xlane.xlu0 %1893 }
 0x534   : > { %v8242_v36 = vmax.f32 %v8238_v31, %v1894_v34  ;;  %v2096_v27 = vmul.f32 1.442695, %v2003_v40 }
 0x536   : > { %9882 = vst [vmem:[#allocation90_spill] sm:$0xff] %v8242_v36  ;;  %v3913_v20 = vpop.f32.mrf.mxu1  ;;  %3500 = vperm.xlu0 %5694, %v8244_v57   ;;  %4306 = vst.msk [vmem:[#allocation3 + $0x1d0] sm:$0xff] %vm3254_vm1, %v8242_v36  ;;  %5858 = vpow2.f32 %v2096_v27  ;;  %v9892_v57 = vld [vmem:[#allocation42_spill] sm:$0xff]  ;;  %v9939_v36 = vld [vmem:[#allocation55_spill] sm:$0xff] }
 0x537   : > { %v4132_v12 = vadd.f32 %v3913_v20, %v3715_v25  ;;  %v8256_v25 = vpop.eup %5854  ;;  %v2528_v20 = vsub.f32 %v9889_v56, %v2274_v54 }
 0x538   : > { %v3915_v33 = vpop.f32.mrf.mxu1  ;;  %9886 = vst [vmem:[#allocation185_spill] sm:$0xff] %v8256_v25  ;;  %v8274_v31 = vpop.eup %5856 }
 0x539   : > { %4196 = vst [vmem:[#allocation5 + $0x120] sm:$0xff] %v4132_v12  ;;  %2288 = vperm.xlu1 %5695, %v9884_v52   ;;  %9893 = vst [vmem:[#allocation43_spill] sm:$0xff] %v8274_v31 }
 0x53a   : > { %v3916_v3 = vpop.f32.mrf.mxu1  ;;  %2313 = vperm.xlu0 %5694, %v7669_v16   ;;  %v9890_v16 = vld [vmem:[#allocation44_spill] sm:$0xff] }
 0x53b   : > { %v4133_v11 = vadd.f32 %v3916_v3, %v3716_v39  ;;  %v2529_v12 = vsub.f32 %v9890_v16, %v2274_v54  ;;  %v2100_v39 = vmul.f32 1.442695, %v2005_v14  ;;  %v2698_v3 = vmul.f32 1.442695, %v2528_v20  ;;  %v9894_v14 = vld [vmem:[#allocation119_spill] sm:$0xff] }
 0x53c   : > { %v3918_v34 = vpop.f32.mrf.mxu1 }
 0x53d   : > { %4197 = vst [vmem:[#allocation5 + $0x150] sm:$0xff] %v4133_v11  ;;  %3485 = vperm.xlu1 %5695, %v8254_v49   ;;  %v2700_v11 = vmul.f32 1.442695, %v2529_v12  ;;  %5860 = vpow2.f32 %v2100_v39 }
 0x53e   : > { %3510 = vperm.xlu0 %5694, %v8256_v25   ;;  %5862 = vpow2.f32 %v2698_v3 }
 0x53f   : > { %v1885_v33 = vpop.xlane.xlu1 %1884  ;;  %5864 = vpow2.f32 %v2700_v11 }
 0x540   : > { %v8267_v40 = vmax.f32 %v8261_v22, %v1885_v33  ;;  %v9908_v22 = vld [vmem:[#allocation46_spill] sm:$0xff] }
 0x542   : > { %4303 = vst.msk [vmem:[#allocation3 + $0x1b8] sm:$0xff] %vm3254_vm1, %v8267_v40  ;;  %2323 = vperm.xlu0 %5694, %v7686_v6  }
 0x543   : > { %v2269_v34 = vpop.permute.xlu1 %2268  ;;  %v8278_v6 = vpop.eup %5858 }
 0x544   : > { %v2526_v56 = vsub.f32 %v9891_v5, %v2269_v34  ;;  %v2527_v25 = vsub.f32 %v9892_v57, %v2269_v34  ;;  %9895 = vst [vmem:[#allocation44_spill] sm:$0xff] %v8278_v6  ;;  %v9897_v57 = vld [vmem:[#allocation125_spill] sm:$0xff]  ;;  %v1901_v34 = vmax.f32 %v8206_v63, %v8210_v58  ;;  %v9898_v5 = vld [vmem:[#allocation96_spill] sm:$0xff] }
 0x546   : > { %v2694_v54 = vmul.f32 1.442695, %v2526_v56  ;;  %v2696_v27 = vmul.f32 1.442695, %v2527_v25  ;;  %3520 = vperm.xlu0 %5694, %v8274_v31   ;;  %v1996_v56 = vsub.f32 %v9898_v5, %v9864_v21  ;;  %v3334_v31 = vld [vmem:[#allocation5 + $0x60] sm:$0xff] }
 0x547   : > { %v3718_v5 = vmul.f32 %v8179_v60, %v3334_v31  ;;  %v3466_v58 = vpop.permute.xlu1 %3465  ;;  %v9906_v60 = vld [vmem:[#allocation48_spill] sm:$0xff] }
 0x548   : > { %5866 = vpow2.f32 %v2694_v54  ;;  %v2284_v54 = vpop.permute.xlu0 %2283 }
 0x549   : > { %5868 = vpow2.f32 %v2696_v27  ;;  %v2082_v27 = vmul.f32 1.442695, %v1996_v56  ;;  %v9901_v56 = vld [vmem:[#allocation109_spill] sm:$0xff]  ;;  %v2533_v31 = vsub.f32 %v9906_v60, %v2284_v54 }
 0x54a   : > { %2333 = vperm.xlu0 %5694, %v9894_v14   ;;  %v8281_v20 = vpop.eup %5860 }
 0x54b   : > { %9896 = vst [vmem:[#allocation41_spill] sm:$0xff] %v8281_v20  ;;  %v8284_v16 = vpop.eup %5862  ;;  %5870 = vpow2.f32 %v2082_v27 }
 0x54c   : > { %v8286_v12 = vpop.eup %5864 }
 0x54e   : > { %3530 = vperm.xlu0 %5694, %v8278_v6   ;;  %v8300_v6 = vld [vmem:[#allocation3 + $0x1e0] sm:$0xff] }
 0x54f   : > { %9899 = vst [vmem:[#allocation42_spill] sm:$0xff] %v8300_v6 }
 0x552   : > { %2343 = vperm.xlu0 %5694, %v9897_v57  }
 0x555   : > { %v5867_v25 = vpop.eup %5866 }
 0x556   : > { %v5869_v33 = vpop.eup %5868  ;;  %3540 = vperm.xlu0 %5694, %v8281_v20   ;;  %v3787_v39 = vpack.c.bf16 %v8284_v16, %v5867_v25  ;;  %v8298_v20 = vpop.permute.xlu0 %3480 }
 0x557   : > { %v3788_v3 = vpack.c.bf16 %v8286_v12, %v5869_v33  ;;  %v8291_v11 = vadd.f32 %v5869_v33, %v5867_v25  ;;  %v3333_v25 = vld [vmem:[#allocation5 + $0x108] sm:$0xff] }
 0x558   : > { %v8309_v62 = vpop.eup %5870 }
 0x559   : > { %3943 = vmatprep.mubr.bf16.mxu1 %v3788_v3  ;;  %v3717_v3 = vmul.f32 %v3456_v7, %v3333_v25  ;;  %9902 = vst [vmem:[#allocation125_spill] sm:$0xff] %v8309_v62  ;;  %v9903_v7 = vld [vmem:[#allocation118_spill] sm:$0xff] }
 0x55a   : > { %3944 = vmatmul.mubr.bf16.gmra.mxu1 %v3787_v39  ;;  %2353 = vperm.xlu0 %5694, %v7770_v8   ;;  %v2007_v25 = vsub.f32 %v9903_v7, %v9894_v14  ;;  %v9937_v8 = vld [vmem:[#allocation116_spill] sm:$0xff] }
 0x561   : > { %1902 = vmax.xlane.f32.xlu1 %v1901_v34 }
 0x56c   : > { %v1900_v33 = vpop.xlane.xlu0 %1899 }
 0x56d   : > { %v8303_v39 = vmax.f32 %v8300_v6, %v1900_v33  ;;  %v8314_v6 = vld [vmem:[#allocation3 + $0x1c8] sm:$0xff] }
 0x56e   : > { %9904 = vst [vmem:[#allocation96_spill] sm:$0xff] %v8314_v6 }
 0x56f   : > { %9900 = vst [vmem:[#allocation119_spill] sm:$0xff] %v8303_v39  ;;  %v3921_v15 = vpop.f32.mrf.mxu1  ;;  %4308 = vst.msk [vmem:[#allocation3 + $0x1e0] sm:$0xff] %vm3254_vm1, %v8303_v39 }
 0x570   : > { %v4134_v21 = vadd.f32 %v3921_v15, %v3717_v3  ;;  %v9905_v15 = vld [vmem:[#allocation47_spill] sm:$0xff] }
 0x571   : > { %v3923_v34 = vpop.f32.mrf.mxu1  ;;  %v2532_v3 = vsub.f32 %v9905_v15, %v2284_v54 }
 0x572   : > { %4198 = vst [vmem:[#allocation5 + $0x108] sm:$0xff] %v4134_v21  ;;  %2298 = vperm.xlu1 %5695, %v9901_v56  }
 0x573   : > { %v3924_v27 = vpop.f32.mrf.mxu1 }
 0x574   : > { %v4135_v63 = vadd.f32 %v3924_v27, %v3718_v5  ;;  %v2104_v5 = vmul.f32 1.442695, %v2007_v25  ;;  %v2706_v27 = vmul.f32 1.442695, %v2532_v3 }
 0x575   : > { %v3926_v33 = vpop.f32.mrf.mxu1 }
 0x576   : > { %4199 = vst [vmem:[#allocation5 + $0x60] sm:$0xff] %v4135_v63  ;;  %3495 = vperm.xlu1 %5695, %v8309_v62   ;;  %v2708_v63 = vmul.f32 1.442695, %v2533_v31  ;;  %v9907_v33 = vld [vmem:[#allocation45_spill] sm:$0xff]  ;;  %5872 = vpow2.f32 %v2104_v5 }
 0x577   : > { %5874 = vpow2.f32 %v2706_v27 }
 0x578   : > { %v1891_v21 = vpop.xlane.xlu1 %1890  ;;  %5876 = vpow2.f32 %v2708_v63 }
 0x579   : > { %v8319_v34 = vmax.f32 %v8314_v6, %v1891_v21  ;;  %3002 = vadd.xlane.f32.xlu0 %v7742_v29 }
 0x57b   : > { %4305 = vst.msk [vmem:[#allocation3 + $0x1c8] sm:$0xff] %vm3254_vm1, %v8319_v34 }
 0x57c   : > { %v2279_v14 = vpop.permute.xlu1 %2278 }
 0x57d   : > { %v2530_v7 = vsub.f32 %v9907_v33, %v2279_v14  ;;  %v2531_v39 = vsub.f32 %v9908_v22, %v2279_v14  ;;  %v9914_v14 = vld [vmem:[#allocation102_spill] sm:$0xff] }
 0x57e   : > { %v1998_v33 = vsub.f32 %v9914_v14, %v9884_v52  ;;  %v9919_v14 = vld [vmem:[#allocation111_spill] sm:$0xff] }
 0x57f   : > { %v2702_v54 = vmul.f32 1.442695, %v2530_v7  ;;  %v2704_v15 = vmul.f32 1.442695, %v2531_v39  ;;  %v8337_v39 = vpop.f32.mrf.mxu0  ;;  %v2294_v7 = vpop.permute.xlu0 %2293 }
 0x580   : > { %9912 = vst [vmem:[#allocation48_spill] sm:$0xff] %v8337_v39 }
 0x581   : > { %5878 = vpow2.f32 %v2702_v54  ;;  %v8339_v27 = vpop.f32.mrf.mxu0  ;;  %v2086_v54 = vmul.f32 1.442695, %v1998_v33 }
 0x582   : > { %5880 = vpow2.f32 %v2704_v15  ;;  %9913 = vst [vmem:[#allocation45_spill] sm:$0xff] %v8339_v27  ;;  %v1907_v63 = vmax.f32 %v8337_v39, %v8339_v27  ;;  %v9915_v15 = vld [vmem:[#allocation107_spill] sm:$0xff]  ;;  %v3336_v39 = vld [vmem:[#allocation5 + $0x188] sm:$0xff] }
 0x583   : > { %v8326_v60 = vpop.eup %5872  ;;  %5882 = vpow2.f32 %v2086_v54 }
 0x584   : > { %9909 = vst [vmem:[#allocation109_spill] sm:$0xff] %v8326_v60  ;;  %v8328_v29 = vpop.eup %5874 }
 0x585   : > { %9910 = vst [vmem:[#allocation118_spill] sm:$0xff] %v8328_v29  ;;  %v8330_v25 = vpop.eup %5876 }
 0x586   : > { %9911 = vst [vmem:[#allocation47_spill] sm:$0xff] %v8330_v25 }
 0x58e   : > { %v5879_v3 = vpop.eup %5878 }
 0x58f   : > { %v5881_v31 = vpop.eup %5880  ;;  %3550 = vperm.xlu0 %5694, %v8326_v60   ;;  %v3789_v21 = vpack.c.bf16 %v8328_v29, %v5879_v3  ;;  %v8349_v60 = vld [vmem:[#allocation3 + $0x1f0] sm:$0xff]  ;;  %v9922_v29 = vld [vmem:[#allocation113_spill] sm:$0xff] }
 0x590   : > { %v3790_v22 = vpack.c.bf16 %v8330_v25, %v5881_v31  ;;  %v8335_v5 = vadd.f32 %v5881_v31, %v5879_v3  ;;  %v2000_v3 = vsub.f32 %v9915_v15, %v9901_v56  ;;  %v8347_v31 = vpop.permute.xlu0 %3490  ;;  %9916 = vst [vmem:[#allocation46_spill] sm:$0xff] %v8349_v60  ;;  %v3720_v15 = vmul.f32 %v8234_v45, %v3336_v39  ;;  %v9921_v25 = vld [vmem:[#allocation114_spill] sm:$0xff]  ;;  %v8368_v45 = vld [vmem:[#allocation3 + $0x1d8] sm:$0xff]  ;;  %v9925_v39 = vld [vmem:[#allocation51_spill] sm:$0xff] }
 0x592   : > { %3951 = vmatprep.mubr.bf16.mxu1 %v3790_v22  ;;  %v2090_v22 = vmul.f32 1.442695, %v2000_v3 }
 0x593   : > { %3952 = vmatmul.mubr.bf16.gmra.mxu1 %v3789_v21  ;;  %v3335_v21 = vld [vmem:[#allocation5 + $0xe0] sm:$0xff] }
 0x594   : > { %v3719_v27 = vmul.f32 %v3466_v58, %v3335_v21  ;;  %5884 = vpow2.f32 %v2090_v22  ;;  %v8360_v21 = vpop.eup %5882 }
 0x595   : > { %9920 = vst [vmem:[#allocation107_spill] sm:$0xff] %v8360_v21 }
 0x59a   : > { %1908 = vmax.xlane.f32.xlu1 %v1907_v63  ;;  %v9918_v63 = vld [vmem:[#allocation112_spill] sm:$0xff] }
 0x59b   : > { %v2002_v56 = vsub.f32 %v9919_v14, %v9918_v63  ;;  %9924 = vst [vmem:[#allocation112_spill] sm:$0xff] %v8368_v45  ;;  %v9926_v14 = vld [vmem:[#allocation52_spill] sm:$0xff] }
 0x5a5   : > { %v1906_v6 = vpop.xlane.xlu0 %1905 }
 0x5a6   : > { %v8352_v62 = vmax.f32 %v8349_v60, %v1906_v6  ;;  %v2094_v6 = vmul.f32 1.442695, %v2002_v56  ;;  %v3476_v60 = vpop.permute.xlu1 %3475  ;;  %v2537_v56 = vsub.f32 %v9926_v14, %v2294_v7 }
 0x5a8   : > { %9917 = vst [vmem:[#allocation102_spill] sm:$0xff] %v8352_v62  ;;  %v3929_v52 = vpop.f32.mrf.mxu1  ;;  %4310 = vst.msk [vmem:[#allocation3 + $0x1f0] sm:$0xff] %vm3254_vm1, %v8352_v62  ;;  %v2004_v62 = vsub.f32 %v9922_v29, %v9921_v25  ;;  %5886 = vpow2.f32 %v2094_v6  ;;  %v9928_v6 = vld [vmem:[#allocation49_spill] sm:$0xff] }
 0x5a9   : > { %v4136_v33 = vadd.f32 %v3929_v52, %v3719_v27  ;;  %v9923_v27 = vld [vmem:[#allocation124_spill] sm:$0xff] }
 0x5aa   : > { %v3931_v54 = vpop.f32.mrf.mxu1  ;;  %v2009_v52 = vsub.f32 %v9923_v27, %v9897_v57  ;;  %v2716_v57 = vmul.f32 1.442695, %v2537_v56  ;;  %v9933_v56 = vld [vmem:[#allocation123_spill] sm:$0xff] }
 0x5ab   : > { %4200 = vst [vmem:[#allocation5 + $0xe0] sm:$0xff] %v4136_v33  ;;  %2308 = vperm.xlu1 %5695, %v9918_v63   ;;  %v2536_v63 = vsub.f32 %v9925_v39, %v2294_v7  ;;  %v2098_v54 = vmul.f32 1.442695, %v2004_v62  ;;  %v9929_v7 = vld [vmem:[#allocation50_spill] sm:$0xff] }
 0x5ac   : > { %v3932_v3 = vpop.f32.mrf.mxu1 }
 0x5ad   : > { %v4137_v58 = vadd.f32 %v3932_v3, %v3720_v15  ;;  %v2108_v15 = vmul.f32 1.442695, %v2009_v52  ;;  %5888 = vpow2.f32 %v2098_v54 }
 0x5ae   : > { %v3934_v22 = vpop.f32.mrf.mxu1  ;;  %3005 = vadd.xlane.f32.xlu0 %v7793_v61  ;;  %v2714_v61 = vmul.f32 1.442695, %v2536_v63  ;;  %v2304_v63 = vpop.permute.xlu0 %2303 }
 0x5af   : > { %4201 = vst [vmem:[#allocation5 + $0x188] sm:$0xff] %v4137_v58  ;;  %3505 = vperm.xlu1 %5695, %v8360_v21   ;;  %v8378_v58 = vpop.eup %5884  ;;  %5890 = vpow2.f32 %v2108_v15 }
 0x5b0   : > { %9927 = vst [vmem:[#allocation111_spill] sm:$0xff] %v8378_v58  ;;  %5892 = vpow2.f32 %v2714_v61 }
 0x5b1   : > { %v1897_v33 = vpop.xlane.xlu1 %1896  ;;  %5894 = vpow2.f32 %v2716_v57 }
 0x5b2   : > { %v8373_v29 = vmax.f32 %v8368_v45, %v1897_v33 }
 0x5b3   : > { %2318 = vperm.xlu1 %5695, %v9921_v25   ;;  %v9930_v25 = vld [vmem:[#allocation117_spill] sm:$0xff] }
 0x5b4   : > { %4307 = vst.msk [vmem:[#allocation3 + $0x1d8] sm:$0xff] %vm3254_vm1, %v8373_v29 }
 0x5b5   : > { %v2289_v3 = vpop.permute.xlu1 %2288  ;;  %v8384_v39 = vpop.eup %5886 }
 0x5b6   : > { %v2534_v22 = vsub.f32 %v9928_v6, %v2289_v3  ;;  %v2535_v27 = vsub.f32 %v9929_v7, %v2289_v3  ;;  %9931 = vst [vmem:[#allocation114_spill] sm:$0xff] %v8384_v39  ;;  %v8398_v3 = vpop.permute.xlu0 %3500 }
 0x5b7   : > { %3515 = vperm.xlu1 %5695, %v8378_v58  }
 0x5b8   : > { %v2710_v62 = vmul.f32 1.442695, %v2534_v22  ;;  %v2712_v52 = vmul.f32 1.442695, %v2535_v27 }
 0x5ba   : > { %5896 = vpow2.f32 %v2710_v62  ;;  %v8387_v14 = vpop.eup %5888  ;;  %v8406_v27 = vpop.permute.xlu0 %2313 }
 0x5bb   : > { %5898 = vpow2.f32 %v2712_v52  ;;  %2328 = vperm.xlu1 %5695, %v9930_v25   ;;  %9932 = vst [vmem:[#allocation113_spill] sm:$0xff] %v8387_v14 }
 0x5bc   : > { %v8390_v33 = vpop.eup %5890 }
 0x5bd   : > { %9934 = vst [vmem:[#allocation124_spill] sm:$0xff] %v8390_v33  ;;  %v8393_v54 = vpop.eup %5892 }
 0x5be   : > { %9935 = vst [vmem:[#allocation51_spill] sm:$0xff] %v8393_v54  ;;  %v8395_v15 = vpop.eup %5894  ;;  %v8408_v62 = vpop.permute.xlu0 %3510 }
 0x5bf   : > { %3525 = vperm.xlu1 %5695, %v8384_v39   ;;  %9936 = vst [vmem:[#allocation52_spill] sm:$0xff] %v8395_v15 }
 0x5c2   : > { %v8410_v52 = vpop.permute.xlu0 %2323 }
 0x5c3   : > { %2338 = vperm.xlu1 %5695, %v9933_v56  }
 0x5c4   : > { %2363 = vperm.xlu0 %5694, %v7823_v18  }
 0x5c6   : > { %v8412_v58 = vpop.permute.xlu0 %3520 }
 0x5c7   : > { %v5897_v61 = vpop.eup %5896  ;;  %3535 = vperm.xlu1 %5695, %v8387_v14   ;;  %v3337_v14 = vld [vmem:[#allocation5 + $0x138] sm:$0xff] }
 0x5c8   : > { %v5899_v57 = vpop.eup %5898  ;;  %3560 = vperm.xlu0 %5694, %v8390_v33   ;;  %v3791_v6 = vpack.c.bf16 %v8393_v54, %v5897_v61  ;;  %v3721_v39 = vmul.f32 %v3476_v60, %v3337_v14  ;;  %v3338_v33 = vld [vmem:[#allocation5 + $0x140] sm:$0xff]  ;;  %v2006_v60 = vsub.f32 %v9937_v8, %v9930_v25  ;;  %v8420_v14 = vld [vmem:[#allocation3 + $0x1e8] sm:$0xff] }
 0x5c9   : > { %v3792_v22 = vpack.c.bf16 %v8395_v15, %v5899_v57  ;;  %v8403_v7 = vadd.f32 %v5899_v57, %v5897_v61  ;;  %v3722_v61 = vmul.f32 %v8298_v20, %v3338_v33  ;;  %9938 = vst [vmem:[#allocation49_spill] sm:$0xff] %v8420_v14 }
 0x5cb   : > { %3959 = vmatprep.mubr.bf16.mxu1 %v3792_v22  ;;  %2348 = vperm.xlu1 %5695, %v7755_v55   ;;  %v3486_v22 = vpop.permute.xlu1 %3485 }
 0x5cc   : > { %3960 = vmatmul.mubr.bf16.gmra.mxu1 %v3791_v6  ;;  %v8415_v6 = vpop.permute.xlu0 %2333 }
 0x5d0   : > { %v8427_v49 = vpop.permute.xlu0 %3530 }
 0x5e1   : > { %v3937_v21 = vpop.f32.mrf.mxu1 }
 0x5e2   : > { %v4138_v54 = vadd.f32 %v3937_v21, %v3721_v39  ;;  %v2540_v21 = vsub.f32 %v9939_v36, %v2304_v63  ;;  %v9940_v39 = vld [vmem:[#allocation56_spill] sm:$0xff] }
 0x5e3   : > { %v3939_v15 = vpop.f32.mrf.mxu1 }
 0x5e4   : > { %4202 = vst [vmem:[#allocation5 + $0x138] sm:$0xff] %v4138_v54  ;;  %v2541_v15 = vsub.f32 %v9940_v39, %v2304_v63  ;;  %v2102_v54 = vmul.f32 1.442695, %v2006_v60  ;;  %v9943_v60 = vld [vmem:[#allocation121_spill] sm:$0xff] }
 0x5e5   : > { %v3940_v57 = vpop.f32.mrf.mxu1  ;;  %v2008_v39 = vsub.f32 %v9943_v60, %v9933_v56 }
 0x5e6   : > { %v4139_v45 = vadd.f32 %v3940_v57, %v3722_v61  ;;  %v9942_v61 = vld [vmem:[#allocation54_spill] sm:$0xff]  ;;  %5900 = vpow2.f32 %v2102_v54 }
 0x5e7   : > { %v3942_v18 = vpop.f32.mrf.mxu1  ;;  %3011 = vadd.xlane.f32.xlu0 %v7848_v30  ;;  %v2724_v30 = vmul.f32 1.442695, %v2541_v15  ;;  %v2106_v15 = vmul.f32 1.442695, %v2008_v39 }
 0x5e8   : > { %4203 = vst [vmem:[#allocation5 + $0x140] sm:$0xff] %v4139_v45  ;;  %v2722_v18 = vmul.f32 1.442695, %v2540_v21  ;;  %v9941_v45 = vld [vmem:[#allocation53_spill] sm:$0xff]  ;;  %v8436_v21 = vpop.permute.xlu0 %2343 }
 0x5ea   : > { %v1903_v20 = vpop.xlane.xlu1 %1902  ;;  %5902 = vpow2.f32 %v2722_v18  ;;  %v2871_v18 = vld [vmem:[#allocation4 + $0x8] sm:$0xff] }
 0x5eb   : > { %v8425_v33 = vmax.f32 %v8420_v14, %v1903_v20  ;;  %5904 = vpow2.f32 %v2724_v30 }
 0x5ec   : > { %v8438_v20 = vpop.permute.xlu0 %3540 }
 0x5ed   : > { %4309 = vst.msk [vmem:[#allocation3 + $0x1e8] sm:$0xff] %vm3254_vm1, %v8425_v33 }
 0x5ee   : > { %v2299_v8 = vpop.permute.xlu1 %2298 }
 0x5ef   : > { %v2538_v25 = vsub.f32 %v9941_v45, %v2299_v8  ;;  %v2539_v57 = vsub.f32 %v9942_v61, %v2299_v8  ;;  %2999 = vadd.xlane.f32.xlu1 %v7740_v46 }
 0x5f0   : > { %v8445_v54 = vpop.permute.xlu0 %2353 }
 0x5f1   : > { %v2718_v36 = vmul.f32 1.442695, %v2538_v25  ;;  %v2720_v63 = vmul.f32 1.442695, %v2539_v57  ;;  %v9947_v25 = vld [vmem:[#allocation122_spill] sm:$0xff] }
 0x5f2   : > { %v2935_v61 = vmul.f32 %v9947_v25, %v2871_v18  ;;  %v3340_v25 = vld [vmem:[#allocation5 + $0x1a8] sm:$0xff] }
 0x5f3   : > { %5906 = vpow2.f32 %v2718_v36  ;;  %v8440_v45 = vpop.eup %5900 }
 0x5f4   : > { %5908 = vpow2.f32 %v2720_v63  ;;  %9944 = vst [vmem:[#allocation50_spill] sm:$0xff] %v8440_v45 }
 0x5f5   : > { %5910 = vpow2.f32 %v2106_v15 }
 0x5f7   : > { %v8443_v46 = vpop.eup %5902 }
 0x5f8   : > { %9945 = vst [vmem:[#allocation117_spill] sm:$0xff] %v8443_v46  ;;  %v8447_v8 = vpop.eup %5904 }
 0x5f9   : > { %9946 = vst [vmem:[#allocation123_spill] sm:$0xff] %v8447_v8 }
 0x5fd   : > { %2373 = vperm.xlu0 %5694, %v7881_v35  }
 0x600   : > { %v5907_v56 = vpop.eup %5906  ;;  %3545 = vperm.xlu1 %5695, %v8440_v45   ;;  %v3339_v45 = vld [vmem:[#allocation5 + $0x80] sm:$0xff] }
 0x601   : > { %v5909_v30 = vpop.eup %5908  ;;  %v3793_v57 = vpack.c.bf16 %v8443_v46, %v5907_v56  ;;  %v3723_v18 = vmul.f32 %v3486_v22, %v3339_v45  ;;  %v9951_v45 = vld [vmem:[#allocation60_spill] sm:$0xff] }
 0x602   : > { %v3003_v36 = vpop.xlane.xlu0 %3002  ;;  %v3794_v63 = vpack.c.bf16 %v8447_v8, %v5909_v30  ;;  %v8453_v60 = vadd.f32 %v5909_v30, %v5907_v56  ;;  %v8457_v15 = vpop.eup %5910  ;;  %v3724_v56 = vmul.f32 %v8347_v31, %v3340_v25  ;;  %v9952_v25 = vld [vmem:[#allocation57_spill] sm:$0xff] }
 0x603   : > { %v3191_v39 = vadd.f32 %v3003_v36, %v2935_v61  ;;  %9948 = vst [vmem:[#allocation116_spill] sm:$0xff] %v8457_v15  ;;  %v8462_v61 = vpop.permute.xlu1 %3495 }
 0x604   : > { %3967 = vmatprep.mubr.bf16.mxu1 %v3794_v63  ;;  %2358 = vperm.xlu1 %5695, %v7773_v32   ;;  %v8464_v63 = vld [vmem:[#allocation3 + $0x1f8] sm:$0xff] }
 0x605   : > { %3256 = vst.msk [vmem:[#allocation4 + $0x8] sm:$0xff] %vm3254_vm1, %v3191_v39  ;;  %3968 = vmatmul.mubr.bf16.gmra.mxu1 %v3793_v57  ;;  %9949 = vst [vmem:[#allocation55_spill] sm:$0xff] %v8464_v63  ;;  %v9950_v39 = vld [vmem:[#allocation59_spill] sm:$0xff] }
 0x606   : > { %v2544_v22 = vsub.f32 %v9950_v39, %v8406_v27 }
 0x608   : > { %3555 = vperm.xlu1 %5695, %v8457_v15   ;;  %v2730_v31 = vmul.f32 1.442695, %v2544_v22  ;;  %v9955_v22 = vld [vmem:[#allocation64_spill] sm:$0xff] }
 0x609   : > { %v2549_v15 = vsub.f32 %v9955_v22, %v8410_v52 }
 0x60a   : > { %5912 = vpow2.f32 %v2730_v31 }
 0x61a   : > { %v3945_v46 = vpop.f32.mrf.mxu1 }
 0x61b   : > { %v4140_v14 = vadd.f32 %v3945_v46, %v3723_v18  ;;  %v2545_v46 = vsub.f32 %v9951_v45, %v8406_v27  ;;  %v9954_v27 = vld [vmem:[#allocation63_spill] sm:$0xff] }
 0x61c   : > { %v3947_v35 = vpop.f32.mrf.mxu1  ;;  %3017 = vadd.xlane.f32.xlu0 %v7902_v50  ;;  %v2548_v39 = vsub.f32 %v9954_v27, %v8410_v52 }
 0x61d   : > { %4204 = vst [vmem:[#allocation5 + $0x80] sm:$0xff] %v4140_v14  ;;  %v2732_v14 = vmul.f32 1.442695, %v2545_v46 }
 0x61e   : > { %v3948_v30 = vpop.f32.mrf.mxu1 }
 0x61f   : > { %v4141_v36 = vadd.f32 %v3948_v30, %v3724_v56  ;;  %v9953_v30 = vld [vmem:[#allocation58_spill] sm:$0xff]  ;;  %5914 = vpow2.f32 %v2732_v14  ;;  %v9958_v14 = vld [vmem:[#allocation67_spill] sm:$0xff] }
 0x620   : > { %v3950_v57 = vpop.f32.mrf.mxu1 }
 0x621   : > { %4205 = vst [vmem:[#allocation5 + $0x1a8] sm:$0xff] %v4141_v36  ;;  %v2010_v57 = vsub.f32 %v7751_v44, %v7755_v55  ;;  %v9956_v55 = vld [vmem:[#allocation61_spill] sm:$0xff] }
 0x623   : > { %v1909_v35 = vpop.xlane.xlu1 %1908  ;;  %v2110_v46 = vmul.f32 1.442695, %v2010_v57 }
 0x624   : > { %v8471_v50 = vmax.f32 %v8464_v63, %v1909_v35 }
 0x626   : > { %4311 = vst.msk [vmem:[#allocation3 + $0x1f8] sm:$0xff] %vm3254_vm1, %v8471_v50 }
 0x627   : > { %v2309_v18 = vpop.permute.xlu1 %2308 }
 0x628   : > { %v2542_v56 = vsub.f32 %v9952_v25, %v2309_v18  ;;  %v2543_v36 = vsub.f32 %v9953_v30, %v2309_v18  ;;  %v2738_v18 = vmul.f32 1.442695, %v2548_v39  ;;  %v2740_v25 = vmul.f32 1.442695, %v2549_v15  ;;  %v9957_v30 = vld [vmem:[#allocation62_spill] sm:$0xff]  ;;  %v8493_v39 = vpop.permute.xlu0 %3550 }
 0x62a   : > { %v2726_v45 = vmul.f32 1.442695, %v2542_v56  ;;  %v2728_v35 = vmul.f32 1.442695, %v2543_v36  ;;  %v2552_v56 = vsub.f32 %v9958_v14, %v8415_v6 }
 0x62b   : > { %v8483_v63 = vpop.permute.xlu1 %3505 }
 0x62c   : > { %5916 = vpow2.f32 %v2726_v45  ;;  %3008 = vadd.xlane.f32.xlu1 %v7797_v41  ;;  %v9959_v41 = vld [vmem:[#allocation68_spill] sm:$0xff]  ;;  %v2872_v45 = vld [vmem:[#allocation4 + $0x10] sm:$0xff] }
 0x62d   : > { %5918 = vpow2.f32 %v2728_v35  ;;  %v2553_v57 = vsub.f32 %v9959_v41, %v8415_v6  ;;  %v2746_v35 = vmul.f32 1.442695, %v2552_v56  ;;  %v2936_v22 = vmul.f32 %v7767_v43, %v2872_v45 }
 0x62e   : > { %5920 = vpow2.f32 %v2110_v46  ;;  %v8498_v46 = vpop.eup %5912 }
 0x62f   : > { %v2319_v44 = vpop.permute.xlu1 %2318  ;;  %5922 = vpow2.f32 %v2738_v18  ;;  %9960 = vst [vmem:[#allocation56_spill] sm:$0xff] %v8498_v46  ;;  %v2748_v18 = vmul.f32 1.442695, %v2553_v57 }
 0x630   : > { %v2546_v31 = vsub.f32 %v9956_v55, %v2319_v44  ;;  %v2547_v27 = vsub.f32 %v9957_v30, %v2319_v44  ;;  %5924 = vpow2.f32 %v2740_v25  ;;  %v9962_v30 = vld [vmem:[#allocation65_spill] sm:$0xff] }
 0x632   : > { %v2734_v52 = vmul.f32 1.442695, %v2546_v31  ;;  %v2736_v36 = vmul.f32 1.442695, %v2547_v27  ;;  %2383 = vperm.xlu0 %5694, %v7936_v26   ;;  %v8500_v31 = vpop.eup %5914  ;;  %v9963_v27 = vld [vmem:[#allocation66_spill] sm:$0xff] }
 0x633   : > { %v8495_v15 = vpop.permute.xlu1 %3515  ;;  %9961 = vst [vmem:[#allocation53_spill] sm:$0xff] %v8500_v31 }
 0x634   : > { %5926 = vpow2.f32 %v2734_v52 }
 0x635   : > { %5928 = vpow2.f32 %v2736_v36 }
 0x636   : > { %5930 = vpow2.f32 %v2746_v35 }
 0x637   : > { %v3006_v44 = vpop.xlane.xlu0 %3005  ;;  %v2329_v55 = vpop.permute.xlu1 %2328  ;;  %5932 = vpow2.f32 %v2748_v18 }
 0x638   : > { %v3192_v25 = vadd.f32 %v3006_v44, %v2936_v22  ;;  %v2550_v6 = vsub.f32 %v9962_v30, %v2329_v55  ;;  %v2551_v14 = vsub.f32 %v9963_v27, %v2329_v55  ;;  %v9965_v22 = vld [vmem:[#allocation71_spill] sm:$0xff]  ;;  %v9966_v55 = vld [vmem:[#allocation72_spill] sm:$0xff]  ;;  %v9970_v27 = vld [vmem:[#allocation69_spill] sm:$0xff] }
 0x639   : > { %v5917_v41 = vpop.eup %5916  ;;  %v2556_v44 = vsub.f32 %v9965_v22, %v8436_v21  ;;  %v2557_v35 = vsub.f32 %v9966_v55, %v8436_v21 }
 0x63a   : > { %v5919_v8 = vpop.eup %5918  ;;  %3257 = vst.msk [vmem:[#allocation4 + $0x10] sm:$0xff] %vm3254_vm1, %v3192_v25  ;;  %v2742_v56 = vmul.f32 1.442695, %v2550_v6  ;;  %v2744_v52 = vmul.f32 1.442695, %v2551_v14  ;;  %v3795_v43 = vpack.c.bf16 %v8498_v46, %v5917_v41 }
 0x63b   : > { %v8506_v36 = vpop.permute.xlu1 %3525  ;;  %v3796_v57 = vpack.c.bf16 %v8500_v31, %v5919_v8  ;;  %v8509_v45 = vadd.f32 %v5919_v8, %v5917_v41  ;;  %v8516_v25 = vpop.eup %5920  ;;  %v2754_v8 = vmul.f32 1.442695, %v2556_v44  ;;  %v9971_v41 = vld [vmem:[#allocation70_spill] sm:$0xff]  ;;  %v2756_v31 = vmul.f32 1.442695, %v2557_v35  ;;  %v9973_v35 = vld [vmem:[#allocation75_spill] sm:$0xff] }
 0x63c   : > { %5934 = vpow2.f32 %v2742_v56  ;;  %9967 = vst [vmem:[#allocation121_spill] sm:$0xff] %v8516_v25  ;;  %v8518_v18 = vpop.eup %5922 }
 0x63d   : > { %9964 = vst [vmem:[#allocation54_spill] sm:$0xff] %v8509_v45  ;;  %5936 = vpow2.f32 %v2744_v52  ;;  %3975 = vmatprep.mubr.bf16.mxu1 %v3796_v57  ;;  %2368 = vperm.xlu1 %5695, %v7811_v0   ;;  %9968 = vst [vmem:[#allocation122_spill] sm:$0xff] %v8518_v18  ;;  %v8520_v6 = vpop.eup %5924 }
 0x63e   : > { %3976 = vmatmul.mubr.bf16.gmra.mxu1 %v3795_v43  ;;  %9969 = vst [vmem:[#allocation59_spill] sm:$0xff] %v8520_v6  ;;  %v9972_v43 = vld [vmem:[#allocation76_spill] sm:$0xff]  ;;  %5938 = vpow2.f32 %v2754_v8 }
 0x63f   : > { %v2339_v30 = vpop.permute.xlu1 %2338  ;;  %v2561_v55 = vsub.f32 %v9972_v43, %v8445_v54  ;;  %5940 = vpow2.f32 %v2756_v31  ;;  %v9974_v43 = vld [vmem:[#allocation73_spill] sm:$0xff] }
 0x640   : > { %v2554_v14 = vsub.f32 %v9970_v27, %v2339_v30  ;;  %v2555_v56 = vsub.f32 %v9971_v41, %v2339_v30  ;;  %v2560_v30 = vsub.f32 %v9973_v35, %v8445_v54 }
 0x641   : > { %v5927_v22 = vpop.eup %5926  ;;  %3565 = vperm.xlu1 %5695, %v8516_v25  }
 0x642   : > { %v5929_v21 = vpop.eup %5928  ;;  %v2750_v52 = vmul.f32 1.442695, %v2554_v14  ;;  %v3797_v57 = vpack.c.bf16 %v8518_v18, %v5927_v22  ;;  %v2752_v46 = vmul.f32 1.442695, %v2555_v56  ;;  %v2764_v14 = vmul.f32 1.442695, %v2561_v55 }
 0x643   : > { %v8528_v45 = vpop.permute.xlu1 %3535  ;;  %v3798_v44 = vpack.c.bf16 %v8520_v6, %v5929_v21  ;;  %v8531_v0 = vadd.f32 %v5929_v21, %v5927_v22  ;;  %v8535_v27 = vpop.eup %5930  ;;  %v9975_v6 = vld [vmem:[#allocation74_spill] sm:$0xff]  ;;  %v2762_v31 = vmul.f32 1.442695, %v2560_v30 }
 0x644   : > { %5942 = vpow2.f32 %v2750_v52  ;;  %v8537_v56 = vpop.eup %5932  ;;  %v3342_v30 = vld [vmem:[#allocation5 + $0x28] sm:$0xff] }
 0x645   : > { %3983 = vmatprep.mubr.bf16.mxu1 %v3798_v44  ;;  %5944 = vpow2.f32 %v2752_v46  ;;  %v3341_v46 = vld [vmem:[#allocation5 + $0x1b8] sm:$0xff] }
 0x646   : > { %3984 = vmatmul.mubr.bf16.gmra.mxu1 %v3797_v57  ;;  %5946 = vpow2.f32 %v2764_v14 }
 0x647   : > { %v2349_v41 = vpop.permute.xlu1 %2348 }
 0x648   : > { %v2558_v25 = vsub.f32 %v9974_v43, %v2349_v41  ;;  %v2559_v22 = vsub.f32 %v9975_v6, %v2349_v41 }
 0x649   : > { %v5935_v21 = vpop.eup %5934 }
 0x64a   : > { %v5937_v8 = vpop.eup %5936  ;;  %v2758_v44 = vmul.f32 1.442695, %v2558_v25  ;;  %v2760_v18 = vmul.f32 1.442695, %v2559_v22  ;;  %v3799_v54 = vpack.c.bf16 %v8535_v27, %v5935_v21  ;;  %v3725_v25 = vmul.f32 %v8462_v61, %v3341_v46 }
 0x64b   : > { %v3800_v52 = vpack.c.bf16 %v8537_v56, %v5937_v8  ;;  %v8543_v57 = vadd.f32 %v5937_v8, %v5935_v21  ;;  %v8545_v55 = vpop.eup %5938 }
 0x64c   : > { %5948 = vpow2.f32 %v2758_v44  ;;  %9976 = vst [vmem:[#allocation60_spill] sm:$0xff] %v8545_v55  ;;  %v8548_v6 = vpop.eup %5940 }
 0x64d   : > { %5950 = vpow2.f32 %v2760_v18  ;;  %3991 = vmatprep.mubr.bf16.mxu1 %v3800_v52  ;;  %9977 = vst [vmem:[#allocation57_spill] sm:$0xff] %v8548_v6 }
 0x64e   : > { %5952 = vpow2.f32 %v2762_v31  ;;  %3992 = vmatmul.mubr.bf16.gmra.mxu1 %v3799_v54  ;;  %v3726_v31 = vmul.f32 %v8398_v3, %v3342_v30  ;;  %v2364_v3 = vpop.permute.xlu0 %2363 }
 0x651   : > { %3023 = vadd.xlane.f32.xlu0 %v7958_v59  ;;  %v5943_v35 = vpop.eup %5942 }
 0x652   : > { %v5945_v41 = vpop.eup %5944  ;;  %v3801_v22 = vpack.c.bf16 %v8545_v55, %v5943_v35  ;;  %v8566_v30 = vpop.permute.xlu0 %3560 }
 0x653   : > { %v3953_v14 = vpop.f32.mrf.mxu1  ;;  %v3802_v21 = vpack.c.bf16 %v8548_v6, %v5945_v41  ;;  %v8553_v8 = vadd.f32 %v5945_v41, %v5943_v35  ;;  %v8556_v44 = vpop.eup %5946  ;;  %v2874_v41 = vld [vmem:[#allocation4 + $0x20] sm:$0xff] }
 0x654   : > { %v4142_v43 = vadd.f32 %v3953_v14, %v3725_v25  ;;  %9978 = vst [vmem:[#allocation58_spill] sm:$0xff] %v8556_v44 }
 0x655   : > { %v3955_v18 = vpop.f32.mrf.mxu1  ;;  %3999 = vmatprep.mubr.bf16.mxu1 %v3802_v21 }
 0x656   : > { %4206 = vst [vmem:[#allocation5 + $0x1b8] sm:$0xff] %v4142_v43  ;;  %4000 = vmatmul.mubr.bf16.gmra.mxu1 %v3801_v22  ;;  %v2938_v43 = vmul.f32 %v7833_v2, %v2874_v41 }
 0x657   : > { %v3956_v59 = vpop.f32.mrf.mxu1 }
 0x658   : > { %v4143_v61 = vadd.f32 %v3956_v59, %v3726_v31  ;;  %v2870_v31 = vld [vmem:[#allocation4] sm:$0xff]  ;;  %v9980_v59 = vld [vmem:[#allocation88_spill] sm:$0xff] }
 0x659   : > { %v5949_v54 = vpop.eup %5948  ;;  %v3958_v52 = vpop.f32.mrf.mxu1 }
 0x65a   : > { %v5951_v46 = vpop.eup %5950  ;;  %4207 = vst [vmem:[#allocation5 + $0x28] sm:$0xff] %v4143_v61  ;;  %v2934_v61 = vmul.f32 %v9980_v59, %v2870_v31  ;;  %v3343_v59 = vld [vmem:[#allocation5 + $0x1e8] sm:$0xff] }
 0x65b   : > { %v8558_v25 = vpop.eup %5952  ;;  %v3804_v14 = vpack.c.bf16 %v8556_v44, %v5951_v46  ;;  %v8561_v18 = vadd.f32 %v5951_v46, %v5949_v54  ;;  %v9984_v44 = vld [vmem:[#allocation79_spill] sm:$0xff] }
 0x65c   : > { %9979 = vst [vmem:[#allocation63_spill] sm:$0xff] %v8558_v25  ;;  %v3803_v35 = vpack.c.bf16 %v8558_v25, %v5949_v54 }
 0x65d   : > { %4007 = vmatprep.mubr.bf16.mxu1 %v3804_v14  ;;  %v9982_v14 = vld [vmem:[#allocation94_spill] sm:$0xff] }
 0x65e   : > { %4008 = vmatmul.mubr.bf16.gmra.mxu1 %v3803_v35  ;;  %v2565_v35 = vsub.f32 %v9982_v14, %v2364_v3 }
 0x660   : > { %v2772_v41 = vmul.f32 1.442695, %v2565_v35 }
 0x665   : > { %3014 = vadd.xlane.f32.xlu1 %v7852_v23  ;;  %v9981_v23 = vld [vmem:[#allocation91_spill] sm:$0xff] }
 0x666   : > { %v2564_v46 = vsub.f32 %v9981_v23, %v2364_v3  ;;  %v3727_v3 = vmul.f32 %v8483_v63, %v3343_v59 }
 0x667   : > { %2393 = vperm.xlu0 %5694, %v7990_v19  }
 0x668   : > { %v2770_v2 = vmul.f32 1.442695, %v2564_v46 }
 0x66a   : > { %5954 = vpow2.f32 %v2770_v2 }
 0x66b   : > { %5956 = vpow2.f32 %v2772_v41 }
 0x670   : > { %v3012_v22 = vpop.xlane.xlu0 %3011 }
 0x671   : > { %v3194_v21 = vadd.f32 %v3012_v22, %v2938_v43  ;;  %v9983_v22 = vld [vmem:[#allocation77_spill] sm:$0xff] }
 0x673   : > { %3259 = vst.msk [vmem:[#allocation4 + $0x20] sm:$0xff] %vm3254_vm1, %v3194_v21 }
 0x676   : > { %2378 = vperm.xlu1 %5695, %v7826_v42  }
 0x677   : > { %v8582_v14 = vpop.eup %5954 }
 0x678   : > { %v3000_v54 = vpop.xlane.xlu1 %2999  ;;  %9985 = vst [vmem:[#allocation64_spill] sm:$0xff] %v8582_v14  ;;  %v8584_v35 = vpop.eup %5956 }
 0x679   : > { %v3190_v52 = vadd.f32 %v3000_v54, %v2934_v61  ;;  %v3344_v61 = vld [vmem:[#allocation5 + $0xf8] sm:$0xff]  ;;  %9986 = vst [vmem:[#allocation61_spill] sm:$0xff] %v8584_v35 }
 0x67a   : > { %v3728_v46 = vmul.f32 %v8408_v62, %v3344_v61  ;;  %v2374_v62 = vpop.permute.xlu0 %2373  ;;  %v2873_v61 = vld [vmem:[#allocation4 + $0x18] sm:$0xff] }
 0x67b   : > { %3255 = vst.msk [vmem:[#allocation4] sm:$0xff] %vm3254_vm1, %v3190_v52 }
 0x67c   : > { %v8575_v25 = vpop.permute.xlu1 %3545 }
 0x680   : > { %v2359_v43 = vpop.permute.xlu1 %2358 }
 0x681   : > { %v2562_v21 = vsub.f32 %v9983_v22, %v2359_v43  ;;  %v2563_v6 = vsub.f32 %v9984_v44, %v2359_v43  ;;  %v2876_v22 = vld [vmem:[#allocation4 + $0x30] sm:$0xff] }
 0x683   : > { %v2766_v55 = vmul.f32 1.442695, %v2562_v21  ;;  %v2768_v31 = vmul.f32 1.442695, %v2563_v6  ;;  %v2940_v21 = vmul.f32 %v7878_v51, %v2876_v22 }
 0x685   : > { %5958 = vpow2.f32 %v2766_v55 }
 0x686   : > { %5960 = vpow2.f32 %v2768_v31  ;;  %3029 = vadd.xlane.f32.xlu0 %v8012_v28 }
 0x68c   : > { %v3961_v54 = vpop.f32.mrf.mxu1 }
 0x68d   : > { %v4144_v52 = vadd.f32 %v3961_v54, %v3727_v3  ;;  %v8595_v3 = vpop.permute.xlu1 %3555  ;;  %v2568_v54 = vsub.f32 %v7614_v10, %v2374_v62 }
 0x68e   : > { %v3963_v23 = vpop.f32.mrf.mxu1 }
 0x68f   : > { %4208 = vst [vmem:[#allocation5 + $0x1e8] sm:$0xff] %v4144_v52  ;;  %v9987_v52 = vld [vmem:[#allocation120_spill] sm:$0xff] }
 0x690   : > { %v3964_v44 = vpop.f32.mrf.mxu1  ;;  %v2937_v23 = vmul.f32 %v9987_v52, %v2873_v61 }
 0x691   : > { %v4145_v6 = vadd.f32 %v3964_v44, %v3728_v46 }
 0x692   : > { %v5959_v55 = vpop.eup %5958  ;;  %v3966_v2 = vpop.f32.mrf.mxu1 }
 0x693   : > { %v5961_v41 = vpop.eup %5960  ;;  %4209 = vst [vmem:[#allocation5 + $0xf8] sm:$0xff] %v4145_v6  ;;  %v3805_v28 = vpack.c.bf16 %v8582_v14, %v5959_v55  ;;  %v10066_v14 = vld [vmem:[#allocation131_spill] sm:$0xff] }
 0x694   : > { %v3806_v63 = vpack.c.bf16 %v8584_v35, %v5961_v41  ;;  %v8588_v43 = vadd.f32 %v5961_v41, %v5959_v55  ;;  %v2778_v55 = vmul.f32 1.442695, %v2568_v54  ;;  %v9989_v41 = vld [vmem:[#allocation97_spill] sm:$0xff] }
 0x696   : > { %4015 = vmatprep.mubr.bf16.mxu1 %v3806_v63  ;;  %v9990_v63 = vld [vmem:[#allocation100_spill] sm:$0xff]  ;;  %5962 = vpow2.f32 %v2778_v55 }
 0x697   : > { %4016 = vmatmul.mubr.bf16.gmra.mxu1 %v3805_v28 }
 0x69a   : > { %3020 = vadd.xlane.f32.xlu1 %v7906_v38  ;;  %v9988_v38 = vld [vmem:[#allocation105_spill] sm:$0xff] }
 0x69b   : > { %v2569_v46 = vsub.f32 %v9988_v38, %v2374_v62  ;;  %v3345_v62 = vld [vmem:[#allocation5 + $0x160] sm:$0xff] }
 0x69c   : > { %2403 = vperm.xlu0 %5694, %v8043_v48  }
 0x69d   : > { %v2780_v51 = vmul.f32 1.442695, %v2569_v46 }
 0x69f   : > { %5964 = vpow2.f32 %v2780_v51 }
 0x6a3   : > { %v8606_v38 = vpop.eup %5962 }
 0x6a4   : > { %9991 = vst [vmem:[#allocation62_spill] sm:$0xff] %v8606_v38 }
 0x6a5   : > { %v3018_v31 = vpop.xlane.xlu0 %3017 }
 0x6a6   : > { %v3196_v59 = vadd.f32 %v3018_v31, %v2940_v21  ;;  %v3729_v31 = vmul.f32 %v8495_v15, %v3345_v62 }
 0x6a8   : > { %3261 = vst.msk [vmem:[#allocation4 + $0x30] sm:$0xff] %vm3254_vm1, %v3196_v59  ;;  %v3346_v59 = vld [vmem:[#allocation5 + $0x30] sm:$0xff] }
 0x6ab   : > { %2388 = vperm.xlu1 %5695, %v7866_v17  }
 0x6b5   : > { %v3009_v44 = vpop.xlane.xlu1 %3008 }
 0x6b6   : > { %v3193_v6 = vadd.f32 %v3009_v44, %v2937_v23  ;;  %v3730_v23 = vmul.f32 %v8412_v58, %v3346_v59  ;;  %v2384_v58 = vpop.permute.xlu0 %2383  ;;  %v9994_v59 = vld [vmem:[#allocation130_spill] sm:$0xff] }
 0x6b8   : > { %3258 = vst.msk [vmem:[#allocation4 + $0x18] sm:$0xff] %vm3254_vm1, %v3193_v6 }
 0x6b9   : > { %v2369_v2 = vpop.permute.xlu1 %2368 }
 0x6ba   : > { %v2566_v28 = vsub.f32 %v9989_v41, %v2369_v2  ;;  %v2567_v22 = vsub.f32 %v9990_v63, %v2369_v2  ;;  %v3025_v41 = vadd.f32 %v7954_v1, %v7952_v9  ;;  %v2878_v63 = vld [vmem:[#allocation4 + $0x40] sm:$0xff]  ;;  %v2875_v9 = vld [vmem:[#allocation4 + $0x28] sm:$0xff] }
 0x6bb   : > { %3035 = vadd.xlane.f32.xlu0 %v8065_v53  ;;  %v8608_v53 = vpop.eup %5964  ;;  %v9993_v1 = vld [vmem:[#allocation126_spill] sm:$0xff] }
 0x6bc   : > { %v2774_v21 = vmul.f32 1.442695, %v2566_v28  ;;  %v2776_v10 = vmul.f32 1.442695, %v2567_v22  ;;  %9992 = vst [vmem:[#allocation67_spill] sm:$0xff] %v8608_v53  ;;  %v2942_v22 = vmul.f32 %v7928_v47, %v2878_v63 }
 0x6bd   : > { %v8620_v62 = vpop.permute.xlu1 %3565 }
 0x6be   : > { %5966 = vpow2.f32 %v2774_v21 }
 0x6bf   : > { %5968 = vpow2.f32 %v2776_v10 }
 0x6c5   : > { %v3969_v61 = vpop.f32.mrf.mxu1 }
 0x6c6   : > { %v4146_v54 = vadd.f32 %v3969_v61, %v3729_v31  ;;  %v2572_v31 = vsub.f32 %v9993_v1, %v2384_v58  ;;  %v2939_v61 = vmul.f32 %v9994_v59, %v2875_v9  ;;  %v3349_v59 = vld [vmem:[#allocation5 + $0xf0] sm:$0xff] }
 0x6c7   : > { %v3971_v52 = vpop.f32.mrf.mxu1 }
 0x6c8   : > { %4210 = vst [vmem:[#allocation5 + $0x160] sm:$0xff] %v4146_v54  ;;  %v9995_v54 = vld [vmem:[#allocation127_spill] sm:$0xff]  ;;  %v2786_v47 = vmul.f32 1.442695, %v2572_v31 }
 0x6c9   : > { %v3972_v46 = vpop.f32.mrf.mxu1  ;;  %v2573_v52 = vsub.f32 %v9995_v54, %v2384_v58  ;;  %v3347_v58 = vld [vmem:[#allocation5 + $0x1e0] sm:$0xff]  ;;  %v9999_v54 = vld [vmem:[#allocation168_spill] sm:$0xff] }
 0x6ca   : > { %v4147_v44 = vadd.f32 %v3972_v46, %v3730_v23  ;;  %5970 = vpow2.f32 %v2786_v47 }
 0x6cb   : > { %v5967_v6 = vpop.eup %5966  ;;  %v3974_v55 = vpop.f32.mrf.mxu1 }
 0x6cc   : > { %v5969_v51 = vpop.eup %5968  ;;  %4211 = vst [vmem:[#allocation5 + $0x30] sm:$0xff] %v4147_v44  ;;  %v3807_v2 = vpack.c.bf16 %v8606_v38, %v5967_v6  ;;  %v2788_v44 = vmul.f32 1.442695, %v2573_v52  ;;  %v9996_v55 = vld [vmem:[#allocation108_spill] sm:$0xff]  ;;  %v10000_v52 = vld [vmem:[#allocation169_spill] sm:$0xff] }
 0x6cd   : > { %v3808_v15 = vpack.c.bf16 %v8608_v53, %v5969_v51  ;;  %v8614_v28 = vadd.f32 %v5969_v51, %v5967_v6 }
 0x6ce   : > { %5972 = vpow2.f32 %v2788_v44 }
 0x6cf   : > { %4023 = vmatprep.mubr.bf16.mxu1 %v3808_v15  ;;  %3026 = vadd.xlane.f32.xlu1 %v3025_v41 }
 0x6d0   : > { %4024 = vmatmul.mubr.bf16.gmra.mxu1 %v3807_v2  ;;  %v9997_v2 = vld [vmem:[#allocation110_spill] sm:$0xff] }
 0x6d1   : > { %2413 = vperm.xlu0 %5694, %v8096_v24  }
 0x6d7   : > { %v8631_v31 = vpop.eup %5970 }
 0x6d8   : > { %9998 = vst [vmem:[#allocation68_spill] sm:$0xff] %v8631_v31 }
 0x6da   : > { %v3024_v21 = vpop.xlane.xlu0 %3023 }
 0x6db   : > { %v3198_v10 = vadd.f32 %v3024_v21, %v2942_v22  ;;  %v3731_v22 = vmul.f32 %v8506_v36, %v3347_v58  ;;  %v3348_v21 = vld [vmem:[#allocation5] sm:$0xff] }
 0x6dc   : > { %v3732_v1 = vmul.f32 %v8427_v49, %v3348_v21 }
 0x6dd   : > { %3263 = vst.msk [vmem:[#allocation4 + $0x40] sm:$0xff] %vm3254_vm1, %v3198_v10 }
 0x6e0   : > { %2398 = vperm.xlu1 %5695, %v7919_v4  }
 0x6ee   : > { %v3015_v23 = vpop.xlane.xlu1 %3014 }
 0x6ef   : > { %v3195_v46 = vadd.f32 %v3015_v23, %v2939_v61  ;;  %v3031_v23 = vadd.f32 %v10000_v52, %v9999_v54  ;;  %v3352_v54 = vld [vmem:[#allocation5 + $0x1d0] sm:$0xff] }
 0x6f0   : > { %3041 = vadd.xlane.f32.xlu0 %v8118_v37 }
 0x6f1   : > { %3260 = vst.msk [vmem:[#allocation4 + $0x28] sm:$0xff] %vm3254_vm1, %v3195_v46  ;;  %v8635_v46 = vpop.eup %5972 }
 0x6f2   : > { %v2379_v6 = vpop.permute.xlu1 %2378  ;;  %10001 = vst [vmem:[#allocation65_spill] sm:$0xff] %v8635_v46 }
 0x6f3   : > { %v2570_v51 = vsub.f32 %v9996_v55, %v2379_v6  ;;  %v2571_v15 = vsub.f32 %v9997_v2, %v2379_v6  ;;  %v3733_v55 = vmul.f32 %v8528_v45, %v3349_v59 }
 0x6f5   : > { %v2782_v41 = vmul.f32 1.442695, %v2570_v51  ;;  %v2784_v63 = vmul.f32 1.442695, %v2571_v15  ;;  %v3350_v51 = vld [vmem:[#allocation5 + $0x8] sm:$0xff]  ;;  %v10002_v15 = vld [vmem:[#allocation35_spill] sm:$0xff] }
 0x6f6   : > { %v3734_v21 = vmul.f32 %v8438_v20, %v3350_v51  ;;  %v3736_v20 = vmul.f32 %v8493_v39, %v3352_v54  ;;  %v3355_v39 = vld [vmem:[#allocation5 + $0x40] sm:$0xff] }
 0x6f7   : > { %5974 = vpow2.f32 %v2782_v41  ;;  %v3739_v54 = vmul.f32 %v8620_v62, %v3355_v39 }
 0x6f8   : > { %5976 = vpow2.f32 %v2784_v63 }
 0x6fe   : > { %v3977_v37 = vpop.f32.mrf.mxu1 }
 0x6ff   : > { %v4148_v10 = vadd.f32 %v3977_v37, %v3731_v22  ;;  %v3351_v37 = vld [vmem:[#allocation5 + $0x148] sm:$0xff] }
 0x700   : > { %v3979_v9 = vpop.f32.mrf.mxu1 }
 0x701   : > { %4212 = vst [vmem:[#allocation5 + $0x1e0] sm:$0xff] %v4148_v10  ;;  %v2394_v10 = vpop.permute.xlu0 %2393 }
 0x702   : > { %v3980_v61 = vpop.f32.mrf.mxu1 }
 0x703   : > { %v4149_v47 = vadd.f32 %v3980_v61, %v3732_v1  ;;  %v2880_v1 = vld [vmem:[#allocation4 + $0x50] sm:$0xff]  ;;  %v3735_v61 = vmul.f32 %v8575_v25, %v3351_v37  ;;  %v10004_v25 = vld [vmem:[#allocation164_spill] sm:$0xff] }
 0x704   : > { %v5975_v44 = vpop.eup %5974  ;;  %v3982_v6 = vpop.f32.mrf.mxu1  ;;  %3032 = vadd.xlane.f32.xlu1 %v3031_v23  ;;  %v10003_v23 = vld [vmem:[#allocation166_spill] sm:$0xff] }
 0x705   : > { %v5977_v36 = vpop.eup %5976  ;;  %4213 = vst [vmem:[#allocation5] sm:$0xff] %v4149_v47  ;;  %v3809_v49 = vpack.c.bf16 %v8631_v31, %v5975_v44  ;;  %v2944_v47 = vmul.f32 %v10003_v23, %v2880_v1 }
 0x706   : > { %v3985_v2 = vpop.f32.mrf.mxu1  ;;  %2423 = vperm.xlu0 %5694, %v10002_v15   ;;  %v3810_v41 = vpack.c.bf16 %v8635_v46, %v5977_v36  ;;  %v8641_v63 = vadd.f32 %v5977_v36, %v5975_v44 }
 0x707   : > { %v4150_v58 = vadd.f32 %v3985_v2, %v3733_v55  ;;  %v3353_v2 = vld [vmem:[#allocation5 + $0x100] sm:$0xff] }
 0x708   : > { %v3987_v22 = vpop.f32.mrf.mxu1  ;;  %4031 = vmatprep.mubr.bf16.mxu1 %v3810_v41 }
 0x709   : > { %4214 = vst [vmem:[#allocation5 + $0xf0] sm:$0xff] %v4150_v58  ;;  %4032 = vmatmul.mubr.bf16.gmra.mxu1 %v3809_v49  ;;  %v3737_v58 = vmul.f32 %v8595_v3, %v3353_v2  ;;  %v3354_v22 = vld [vmem:[#allocation5 + $0xc8] sm:$0xff] }
 0x70a   : > { %v3988_v45 = vpop.f32.mrf.mxu1 }
 0x70b   : > { %v4151_v9 = vadd.f32 %v3988_v45, %v3734_v21 }
 0x70c   : > { %v3990_v59 = vpop.f32.mrf.mxu1 }
 0x70d   : > { %4215 = vst [vmem:[#allocation5 + $0x8] sm:$0xff] %v4151_v9  ;;  %v3738_v9 = vmul.f32 %v8566_v30, %v3354_v22 }
 0x70e   : > { %v3993_v52 = vpop.f32.mrf.mxu1 }
 0x70f   : > { %v4152_v44 = vadd.f32 %v3993_v52, %v3735_v61  ;;  %v3030_v6 = vpop.xlane.xlu0 %3029  ;;  %v2877_v52 = vld [vmem:[#allocation4 + $0x38] sm:$0xff] }
 0x710   : > { %v3200_v36 = vadd.f32 %v3030_v6, %v2944_v47  ;;  %v3995_v55 = vpop.f32.mrf.mxu1 }
 0x711   : > { %4216 = vst [vmem:[#allocation5 + $0x148] sm:$0xff] %v4152_v44  ;;  %v10005_v44 = vld [vmem:[#allocation134_spill] sm:$0xff] }
 0x712   : > { %3265 = vst.msk [vmem:[#allocation4 + $0x50] sm:$0xff] %vm3254_vm1, %v3200_v36  ;;  %v3996_v49 = vpop.f32.mrf.mxu1  ;;  %v2576_v6 = vsub.f32 %v10005_v44, %v2394_v10  ;;  %v10006_v36 = vld [vmem:[#allocation140_spill] sm:$0xff] }
 0x713   : > { %v4153_v51 = vadd.f32 %v3996_v49, %v3736_v20  ;;  %v2941_v55 = vmul.f32 %v10006_v36, %v2877_v52  ;;  %v10007_v20 = vld [vmem:[#allocation135_spill] sm:$0xff] }
 0x714   : > { %v3998_v41 = vpop.f32.mrf.mxu1  ;;  %v2577_v49 = vsub.f32 %v10007_v20, %v2394_v10  ;;  %v2882_v20 = vld [vmem:[#allocation4 + $0x60] sm:$0xff] }
 0x715   : > { %4217 = vst [vmem:[#allocation5 + $0x1d0] sm:$0xff] %v4153_v51  ;;  %2408 = vperm.xlu1 %5695, %v10004_v25   ;;  %v10008_v41 = vld [vmem:[#allocation180_spill] sm:$0xff] }
 0x716   : > { %v4001_v21 = vpop.f32.mrf.mxu1  ;;  %v2796_v22 = vmul.f32 1.442695, %v2577_v49  ;;  %v10015_v49 = vld [vmem:[#allocation83_spill] sm:$0xff] }
 0x717   : > { %v4154_v37 = vadd.f32 %v4001_v21, %v3737_v58  ;;  %v2794_v58 = vmul.f32 1.442695, %v2576_v6 }
 0x718   : > { %v4003_v45 = vpop.f32.mrf.mxu1 }
 0x719   : > { %4218 = vst [vmem:[#allocation5 + $0x100] sm:$0xff] %v4154_v37  ;;  %v10009_v37 = vld [vmem:[#allocation128_spill] sm:$0xff]  ;;  %5978 = vpow2.f32 %v2794_v58  ;;  %v10016_v58 = vld [vmem:[#allocation78_spill] sm:$0xff] }
 0x71a   : > { %v4004_v1 = vpop.f32.mrf.mxu1  ;;  %5980 = vpow2.f32 %v2796_v22  ;;  %v10017_v22 = vld [vmem:[#allocation144_spill] sm:$0xff] }
 0x71b   : > { %v4155_v59 = vadd.f32 %v4004_v1, %v3738_v9  ;;  %v10010_v9 = vld [vmem:[#allocation129_spill] sm:$0xff] }
 0x71c   : > { %v4006_v61 = vpop.f32.mrf.mxu1 }
 0x71d   : > { %4219 = vst [vmem:[#allocation5 + $0xc8] sm:$0xff] %v4155_v59  ;;  %v10012_v61 = vld [vmem:[#allocation171_spill] sm:$0xff] }
 0x71e   : > { %v4009_v23 = vpop.f32.mrf.mxu1 }
 0x71f   : > { %v4156_v47 = vadd.f32 %v4009_v23, %v3739_v54  ;;  %v10013_v54 = vld [vmem:[#allocation172_spill] sm:$0xff] }
 0x720   : > { %v4011_v3 = vpop.f32.mrf.mxu1  ;;  %v3037_v52 = vadd.f32 %v10013_v54, %v10012_v61 }
 0x721   : > { %4220 = vst [vmem:[#allocation5 + $0x40] sm:$0xff] %v4156_v47 }
 0x722   : > { %v8655_v51 = vpop.f32.mrf.mxu1 }
 0x723   : > { %v3021_v30 = vpop.xlane.xlu1 %3020 }
 0x724   : > { %v3197_v2 = vadd.f32 %v3021_v30, %v2941_v55  ;;  %v4014_v62 = vpop.f32.mrf.mxu1  ;;  %v2404_v55 = vpop.permute.xlu0 %2403  ;;  %v2946_v30 = vmul.f32 %v10015_v49, %v2882_v20  ;;  %v10021_v49 = vld [vmem:[#allocation136_spill] sm:$0xff] }
 0x725   : > { %3047 = vadd.xlane.f32.xlu0 %v10008_v41  ;;  %v2879_v62 = vld [vmem:[#allocation4 + $0x48] sm:$0xff] }
 0x726   : > { %3262 = vst.msk [vmem:[#allocation4 + $0x38] sm:$0xff] %vm3254_vm1, %v3197_v2  ;;  %v8661_v59 = vpop.eup %5978 }
 0x727   : > { %v2389_v21 = vpop.permute.xlu1 %2388  ;;  %10011 = vst [vmem:[#allocation66_spill] sm:$0xff] %v8661_v59  ;;  %v8665_v23 = vpop.eup %5980 }
 0x728   : > { %v2574_v45 = vsub.f32 %v10009_v37, %v2389_v21  ;;  %v2575_v39 = vsub.f32 %v10010_v9, %v2389_v21  ;;  %10014 = vst [vmem:[#allocation71_spill] sm:$0xff] %v8665_v23  ;;  %v2580_v21 = vsub.f32 %v10017_v22, %v2404_v55 }
 0x72a   : > { %v2790_v1 = vmul.f32 1.442695, %v2574_v45  ;;  %v2792_v10 = vmul.f32 1.442695, %v2575_v39  ;;  %v10018_v45 = vld [vmem:[#allocation149_spill] sm:$0xff] }
 0x72b   : > { %v2943_v9 = vmul.f32 %v10018_v45, %v2879_v62  ;;  %v10019_v39 = vld [vmem:[#allocation145_spill] sm:$0xff]  ;;  %v10025_v45 = vld [vmem:[#allocation175_spill] sm:$0xff] }
 0x72c   : > { %5982 = vpow2.f32 %v2790_v1  ;;  %v2581_v1 = vsub.f32 %v10019_v39, %v2404_v55 }
 0x72d   : > { %5984 = vpow2.f32 %v2792_v10 }
 0x739   : > { %v5983_v47 = vpop.eup %5982  ;;  %3038 = vadd.xlane.f32.xlu1 %v3037_v52  ;;  %v10020_v52 = vld [vmem:[#allocation184_spill] sm:$0xff] }
 0x73a   : > { %v5985_v44 = vpop.eup %5984  ;;  %v3811_v6 = vpack.c.bf16 %v8661_v59, %v5983_v47 }
 0x73b   : > { %2433 = vperm.xlu0 %5694, %v8202_v13   ;;  %v3812_v3 = vpack.c.bf16 %v8665_v23, %v5985_v44  ;;  %v8670_v36 = vadd.f32 %v5985_v44, %v5983_v47  ;;  %v2802_v47 = vmul.f32 1.442695, %v2580_v21  ;;  %v10024_v21 = vld [vmem:[#allocation174_spill] sm:$0xff] }
 0x73d   : > { %4039 = vmatprep.mubr.bf16.mxu1 %v3812_v3  ;;  %5986 = vpow2.f32 %v2802_v47 }
 0x73e   : > { %4040 = vmatmul.mubr.bf16.gmra.mxu1 %v3811_v6  ;;  %v2804_v6 = vmul.f32 1.442695, %v2581_v1 }
 0x740   : > { %5988 = vpow2.f32 %v2804_v6  ;;  %v2884_v6 = vld [vmem:[#allocation4 + $0x70] sm:$0xff] }
 0x744   : > { %v3036_v2 = vpop.xlane.xlu0 %3035 }
 0x745   : > { %v3202_v41 = vadd.f32 %v3036_v2, %v2946_v30  ;;  %v10022_v2 = vld [vmem:[#allocation137_spill] sm:$0xff] }
 0x747   : > { %3267 = vst.msk [vmem:[#allocation4 + $0x60] sm:$0xff] %vm3254_vm1, %v3202_v41 }
 0x74a   : > { %2418 = vperm.xlu1 %5695, %v10016_v58   ;;  %v8686_v22 = vpop.eup %5986 }
 0x74b   : > { %10023 = vst [vmem:[#allocation72_spill] sm:$0xff] %v8686_v22 }
 0x74c   : > { %v2414_v47 = vpop.permute.xlu0 %2413 }
 0x74d   : > { %v8690_v39 = vpop.eup %5988 }
 0x74e   : > { %10026 = vst [vmem:[#allocation69_spill] sm:$0xff] %v8690_v39 }
 0x757   : > { %v8676_v37 = vpop.f32.mrf.mxu1 }
 0x758   : > { %v3027_v10 = vpop.xlane.xlu1 %3026 }
 0x759   : > { %v4019_v61 = vpop.f32.mrf.mxu1  ;;  %v3199_v54 = vadd.f32 %v3027_v10, %v2943_v9  ;;  %v3043_v9 = vadd.f32 %v10025_v45, %v10024_v21  ;;  %v10030_v21 = vld [vmem:[#allocation157_spill] sm:$0xff] }
 0x75a   : > { %3053 = vadd.xlane.f32.xlu0 %v10020_v52 }
 0x75b   : > { %3264 = vst.msk [vmem:[#allocation4 + $0x48] sm:$0xff] %vm3254_vm1, %v3199_v54  ;;  %v8682_v44 = vpop.f32.mrf.mxu1 }
 0x75c   : > { %v2399_v3 = vpop.permute.xlu1 %2398 }
 0x75d   : > { %v4022_v20 = vpop.f32.mrf.mxu1  ;;  %v2578_v30 = vsub.f32 %v10021_v49, %v2399_v3  ;;  %v2579_v41 = vsub.f32 %v10022_v2, %v2399_v3  ;;  %v10027_v3 = vld [vmem:[#allocation86_spill] sm:$0xff]  ;;  %v10028_v2 = vld [vmem:[#allocation80_spill] sm:$0xff] }
 0x75e   : > { %v2948_v20 = vmul.f32 %v10027_v3, %v2884_v6 }
 0x75f   : > { %v2798_v62 = vmul.f32 1.442695, %v2578_v30  ;;  %v2800_v55 = vmul.f32 1.442695, %v2579_v41  ;;  %v2881_v41 = vld [vmem:[#allocation4 + $0x58] sm:$0xff] }
 0x760   : > { %v2945_v45 = vmul.f32 %v10030_v21, %v2881_v41 }
 0x761   : > { %5990 = vpow2.f32 %v2798_v62  ;;  %v10029_v62 = vld [vmem:[#allocation152_spill] sm:$0xff] }
 0x762   : > { %5992 = vpow2.f32 %v2800_v55  ;;  %v2584_v55 = vsub.f32 %v10029_v62, %v2414_v47 }
 0x76e   : > { %v5991_v1 = vpop.eup %5990  ;;  %3044 = vadd.xlane.f32.xlu1 %v3043_v9  ;;  %v10031_v9 = vld [vmem:[#allocation153_spill] sm:$0xff] }
 0x76f   : > { %v5993_v10 = vpop.eup %5992  ;;  %v3813_v61 = vpack.c.bf16 %v8686_v22, %v5991_v1  ;;  %v10033_v22 = vld [vmem:[#allocation147_spill] sm:$0xff] }
 0x770   : > { %2443 = vperm.xlu0 %5694, %v8267_v40   ;;  %v3814_v54 = vpack.c.bf16 %v8690_v39, %v5993_v10  ;;  %v8695_v52 = vadd.f32 %v5993_v10, %v5991_v1  ;;  %v2585_v1 = vsub.f32 %v10031_v9, %v2414_v47  ;;  %v10036_v9 = vld [vmem:[#allocation179_spill] sm:$0xff] }
 0x772   : > { %4047 = vmatprep.mubr.bf16.mxu1 %v3814_v54  ;;  %v2812_v3 = vmul.f32 1.442695, %v2585_v1 }
 0x773   : > { %4048 = vmatmul.mubr.bf16.gmra.mxu1 %v3813_v61  ;;  %v2810_v61 = vmul.f32 1.442695, %v2584_v55 }
 0x775   : > { %5994 = vpow2.f32 %v2810_v61 }
 0x776   : > { %5996 = vpow2.f32 %v2812_v3 }
 0x779   : > { %v3042_v49 = vpop.xlane.xlu0 %3041 }
 0x77a   : > { %v3204_v30 = vadd.f32 %v3042_v49, %v2948_v20 }
 0x77c   : > { %3269 = vst.msk [vmem:[#allocation4 + $0x70] sm:$0xff] %vm3254_vm1, %v3204_v30  ;;  %v10032_v30 = vld [vmem:[#allocation146_spill] sm:$0xff] }
 0x77f   : > { %2428 = vperm.xlu1 %5695, %v10028_v2  }
 0x781   : > { %v2424_v3 = vpop.permute.xlu0 %2423 }
 0x782   : > { %v8711_v55 = vpop.eup %5994 }
 0x783   : > { %10034 = vst [vmem:[#allocation70_spill] sm:$0xff] %v8711_v55 }
 0x78d   : > { %v3033_v10 = vpop.xlane.xlu1 %3032 }
 0x78e   : > { %v3201_v54 = vadd.f32 %v3033_v10, %v2945_v45  ;;  %v10035_v45 = vld [vmem:[#allocation178_spill] sm:$0xff]  ;;  %v8715_v10 = vpop.eup %5996 }
 0x78f   : > { %3059 = vadd.xlane.f32.xlu0 %v8291_v11  ;;  %v3049_v1 = vadd.f32 %v10036_v9, %v10035_v45  ;;  %10037 = vst [vmem:[#allocation76_spill] sm:$0xff] %v8715_v10  ;;  %v2883_v45 = vld [vmem:[#allocation4 + $0x68] sm:$0xff]  ;;  %v10040_v9 = vld [vmem:[#allocation159_spill] sm:$0xff] }
 0x790   : > { %3266 = vst.msk [vmem:[#allocation4 + $0x58] sm:$0xff] %vm3254_vm1, %v3201_v54  ;;  %v8705_v6 = vpop.f32.mrf.mxu1 }
 0x791   : > { %v2409_v20 = vpop.permute.xlu1 %2408 }
 0x792   : > { %v4027_v49 = vpop.f32.mrf.mxu1  ;;  %v2582_v39 = vsub.f32 %v10032_v30, %v2409_v20  ;;  %v2583_v62 = vsub.f32 %v10033_v22, %v2409_v20  ;;  %v2886_v20 = vld [vmem:[#allocation4 + $0x80] sm:$0xff]  ;;  %v10038_v30 = vld [vmem:[#allocation92_spill] sm:$0xff] }
 0x794   : > { %v2806_v41 = vmul.f32 1.442695, %v2582_v39  ;;  %v2808_v21 = vmul.f32 1.442695, %v2583_v62  ;;  %v8709_v47 = vpop.f32.mrf.mxu1  ;;  %v2950_v62 = vmul.f32 %v10038_v30, %v2886_v20 }
 0x796   : > { %5998 = vpow2.f32 %v2806_v41  ;;  %v4030_v11 = vpop.f32.mrf.mxu1 }
 0x797   : > { %6000 = vpow2.f32 %v2808_v21  ;;  %v10039_v11 = vld [vmem:[#allocation82_spill] sm:$0xff] }
 0x7a3   : > { %v5999_v54 = vpop.eup %5998  ;;  %3050 = vadd.xlane.f32.xlu1 %v3049_v1  ;;  %v2588_v1 = vsub.f32 %v10040_v9, %v2424_v3 }
 0x7a4   : > { %v6001_v49 = vpop.eup %6000  ;;  %v3815_v22 = vpack.c.bf16 %v8711_v55, %v5999_v54  ;;  %v10041_v55 = vld [vmem:[#allocation165_spill] sm:$0xff] }
 0x7a5   : > { %2453 = vperm.xlu0 %5694, %v8319_v34   ;;  %v3816_v39 = vpack.c.bf16 %v8715_v10, %v6001_v49  ;;  %v8720_v61 = vadd.f32 %v6001_v49, %v5999_v54  ;;  %v2947_v23 = vmul.f32 %v10041_v55, %v2883_v45  ;;  %v10042_v10 = vld [vmem:[#allocation160_spill] sm:$0xff]  ;;  %v10047_v45 = vld [vmem:[#allocation183_spill] sm:$0xff] }
 0x7a6   : > { %v2589_v54 = vsub.f32 %v10042_v10, %v2424_v3  ;;  %v10046_v3 = vld [vmem:[#allocation182_spill] sm:$0xff] }
 0x7a7   : > { %4055 = vmatprep.mubr.bf16.mxu1 %v3816_v39 }
 0x7a8   : > { %4056 = vmatmul.mubr.bf16.gmra.mxu1 %v3815_v22  ;;  %v2818_v22 = vmul.f32 1.442695, %v2588_v1  ;;  %v2820_v20 = vmul.f32 1.442695, %v2589_v54  ;;  %v3055_v1 = vadd.f32 %v10047_v45, %v10046_v3  ;;  %v10051_v3 = vld [vmem:[#allocation23_spill] sm:$0xff] }
 0x7aa   : > { %6002 = vpow2.f32 %v2818_v22 }
 0x7ab   : > { %6004 = vpow2.f32 %v2820_v20 }
 0x7ae   : > { %v3048_v41 = vpop.xlane.xlu0 %3047 }
 0x7af   : > { %v3206_v21 = vadd.f32 %v3048_v41, %v2950_v62  ;;  %v10043_v62 = vld [vmem:[#allocation154_spill] sm:$0xff] }
 0x7b1   : > { %3271 = vst.msk [vmem:[#allocation4 + $0x80] sm:$0xff] %vm3254_vm1, %v3206_v21  ;;  %v10044_v21 = vld [vmem:[#allocation155_spill] sm:$0xff] }
 0x7b4   : > { %2438 = vperm.xlu1 %5695, %v10039_v11  }
 0x7b6   : > { %v2434_v20 = vpop.permute.xlu0 %2433 }
 0x7b7   : > { %v8736_v10 = vpop.eup %6002  ;;  %v2592_v45 = vsub.f32 %v10051_v3, %v2434_v20 }
 0x7b8   : > { %10045 = vst [vmem:[#allocation75_spill] sm:$0xff] %v8736_v10  ;;  %v8740_v54 = vpop.eup %6004 }
 0x7b9   : > { %10048 = vst [vmem:[#allocation73_spill] sm:$0xff] %v8740_v54 }
 0x7c2   : > { %v3039_v49 = vpop.xlane.xlu1 %3038 }
 0x7c3   : > { %v3203_v39 = vadd.f32 %v3039_v49, %v2947_v23 }
 0x7c4   : > { %3065 = vadd.xlane.f32.xlu0 %v8335_v5 }
 0x7c5   : > { %3268 = vst.msk [vmem:[#allocation4 + $0x68] sm:$0xff] %vm3254_vm1, %v3203_v39 }
 0x7c6   : > { %v2419_v30 = vpop.permute.xlu1 %2418 }
 0x7c7   : > { %v2586_v41 = vsub.f32 %v10043_v62, %v2419_v30  ;;  %v2587_v59 = vsub.f32 %v10044_v21, %v2419_v30  ;;  %v2888_v30 = vld [vmem:[#allocation4 + $0x90] sm:$0xff]  ;;  %v10049_v62 = vld [vmem:[#allocation98_spill] sm:$0xff] }
 0x7c9   : > { %v2814_v46 = vmul.f32 1.442695, %v2586_v41  ;;  %v2816_v9 = vmul.f32 1.442695, %v2587_v59  ;;  %v8732_v31 = vpop.f32.mrf.mxu1  ;;  %v2952_v41 = vmul.f32 %v10049_v62, %v2888_v30 }
 0x7cb   : > { %6006 = vpow2.f32 %v2814_v46  ;;  %v4035_v55 = vpop.f32.mrf.mxu1 }
 0x7cc   : > { %6008 = vpow2.f32 %v2816_v9  ;;  %v10050_v55 = vld [vmem:[#allocation85_spill] sm:$0xff] }
 0x7cd   : > { %v8734_v23 = vpop.f32.mrf.mxu1 }
 0x7cf   : > { %v4038_v5 = vpop.f32.mrf.mxu1 }
 0x7d0   : > { %v2885_v5 = vld [vmem:[#allocation4 + $0x78] sm:$0xff] }
 0x7d8   : > { %v6007_v49 = vpop.eup %6006  ;;  %3056 = vadd.xlane.f32.xlu1 %v3055_v1  ;;  %v10052_v1 = vld [vmem:[#allocation89_spill] sm:$0xff] }
 0x7d9   : > { %v6009_v39 = vpop.eup %6008  ;;  %v3817_v59 = vpack.c.bf16 %v8736_v10, %v6007_v49  ;;  %v2949_v10 = vmul.f32 %v10052_v1, %v2885_v5  ;;  %v3061_v5 = vadd.f32 %v8286_v12, %v8284_v16 }
 0x7da   : > { %2463 = vperm.xlu0 %5694, %v8373_v29   ;;  %v3818_v46 = vpack.c.bf16 %v8740_v54, %v6009_v39  ;;  %v8745_v22 = vadd.f32 %v6009_v39, %v6007_v49  ;;  %v10053_v54 = vld [vmem:[#allocation24_spill] sm:$0xff] }
 0x7db   : > { %v2593_v49 = vsub.f32 %v10053_v54, %v2434_v20 }
 0x7dc   : > { %4063 = vmatprep.mubr.bf16.mxu1 %v3818_v46 }
 0x7dd   : > { %4064 = vmatmul.mubr.bf16.gmra.mxu1 %v3817_v59  ;;  %v2826_v59 = vmul.f32 1.442695, %v2592_v45  ;;  %v2828_v30 = vmul.f32 1.442695, %v2593_v49 }
 0x7df   : > { %6010 = vpow2.f32 %v2826_v59  ;;  %v2890_v59 = vld [vmem:[#allocation4 + $0xa0] sm:$0xff] }
 0x7e0   : > { %6012 = vpow2.f32 %v2828_v30  ;;  %v10058_v30 = vld [vmem:[#allocation103_spill] sm:$0xff] }
 0x7e3   : > { %v3054_v21 = vpop.xlane.xlu0 %3053 }
 0x7e4   : > { %v3208_v9 = vadd.f32 %v3054_v21, %v2952_v41  ;;  %v10054_v41 = vld [vmem:[#allocation161_spill] sm:$0xff] }
 0x7e6   : > { %3273 = vst.msk [vmem:[#allocation4 + $0x90] sm:$0xff] %vm3254_vm1, %v3208_v9  ;;  %v10055_v9 = vld [vmem:[#allocation162_spill] sm:$0xff] }
 0x7e9   : > { %2448 = vperm.xlu1 %5695, %v10050_v55  }
 0x7ec   : > { %v8761_v20 = vpop.eup %6010 }
 0x7ed   : > { %10056 = vst [vmem:[#allocation74_spill] sm:$0xff] %v8761_v20  ;;  %v8765_v45 = vpop.eup %6012 }
 0x7ee   : > { %10057 = vst [vmem:[#allocation88_spill] sm:$0xff] %v8765_v45 }
 0x7f7   : > { %v3045_v39 = vpop.xlane.xlu1 %3044 }
 0x7f8   : > { %v3205_v46 = vadd.f32 %v3045_v39, %v2949_v10 }
 0x7f9   : > { %3071 = vadd.xlane.f32.xlu0 %v8403_v7 }
 0x7fa   : > { %3270 = vst.msk [vmem:[#allocation4 + $0x78] sm:$0xff] %vm3254_vm1, %v3205_v46  ;;  %v2444_v46 = vpop.permute.xlu0 %2443 }
 0x7fb   : > { %v2429_v62 = vpop.permute.xlu1 %2428 }
 0x7fc   : > { %v2590_v21 = vsub.f32 %v10054_v41, %v2429_v62  ;;  %v2591_v53 = vsub.f32 %v10055_v9, %v2429_v62  ;;  %v2954_v62 = vmul.f32 %v10058_v30, %v2890_v59  ;;  %v10059_v41 = vld [vmem:[#allocation90_spill] sm:$0xff]  ;;  %v10060_v9 = vld [vmem:[#allocation27_spill] sm:$0xff] }
 0x7fe   : > { %v2822_v38 = vmul.f32 1.442695, %v2590_v21  ;;  %v2824_v3 = vmul.f32 1.442695, %v2591_v53  ;;  %v8757_v35 = vpop.f32.mrf.mxu1  ;;  %v2887_v21 = vld [vmem:[#allocation4 + $0x88] sm:$0xff] }
 0x800   : > { %6014 = vpow2.f32 %v2822_v38  ;;  %v4043_v54 = vpop.f32.mrf.mxu1 }
 0x801   : > { %6016 = vpow2.f32 %v2824_v3  ;;  %v2596_v3 = vsub.f32 %v10060_v9, %v2444_v46  ;;  %v10061_v54 = vld [vmem:[#allocation95_spill] sm:$0xff] }
 0x802   : > { %v8759_v10 = vpop.f32.mrf.mxu1 }
 0x804   : > { %v4046_v7 = vpop.f32.mrf.mxu1 }
 0x805   : > { %v2951_v7 = vmul.f32 %v10061_v54, %v2887_v21 }
 0x80d   : > { %v6015_v1 = vpop.eup %6014  ;;  %3062 = vadd.xlane.f32.xlu1 %v3061_v5  ;;  %v10062_v5 = vld [vmem:[#allocation28_spill] sm:$0xff] }
 0x80e   : > { %v6017_v49 = vpop.eup %6016  ;;  %v3819_v53 = vpack.c.bf16 %v8761_v20, %v6015_v1  ;;  %v10065_v20 = vld [vmem:[#allocation133_spill] sm:$0xff] }
 0x80f   : > { %2473 = vperm.xlu0 %5694, %v8425_v33   ;;  %v3820_v38 = vpack.c.bf16 %v8765_v45, %v6017_v49  ;;  %v8770_v39 = vadd.f32 %v6017_v49, %v6015_v1  ;;  %v2597_v1 = vsub.f32 %v10062_v5, %v2444_v46  ;;  %v2011_v9 = vsub.f32 %v10066_v14, %v10065_v20  ;;  %v10068_v5 = vld [vmem:[#allocation141_spill] sm:$0xff]  ;;  %v10070_v14 = vld [vmem:[#allocation150_spill] sm:$0xff] }
 0x811   : > { %4071 = vmatprep.mubr.bf16.mxu1 %v3820_v38  ;;  %v2836_v59 = vmul.f32 1.442695, %v2597_v1 }
 0x812   : > { %4072 = vmatmul.mubr.bf16.gmra.mxu1 %v3819_v53  ;;  %v2834_v53 = vmul.f32 1.442695, %v2596_v3  ;;  %v2112_v3 = vmul.f32 1.442695, %v2011_v9  ;;  %v10073_v9 = vld [vmem:[#allocation47_spill] sm:$0xff] }
 0x814   : > { %6018 = vpow2.f32 %v2834_v53  ;;  %v10071_v53 = vld [vmem:[#allocation158_spill] sm:$0xff] }
 0x815   : > { %6020 = vpow2.f32 %v2836_v59  ;;  %v2017_v59 = vsub.f32 %v10071_v53, %v7936_v26  ;;  %v2892_v53 = vld [vmem:[#allocation4 + $0xb0] sm:$0xff] }
 0x818   : > { %v3060_v16 = vpop.xlane.xlu0 %3059 }
 0x819   : > { %v3210_v12 = vadd.f32 %v3060_v16, %v2954_v62  ;;  %v10063_v62 = vld [vmem:[#allocation21_spill] sm:$0xff] }
 0x81b   : > { %3275 = vst.msk [vmem:[#allocation4 + $0xa0] sm:$0xff] %vm3254_vm1, %v3210_v12  ;;  %v10064_v12 = vld [vmem:[#allocation22_spill] sm:$0xff] }
 0x81e   : > { %2458 = vperm.xlu1 %5695, %v10059_v41  }
 0x82c   : > { %v3051_v49 = vpop.xlane.xlu1 %3050 }
 0x82d   : > { %v3207_v38 = vadd.f32 %v3051_v49, %v2951_v7  ;;  %v10067_v7 = vld [vmem:[#allocation143_spill] sm:$0xff] }
 0x82e   : > { %3077 = vadd.xlane.f32.xlu0 %v8453_v60  ;;  %v2013_v1 = vsub.f32 %v10068_v5, %v10067_v7  ;;  %v2124_v7 = vmul.f32 1.442695, %v2017_v59 }
 0x82f   : > { %3272 = vst.msk [vmem:[#allocation4 + $0x88] sm:$0xff] %vm3254_vm1, %v3207_v38 }
 0x830   : > { %v2439_v30 = vpop.permute.xlu1 %2438 }
 0x831   : > { %v2594_v16 = vsub.f32 %v10063_v62, %v2439_v30  ;;  %v2595_v45 = vsub.f32 %v10064_v12, %v2439_v30  ;;  %v2116_v30 = vmul.f32 1.442695, %v2013_v1  ;;  %v10069_v62 = vld [vmem:[#allocation151_spill] sm:$0xff]  ;;  %v10072_v12 = vld [vmem:[#allocation118_spill] sm:$0xff] }
 0x832   : > { %v2015_v20 = vsub.f32 %v10070_v14, %v10069_v62  ;;  %v10075_v14 = vld [vmem:[#allocation170_spill] sm:$0xff] }
 0x833   : > { %v2830_v21 = vmul.f32 1.442695, %v2594_v16  ;;  %v2832_v54 = vmul.f32 1.442695, %v2595_v45  ;;  %v8784_v46 = vpop.f32.mrf.mxu1  ;;  %v8794_v16 = vpop.eup %6018 }
 0x834   : > { %v2120_v45 = vmul.f32 1.442695, %v2015_v20  ;;  %v2021_v20 = vsub.f32 %v10075_v14, %v8043_v48 }
 0x835   : > { %6022 = vpow2.f32 %v2830_v21  ;;  %v4051_v60 = vpop.f32.mrf.mxu1  ;;  %v3067_v21 = vadd.f32 %v10073_v9, %v10072_v12  ;;  %v10077_v12 = vld [vmem:[#allocation173_spill] sm:$0xff] }
 0x836   : > { %6024 = vpow2.f32 %v2832_v54  ;;  %v8798_v60 = vpop.eup %6020  ;;  %v2132_v59 = vmul.f32 1.442695, %v2021_v20  ;;  %v2023_v9 = vsub.f32 %v10077_v12, %v8096_v24 }
 0x837   : > { %v8788_v49 = vpop.f32.mrf.mxu1  ;;  %6026 = vpow2.f32 %v2112_v3  ;;  %v10074_v3 = vld [vmem:[#allocation167_spill] sm:$0xff] }
 0x838   : > { %6028 = vpow2.f32 %v2116_v30  ;;  %v2019_v5 = vsub.f32 %v10074_v3, %v7990_v19  ;;  %v2454_v19 = vpop.permute.xlu0 %2453  ;;  %v2136_v3 = vmul.f32 1.442695, %v2023_v9 }
 0x839   : > { %v4054_v38 = vpop.f32.mrf.mxu1  ;;  %6030 = vpow2.f32 %v2120_v45 }
 0x83a   : > { %6032 = vpow2.f32 %v2124_v7  ;;  %v2128_v62 = vmul.f32 1.442695, %v2019_v5  ;;  %v10080_v5 = vld [vmem:[#allocation176_spill] sm:$0xff] }
 0x83c   : > { %6034 = vpow2.f32 %v2128_v62  ;;  %v10082_v62 = vld [vmem:[#allocation181_spill] sm:$0xff] }
 0x83d   : > { %6036 = vpow2.f32 %v2132_v59  ;;  %v2027_v14 = vsub.f32 %v10082_v62, %v8202_v13  ;;  %v10085_v59 = vld [vmem:[#allocation115_spill] sm:$0xff] }
 0x83e   : > { %6038 = vpow2.f32 %v2136_v3  ;;  %v2029_v12 = vsub.f32 %v10085_v59, %v8267_v40  ;;  %v2889_v3 = vld [vmem:[#allocation4 + $0x98] sm:$0xff] }
 0x83f   : > { %v10093_v59 = vld [vmem:[#allocation32_spill] sm:$0xff] }
 0x842   : > { %v6023_v54 = vpop.eup %6022  ;;  %3068 = vadd.xlane.f32.xlu1 %v3067_v21 }
 0x843   : > { %v6025_v1 = vpop.eup %6024  ;;  %v3821_v38 = vpack.c.bf16 %v8794_v16, %v6023_v54 }
 0x844   : > { %2483 = vperm.xlu0 %5694, %v8471_v50   ;;  %v3822_v26 = vpack.c.bf16 %v8798_v60, %v6025_v1  ;;  %v8805_v30 = vadd.f32 %v6025_v1, %v6023_v54  ;;  %v8809_v45 = vpop.eup %6026  ;;  %v10079_v54 = vld [vmem:[#allocation125_spill] sm:$0xff]  ;;  %v2025_v1 = vsub.f32 %v10080_v5, %v10002_v15  ;;  %v2144_v15 = vmul.f32 1.442695, %v2027_v14 }
 0x845   : > { %10076 = vst [vmem:[#allocation91_spill] sm:$0xff] %v8809_v45  ;;  %v8814_v21 = vpop.eup %6028  ;;  %v2956_v7 = vmul.f32 %v10079_v54, %v2892_v53  ;;  %v10084_v53 = vld [vmem:[#allocation119_spill] sm:$0xff]  ;;  %v2148_v54 = vmul.f32 1.442695, %v2029_v12  ;;  %v10092_v14 = vld [vmem:[#allocation101_spill] sm:$0xff] }
 0x846   : > { %4079 = vmatprep.mubr.bf16.mxu1 %v3822_v26  ;;  %10078 = vst [vmem:[#allocation94_spill] sm:$0xff] %v8814_v21  ;;  %v8820_v26 = vpop.eup %6030  ;;  %v2140_v24 = vmul.f32 1.442695, %v2025_v1  ;;  %v10089_v1 = vld [vmem:[#allocation112_spill] sm:$0xff] }
 0x847   : > { %4080 = vmatmul.mubr.bf16.gmra.mxu1 %v3821_v38  ;;  %10081 = vst [vmem:[#allocation77_spill] sm:$0xff] %v8820_v26  ;;  %v8826_v20 = vpop.eup %6032 }
 0x848   : > { %3570 = vperm.xlu0 %5694, %v8809_v45   ;;  %10083 = vst [vmem:[#allocation79_spill] sm:$0xff] %v8826_v20  ;;  %6040 = vpow2.f32 %v2140_v24  ;;  %v10091_v24 = vld [vmem:[#allocation31_spill] sm:$0xff]  ;;  %v10133_v45 = vld [vmem:[#allocation45_spill] sm:$0xff] }
 0x849   : > { %v8832_v9 = vpop.eup %6034  ;;  %6042 = vpow2.f32 %v2144_v15  ;;  %v2600_v62 = vsub.f32 %v10091_v24, %v2454_v19  ;;  %v2953_v15 = vmul.f32 %v10092_v14, %v2889_v3 }
 0x84a   : > { %10086 = vst [vmem:[#allocation120_spill] sm:$0xff] %v8832_v9  ;;  %6044 = vpow2.f32 %v2148_v54 }
 0x84b   : > { %v2842_v54 = vmul.f32 1.442695, %v2600_v62 }
 0x84c   : > { %3580 = vperm.xlu0 %5694, %v8814_v21  }
 0x84d   : > { %v3066_v48 = vpop.xlane.xlu0 %3065 }
 0x84e   : > { %v3212_v38 = vadd.f32 %v3066_v48, %v2956_v7  ;;  %v10087_v7 = vld [vmem:[#allocation96_spill] sm:$0xff]  ;;  %v8837_v48 = vpop.eup %6036 }
 0x84f   : > { %v2031_v13 = vsub.f32 %v10087_v7, %v8319_v34  ;;  %10088 = vst [vmem:[#allocation105_spill] sm:$0xff] %v8837_v48  ;;  %v8842_v40 = vpop.eup %6038  ;;  %v2601_v34 = vsub.f32 %v10093_v59, %v2454_v19 }
 0x850   : > { %3277 = vst.msk [vmem:[#allocation4 + $0xb0] sm:$0xff] %vm3254_vm1, %v3212_v38  ;;  %3590 = vperm.xlu0 %5694, %v8820_v26   ;;  %v2033_v38 = vsub.f32 %v10089_v1, %v8373_v29  ;;  %10090 = vst [vmem:[#allocation97_spill] sm:$0xff] %v8842_v40  ;;  %v10095_v1 = vld [vmem:[#allocation25_spill] sm:$0xff] }
 0x851   : > { %v2152_v5 = vmul.f32 1.442695, %v2031_v13  ;;  %v2844_v29 = vmul.f32 1.442695, %v2601_v34 }
 0x852   : > { %v2156_v7 = vmul.f32 1.442695, %v2033_v38 }
 0x853   : > { %2468 = vperm.xlu1 %5695, %v10084_v53   ;;  %6046 = vpow2.f32 %v2152_v5 }
 0x854   : > { %3600 = vperm.xlu0 %5694, %v8826_v20   ;;  %6048 = vpow2.f32 %v2156_v7  ;;  %v10101_v7 = vld [vmem:[#allocation51_spill] sm:$0xff] }
 0x855   : > { %6050 = vpow2.f32 %v2842_v54  ;;  %v10102_v54 = vld [vmem:[#allocation52_spill] sm:$0xff] }
 0x856   : > { %6052 = vpow2.f32 %v2844_v29  ;;  %v3073_v29 = vadd.f32 %v10102_v54, %v10101_v7  ;;  %v10106_v54 = vld [vmem:[#allocation142_spill] sm:$0xff] }
 0x858   : > { %3610 = vperm.xlu0 %5694, %v8832_v9   ;;  %v8848_v9 = vpop.eup %6040 }
 0x859   : > { %10094 = vst [vmem:[#allocation100_spill] sm:$0xff] %v8848_v9  ;;  %v8854_v14 = vpop.eup %6042 }
 0x85a   : > { %10097 = vst [vmem:[#allocation126_spill] sm:$0xff] %v8854_v14  ;;  %v8859_v62 = vpop.eup %6044 }
 0x85b   : > { %10098 = vst [vmem:[#allocation130_spill] sm:$0xff] %v8859_v62 }
 0x85c   : > { %3620 = vperm.xlu0 %5694, %v8837_v48  }
 0x860   : > { %3630 = vperm.xlu0 %5694, %v8842_v40   ;;  %v10096_v40 = vld [vmem:[#allocation26_spill] sm:$0xff]  ;;  %v8864_v59 = vpop.eup %6046 }
 0x861   : > { %v3057_v12 = vpop.xlane.xlu1 %3056  ;;  %10099 = vst [vmem:[#allocation127_spill] sm:$0xff] %v8864_v59  ;;  %v8867_v34 = vpop.eup %6048 }
 0x862   : > { %v3209_v48 = vadd.f32 %v3057_v12, %v2953_v15  ;;  %10100 = vst [vmem:[#allocation108_spill] sm:$0xff] %v8867_v34  ;;  %v8870_v12 = vpop.eup %6050 }
 0x864   : > { %3274 = vst.msk [vmem:[#allocation4 + $0x98] sm:$0xff] %vm3254_vm1, %v3209_v48  ;;  %3640 = vperm.xlu0 %5694, %v8848_v9   ;;  %v10107_v9 = vld [vmem:[#allocation107_spill] sm:$0xff] }
 0x865   : > { %v2449_v13 = vpop.permute.xlu1 %2448 }
 0x866   : > { %v2598_v24 = vsub.f32 %v10095_v1, %v2449_v13  ;;  %v2599_v3 = vsub.f32 %v10096_v40, %v2449_v13  ;;  %v8874_v13 = vpop.eup %6052  ;;  %v10103_v1 = vld [vmem:[#allocation132_spill] sm:$0xff] }
 0x868   : > { %v2838_v19 = vmul.f32 1.442695, %v2598_v24  ;;  %v2840_v5 = vmul.f32 1.442695, %v2599_v3  ;;  %v8856_v38 = vpop.f32.mrf.mxu1  ;;  %3650 = vperm.xlu0 %5694, %v8854_v14   ;;  %v2012_v24 = vsub.f32 %v10103_v1, %v7773_v32  ;;  %v2016_v32 = vsub.f32 %v10106_v54, %v7826_v42  ;;  %v2464_v1 = vpop.permute.xlu0 %2463 }
 0x86a   : > { %6054 = vpow2.f32 %v2838_v19  ;;  %v4059_v48 = vpop.f32.mrf.mxu1  ;;  %v2122_v26 = vmul.f32 1.442695, %v2016_v32  ;;  %v2891_v32 = vld [vmem:[#allocation4 + $0xa8] sm:$0xff] }
 0x86b   : > { %6056 = vpow2.f32 %v2840_v5 }
 0x86c   : > { %v8861_v15 = vpop.f32.mrf.mxu1  ;;  %3660 = vperm.xlu0 %5694, %v8859_v62   ;;  %v10105_v62 = vld [vmem:[#allocation138_spill] sm:$0xff] }
 0x86e   : > { %v4062_v40 = vpop.f32.mrf.mxu1 }
 0x870   : > { %3670 = vperm.xlu0 %5694, %v8864_v59   ;;  %v10104_v59 = vld [vmem:[#allocation139_spill] sm:$0xff] }
 0x871   : > { %v2014_v14 = vsub.f32 %v10105_v62, %v10104_v59 }
 0x873   : > { %v2118_v7 = vmul.f32 1.442695, %v2014_v14  ;;  %v10109_v14 = vld [vmem:[#allocation156_spill] sm:$0xff] }
 0x874   : > { %3680 = vperm.xlu0 %5694, %v8867_v34   ;;  %v2114_v34 = vmul.f32 1.442695, %v2012_v24  ;;  %v2020_v59 = vsub.f32 %v10109_v14, %v7919_v4 }
 0x876   : > { %6058 = vpow2.f32 %v2114_v34  ;;  %v10110_v34 = vld [vmem:[#allocation102_spill] sm:$0xff]  ;;  %v2130_v42 = vmul.f32 1.442695, %v2020_v59 }
 0x877   : > { %v6055_v3 = vpop.eup %6054  ;;  %3074 = vadd.xlane.f32.xlu1 %v3073_v29  ;;  %v2894_v29 = vld [vmem:[#allocation4 + $0xc0] sm:$0xff]  ;;  %6060 = vpow2.f32 %v2118_v7  ;;  %v10113_v7 = vld [vmem:[#allocation84_spill] sm:$0xff]  ;;  %v10118_v59 = vld [vmem:[#allocation106_spill] sm:$0xff] }
 0x878   : > { %v6057_v19 = vpop.eup %6056  ;;  %v3823_v5 = vpack.c.bf16 %v8870_v12, %v6055_v3  ;;  %v2958_v20 = vmul.f32 %v10107_v9, %v2894_v29  ;;  %6062 = vpow2.f32 %v2122_v26  ;;  %v10111_v9 = vld [vmem:[#allocation163_spill] sm:$0xff]  ;;  %v2026_v54 = vsub.f32 %v10113_v7, %v10028_v2  ;;  %v10114_v29 = vld [vmem:[#allocation49_spill] sm:$0xff] }
 0x879   : > { %v3824_v48 = vpack.c.bf16 %v8874_v13, %v6057_v19  ;;  %v8880_v40 = vadd.f32 %v6057_v19, %v6055_v3  ;;  %v10108_v3 = vld [vmem:[#allocation148_spill] sm:$0xff]  ;;  %v10119_v2 = vld [vmem:[#allocation33_spill] sm:$0xff] }
 0x87a   : > { %v2018_v19 = vsub.f32 %v10108_v3, %v7866_v17  ;;  %v2035_v3 = vsub.f32 %v10114_v29, %v8425_v33 }
 0x87b   : > { %4087 = vmatprep.mubr.bf16.mxu1 %v3824_v48 }
 0x87c   : > { %4088 = vmatmul.mubr.bf16.gmra.mxu1 %v3823_v5  ;;  %v2126_v62 = vmul.f32 1.442695, %v2018_v19  ;;  %v2022_v5 = vsub.f32 %v10111_v9, %v10004_v25  ;;  %v10115_v19 = vld [vmem:[#allocation54_spill] sm:$0xff]  ;;  %v2142_v9 = vmul.f32 1.442695, %v2026_v54 }
 0x87e   : > { %6064 = vpow2.f32 %v2126_v62  ;;  %v2134_v17 = vmul.f32 1.442695, %v2022_v5  ;;  %v10117_v62 = vld [vmem:[#allocation36_spill] sm:$0xff]  ;;  %v2605_v5 = vsub.f32 %v10119_v2, %v2464_v1 }
 0x87f   : > { %6066 = vpow2.f32 %v2130_v42  ;;  %v2604_v14 = vsub.f32 %v10117_v62, %v2464_v1  ;;  %v2955_v42 = vmul.f32 %v10118_v59, %v2891_v32  ;;  %v10121_v1 = vld [vmem:[#allocation29_spill] sm:$0xff]  ;;  %v10122_v62 = vld [vmem:[#allocation30_spill] sm:$0xff] }
 0x880   : > { %6068 = vpow2.f32 %v2134_v17  ;;  %v2852_v32 = vmul.f32 1.442695, %v2605_v5 }
 0x881   : > { %v2850_v29 = vmul.f32 1.442695, %v2604_v14 }
 0x882   : > { %v3072_v24 = vpop.xlane.xlu0 %3071 }
 0x883   : > { %v3214_v21 = vadd.f32 %v3072_v24, %v2958_v20  ;;  %v8895_v48 = vpop.eup %6058  ;;  %v10116_v24 = vld [vmem:[#allocation87_spill] sm:$0xff] }
 0x884   : > { %v8900_v20 = vpop.eup %6060 }
 0x885   : > { %3279 = vst.msk [vmem:[#allocation4 + $0xc0] sm:$0xff] %vm3254_vm1, %v3214_v21  ;;  %v10112_v21 = vld [vmem:[#allocation81_spill] sm:$0xff]  ;;  %v8905_v25 = vpop.eup %6062 }
 0x886   : > { %v2024_v26 = vsub.f32 %v10112_v21, %v10016_v58  ;;  %v2028_v58 = vsub.f32 %v10116_v24, %v10039_v11  ;;  %v10120_v11 = vld [vmem:[#allocation93_spill] sm:$0xff] }
 0x888   : > { %2478 = vperm.xlu1 %5695, %v10110_v34   ;;  %v2138_v4 = vmul.f32 1.442695, %v2024_v26  ;;  %v2160_v26 = vmul.f32 1.442695, %v2035_v3  ;;  %v2146_v7 = vmul.f32 1.442695, %v2028_v58 }
 0x88a   : > { %6070 = vpow2.f32 %v2138_v4 }
 0x88b   : > { %v8916_v21 = vpop.eup %6064  ;;  %6072 = vpow2.f32 %v2142_v9 }
 0x88c   : > { %3575 = vperm.xlu1 %5695, %v8895_v48   ;;  %v8922_v54 = vpop.eup %6066  ;;  %6074 = vpow2.f32 %v2160_v26 }
 0x88d   : > { %6076 = vpow2.f32 %v2146_v7  ;;  %v8931_v2 = vpop.eup %6068 }
 0x88e   : > { %6078 = vpow2.f32 %v2850_v29  ;;  %10124 = vst [vmem:[#allocation110_spill] sm:$0xff] %v8931_v2 }
 0x88f   : > { %6080 = vpow2.f32 %v2852_v32 }
 0x890   : > { %3585 = vperm.xlu1 %5695, %v8900_v20  }
 0x893   : > { %3083 = vadd.xlane.f32.xlu0 %v10115_v19  ;;  %v2030_v19 = vsub.f32 %v10120_v11, %v10050_v55  ;;  %v10123_v55 = vld [vmem:[#allocation99_spill] sm:$0xff] }
 0x894   : > { %3595 = vperm.xlu1 %5695, %v8905_v25   ;;  %v2032_v9 = vsub.f32 %v10123_v55, %v10059_v41  ;;  %v2896_v55 = vld [vmem:[#allocation4 + $0xd0] sm:$0xff] }
 0x896   : > { %v3063_v17 = vpop.xlane.xlu1 %3062  ;;  %v2154_v26 = vmul.f32 1.442695, %v2032_v9  ;;  %v10131_v9 = vld [vmem:[#allocation111_spill] sm:$0xff] }
 0x897   : > { %v3211_v33 = vadd.f32 %v3063_v17, %v2955_v42  ;;  %v2150_v42 = vmul.f32 1.442695, %v2030_v19 }
 0x898   : > { %3605 = vperm.xlu1 %5695, %v8916_v21  }
 0x899   : > { %3276 = vst.msk [vmem:[#allocation4 + $0xa8] sm:$0xff] %vm3254_vm1, %v3211_v33  ;;  %v8936_v33 = vpop.eup %6070 }
 0x89a   : > { %v2459_v4 = vpop.permute.xlu1 %2458  ;;  %10125 = vst [vmem:[#allocation168_spill] sm:$0xff] %v8936_v33  ;;  %v8939_v29 = vpop.eup %6072 }
 0x89b   : > { %v2602_v24 = vsub.f32 %v10121_v1, %v2459_v4  ;;  %v2603_v3 = vsub.f32 %v10122_v62, %v2459_v4  ;;  %10126 = vst [vmem:[#allocation169_spill] sm:$0xff] %v8939_v29  ;;  %v8941_v41 = vpop.eup %6074 }
 0x89c   : > { %3615 = vperm.xlu1 %5695, %v8922_v54   ;;  %10127 = vst [vmem:[#allocation35_spill] sm:$0xff] %v8941_v41  ;;  %v8944_v11 = vpop.eup %6076 }
 0x89d   : > { %v2846_v58 = vmul.f32 1.442695, %v2602_v24  ;;  %v2848_v14 = vmul.f32 1.442695, %v2603_v3  ;;  %v8927_v59 = vpop.f32.mrf.mxu1  ;;  %10128 = vst [vmem:[#allocation166_spill] sm:$0xff] %v8944_v11  ;;  %v8947_v19 = vpop.eup %6078 }
 0x89e   : > { %v8949_v32 = vpop.eup %6080 }
 0x89f   : > { %6082 = vpow2.f32 %v2846_v58  ;;  %v4067_v5 = vpop.f32.mrf.mxu1 }
 0x8a0   : > { %6084 = vpow2.f32 %v2848_v14  ;;  %3625 = vperm.xlu1 %5695, %v8931_v2   ;;  %v2960_v5 = vmul.f32 %v10131_v9, %v2896_v55  ;;  %v3358_v2 = vld [vmem:[#allocation5 + $0x128] sm:$0xff]  ;;  %v2893_v9 = vld [vmem:[#allocation4 + $0xb8] sm:$0xff] }
 0x8a1   : > { %v8934_v17 = vpop.f32.mrf.mxu1  ;;  %6086 = vpow2.f32 %v2150_v42  ;;  %v2474_v42 = vpop.permute.xlu0 %2473 }
 0x8a2   : > { %6088 = vpow2.f32 %v2154_v26 }
 0x8a3   : > { %v4070_v7 = vpop.f32.mrf.mxu1 }
 0x8a4   : > { %3635 = vperm.xlu1 %5695, %v8936_v33  }
 0x8a8   : > { %3645 = vperm.xlu1 %5695, %v8939_v29  }
 0x8a9   : > { %3690 = vperm.xlu0 %5694, %v8941_v41  }
 0x8ac   : > { %v6083_v4 = vpop.eup %6082  ;;  %3655 = vperm.xlu1 %5695, %v8944_v11   ;;  %v3356_v11 = vld [vmem:[#allocation5 + $0x1f8] sm:$0xff] }
 0x8ad   : > { %v6085_v1 = vpop.eup %6084  ;;  %v3825_v24 = vpack.c.bf16 %v8947_v19, %v6083_v4 }
 0x8ae   : > { %v3826_v62 = vpack.c.bf16 %v8949_v32, %v6085_v1  ;;  %v8954_v3 = vadd.f32 %v6085_v1, %v6083_v4  ;;  %v8956_v58 = vpop.eup %6086  ;;  %v10132_v1 = vld [vmem:[#allocation48_spill] sm:$0xff] }
 0x8af   : > { %10129 = vst [vmem:[#allocation164_spill] sm:$0xff] %v8956_v58  ;;  %v8959_v14 = vpop.eup %6088 }
 0x8b0   : > { %4095 = vmatprep.mubr.bf16.mxu1 %v3826_v62  ;;  %3665 = vperm.xlu1 %5695, %v8956_v58   ;;  %10130 = vst [vmem:[#allocation134_spill] sm:$0xff] %v8959_v14 }
 0x8b1   : > { %4096 = vmatmul.mubr.bf16.gmra.mxu1 %v3825_v24 }
 0x8b4   : > { %3675 = vperm.xlu1 %5695, %v8959_v14  }
 0x8b7   : > { %v3078_v26 = vpop.xlane.xlu0 %3077 }
 0x8b8   : > { %v3216_v7 = vadd.f32 %v3078_v26, %v2960_v5  ;;  %v3360_v26 = vld [vmem:[#allocation5 + $0x1f0] sm:$0xff] }
 0x8ba   : > { %3281 = vst.msk [vmem:[#allocation4 + $0xd0] sm:$0xff] %vm3254_vm1, %v3216_v7  ;;  %v10134_v7 = vld [vmem:[#allocation39_spill] sm:$0xff] }
 0x8bf   : > { %v2484_v4 = vpop.permute.xlu0 %2483 }
 0x8c0   : > { %v2612_v41 = vsub.f32 %v10132_v1, %v2484_v4  ;;  %v2613_v62 = vsub.f32 %v10133_v45, %v2484_v4  ;;  %v2608_v1 = vsub.f32 %v10134_v7, %v2474_v42  ;;  %v10138_v7 = vld [vmem:[#allocation177_spill] sm:$0xff] }
 0x8c2   : > { %v2866_v58 = vmul.f32 1.442695, %v2612_v41  ;;  %v2868_v24 = vmul.f32 1.442695, %v2613_v62  ;;  %v10135_v41 = vld [vmem:[#allocation104_spill] sm:$0xff] }
 0x8c3   : > { %v3571_v29 = vpop.permute.xlu0 %3570  ;;  %v2957_v4 = vmul.f32 %v10135_v41, %v2893_v9  ;;  %v10136_v62 = vld [vmem:[#allocation40_spill] sm:$0xff] }
 0x8c4   : > { %6090 = vpow2.f32 %v2866_v58  ;;  %v3740_v33 = vmul.f32 %v3571_v29, %v3356_v11  ;;  %v2609_v58 = vsub.f32 %v10136_v62, %v2474_v42 }
 0x8c5   : > { %6092 = vpow2.f32 %v2868_v24 }
 0x8c6   : > { %v4157_v14 = vadd.f32 %v8655_v51, %v3740_v33  ;;  %v3362_v33 = vld [vmem:[#allocation5 + $0x78] sm:$0xff] }
 0x8c7   : > { %v3581_v55 = vpop.permute.xlu0 %3580 }
 0x8c8   : > { %4221 = vst [vmem:[#allocation5 + $0x1f8] sm:$0xff] %v4157_v14  ;;  %v3742_v5 = vmul.f32 %v3581_v55, %v3358_v2  ;;  %3089 = vadd.xlane.f32.xlu0 %v8531_v0  ;;  %v2858_v2 = vmul.f32 1.442695, %v2608_v1  ;;  %v2860_v14 = vmul.f32 1.442695, %v2609_v58  ;;  %v10139_v58 = vld [vmem:[#allocation42_spill] sm:$0xff] }
 0x8ca   : > { %v4159_v45 = vadd.f32 %v8682_v44, %v3742_v5  ;;  %v10137_v5 = vld [vmem:[#allocation34_spill] sm:$0xff]  ;;  %6094 = vpow2.f32 %v2858_v2 }
 0x8cb   : > { %v3591_v29 = vpop.permute.xlu0 %3590  ;;  %v3069_v11 = vpop.xlane.xlu1 %3068  ;;  %6096 = vpow2.f32 %v2860_v14 }
 0x8cc   : > { %4223 = vst [vmem:[#allocation5 + $0x128] sm:$0xff] %v4159_v45  ;;  %v3744_v24 = vmul.f32 %v3591_v29, %v3360_v26  ;;  %v3213_v51 = vadd.f32 %v3069_v11, %v2957_v4  ;;  %3095 = vadd.xlane.f32.xlu0 %v8543_v57  ;;  %v3364_v57 = vld [vmem:[#allocation5 + $0x90] sm:$0xff]  ;;  %v2034_v29 = vsub.f32 %v10139_v58, %v10084_v53 }
 0x8ce   : > { %v4161_v0 = vadd.f32 %v8709_v47, %v3744_v24  ;;  %3278 = vst.msk [vmem:[#allocation4 + $0xb8] sm:$0xff] %vm3254_vm1, %v3213_v51  ;;  %v2158_v14 = vmul.f32 1.442695, %v2034_v29 }
 0x8cf   : > { %v3601_v55 = vpop.permute.xlu0 %3600  ;;  %v2469_v44 = vpop.permute.xlu1 %2468 }
 0x8d0   : > { %4225 = vst [vmem:[#allocation5 + $0x1f0] sm:$0xff] %v4161_v0  ;;  %v3746_v9 = vmul.f32 %v3601_v55, %v3362_v33  ;;  %v2606_v42 = vsub.f32 %v10137_v5, %v2469_v44  ;;  %v2607_v41 = vsub.f32 %v10138_v7, %v2469_v44  ;;  %3101 = vadd.xlane.f32.xlu0 %v8553_v8  ;;  %v10140_v0 = vld [vmem:[#allocation117_spill] sm:$0xff]  ;;  %v10141_v55 = vld [vmem:[#allocation123_spill] sm:$0xff] }
 0x8d1   : > { %v8978_v26 = vpop.eup %6090  ;;  %v3079_v53 = vadd.f32 %v10141_v55, %v10140_v0  ;;  %v10143_v55 = vld [vmem:[#allocation37_spill] sm:$0xff] }
 0x8d2   : > { %v8980_v45 = vpop.eup %6092  ;;  %v4163_v47 = vadd.f32 %v8734_v23, %v3746_v9  ;;  %v2854_v1 = vmul.f32 1.442695, %v2606_v42  ;;  %v2856_v4 = vmul.f32 1.442695, %v2607_v41  ;;  %v8983_v62 = vpop.f32.mrf.mxu1  ;;  %v3366_v23 = vld [vmem:[#allocation5 + $0xd0] sm:$0xff]  ;;  %v3368_v42 = vld [vmem:[#allocation5 + $0x88] sm:$0xff] }
 0x8d3   : > { %v3611_v11 = vpop.permute.xlu0 %3610  ;;  %v8989_v8 = vadd.f32 %v8980_v45, %v8978_v26 }
 0x8d4   : > { %4227 = vst [vmem:[#allocation5 + $0x78] sm:$0xff] %v4163_v47  ;;  %6098 = vpow2.f32 %v2854_v1  ;;  %v3748_v24 = vmul.f32 %v3611_v11, %v3364_v57  ;;  %v4075_v51 = vpop.f32.mrf.mxu1  ;;  %3107 = vadd.xlane.f32.xlu0 %v8561_v18 }
 0x8d5   : > { %6100 = vpow2.f32 %v2856_v4 }
 0x8d6   : > { %v4165_v33 = vadd.f32 %v8759_v10, %v3748_v24  ;;  %v4076_v2 = vpop.f32.mrf.mxu1  ;;  %6102 = vpow2.f32 %v2158_v14  ;;  %v3370_v10 = vld [vmem:[#allocation5 + $0x1c8] sm:$0xff]  ;;  %v3357_v14 = vld [vmem:[#allocation5 + $0x20] sm:$0xff] }
 0x8d7   : > { %v3621_v44 = vpop.permute.xlu0 %3620  ;;  %v8999_v47 = vpop.eup %6094 }
 0x8d8   : > { %4229 = vst [vmem:[#allocation5 + $0x90] sm:$0xff] %v4165_v33  ;;  %v3750_v9 = vmul.f32 %v3621_v44, %v3366_v23  ;;  %v4078_v5 = vpop.f32.mrf.mxu1  ;;  %3080 = vadd.xlane.f32.xlu1 %v3079_v53  ;;  %3113 = vadd.xlane.f32.xlu0 %v8588_v43  ;;  %v9001_v4 = vpop.eup %6096  ;;  %v10144_v53 = vld [vmem:[#allocation38_spill] sm:$0xff] }
 0x8da   : > { %v4167_v7 = vadd.f32 %v8788_v49, %v3750_v9  ;;  %v3372_v49 = vld [vmem:[#allocation5 + $0x178] sm:$0xff] }
 0x8db   : > { %v3631_v18 = vpop.permute.xlu0 %3630 }
 0x8dc   : > { %4231 = vst [vmem:[#allocation5 + $0xd0] sm:$0xff] %v4167_v7  ;;  %v3752_v41 = vmul.f32 %v3631_v18, %v3368_v42  ;;  %3119 = vadd.xlane.f32.xlu0 %v8614_v28 }
 0x8de   : > { %v4169_v57 = vadd.f32 %v8861_v15, %v3752_v41  ;;  %v3359_v41 = vld [vmem:[#allocation5 + $0x1a0] sm:$0xff] }
 0x8df   : > { %v3641_v1 = vpop.permute.xlu0 %3640 }
 0x8e0   : > { %4233 = vst [vmem:[#allocation5 + $0x88] sm:$0xff] %v4169_v57  ;;  %v3754_v58 = vmul.f32 %v3641_v1, %v3370_v10  ;;  %3125 = vadd.xlane.f32.xlu0 %v8641_v63  ;;  %v2895_v63 = vld [vmem:[#allocation4 + $0xc8] sm:$0xff]  ;;  %v10145_v1 = vld [vmem:[#allocation56_spill] sm:$0xff] }
 0x8e1   : > { %v6099_v43 = vpop.eup %6098 }
 0x8e2   : > { %v6101_v29 = vpop.eup %6100  ;;  %v4171_v11 = vadd.f32 %v8934_v17, %v3754_v58  ;;  %v3827_v24 = vpack.c.bf16 %v8999_v47, %v6099_v43  ;;  %v10146_v58 = vld [vmem:[#allocation53_spill] sm:$0xff] }
 0x8e3   : > { %v3651_v28 = vpop.permute.xlu0 %3650  ;;  %v3828_v51 = vpack.c.bf16 %v9001_v4, %v6101_v29  ;;  %v9008_v33 = vpop.eup %6102 }
 0x8e4   : > { %4235 = vst [vmem:[#allocation5 + $0x1c8] sm:$0xff] %v4171_v11  ;;  %v3756_v15 = vmul.f32 %v3651_v28, %v3372_v49  ;;  %3131 = vadd.xlane.f32.xlu0 %v8670_v36  ;;  %v10142_v36 = vld [vmem:[#allocation185_spill] sm:$0xff]  ;;  %v3361_v28 = vld [vmem:[#allocation5 + $0xe8] sm:$0xff] }
 0x8e5   : > { %4103 = vmatprep.mubr.bf16.mxu1 %v3828_v51  ;;  %v2959_v17 = vmul.f32 %v10142_v36, %v2895_v63 }
 0x8e6   : > { %v4173_v23 = vadd.f32 %v4076_v2, %v3756_v15  ;;  %4104 = vmatmul.mubr.bf16.gmra.mxu1 %v3827_v24  ;;  %v10147_v15 = vld [vmem:[#allocation122_spill] sm:$0xff] }
 0x8e7   : > { %v3661_v44 = vpop.permute.xlu0 %3660 }
 0x8e8   : > { %4237 = vst [vmem:[#allocation5 + $0x178] sm:$0xff] %v4173_v23  ;;  %3137 = vadd.xlane.f32.xlu0 %v8695_v52  ;;  %v3178_v52 = vadd.f32 %v6101_v29, %v6099_v43  ;;  %v3085_v43 = vadd.f32 %v10146_v58, %v10145_v1  ;;  %v10148_v23 = vld [vmem:[#allocation59_spill] sm:$0xff] }
 0x8e9   : > { %3685 = vperm.xlu1 %5695, %v9008_v33   ;;  %v3091_v63 = vadd.f32 %v10148_v23, %v10147_v15  ;;  %v10154_v1 = vld [vmem:[#allocation63_spill] sm:$0xff] }
 0x8ec   : > { %3143 = vadd.xlane.f32.xlu0 %v8720_v61 }
 0x8f0   : > { %3149 = vadd.xlane.f32.xlu0 %v8745_v22 }
 0x8f4   : > { %3155 = vadd.xlane.f32.xlu0 %v8770_v39 }
 0x8f8   : > { %3161 = vadd.xlane.f32.xlu0 %v8805_v30  ;;  %v3374_v30 = vld [vmem:[#allocation5 + $0x190] sm:$0xff] }
 0x8f9   : > { %v3758_v18 = vmul.f32 %v3661_v44, %v3374_v30  ;;  %v10150_v30 = vld [vmem:[#allocation57_spill] sm:$0xff] }
 0x8fc   : > { %3167 = vadd.xlane.f32.xlu0 %v8880_v40 }
 0x900   : > { %3173 = vadd.xlane.f32.xlu0 %v8954_v3  ;;  %v3075_v2 = vpop.xlane.xlu1 %3074 }
 0x901   : > { %v3215_v0 = vadd.f32 %v3075_v2, %v2959_v17  ;;  %v9030_v17 = vpop.permute.xlu0 %3670  ;;  %v3363_v2 = vld [vmem:[#allocation5 + $0x70] sm:$0xff] }
 0x903   : > { %3280 = vst.msk [vmem:[#allocation4 + $0xc8] sm:$0xff] %vm3254_vm1, %v3215_v0 }
 0x904   : > { %3179 = vadd.xlane.f32.xlu0 %v3178_v52  ;;  %v2479_v61 = vpop.permute.xlu1 %2478  ;;  %v3097_v52 = vadd.f32 %v8537_v56, %v8535_v27  ;;  %v2898_v56 = vld [vmem:[#allocation4 + $0xe0] sm:$0xff] }
 0x905   : > { %v2610_v22 = vsub.f32 %v10143_v55, %v2479_v61  ;;  %v2611_v39 = vsub.f32 %v10144_v53, %v2479_v61 }
 0x907   : > { %v2862_v40 = vmul.f32 1.442695, %v2610_v22  ;;  %v2864_v9 = vmul.f32 1.442695, %v2611_v39  ;;  %v9022_v5 = vpop.f32.mrf.mxu1  ;;  %v3365_v22 = vld [vmem:[#allocation5 + $0x1d8] sm:$0xff] }
 0x908   : > { %v3576_v42 = vpop.permute.xlu1 %3575 }
 0x909   : > { %6104 = vpow2.f32 %v2862_v40  ;;  %v4083_v3 = vpop.f32.mrf.mxu1  ;;  %v3741_v7 = vmul.f32 %v3576_v42, %v3357_v14  ;;  %v10149_v14 = vld [vmem:[#allocation60_spill] sm:$0xff] }
 0x90a   : > { %6106 = vpow2.f32 %v2864_v9  ;;  %v3103_v44 = vadd.f32 %v10150_v30, %v10149_v14  ;;  %v9039_v9 = vpop.permute.xlu0 %3680 }
 0x90b   : > { %v4158_v10 = vadd.f32 %v8676_v37, %v3741_v7  ;;  %v4084_v57 = vpop.f32.mrf.mxu1  ;;  %v10151_v7 = vld [vmem:[#allocation55_spill] sm:$0xff] }
 0x90c   : > { %v4175_v49 = vadd.f32 %v4084_v57, %v3758_v18  ;;  %v3586_v29 = vpop.permute.xlu1 %3585  ;;  %v2037_v18 = vsub.f32 %v10151_v7, %v8471_v50  ;;  %v10153_v57 = vld [vmem:[#allocation58_spill] sm:$0xff] }
 0x90d   : > { %4222 = vst [vmem:[#allocation5 + $0x20] sm:$0xff] %v4158_v10  ;;  %v4086_v11 = vpop.f32.mrf.mxu1  ;;  %v3743_v24 = vmul.f32 %v3586_v29, %v3359_v41  ;;  %3086 = vadd.xlane.f32.xlu1 %v3085_v43  ;;  %v3109_v58 = vadd.f32 %v10154_v1, %v10153_v57  ;;  %v10169_v57 = vld [vmem:[#allocation74_spill] sm:$0xff]  ;;  %v10170_v1 = vld [vmem:[#allocation88_spill] sm:$0xff] }
 0x90e   : > { %4239 = vst [vmem:[#allocation5 + $0x190] sm:$0xff] %v4175_v49  ;;  %v2164_v11 = vmul.f32 1.442695, %v2037_v18  ;;  %v10167_v18 = vld [vmem:[#allocation75_spill] sm:$0xff] }
 0x90f   : > { %v4160_v51 = vadd.f32 %v8705_v6, %v3743_v24  ;;  %v3369_v24 = vld [vmem:[#allocation5 + $0xa8] sm:$0xff] }
 0x910   : > { %v3596_v36 = vpop.permute.xlu1 %3595  ;;  %6108 = vpow2.f32 %v2164_v11 }
 0x911   : > { %4224 = vst [vmem:[#allocation5 + $0x1a0] sm:$0xff] %v4160_v51  ;;  %v3745_v37 = vmul.f32 %v3596_v36, %v3361_v28  ;;  %3092 = vadd.xlane.f32.xlu1 %v3091_v63  ;;  %v10155_v28 = vld [vmem:[#allocation64_spill] sm:$0xff]  ;;  %v3371_v63 = vld [vmem:[#allocation5 + $0x170] sm:$0xff] }
 0x913   : > { %v4162_v0 = vadd.f32 %v8732_v31, %v3745_v37  ;;  %v10157_v37 = vld [vmem:[#allocation62_spill] sm:$0xff] }
 0x914   : > { %v3606_v61 = vpop.permute.xlu1 %3605 }
 0x915   : > { %4226 = vst [vmem:[#allocation5 + $0xe8] sm:$0xff] %v4162_v0  ;;  %v3747_v55 = vmul.f32 %v3606_v61, %v3363_v2  ;;  %3098 = vadd.xlane.f32.xlu1 %v3097_v52  ;;  %v10158_v2 = vld [vmem:[#allocation67_spill] sm:$0xff] }
 0x916   : > { %v6105_v6 = vpop.eup %6104  ;;  %v3121_v0 = vadd.f32 %v10158_v2, %v10157_v37  ;;  %v10172_v37 = vld [vmem:[#allocation113_spill] sm:$0xff] }
 0x917   : > { %v6107_v53 = vpop.eup %6106  ;;  %v4164_v39 = vadd.f32 %v8757_v35, %v3747_v55  ;;  %v3829_v40 = vpack.c.bf16 %v8978_v26, %v6105_v6  ;;  %v3367_v35 = vld [vmem:[#allocation5 + $0xb8] sm:$0xff]  ;;  %v10152_v26 = vld [vmem:[#allocation114_spill] sm:$0xff] }
 0x918   : > { %v3616_v31 = vpop.permute.xlu1 %3615  ;;  %v3830_v42 = vpack.c.bf16 %v8980_v45, %v6107_v53  ;;  %v3184_v27 = vadd.f32 %v6107_v53, %v6105_v6  ;;  %v2962_v10 = vmul.f32 %v10152_v26, %v2898_v56  ;;  %v3373_v55 = vld [vmem:[#allocation5 + $0x68] sm:$0xff]  ;;  %v10159_v6 = vld [vmem:[#allocation68_spill] sm:$0xff] }
 0x919   : > { %4228 = vst [vmem:[#allocation5 + $0x70] sm:$0xff] %v4164_v39  ;;  %v3749_v3 = vmul.f32 %v3616_v31, %v3365_v22  ;;  %3104 = vadd.xlane.f32.xlu1 %v3103_v44  ;;  %v10160_v22 = vld [vmem:[#allocation65_spill] sm:$0xff]  ;;  %v10162_v44 = vld [vmem:[#allocation71_spill] sm:$0xff] }
 0x91a   : > { %4111 = vmatprep.mubr.bf16.mxu1 %v3830_v42  ;;  %3185 = vadd.xlane.f32.xlu0 %v3184_v27  ;;  %v3127_v53 = vadd.f32 %v10160_v22, %v10159_v6  ;;  %v10163_v42 = vld [vmem:[#allocation72_spill] sm:$0xff]  ;;  %v10164_v27 = vld [vmem:[#allocation69_spill] sm:$0xff] }
 0x91b   : > { %v4166_v41 = vadd.f32 %v8784_v46, %v3749_v3  ;;  %4112 = vmatmul.mubr.bf16.gmra.mxu1 %v3829_v40  ;;  %v10156_v46 = vld [vmem:[#allocation61_spill] sm:$0xff]  ;;  %v3139_v56 = vadd.f32 %v10164_v27, %v10163_v42  ;;  %v10166_v3 = vld [vmem:[#allocation76_spill] sm:$0xff] }
 0x91c   : > { %v3084_v45 = vpop.xlane.xlu0 %3083  ;;  %v3626_v43 = vpop.permute.xlu1 %3625  ;;  %v3115_v51 = vadd.f32 %v10156_v46, %v10155_v28 }
 0x91d   : > { %4230 = vst [vmem:[#allocation5 + $0x1d8] sm:$0xff] %v4166_v41  ;;  %v3218_v49 = vadd.f32 %v3084_v45, %v2962_v10  ;;  %v3751_v29 = vmul.f32 %v3626_v43, %v3367_v35  ;;  %3110 = vadd.xlane.f32.xlu1 %v3109_v58  ;;  %v9061_v31 = vpop.eup %6108  ;;  %v10168_v35 = vld [vmem:[#allocation73_spill] sm:$0xff]  ;;  %v3375_v41 = vld [vmem:[#allocation5 + $0x198] sm:$0xff]  ;;  %v3157_v58 = vadd.f32 %v10170_v1, %v10169_v57 }
 0x91e   : > { %v3376_v45 = vld [vmem:[#allocation5 + $0x38] sm:$0xff]  ;;  %v2914_v57 = vld [vmem:[#allocation4 + $0x160] sm:$0xff] }
 0x91f   : > { %3283 = vst.msk [vmem:[#allocation4 + $0xe0] sm:$0xff] %vm3254_vm1, %v3218_v49  ;;  %v4168_v50 = vadd.f32 %v8856_v38, %v3751_v29  ;;  %v3760_v11 = vmul.f32 %v9030_v17, %v3376_v45  ;;  %v3181_v17 = vadd.f32 %v9001_v4, %v8999_v47  ;;  %v2904_v4 = vld [vmem:[#allocation4 + $0x110] sm:$0xff]  ;;  %v3377_v45 = vld [vmem:[#allocation5 + $0xc0] sm:$0xff] }
 0x920   : > { %v3636_v15 = vpop.permute.xlu1 %3635 }
 0x921   : > { %4232 = vst [vmem:[#allocation5 + $0xb8] sm:$0xff] %v4168_v50  ;;  %v3753_v23 = vmul.f32 %v3636_v15, %v3369_v24  ;;  %3116 = vadd.xlane.f32.xlu1 %v3115_v51  ;;  %v3163_v24 = vadd.f32 %v8798_v60, %v8794_v16  ;;  %v3169_v51 = vadd.f32 %v8874_v13, %v8870_v12  ;;  %v2900_v60 = vld [vmem:[#allocation4 + $0xf0] sm:$0xff]  ;;  %v2902_v12 = vld [vmem:[#allocation4 + $0x100] sm:$0xff] }
 0x922   : > { %v3175_v15 = vadd.f32 %v8949_v32, %v8947_v19  ;;  %v2964_v2 = vmul.f32 %v10172_v37, %v2900_v60  ;;  %v10173_v19 = vld [vmem:[#allocation50_spill] sm:$0xff] }
 0x923   : > { %v4170_v36 = vadd.f32 %v8927_v59, %v3753_v23  ;;  %v10161_v59 = vld [vmem:[#allocation66_spill] sm:$0xff]  ;;  %v2966_v32 = vmul.f32 %v10173_v19, %v2902_v12  ;;  %v2922_v19 = vld [vmem:[#allocation4 + $0x1a0] sm:$0xff] }
 0x924   : > { %v3646_v52 = vpop.permute.xlu1 %3645  ;;  %v3133_v40 = vadd.f32 %v10162_v44, %v10161_v59  ;;  %v10171_v23 = vld [vmem:[#allocation46_spill] sm:$0xff]  ;;  %v9083_v16 = vpop.permute.xlu0 %3690 }
 0x925   : > { %4234 = vst [vmem:[#allocation5 + $0xa8] sm:$0xff] %v4170_v36  ;;  %v3755_v61 = vmul.f32 %v3646_v52, %v3371_v63  ;;  %3122 = vadd.xlane.f32.xlu1 %v3121_v0  ;;  %v2036_v63 = vsub.f32 %v10171_v23, %v10110_v34  ;;  %v10174_v52 = vld [vmem:[#allocation116_spill] sm:$0xff] }
 0x927   : > { %v4172_v38 = vadd.f32 %v8983_v62, %v3755_v61  ;;  %v10165_v62 = vld [vmem:[#allocation70_spill] sm:$0xff]  ;;  %v2162_v36 = vmul.f32 1.442695, %v2036_v63  ;;  %v2968_v61 = vmul.f32 %v10174_v52, %v2904_v4 }
 0x928   : > { %v3656_v39 = vpop.permute.xlu1 %3655  ;;  %v3145_v7 = vadd.f32 %v10166_v3, %v10165_v62  ;;  %v2910_v3 = vld [vmem:[#allocation4 + $0x140] sm:$0xff] }
 0x929   : > { %4236 = vst [vmem:[#allocation5 + $0x170] sm:$0xff] %v4172_v38  ;;  %v3757_v14 = vmul.f32 %v3656_v39, %v3373_v55  ;;  %3128 = vadd.xlane.f32.xlu1 %v3127_v53  ;;  %6110 = vpow2.f32 %v2162_v36  ;;  %v2906_v38 = vld [vmem:[#allocation4 + $0x120] sm:$0xff]  ;;  %v2920_v36 = vld [vmem:[#allocation4 + $0x190] sm:$0xff] }
 0x92b   : > { %v4174_v30 = vadd.f32 %v9022_v5, %v3757_v14  ;;  %v3151_v5 = vadd.f32 %v10168_v35, %v10167_v18  ;;  %v2908_v14 = vld [vmem:[#allocation4 + $0x130] sm:$0xff]  ;;  %v2974_v35 = vmul.f32 %v8900_v20, %v2910_v3 }
 0x92c   : > { %v3666_v26 = vpop.permute.xlu1 %3665  ;;  %v2972_v44 = vmul.f32 %v8895_v48, %v2908_v14  ;;  %v2928_v14 = vld [vmem:[#allocation4 + $0x1d0] sm:$0xff] }
 0x92d   : > { %4238 = vst [vmem:[#allocation5 + $0x68] sm:$0xff] %v4174_v30  ;;  %3134 = vadd.xlane.f32.xlu1 %v3133_v40  ;;  %v3759_v10 = vmul.f32 %v3666_v26, %v3375_v41  ;;  %v2897_v30 = vld [vmem:[#allocation4 + $0xd8] sm:$0xff]  ;;  %v10176_v40 = vld [vmem:[#allocation43_spill] sm:$0xff] }
 0x92e   : > { %v2961_v42 = vmul.f32 %v10176_v40, %v2897_v30  ;;  %v2912_v41 = vld [vmem:[#allocation4 + $0x150] sm:$0xff] }
 0x92f   : > { %v2976_v26 = vmul.f32 %v8905_v25, %v2912_v41  ;;  %v2918_v25 = vld [vmem:[#allocation4 + $0x180] sm:$0xff] }
 0x930   : > { %3700 = vperm.xlu0 %5694, %v9061_v31   ;;  %v3676_v53 = vpop.permute.xlu1 %3675 }
 0x931   : > { %3140 = vadd.xlane.f32.xlu1 %v3139_v56 }
 0x935   : > { %3146 = vadd.xlane.f32.xlu1 %v3145_v7 }
 0x936   : > { %v9096_v27 = vpop.eup %6110 }
 0x939   : > { %3152 = vadd.xlane.f32.xlu1 %v3151_v5 }
 0x93c   : > { %v4089_v43 = vpop.f32.mrf.mxu1 }
 0x93d   : > { %v4176_v49 = vadd.f32 %v4089_v43, %v3759_v10  ;;  %3158 = vadd.xlane.f32.xlu1 %v3157_v58  ;;  %v2978_v58 = vmul.f32 %v8916_v21, %v2914_v57  ;;  %v10177_v21 = vld [vmem:[#allocation110_spill] sm:$0xff]  ;;  %v10184_v57 = vld [vmem:[#allocation41_spill] sm:$0xff] }
 0x93e   : > { %v4091_v29 = vpop.f32.mrf.mxu1  ;;  %v2982_v23 = vmul.f32 %v10177_v21, %v2918_v25  ;;  %v3379_v25 = vld [vmem:[#allocation5 + $0x158] sm:$0xff] }
 0x93f   : > { %4240 = vst [vmem:[#allocation5 + $0x198] sm:$0xff] %v4176_v49  ;;  %v2916_v49 = vld [vmem:[#allocation4 + $0x170] sm:$0xff] }
 0x940   : > { %v4092_v50 = vpop.f32.mrf.mxu1  ;;  %v2980_v20 = vmul.f32 %v8922_v54, %v2916_v49 }
 0x941   : > { %v4177_v28 = vadd.f32 %v4092_v50, %v3760_v11  ;;  %3164 = vadd.xlane.f32.xlu1 %v3163_v24  ;;  %v3761_v11 = vmul.f32 %v3676_v53, %v3377_v45  ;;  %v3378_v24 = vld [vmem:[#allocation5 + $0x1c0] sm:$0xff]  ;;  %v2903_v45 = vld [vmem:[#allocation4 + $0x108] sm:$0xff] }
 0x942   : > { %v4094_v46 = vpop.f32.mrf.mxu1 }
 0x943   : > { %4241 = vst [vmem:[#allocation5 + $0x38] sm:$0xff] %v4177_v28 }
 0x945   : > { %3170 = vadd.xlane.f32.xlu1 %v3169_v51 }
 0x949   : > { %3176 = vadd.xlane.f32.xlu1 %v3175_v15 }
 0x94d   : > { %3182 = vadd.xlane.f32.xlu1 %v3181_v17  ;;  %v3762_v17 = vmul.f32 %v9039_v9, %v3378_v24  ;;  %v10179_v9 = vld [vmem:[#allocation169_spill] sm:$0xff]  ;;  %v2932_v24 = vld [vmem:[#allocation4 + $0x1f0] sm:$0xff] }
 0x951   : > { %v3090_v0 = vpop.xlane.xlu0 %3089  ;;  %3188 = vadd.xlane.f32.xlu1 %v8989_v8  ;;  %v10175_v8 = vld [vmem:[#allocation121_spill] sm:$0xff] }
 0x952   : > { %v3220_v13 = vadd.f32 %v3090_v0, %v2964_v2  ;;  %v2970_v22 = vmul.f32 %v10175_v8, %v2906_v38  ;;  %v10178_v0 = vld [vmem:[#allocation168_spill] sm:$0xff] }
 0x953   : > { %v2984_v12 = vmul.f32 %v10178_v0, %v2920_v36  ;;  %v2909_v0 = vld [vmem:[#allocation4 + $0x138] sm:$0xff] }
 0x954   : > { %3285 = vst.msk [vmem:[#allocation4 + $0xf0] sm:$0xff] %vm3254_vm1, %v3220_v13 }
 0x955   : > { %v3096_v47 = vpop.xlane.xlu0 %3095 }
 0x956   : > { %v3222_v34 = vadd.f32 %v3096_v47, %v2966_v32  ;;  %v2986_v47 = vmul.f32 %v10179_v9, %v2922_v19 }
 0x958   : > { %3287 = vst.msk [vmem:[#allocation4 + $0x100] sm:$0xff] %vm3254_vm1, %v3222_v34  ;;  %v2924_v34 = vld [vmem:[#allocation4 + $0x1b0] sm:$0xff] }
 0x959   : > { %v3102_v55 = vpop.xlane.xlu0 %3101 }
 0x95a   : > { %v3224_v6 = vadd.f32 %v3102_v55, %v2968_v61  ;;  %v10180_v61 = vld [vmem:[#allocation166_spill] sm:$0xff] }
 0x95b   : > { %v2988_v55 = vmul.f32 %v10180_v61, %v2924_v34  ;;  %v2911_v34 = vld [vmem:[#allocation4 + $0x148] sm:$0xff] }
 0x95c   : > { %3289 = vst.msk [vmem:[#allocation4 + $0x110] sm:$0xff] %vm3254_vm1, %v3224_v6  ;;  %v2926_v6 = vld [vmem:[#allocation4 + $0x1c0] sm:$0xff] }
 0x95d   : > { %v3108_v39 = vpop.xlane.xlu0 %3107 }
 0x95e   : > { %v3226_v59 = vadd.f32 %v3108_v39, %v2970_v22  ;;  %v10181_v22 = vld [vmem:[#allocation164_spill] sm:$0xff] }
 0x95f   : > { %v2990_v53 = vmul.f32 %v10181_v22, %v2926_v6  ;;  %v2913_v22 = vld [vmem:[#allocation4 + $0x158] sm:$0xff] }
 0x960   : > { %3291 = vst.msk [vmem:[#allocation4 + $0x120] sm:$0xff] %vm3254_vm1, %v3226_v59  ;;  %v10182_v59 = vld [vmem:[#allocation134_spill] sm:$0xff] }
 0x961   : > { %v3114_v56 = vpop.xlane.xlu0 %3113  ;;  %v3081_v62 = vpop.xlane.xlu1 %3080 }
 0x962   : > { %v3228_v7 = vadd.f32 %v3114_v56, %v2972_v44  ;;  %v3217_v18 = vadd.f32 %v3081_v62, %v2961_v42  ;;  %3695 = vperm.xlu1 %5695, %v9096_v27   ;;  %v2992_v44 = vmul.f32 %v10182_v59, %v2928_v14  ;;  %v2930_v42 = vld [vmem:[#allocation4 + $0x1e0] sm:$0xff] }
 0x963   : > { %v2994_v62 = vmul.f32 %v9008_v33, %v2930_v42  ;;  %v10185_v33 = vld [vmem:[#allocation109_spill] sm:$0xff] }
 0x964   : > { %3293 = vst.msk [vmem:[#allocation4 + $0x130] sm:$0xff] %vm3254_vm1, %v3228_v7  ;;  %3282 = vst.msk [vmem:[#allocation4 + $0xd8] sm:$0xff] %vm3254_vm1, %v3217_v18  ;;  %v2967_v49 = vmul.f32 %v10185_v33, %v2903_v45 }
 0x965   : > { %v3120_v5 = vpop.xlane.xlu0 %3119  ;;  %v3686_v18 = vpop.permute.xlu1 %3685 }
 0x966   : > { %v3230_v48 = vadd.f32 %v3120_v5, %v2974_v35  ;;  %v2899_v35 = vld [vmem:[#allocation4 + $0xe8] sm:$0xff]  ;;  %v10183_v5 = vld [vmem:[#allocation44_spill] sm:$0xff] }
 0x967   : > { %v2963_v41 = vmul.f32 %v10183_v5, %v2899_v35  ;;  %v2919_v35 = vld [vmem:[#allocation4 + $0x188] sm:$0xff] }
 0x968   : > { %3295 = vst.msk [vmem:[#allocation4 + $0x140] sm:$0xff] %vm3254_vm1, %v3230_v48 }
 0x969   : > { %v3126_v10 = vpop.xlane.xlu0 %3125 }
 0x96a   : > { %v3232_v1 = vadd.f32 %v3126_v10, %v2976_v26  ;;  %v2901_v26 = vld [vmem:[#allocation4 + $0xf8] sm:$0xff] }
 0x96c   : > { %3297 = vst.msk [vmem:[#allocation4 + $0x150] sm:$0xff] %vm3254_vm1, %v3232_v1  ;;  %v2965_v1 = vmul.f32 %v10184_v57, %v2901_v26 }
 0x96d   : > { %v3132_v43 = vpop.xlane.xlu0 %3131 }
 0x96e   : > { %v3234_v29 = vadd.f32 %v3132_v43, %v2978_v58 }
 0x970   : > { %3299 = vst.msk [vmem:[#allocation4 + $0x160] sm:$0xff] %vm3254_vm1, %v3234_v29 }
 0x971   : > { %v4097_v50 = vpop.f32.mrf.mxu1  ;;  %v3138_v28 = vpop.xlane.xlu0 %3137 }
 0x972   : > { %v4178_v46 = vadd.f32 %v4097_v50, %v3761_v11  ;;  %v3236_v51 = vadd.f32 %v3138_v28, %v2980_v20  ;;  %v2905_v11 = vld [vmem:[#allocation4 + $0x118] sm:$0xff] }
 0x973   : > { %v4099_v15 = vpop.f32.mrf.mxu1  ;;  %v10186_v50 = vld [vmem:[#allocation124_spill] sm:$0xff] }
 0x974   : > { %4242 = vst [vmem:[#allocation5 + $0xc0] sm:$0xff] %v4178_v46  ;;  %3301 = vst.msk [vmem:[#allocation4 + $0x170] sm:$0xff] %vm3254_vm1, %v3236_v51  ;;  %v2969_v28 = vmul.f32 %v10186_v50, %v2905_v11  ;;  %v2996_v46 = vmul.f32 %v9096_v27, %v2932_v24  ;;  %v2907_v15 = vld [vmem:[#allocation4 + $0x128] sm:$0xff] }
 0x975   : > { %v4100_v63 = vpop.f32.mrf.mxu1  ;;  %v3144_v60 = vpop.xlane.xlu0 %3143  ;;  %v10196_v50 = vld [vmem:[#allocation130_spill] sm:$0xff] }
 0x976   : > { %v4179_v37 = vadd.f32 %v4100_v63, %v3762_v17  ;;  %v3238_v2 = vadd.f32 %v3144_v60, %v2982_v23  ;;  %v3763_v63 = vmul.f32 %v3686_v18, %v3379_v25  ;;  %v10187_v60 = vld [vmem:[#allocation91_spill] sm:$0xff] }
 0x977   : > { %v4102_v54 = vpop.f32.mrf.mxu1  ;;  %v2971_v36 = vmul.f32 %v10187_v60, %v2907_v15  ;;  %v10197_v15 = vld [vmem:[#allocation127_spill] sm:$0xff]  ;;  %v10198_v60 = vld [vmem:[#allocation108_spill] sm:$0xff] }
 0x978   : > { %4243 = vst [vmem:[#allocation5 + $0x1c0] sm:$0xff] %v4179_v37  ;;  %3303 = vst.msk [vmem:[#allocation4 + $0x180] sm:$0xff] %vm3254_vm1, %v3238_v2  ;;  %v3380_v37 = vld [vmem:[#allocation5 + $0x10] sm:$0xff] }
 0x979   : > { %v3150_v13 = vpop.xlane.xlu0 %3149  ;;  %v3764_v27 = vmul.f32 %v9083_v16, %v3380_v37  ;;  %v10190_v16 = vld [vmem:[#allocation79_spill] sm:$0xff] }
 0x97a   : > { %v3240_v32 = vadd.f32 %v3150_v13, %v2984_v12 }
 0x97c   : > { %3305 = vst.msk [vmem:[#allocation4 + $0x190] sm:$0xff] %vm3254_vm1, %v3240_v32  ;;  %v10188_v32 = vld [vmem:[#allocation94_spill] sm:$0xff] }
 0x97d   : > { %v3156_v4 = vpop.xlane.xlu0 %3155  ;;  %v2973_v9 = vmul.f32 %v10188_v32, %v2909_v0  ;;  %v10199_v0 = vld [vmem:[#allocation35_spill] sm:$0xff] }
 0x97e   : > { %v3242_v52 = vadd.f32 %v3156_v4, %v2986_v47 }
 0x980   : > { %3307 = vst.msk [vmem:[#allocation4 + $0x1a0] sm:$0xff] %vm3254_vm1, %v3242_v52 }
 0x981   : > { %v3162_v38 = vpop.xlane.xlu0 %3161 }
 0x982   : > { %v3244_v8 = vadd.f32 %v3162_v38, %v2988_v55  ;;  %v10189_v38 = vld [vmem:[#allocation77_spill] sm:$0xff] }
 0x983   : > { %v2975_v6 = vmul.f32 %v10189_v38, %v2911_v34 }
 0x984   : > { %3309 = vst.msk [vmem:[#allocation4 + $0x1b0] sm:$0xff] %vm3254_vm1, %v3244_v8 }
 0x985   : > { %v3168_v39 = vpop.xlane.xlu0 %3167 }
 0x986   : > { %v3246_v30 = vadd.f32 %v3168_v39, %v2990_v53  ;;  %v2977_v39 = vmul.f32 %v10190_v16, %v2913_v22 }
 0x988   : > { %3311 = vst.msk [vmem:[#allocation4 + $0x1c0] sm:$0xff] %vm3254_vm1, %v3246_v30  ;;  %v2915_v30 = vld [vmem:[#allocation4 + $0x168] sm:$0xff] }
 0x989   : > { %v3174_v40 = vpop.xlane.xlu0 %3173 }
 0x98a   : > { %v3248_v56 = vadd.f32 %v3174_v40, %v2992_v44  ;;  %v10191_v44 = vld [vmem:[#allocation120_spill] sm:$0xff] }
 0x98b   : > { %v2979_v40 = vmul.f32 %v10191_v44, %v2915_v30 }
 0x98c   : > { %3313 = vst.msk [vmem:[#allocation4 + $0x1d0] sm:$0xff] %vm3254_vm1, %v3248_v56  ;;  %v2917_v56 = vld [vmem:[#allocation4 + $0x178] sm:$0xff] }
 0x98d   : > { %v3180_v3 = vpop.xlane.xlu0 %3179 }
 0x98e   : > { %v3250_v7 = vadd.f32 %v3180_v3, %v2994_v62  ;;  %v10192_v3 = vld [vmem:[#allocation105_spill] sm:$0xff] }
 0x990   : > { %3315 = vst.msk [vmem:[#allocation4 + $0x1e0] sm:$0xff] %vm3254_vm1, %v3250_v7  ;;  %v2981_v7 = vmul.f32 %v10192_v3, %v2917_v56 }
 0x996   : > { %v3087_v48 = vpop.xlane.xlu1 %3086 }
 0x997   : > { %v3219_v10 = vadd.f32 %v3087_v48, %v2963_v41  ;;  %v10193_v41 = vld [vmem:[#allocation97_spill] sm:$0xff] }
 0x998   : > { %v2983_v48 = vmul.f32 %v10193_v41, %v2919_v35 }
 0x999   : > { %3284 = vst.msk [vmem:[#allocation4 + $0xe8] sm:$0xff] %vm3254_vm1, %v3219_v10  ;;  %v2921_v10 = vld [vmem:[#allocation4 + $0x198] sm:$0xff] }
 0x99a   : > { %v3093_v58 = vpop.xlane.xlu1 %3092 }
 0x99b   : > { %v3221_v43 = vadd.f32 %v3093_v58, %v2965_v1  ;;  %v10194_v1 = vld [vmem:[#allocation100_spill] sm:$0xff] }
 0x99c   : > { %v2985_v58 = vmul.f32 %v10194_v1, %v2921_v10 }
 0x99d   : > { %3286 = vst.msk [vmem:[#allocation4 + $0xf8] sm:$0xff] %vm3254_vm1, %v3221_v43  ;;  %v2923_v43 = vld [vmem:[#allocation4 + $0x1a8] sm:$0xff] }
 0x99e   : > { %v3099_v29 = vpop.xlane.xlu1 %3098 }
 0x99f   : > { %v3223_v20 = vadd.f32 %v3099_v29, %v2967_v49  ;;  %v10195_v49 = vld [vmem:[#allocation126_spill] sm:$0xff] }
 0x9a0   : > { %v2987_v29 = vmul.f32 %v10195_v49, %v2923_v43 }
 0x9a1   : > { %3288 = vst.msk [vmem:[#allocation4 + $0x108] sm:$0xff] %vm3254_vm1, %v3223_v20  ;;  %v2925_v20 = vld [vmem:[#allocation4 + $0x1b8] sm:$0xff] }
 0x9a2   : > { %v3105_v51 = vpop.xlane.xlu1 %3104 }
 0x9a3   : > { %v3186_v17 = vpop.xlane.xlu0 %3185  ;;  %v3225_v21 = vadd.f32 %v3105_v51, %v2969_v28  ;;  %v2989_v28 = vmul.f32 %v10196_v50, %v2925_v20 }
 0x9a4   : > { %v3252_v23 = vadd.f32 %v3186_v17, %v2996_v46  ;;  %v2927_v46 = vld [vmem:[#allocation4 + $0x1c8] sm:$0xff] }
 0x9a5   : > { %3290 = vst.msk [vmem:[#allocation4 + $0x118] sm:$0xff] %vm3254_vm1, %v3225_v21  ;;  %v2991_v17 = vmul.f32 %v10197_v15, %v2927_v46 }
 0x9a6   : > { %3317 = vst.msk [vmem:[#allocation4 + $0x1f0] sm:$0xff] %vm3254_vm1, %v3252_v23  ;;  %v4105_v2 = vpop.f32.mrf.mxu1  ;;  %v3111_v54 = vpop.xlane.xlu1 %3110  ;;  %v2929_v23 = vld [vmem:[#allocation4 + $0x1d8] sm:$0xff] }
 0x9a7   : > { %v4180_v12 = vadd.f32 %v4105_v2, %v3763_v63  ;;  %v3227_v13 = vadd.f32 %v3111_v54, %v2971_v36  ;;  %v2993_v36 = vmul.f32 %v10198_v60, %v2929_v23  ;;  %v2931_v2 = vld [vmem:[#allocation4 + $0x1e8] sm:$0xff] }
 0x9a8   : > { %v4107_v19 = vpop.f32.mrf.mxu1 }
 0x9a9   : > { %4244 = vst [vmem:[#allocation5 + $0x158] sm:$0xff] %v4180_v12  ;;  %3292 = vst.msk [vmem:[#allocation4 + $0x128] sm:$0xff] %vm3254_vm1, %v3227_v13  ;;  %v2995_v12 = vmul.f32 %v10199_v0, %v2931_v2  ;;  %v2933_v19 = vld [vmem:[#allocation4 + $0x1f8] sm:$0xff] }
 0x9aa   : > { %v4108_v47 = vpop.f32.mrf.mxu1  ;;  %v3117_v4 = vpop.xlane.xlu1 %3116  ;;  %v2997_v32 = vmul.f32 %v9061_v31, %v2933_v19 }
 0x9ab   : > { %v4181_v52 = vadd.f32 %v4108_v47, %v3764_v27  ;;  %v3229_v61 = vadd.f32 %v3117_v4, %v2973_v9  ;;  %v3382_v47 = vld [vmem:[#allocation5 + $0xa0] sm:$0xff]  ;;  %v3701_v4 = vpop.permute.xlu0 %3700 }
 0x9ac   : > { %v4110_v55 = vpop.f32.mrf.mxu1  ;;  %v3766_v38 = vmul.f32 %v3701_v4, %v3382_v47 }
 0x9ad   : > { %4245 = vst [vmem:[#allocation5 + $0x10] sm:$0xff] %v4181_v52  ;;  %3294 = vst.msk [vmem:[#allocation4 + $0x138] sm:$0xff] %vm3254_vm1, %v3229_v61  ;;  %v3381_v61 = vld [vmem:[#allocation5 + $0x58] sm:$0xff] }
 0x9ae   : > { %v3123_v8 = vpop.xlane.xlu1 %3122 }
 0x9af   : > { %v3231_v53 = vadd.f32 %v3123_v8, %v2975_v6 }
 0x9b1   : > { %3296 = vst.msk [vmem:[#allocation4 + $0x148] sm:$0xff] %vm3254_vm1, %v3231_v53 }
 0x9b2   : > { %v3129_v14 = vpop.xlane.xlu1 %3128 }
 0x9b3   : > { %v3233_v59 = vadd.f32 %v3129_v14, %v2977_v39 }
 0x9b5   : > { %3298 = vst.msk [vmem:[#allocation4 + $0x158] sm:$0xff] %vm3254_vm1, %v3233_v59 }
 0x9b6   : > { %v3135_v42 = vpop.xlane.xlu1 %3134 }
 0x9b7   : > { %v3235_v62 = vadd.f32 %v3135_v42, %v2979_v40 }
 0x9b9   : > { %3300 = vst.msk [vmem:[#allocation4 + $0x168] sm:$0xff] %vm3254_vm1, %v3235_v62 }
 0x9ba   : > { %v3141_v18 = vpop.xlane.xlu1 %3140 }
 0x9bb   : > { %v3237_v5 = vadd.f32 %v3141_v18, %v2981_v7 }
 0x9bd   : > { %3302 = vst.msk [vmem:[#allocation4 + $0x178] sm:$0xff] %vm3254_vm1, %v3237_v5 }
 0x9be   : > { %v3147_v26 = vpop.xlane.xlu1 %3146 }
 0x9bf   : > { %v3239_v57 = vadd.f32 %v3147_v26, %v2983_v48 }
 0x9c1   : > { %3304 = vst.msk [vmem:[#allocation4 + $0x188] sm:$0xff] %vm3254_vm1, %v3239_v57 }
 0x9c2   : > { %v3153_v45 = vpop.xlane.xlu1 %3152 }
 0x9c3   : > { %v3241_v33 = vadd.f32 %v3153_v45, %v2985_v58 }
 0x9c5   : > { %3306 = vst.msk [vmem:[#allocation4 + $0x198] sm:$0xff] %vm3254_vm1, %v3241_v33 }
 0x9c6   : > { %v3159_v11 = vpop.xlane.xlu1 %3158 }
 0x9c7   : > { %v3243_v24 = vadd.f32 %v3159_v11, %v2987_v29 }
 0x9c9   : > { %3308 = vst.msk [vmem:[#allocation4 + $0x1a8] sm:$0xff] %vm3254_vm1, %v3243_v24 }
 0x9ca   : > { %v3165_v25 = vpop.xlane.xlu1 %3164 }
 0x9cb   : > { %v3245_v51 = vadd.f32 %v3165_v25, %v2989_v28 }
 0x9cd   : > { %3310 = vst.msk [vmem:[#allocation4 + $0x1b8] sm:$0xff] %vm3254_vm1, %v3245_v51 }
 0x9ce   : > { %v3171_v21 = vpop.xlane.xlu1 %3170 }
 0x9cf   : > { %v3247_v63 = vadd.f32 %v3171_v21, %v2991_v17 }
 0x9d1   : > { %3312 = vst.msk [vmem:[#allocation4 + $0x1c8] sm:$0xff] %vm3254_vm1, %v3247_v63 }
 0x9d2   : > { %v3177_v37 = vpop.xlane.xlu1 %3176 }
 0x9d3   : > { %v3249_v54 = vadd.f32 %v3177_v37, %v2993_v36 }
 0x9d5   : > { %3314 = vst.msk [vmem:[#allocation4 + $0x1d8] sm:$0xff] %vm3254_vm1, %v3249_v54 }
 0x9d6   : > { %v3183_v13 = vpop.xlane.xlu1 %3182 }
 0x9d7   : > { %v3251_v27 = vadd.f32 %v3183_v13, %v2995_v12 }
 0x9d9   : > { %3316 = vst.msk [vmem:[#allocation4 + $0x1e8] sm:$0xff] %vm3254_vm1, %v3251_v27 }
 0x9da   : > { %v3189_v9 = vpop.xlane.xlu1 %3188 }
 0x9db   : > { %v4113_v34 = vpop.f32.mrf.mxu1  ;;  %v3253_v52 = vadd.f32 %v3189_v9, %v2997_v32 }
 0x9dd   : > { %3318 = vst.msk [vmem:[#allocation4 + $0x1f8] sm:$0xff] %vm3254_vm1, %v3253_v52  ;;  %v4115_v55 = vpop.f32.mrf.mxu1 }
 0x9de   : > { %v3696_v6 = vpop.permute.xlu1 %3695 }
 0x9df   : > { %v4116_v8 = vpop.f32.mrf.mxu1  ;;  %v3765_v22 = vmul.f32 %v3696_v6, %v3381_v61  ;;  %4315 = sbr.rel (%p5231_p6) target bundleno = 2799 (0xaef), region = 52 }
 0x9e0   : > { %v4183_v53 = vadd.f32 %v4116_v8, %v3766_v38 }
 0x9e1   : > { %v4182_v16 = vadd.f32 %v4113_v34, %v3765_v22  ;;  %v4118_v39 = vpop.f32.mrf.mxu1 }
 0x9e2   : > { %4247 = vst [vmem:[#allocation5 + $0xa0] sm:$0xff] %v4183_v53 }
 0x9e3   : > { %4246 = vst [vmem:[#allocation5 + $0x58] sm:$0xff] %v4182_v16 }
 0x9e4   : > { %v4318_v31 = vld [vmem:[#allocation4 + $0x10] sm:$0xff]  ;;  %v4316_v14 = vld [vmem:[#allocation4] sm:$0xff]  ;;  %v4319_v30 = vld [vmem:[#allocation4 + $0x18] sm:$0xff]  ;;  %v6460_v59 = vmov 0  }
 0x9e5   : > { %6113 = vset.pattern.permute.xlu1 %v6460_v59  ;;  %6112 = vset.pattern.permute.xlu0 %v6460_v59  ;;  %6114 = vrcp.f32 %v4318_v31  ;;  %v4317_v44 = vld [vmem:[#allocation4 + $0x8] sm:$0xff]  ;;  %v4320_v42 = vld [vmem:[#allocation4 + $0x20] sm:$0xff]  ;;  %v4323_v56 = vld [vmem:[#allocation4 + $0x38] sm:$0xff] }
 0x9e6   : > { %6116 = vrcp.f32 %v4316_v14  ;;  %v4321_v40 = vld [vmem:[#allocation4 + $0x28] sm:$0xff]  ;;  %v4322_v62 = vld [vmem:[#allocation4 + $0x30] sm:$0xff]  ;;  %v4324_v7 = vld [vmem:[#allocation4 + $0x40] sm:$0xff] }
 0x9e7   : > { %6118 = vrcp.f32 %v4319_v30  ;;  %v4325_v3 = vld [vmem:[#allocation4 + $0x48] sm:$0xff]  ;;  %v4327_v41 = vld [vmem:[#allocation4 + $0x58] sm:$0xff]  ;;  %v4326_v26 = vld [vmem:[#allocation4 + $0x50] sm:$0xff] }
 0x9e8   : > { %6120 = vrcp.f32 %v4317_v44  ;;  %v4329_v57 = vld [vmem:[#allocation4 + $0x68] sm:$0xff]  ;;  %v4328_v58 = vld [vmem:[#allocation4 + $0x60] sm:$0xff]  ;;  %v4331_v43 = vld [vmem:[#allocation4 + $0x78] sm:$0xff] }
 0x9e9   : > { %6122 = vrcp.f32 %v4321_v40  ;;  %v4330_v49 = vld [vmem:[#allocation4 + $0x70] sm:$0xff]  ;;  %v4333_v11 = vld [vmem:[#allocation4 + $0x88] sm:$0xff]  ;;  %v4332_v24 = vld [vmem:[#allocation4 + $0x80] sm:$0xff] }
 0x9ea   : > { %6124 = vrcp.f32 %v4320_v42  ;;  %v4335_v28 = vld [vmem:[#allocation4 + $0x98] sm:$0xff]  ;;  %v4334_v46 = vld [vmem:[#allocation4 + $0x90] sm:$0xff]  ;;  %v4337_v15 = vld [vmem:[#allocation4 + $0xa8] sm:$0xff] }
 0x9eb   : > { %6126 = vrcp.f32 %v4323_v56  ;;  %v4336_v21 = vld [vmem:[#allocation4 + $0xa0] sm:$0xff]  ;;  %v4339_v63 = vld [vmem:[#allocation4 + $0xb8] sm:$0xff]  ;;  %v4338_v36 = vld [vmem:[#allocation4 + $0xb0] sm:$0xff] }
 0x9ec   : > { %6128 = vrcp.f32 %v4322_v62  ;;  %v4341_v2 = vld [vmem:[#allocation4 + $0xc8] sm:$0xff]  ;;  %v4340_v0 = vld [vmem:[#allocation4 + $0xc0] sm:$0xff]  ;;  %v4343_v13 = vld [vmem:[#allocation4 + $0xd8] sm:$0xff] }
 0x9ed   : > { %6130 = vrcp.f32 %v4325_v3  ;;  %v4342_v27 = vld [vmem:[#allocation4 + $0xd0] sm:$0xff]  ;;  %v4345_v9 = vld [vmem:[#allocation4 + $0xe8] sm:$0xff]  ;;  %v4344_v4 = vld [vmem:[#allocation4 + $0xe0] sm:$0xff] }
 0x9ee   : > { %6132 = vrcp.f32 %v4324_v7  ;;  %v4347_v52 = vld [vmem:[#allocation4 + $0xf8] sm:$0xff]  ;;  %v4346_v55 = vld [vmem:[#allocation4 + $0xf0] sm:$0xff]  ;;  %v4349_v6 = vld [vmem:[#allocation4 + $0x108] sm:$0xff] }
 0x9ef   : > { %6134 = vrcp.f32 %v4327_v41  ;;  %v4348_v22 = vld [vmem:[#allocation4 + $0x100] sm:$0xff]  ;;  %v4351_v16 = vld [vmem:[#allocation4 + $0x118] sm:$0xff]  ;;  %v4350_v31 = vld [vmem:[#allocation4 + $0x110] sm:$0xff] }
 0x9f0   : > { %6136 = vrcp.f32 %v4326_v26  ;;  %v4353_v30 = vld [vmem:[#allocation4 + $0x128] sm:$0xff]  ;;  %v4352_v44 = vld [vmem:[#allocation4 + $0x120] sm:$0xff]  ;;  %v4355_v42 = vld [vmem:[#allocation4 + $0x138] sm:$0xff] }
 0x9f1   : > { %6138 = vrcp.f32 %v4329_v57  ;;  %v4354_v62 = vld [vmem:[#allocation4 + $0x130] sm:$0xff]  ;;  %v4357_v7 = vld [vmem:[#allocation4 + $0x148] sm:$0xff]  ;;  %v4359_v41 = vld [vmem:[#allocation4 + $0x158] sm:$0xff] }
 0x9f2   : > { %v6115_v18 = vpop.eup %6114  ;;  %6140 = vrcp.f32 %v4328_v58  ;;  %v4358_v26 = vld [vmem:[#allocation4 + $0x150] sm:$0xff]  ;;  %v4361_v57 = vld [vmem:[#allocation4 + $0x168] sm:$0xff]  ;;  %v4360_v58 = vld [vmem:[#allocation4 + $0x160] sm:$0xff] }
 0x9f3   : > { %v6117_v35 = vpop.eup %6116  ;;  %4520 = vperm.xlu1 %6113, %v6115_v18   ;;  %6142 = vrcp.f32 %v4331_v43  ;;  %v4363_v43 = vld [vmem:[#allocation4 + $0x178] sm:$0xff] }
 0x9f4   : > { %v6119_v5 = vpop.eup %6118  ;;  %4510 = vperm.xlu0 %6112, %v6117_v35   ;;  %6144 = vrcp.f32 %v4330_v49  ;;  %v4356_v35 = vld [vmem:[#allocation4 + $0x140] sm:$0xff]  ;;  %v4362_v49 = vld [vmem:[#allocation4 + $0x170] sm:$0xff] }
 0x9f5   : > { %v6121_v48 = vpop.eup %6120  ;;  %6146 = vrcp.f32 %v4333_v11  ;;  %v4365_v11 = vld [vmem:[#allocation4 + $0x188] sm:$0xff] }
 0x9f6   : > { %v6123_v10 = vpop.eup %6122  ;;  %6148 = vrcp.f32 %v4332_v24  ;;  %v4364_v24 = vld [vmem:[#allocation4 + $0x180] sm:$0xff] }
 0x9f7   : > { %4525 = vperm.xlu1 %6113, %v6119_v5   ;;  %v6125_v1 = vpop.eup %6124  ;;  %6150 = vrcp.f32 %v4335_v28  ;;  %v4367_v28 = vld [vmem:[#allocation4 + $0x198] sm:$0xff] }
 0x9f8   : > { %4515 = vperm.xlu0 %6112, %v6121_v48   ;;  %v6127_v45 = vpop.eup %6126  ;;  %6152 = vrcp.f32 %v4334_v46  ;;  %v4366_v46 = vld [vmem:[#allocation4 + $0x190] sm:$0xff] }
 0x9f9   : > { %v6129_v33 = vpop.eup %6128  ;;  %6154 = vrcp.f32 %v4337_v15  ;;  %v4369_v15 = vld [vmem:[#allocation4 + $0x1a8] sm:$0xff] }
 0x9fa   : > { %v6131_v29 = vpop.eup %6130  ;;  %6156 = vrcp.f32 %v4336_v21  ;;  %v4368_v21 = vld [vmem:[#allocation4 + $0x1a0] sm:$0xff] }
 0x9fb   : > { %4535 = vperm.xlu1 %6113, %v6123_v10   ;;  %v6133_v20 = vpop.eup %6132  ;;  %6158 = vrcp.f32 %v4339_v63  ;;  %v4371_v63 = vld [vmem:[#allocation4 + $0x1b8] sm:$0xff] }
 0x9fc   : > { %4530 = vperm.xlu0 %6112, %v6125_v1   ;;  %v6135_v50 = vpop.eup %6134  ;;  %6160 = vrcp.f32 %v4338_v36  ;;  %v4370_v36 = vld [vmem:[#allocation4 + $0x1b0] sm:$0xff] }
 0x9fd   : > { %v6137_v25 = vpop.eup %6136  ;;  %6162 = vrcp.f32 %v4341_v2  ;;  %v4373_v2 = vld [vmem:[#allocation4 + $0x1c8] sm:$0xff] }
 0x9fe   : > { %v6139_v51 = vpop.eup %6138  ;;  %6164 = vrcp.f32 %v4340_v0  ;;  %v4372_v0 = vld [vmem:[#allocation4 + $0x1c0] sm:$0xff] }
 0x9ff   : > { %4545 = vperm.xlu1 %6113, %v6127_v45   ;;  %v6141_v17 = vpop.eup %6140  ;;  %6166 = vrcp.f32 %v4343_v13  ;;  %v4375_v13 = vld [vmem:[#allocation4 + $0x1d8] sm:$0xff] }
 0xa00   : > { %4540 = vperm.xlu0 %6112, %v6129_v33   ;;  %v6143_v23 = vpop.eup %6142  ;;  %6168 = vrcp.f32 %v4342_v27  ;;  %v4374_v27 = vld [vmem:[#allocation4 + $0x1d0] sm:$0xff] }
 0xa01   : > { %v6145_v60 = vpop.eup %6144  ;;  %6170 = vrcp.f32 %v4345_v9  ;;  %v4377_v9 = vld [vmem:[#allocation4 + $0x1e8] sm:$0xff] }
 0xa02   : > { %v6147_v37 = vpop.eup %6146  ;;  %6172 = vrcp.f32 %v4344_v4  ;;  %v4376_v4 = vld [vmem:[#allocation4 + $0x1e0] sm:$0xff] }
 0xa03   : > { %4555 = vperm.xlu1 %6113, %v6131_v29   ;;  %v6149_v54 = vpop.eup %6148  ;;  %6174 = vrcp.f32 %v4347_v52  ;;  %v4379_v52 = vld [vmem:[#allocation4 + $0x1f8] sm:$0xff] }
 0xa04   : > { %4550 = vperm.xlu0 %6112, %v6133_v20   ;;  %v6151_v12 = vpop.eup %6150  ;;  %6176 = vrcp.f32 %v4346_v55  ;;  %v4378_v55 = vld [vmem:[#allocation4 + $0x1f0] sm:$0xff] }
 0xa05   : > { %v6153_v19 = vpop.eup %6152  ;;  %6178 = vrcp.f32 %v4349_v6 }
 0xa06   : > { %v6155_v32 = vpop.eup %6154  ;;  %6180 = vrcp.f32 %v4348_v22 }
 0xa07   : > { %4565 = vperm.xlu1 %6113, %v6135_v50   ;;  %v6157_v47 = vpop.eup %6156  ;;  %6182 = vrcp.f32 %v4351_v16 }
 0xa08   : > { %4560 = vperm.xlu0 %6112, %v6137_v25   ;;  %v6159_v34 = vpop.eup %6158  ;;  %6184 = vrcp.f32 %v4350_v31  ;;  %v4446_v31 = vld [vmem:[#allocation5 + $0xd8] sm:$0xff] }
 0xa09   : > { %v6161_v61 = vpop.eup %6160  ;;  %6186 = vrcp.f32 %v4353_v30  ;;  %v4444_v30 = vld [vmem:[#allocation5 + $0xb0] sm:$0xff] }
 0xa0a   : > { %v6163_v38 = vpop.eup %6162  ;;  %6188 = vrcp.f32 %v4352_v44 }
 0xa0b   : > { %4575 = vperm.xlu1 %6113, %v6139_v51   ;;  %v6165_v8 = vpop.eup %6164  ;;  %6190 = vrcp.f32 %v4355_v42 }
 0xa0c   : > { %4570 = vperm.xlu0 %6112, %v6141_v17   ;;  %v6167_v53 = vpop.eup %6166  ;;  %6192 = vrcp.f32 %v4354_v62  ;;  %v4445_v62 = vld [vmem:[#allocation5 + $0x1b0] sm:$0xff] }
 0xa0d   : > { %v6169_v39 = vpop.eup %6168  ;;  %6194 = vrcp.f32 %v4357_v7 }
 0xa0e   : > { %v6171_v14 = vpop.eup %6170  ;;  %6196 = vrcp.f32 %v4356_v35 }
 0xa0f   : > { %4585 = vperm.xlu1 %6113, %v6143_v23   ;;  %v6173_v59 = vpop.eup %6172  ;;  %6198 = vrcp.f32 %v4359_v41  ;;  %v4448_v41 = vld [vmem:[#allocation5 + $0x50] sm:$0xff] }
 0xa10   : > { %4580 = vperm.xlu0 %6112, %v6145_v60   ;;  %v6175_v40 = vpop.eup %6174  ;;  %6200 = vrcp.f32 %v4358_v26 }
 0xa11   : > { %v6177_v56 = vpop.eup %6176  ;;  %6202 = vrcp.f32 %v4361_v57 }
 0xa12   : > { %v6179_v3 = vpop.eup %6178  ;;  %6204 = vrcp.f32 %v4360_v58  ;;  %v4450_v58 = vld [vmem:[#allocation5 + $0x130] sm:$0xff] }
 0xa13   : > { %4595 = vperm.xlu1 %6113, %v6147_v37   ;;  %v6181_v18 = vpop.eup %6180  ;;  %6206 = vrcp.f32 %v4363_v43 }
 0xa14   : > { %4590 = vperm.xlu0 %6112, %v6149_v54   ;;  %v6183_v5 = vpop.eup %6182  ;;  %6208 = vrcp.f32 %v4362_v49 }
 0xa15   : > { %v6185_v48 = vpop.eup %6184  ;;  %6210 = vrcp.f32 %v4365_v11  ;;  %v4452_v11 = vld [vmem:[#allocation5 + $0x180] sm:$0xff] }
 0xa16   : > { %v6187_v10 = vpop.eup %6186  ;;  %6212 = vrcp.f32 %v4364_v24 }
 0xa17   : > { %4605 = vperm.xlu1 %6113, %v6151_v12   ;;  %v6189_v1 = vpop.eup %6188  ;;  %6214 = vrcp.f32 %v4367_v28 }
 0xa18   : > { %4600 = vperm.xlu0 %6112, %v6153_v19   ;;  %v6191_v45 = vpop.eup %6190  ;;  %6216 = vrcp.f32 %v4366_v46  ;;  %v4454_v46 = vld [vmem:[#allocation5 + $0x118] sm:$0xff] }
 0xa19   : > { %v6193_v33 = vpop.eup %6192  ;;  %6218 = vrcp.f32 %v4369_v15 }
 0xa1a   : > { %v6195_v29 = vpop.eup %6194  ;;  %6220 = vrcp.f32 %v4368_v21 }
 0xa1b   : > { %4615 = vperm.xlu1 %6113, %v6155_v32   ;;  %v6197_v20 = vpop.eup %6196  ;;  %6222 = vrcp.f32 %v4371_v63  ;;  %v4456_v63 = vld [vmem:[#allocation5 + $0x120] sm:$0xff] }
 0xa1c   : > { %4610 = vperm.xlu0 %6112, %v6157_v47   ;;  %v6199_v50 = vpop.eup %6198  ;;  %6224 = vrcp.f32 %v4370_v36 }
 0xa1d   : > { %v6201_v25 = vpop.eup %6200  ;;  %6226 = vrcp.f32 %v4373_v2 }
 0xa1e   : > { %v6203_v51 = vpop.eup %6202  ;;  %6228 = vrcp.f32 %v4372_v0  ;;  %v4458_v0 = vld [vmem:[#allocation5 + $0x108] sm:$0xff] }
 0xa1f   : > { %4625 = vperm.xlu1 %6113, %v6159_v34   ;;  %v6205_v17 = vpop.eup %6204  ;;  %6230 = vrcp.f32 %v4375_v13 }
 0xa20   : > { %4620 = vperm.xlu0 %6112, %v6161_v61   ;;  %v6207_v23 = vpop.eup %6206  ;;  %6232 = vrcp.f32 %v4374_v27 }
 0xa21   : > { %v6209_v60 = vpop.eup %6208  ;;  %6234 = vrcp.f32 %v4377_v9  ;;  %v4460_v9 = vld [vmem:[#allocation5 + $0xe0] sm:$0xff] }
 0xa22   : > { %v6211_v37 = vpop.eup %6210  ;;  %6236 = vrcp.f32 %v4376_v4 }
 0xa23   : > { %4635 = vperm.xlu1 %6113, %v6163_v38   ;;  %v6213_v54 = vpop.eup %6212  ;;  %6238 = vrcp.f32 %v4379_v52 }
 0xa24   : > { %4630 = vperm.xlu0 %6112, %v6165_v8   ;;  %v6215_v12 = vpop.eup %6214  ;;  %6240 = vrcp.f32 %v4378_v55  ;;  %v4462_v55 = vld [vmem:[#allocation5 + $0x138] sm:$0xff] }
 0xa25   : > { %v6217_v19 = vpop.eup %6216 }
 0xa26   : > { %v6219_v32 = vpop.eup %6218 }
 0xa27   : > { %4645 = vperm.xlu1 %6113, %v6167_v53   ;;  %v6221_v47 = vpop.eup %6220 }
 0xa28   : > { %4640 = vperm.xlu0 %6112, %v6169_v39   ;;  %v6223_v34 = vpop.eup %6222 }
 0xa29   : > { %v6225_v61 = vpop.eup %6224 }
 0xa2a   : > { %v6227_v38 = vpop.eup %6226 }
 0xa2b   : > { %4655 = vperm.xlu1 %6113, %v6171_v14   ;;  %v6229_v6 = vpop.eup %6228 }
 0xa2c   : > { %4650 = vperm.xlu0 %6112, %v6173_v59   ;;  %v6231_v8 = vpop.eup %6230 }
 0xa2d   : > { %v6233_v22 = vpop.eup %6232 }
 0xa2e   : > { %v6235_v53 = vpop.eup %6234 }
 0xa2f   : > { %4665 = vperm.xlu1 %6113, %v6175_v40   ;;  %v6237_v16 = vpop.eup %6236 }
 0xa30   : > { %4660 = vperm.xlu0 %6112, %v6177_v56   ;;  %v6239_v39 = vpop.eup %6238  ;;  %v4447_v56 = vld [vmem:[#allocation5 + $0x18] sm:$0xff] }
 0xa31   : > { %v6241_v14 = vpop.eup %6240 }
 0xa33   : > { %4675 = vperm.xlu1 %6113, %v6179_v3  }
 0xa34   : > { %4670 = vperm.xlu0 %6112, %v6181_v18  }
 0xa37   : > { %4685 = vperm.xlu1 %6113, %v6183_v5   ;;  %v4449_v5 = vld [vmem:[#allocation5 + $0x168] sm:$0xff] }
 0xa38   : > { %4680 = vperm.xlu0 %6112, %v6185_v48  }
 0xa3b   : > { %4695 = vperm.xlu1 %6113, %v6187_v10  }
 0xa3c   : > { %4690 = vperm.xlu0 %6112, %v6189_v1   ;;  %v4451_v1 = vld [vmem:[#allocation5 + $0x48] sm:$0xff] }
 0xa3f   : > { %4705 = vperm.xlu1 %6113, %v6191_v45  }
 0xa40   : > { %4700 = vperm.xlu0 %6112, %v6193_v33  }
 0xa43   : > { %4715 = vperm.xlu1 %6113, %v6195_v29   ;;  %v4453_v29 = vld [vmem:[#allocation5 + $0x110] sm:$0xff] }
 0xa44   : > { %4710 = vperm.xlu0 %6112, %v6197_v20  }
 0xa47   : > { %4725 = vperm.xlu1 %6113, %v6199_v50  }
 0xa48   : > { %4720 = vperm.xlu0 %6112, %v6201_v25   ;;  %v4455_v25 = vld [vmem:[#allocation5 + $0x98] sm:$0xff] }
 0xa4b   : > { %4735 = vperm.xlu1 %6113, %v6203_v51  }
 0xa4c   : > { %4730 = vperm.xlu0 %6112, %v6205_v17  }
 0xa4f   : > { %4745 = vperm.xlu1 %6113, %v6207_v23   ;;  %v4457_v23 = vld [vmem:[#allocation5 + $0x150] sm:$0xff] }
 0xa50   : > { %4740 = vperm.xlu0 %6112, %v6209_v60  }
 0xa53   : > { %4755 = vperm.xlu1 %6113, %v6211_v37  }
 0xa54   : > { %4750 = vperm.xlu0 %6112, %v6213_v54   ;;  %v4459_v54 = vld [vmem:[#allocation5 + $0x60] sm:$0xff] }
 0xa57   : > { %4765 = vperm.xlu1 %6113, %v6215_v12  }
 0xa58   : > { %4760 = vperm.xlu0 %6112, %v6217_v19  }
 0xa5b   : > { %4775 = vperm.xlu1 %6113, %v6219_v32   ;;  %v4461_v32 = vld [vmem:[#allocation5 + $0x188] sm:$0xff] }
 0xa5c   : > { %4770 = vperm.xlu0 %6112, %v6221_v47  }
 0xa5f   : > { %4785 = vperm.xlu1 %6113, %v6223_v34  }
 0xa60   : > { %4780 = vperm.xlu0 %6112, %v6225_v61   ;;  %v4463_v61 = vld [vmem:[#allocation5 + $0x140] sm:$0xff] }
 0xa63   : > { %4795 = vperm.xlu1 %6113, %v6227_v38  }
 0xa64   : > { %4790 = vperm.xlu0 %6112, %v6229_v6  }
 0xa67   : > { %4805 = vperm.xlu1 %6113, %v6231_v8  }
 0xa68   : > { %4800 = vperm.xlu0 %6112, %v6233_v22  }
 0xa6b   : > { %4815 = vperm.xlu1 %6113, %v6235_v53   ;;  %v4465_v53 = vld [vmem:[#allocation5 + $0x1a8] sm:$0xff] }
 0xa6c   : > { %4810 = vperm.xlu0 %6112, %v6237_v16   ;;  %v4464_v16 = vld [vmem:[#allocation5 + $0x80] sm:$0xff] }
 0xa6e   : > { %v4521_v59 = vpop.permute.xlu1 %4520 }
 0xa6f   : > { %v4830_v44 = vmul.f32 %v4521_v59, %v4446_v31  ;;  %v4511_v40 = vpop.permute.xlu0 %4510  ;;  %4825 = vperm.xlu1 %6113, %v6239_v39   ;;  %v4467_v59 = vld [vmem:[#allocation5 + $0x28] sm:$0xff] }
 0xa70   : > { %v4828_v42 = vmul.f32 %v4511_v40, %v4444_v30  ;;  %4820 = vperm.xlu0 %6112, %v6241_v14  }
 0xa71   : > { %4894 = vst [vmem:[%s6705_s12 + $0x10] sm:$0xff] %v4830_v44  ;;  %v4466_v44 = vld [vmem:[#allocation5 + $0x1b8] sm:$0xff] }
 0xa72   : > { %4892 = vst [vmem:[%s6705_s12] sm:$0xff] %v4828_v42  ;;  %v4526_v3 = vpop.permute.xlu1 %4525 }
 0xa73   : > { %v4831_v7 = vmul.f32 %v4526_v3, %v4447_v56  ;;  %v4516_v18 = vpop.permute.xlu0 %4515  ;;  %v4469_v3 = vld [vmem:[#allocation5 + $0xf8] sm:$0xff] }
 0xa74   : > { %v4829_v35 = vmul.f32 %v4516_v18, %v4445_v62 }
 0xa75   : > { %4895 = vst [vmem:[%s6705_s12 + $0x18] sm:$0xff] %v4831_v7  ;;  %v4468_v7 = vld [vmem:[#allocation5 + $0x1e8] sm:$0xff] }
 0xa76   : > { %4893 = vst [vmem:[%s6705_s12 + $0x8] sm:$0xff] %v4829_v35  ;;  %v4536_v48 = vpop.permute.xlu1 %4535 }
 0xa77   : > { %v4833_v26 = vmul.f32 %v4536_v48, %v4449_v5  ;;  %v4531_v10 = vpop.permute.xlu0 %4530  ;;  %v4471_v48 = vld [vmem:[#allocation5 + $0x30] sm:$0xff] }
 0xa78   : > { %v4832_v57 = vmul.f32 %v4531_v10, %v4448_v41 }
 0xa79   : > { %4897 = vst [vmem:[%s6705_s12 + $0x28] sm:$0xff] %v4833_v26  ;;  %v4470_v26 = vld [vmem:[#allocation5 + $0x160] sm:$0xff] }
 0xa7a   : > { %4896 = vst [vmem:[%s6705_s12 + $0x20] sm:$0xff] %v4832_v57  ;;  %v4546_v45 = vpop.permute.xlu1 %4545 }
 0xa7b   : > { %v4835_v43 = vmul.f32 %v4546_v45, %v4451_v1  ;;  %v4541_v33 = vpop.permute.xlu0 %4540  ;;  %v4473_v45 = vld [vmem:[#allocation5] sm:$0xff] }
 0xa7c   : > { %v4834_v49 = vmul.f32 %v4541_v33, %v4450_v58 }
 0xa7d   : > { %4899 = vst [vmem:[%s6705_s12 + $0x38] sm:$0xff] %v4835_v43  ;;  %v4472_v43 = vld [vmem:[#allocation5 + $0x1e0] sm:$0xff] }
 0xa7e   : > { %4898 = vst [vmem:[%s6705_s12 + $0x30] sm:$0xff] %v4834_v49  ;;  %v4556_v20 = vpop.permute.xlu1 %4555 }
 0xa7f   : > { %v4837_v24 = vmul.f32 %v4556_v20, %v4453_v29  ;;  %v4551_v50 = vpop.permute.xlu0 %4550  ;;  %v4475_v20 = vld [vmem:[#allocation5 + $0x8] sm:$0xff] }
 0xa80   : > { %v4836_v28 = vmul.f32 %v4551_v50, %v4452_v11 }
 0xa81   : > { %4901 = vst [vmem:[%s6705_s12 + $0x48] sm:$0xff] %v4837_v24  ;;  %v4474_v24 = vld [vmem:[#allocation5 + $0xf0] sm:$0xff] }
 0xa82   : > { %4900 = vst [vmem:[%s6705_s12 + $0x40] sm:$0xff] %v4836_v28  ;;  %v4566_v51 = vpop.permute.xlu1 %4565 }
 0xa83   : > { %v4839_v15 = vmul.f32 %v4566_v51, %v4455_v25  ;;  %v4561_v17 = vpop.permute.xlu0 %4560  ;;  %v4477_v51 = vld [vmem:[#allocation5 + $0x1d0] sm:$0xff] }
 0xa84   : > { %v4838_v21 = vmul.f32 %v4561_v17, %v4454_v46 }
 0xa85   : > { %4903 = vst [vmem:[%s6705_s12 + $0x58] sm:$0xff] %v4839_v15  ;;  %v4476_v15 = vld [vmem:[#allocation5 + $0x148] sm:$0xff] }
 0xa86   : > { %4902 = vst [vmem:[%s6705_s12 + $0x50] sm:$0xff] %v4838_v21  ;;  %v4576_v60 = vpop.permute.xlu1 %4575 }
 0xa87   : > { %v4841_v36 = vmul.f32 %v4576_v60, %v4457_v23  ;;  %v4571_v37 = vpop.permute.xlu0 %4570  ;;  %v4479_v60 = vld [vmem:[#allocation5 + $0xc8] sm:$0xff] }
 0xa88   : > { %v4840_v2 = vmul.f32 %v4571_v37, %v4456_v63 }
 0xa89   : > { %4905 = vst [vmem:[%s6705_s12 + $0x68] sm:$0xff] %v4841_v36  ;;  %v4478_v36 = vld [vmem:[#allocation5 + $0x100] sm:$0xff] }
 0xa8a   : > { %4904 = vst [vmem:[%s6705_s12 + $0x60] sm:$0xff] %v4840_v2  ;;  %v4586_v12 = vpop.permute.xlu1 %4585 }
 0xa8b   : > { %v4843_v13 = vmul.f32 %v4586_v12, %v4459_v54  ;;  %v4581_v19 = vpop.permute.xlu0 %4580  ;;  %v4481_v12 = vld [vmem:[#allocation5 + $0x1f8] sm:$0xff] }
 0xa8c   : > { %v4842_v27 = vmul.f32 %v4581_v19, %v4458_v0 }
 0xa8d   : > { %4907 = vst [vmem:[%s6705_s12 + $0x78] sm:$0xff] %v4843_v13  ;;  %v4480_v13 = vld [vmem:[#allocation5 + $0x40] sm:$0xff] }
 0xa8e   : > { %4906 = vst [vmem:[%s6705_s12 + $0x70] sm:$0xff] %v4842_v27  ;;  %v4596_v47 = vpop.permute.xlu1 %4595 }
 0xa8f   : > { %v4845_v4 = vmul.f32 %v4596_v47, %v4461_v32  ;;  %v4591_v34 = vpop.permute.xlu0 %4590  ;;  %v4483_v47 = vld [vmem:[#allocation5 + $0x128] sm:$0xff] }
 0xa90   : > { %v4844_v52 = vmul.f32 %v4591_v34, %v4460_v9 }
 0xa91   : > { %4909 = vst [vmem:[%s6705_s12 + $0x88] sm:$0xff] %v4845_v4  ;;  %v4482_v4 = vld [vmem:[#allocation5 + $0x20] sm:$0xff] }
 0xa92   : > { %4908 = vst [vmem:[%s6705_s12 + $0x80] sm:$0xff] %v4844_v52  ;;  %v4606_v38 = vpop.permute.xlu1 %4605 }
 0xa93   : > { %v4847_v6 = vmul.f32 %v4606_v38, %v4463_v61  ;;  %v4601_v8 = vpop.permute.xlu0 %4600  ;;  %v4485_v38 = vld [vmem:[#allocation5 + $0x1f0] sm:$0xff] }
 0xa94   : > { %v4846_v22 = vmul.f32 %v4601_v8, %v4462_v55 }
 0xa95   : > { %4911 = vst [vmem:[%s6705_s12 + $0x98] sm:$0xff] %v4847_v6  ;;  %v4484_v6 = vld [vmem:[#allocation5 + $0x1a0] sm:$0xff] }
 0xa96   : > { %4910 = vst [vmem:[%s6705_s12 + $0x90] sm:$0xff] %v4846_v22  ;;  %v4616_v39 = vpop.permute.xlu1 %4615 }
 0xa97   : > { %v4849_v31 = vmul.f32 %v4616_v39, %v4465_v53  ;;  %v4611_v14 = vpop.permute.xlu0 %4610  ;;  %v4487_v39 = vld [vmem:[#allocation5 + $0x78] sm:$0xff] }
 0xa98   : > { %v4848_v30 = vmul.f32 %v4611_v14, %v4464_v16 }
 0xa99   : > { %4913 = vst [vmem:[%s6705_s12 + $0xa8] sm:$0xff] %v4849_v31  ;;  %v4486_v31 = vld [vmem:[#allocation5 + $0xe8] sm:$0xff] }
 0xa9a   : > { %4912 = vst [vmem:[%s6705_s12 + $0xa0] sm:$0xff] %v4848_v30  ;;  %v4626_v40 = vpop.permute.xlu1 %4625 }
 0xa9b   : > { %v4851_v42 = vmul.f32 %v4626_v40, %v4467_v59  ;;  %v4621_v56 = vpop.permute.xlu0 %4620  ;;  %v4489_v40 = vld [vmem:[#allocation5 + $0x90] sm:$0xff] }
 0xa9c   : > { %v4850_v62 = vmul.f32 %v4621_v56, %v4466_v44 }
 0xa9d   : > { %4915 = vst [vmem:[%s6705_s12 + $0xb8] sm:$0xff] %v4851_v42  ;;  %v4488_v42 = vld [vmem:[#allocation5 + $0x70] sm:$0xff] }
 0xa9e   : > { %4914 = vst [vmem:[%s6705_s12 + $0xb0] sm:$0xff] %v4850_v62  ;;  %v4636_v18 = vpop.permute.xlu1 %4635 }
 0xa9f   : > { %v4853_v35 = vmul.f32 %v4636_v18, %v4469_v3  ;;  %v4631_v5 = vpop.permute.xlu0 %4630  ;;  %v4491_v18 = vld [vmem:[#allocation5 + $0xd0] sm:$0xff] }
 0xaa0   : > { %v4852_v41 = vmul.f32 %v4631_v5, %v4468_v7 }
 0xaa1   : > { %4917 = vst [vmem:[%s6705_s12 + $0xc8] sm:$0xff] %v4853_v35  ;;  %v4490_v35 = vld [vmem:[#allocation5 + $0x1d8] sm:$0xff] }
 0xaa2   : > { %4916 = vst [vmem:[%s6705_s12 + $0xc0] sm:$0xff] %v4852_v41  ;;  %v4646_v10 = vpop.permute.xlu1 %4645 }
 0xaa3   : > { %v4855_v57 = vmul.f32 %v4646_v10, %v4471_v48  ;;  %v4641_v1 = vpop.permute.xlu0 %4640  ;;  %v4493_v10 = vld [vmem:[#allocation5 + $0x88] sm:$0xff] }
 0xaa4   : > { %v4854_v58 = vmul.f32 %v4641_v1, %v4470_v26 }
 0xaa5   : > { %4919 = vst [vmem:[%s6705_s12 + $0xd8] sm:$0xff] %v4855_v57  ;;  %v4492_v57 = vld [vmem:[#allocation5 + $0xb8] sm:$0xff] }
 0xaa6   : > { %4918 = vst [vmem:[%s6705_s12 + $0xd0] sm:$0xff] %v4854_v58  ;;  %v4656_v33 = vpop.permute.xlu1 %4655 }
 0xaa7   : > { %v4857_v49 = vmul.f32 %v4656_v33, %v4473_v45  ;;  %v4651_v29 = vpop.permute.xlu0 %4650  ;;  %v4495_v33 = vld [vmem:[#allocation5 + $0x1c8] sm:$0xff] }
 0xaa8   : > { %v4856_v11 = vmul.f32 %v4651_v29, %v4472_v43 }
 0xaa9   : > { %4921 = vst [vmem:[%s6705_s12 + $0xe8] sm:$0xff] %v4857_v49  ;;  %v4494_v49 = vld [vmem:[#allocation5 + $0xa8] sm:$0xff] }
 0xaaa   : > { %4920 = vst [vmem:[%s6705_s12 + $0xe0] sm:$0xff] %v4856_v11  ;;  %v4666_v50 = vpop.permute.xlu1 %4665 }
 0xaab   : > { %v4859_v28 = vmul.f32 %v4666_v50, %v4475_v20  ;;  %v4661_v25 = vpop.permute.xlu0 %4660  ;;  %v4497_v50 = vld [vmem:[#allocation5 + $0x178] sm:$0xff] }
 0xaac   : > { %v4858_v46 = vmul.f32 %v4661_v25, %v4474_v24 }
 0xaad   : > { %4923 = vst [vmem:[%s6705_s12 + $0xf8] sm:$0xff] %v4859_v28  ;;  %v4496_v28 = vld [vmem:[#allocation5 + $0x170] sm:$0xff] }
 0xaae   : > { %4922 = vst [vmem:[%s6705_s12 + $0xf0] sm:$0xff] %v4858_v46  ;;  %v4676_v17 = vpop.permute.xlu1 %4675 }
 0xaaf   : > { %v4861_v21 = vmul.f32 %v4676_v17, %v4477_v51  ;;  %v4671_v23 = vpop.permute.xlu0 %4670  ;;  %v4499_v17 = vld [vmem:[#allocation5 + $0x190] sm:$0xff] }
 0xab0   : > { %v4860_v63 = vmul.f32 %v4671_v23, %v4476_v15 }
 0xab1   : > { %4925 = vst [vmem:[%s6705_s12 + $0x108] sm:$0xff] %v4861_v21  ;;  %v4498_v21 = vld [vmem:[#allocation5 + $0x68] sm:$0xff] }
 0xab2   : > { %4924 = vst [vmem:[%s6705_s12 + $0x100] sm:$0xff] %v4860_v63  ;;  %v4686_v37 = vpop.permute.xlu1 %4685 }
 0xab3   : > { %v4863_v2 = vmul.f32 %v4686_v37, %v4479_v60  ;;  %v4681_v54 = vpop.permute.xlu0 %4680  ;;  %v4501_v37 = vld [vmem:[#allocation5 + $0x38] sm:$0xff] }
 0xab4   : > { %v4862_v0 = vmul.f32 %v4681_v54, %v4478_v36 }
 0xab5   : > { %4927 = vst [vmem:[%s6705_s12 + $0x118] sm:$0xff] %v4863_v2  ;;  %v4500_v2 = vld [vmem:[#allocation5 + $0x198] sm:$0xff] }
 0xab6   : > { %4926 = vst [vmem:[%s6705_s12 + $0x110] sm:$0xff] %v4862_v0  ;;  %v4696_v19 = vpop.permute.xlu1 %4695 }
 0xab7   : > { %v4865_v27 = vmul.f32 %v4696_v19, %v4481_v12  ;;  %v4691_v32 = vpop.permute.xlu0 %4690  ;;  %v4503_v19 = vld [vmem:[#allocation5 + $0x1c0] sm:$0xff] }
 0xab8   : > { %v4864_v9 = vmul.f32 %v4691_v32, %v4480_v13 }
 0xab9   : > { %4929 = vst [vmem:[%s6705_s12 + $0x128] sm:$0xff] %v4865_v27  ;;  %v4502_v27 = vld [vmem:[#allocation5 + $0xc0] sm:$0xff] }
 0xaba   : > { %4928 = vst [vmem:[%s6705_s12 + $0x120] sm:$0xff] %v4864_v9  ;;  %v4706_v34 = vpop.permute.xlu1 %4705 }
 0xabb   : > { %v4867_v52 = vmul.f32 %v4706_v34, %v4483_v47  ;;  %v4701_v61 = vpop.permute.xlu0 %4700  ;;  %v4505_v34 = vld [vmem:[#allocation5 + $0x10] sm:$0xff] }
 0xabc   : > { %v4866_v55 = vmul.f32 %v4701_v61, %v4482_v4 }
 0xabd   : > { %4931 = vst [vmem:[%s6705_s12 + $0x138] sm:$0xff] %v4867_v52  ;;  %v4504_v52 = vld [vmem:[#allocation5 + $0x158] sm:$0xff] }
 0xabe   : > { %4930 = vst [vmem:[%s6705_s12 + $0x130] sm:$0xff] %v4866_v55  ;;  %v4716_v8 = vpop.permute.xlu1 %4715 }
 0xabf   : > { %v4869_v22 = vmul.f32 %v4716_v8, %v4485_v38  ;;  %v4711_v53 = vpop.permute.xlu0 %4710  ;;  %v4507_v8 = vld [vmem:[#allocation5 + $0xa0] sm:$0xff] }
 0xac0   : > { %v4868_v16 = vmul.f32 %v4711_v53, %v4484_v6 }
 0xac1   : > { %4933 = vst [vmem:[%s6705_s12 + $0x148] sm:$0xff] %v4869_v22  ;;  %v4506_v22 = vld [vmem:[#allocation5 + $0x58] sm:$0xff] }
 0xac2   : > { %4932 = vst [vmem:[%s6705_s12 + $0x140] sm:$0xff] %v4868_v16  ;;  %v4726_v14 = vpop.permute.xlu1 %4725 }
 0xac3   : > { %v4871_v30 = vmul.f32 %v4726_v14, %v4487_v39  ;;  %v4721_v59 = vpop.permute.xlu0 %4720 }
 0xac4   : > { %v4870_v44 = vmul.f32 %v4721_v59, %v4486_v31 }
 0xac5   : > { %4935 = vst [vmem:[%s6705_s12 + $0x158] sm:$0xff] %v4871_v30 }
 0xac6   : > { %4934 = vst [vmem:[%s6705_s12 + $0x150] sm:$0xff] %v4870_v44  ;;  %v4736_v56 = vpop.permute.xlu1 %4735 }
 0xac7   : > { %v4873_v62 = vmul.f32 %v4736_v56, %v4489_v40  ;;  %v4731_v3 = vpop.permute.xlu0 %4730 }
 0xac8   : > { %v4872_v7 = vmul.f32 %v4731_v3, %v4488_v42 }
 0xac9   : > { %4937 = vst [vmem:[%s6705_s12 + $0x168] sm:$0xff] %v4873_v62 }
 0xaca   : > { %4936 = vst [vmem:[%s6705_s12 + $0x160] sm:$0xff] %v4872_v7  ;;  %v4746_v5 = vpop.permute.xlu1 %4745 }
 0xacb   : > { %v4875_v41 = vmul.f32 %v4746_v5, %v4491_v18  ;;  %v4741_v48 = vpop.permute.xlu0 %4740 }
 0xacc   : > { %v4874_v26 = vmul.f32 %v4741_v48, %v4490_v35 }
 0xacd   : > { %4939 = vst [vmem:[%s6705_s12 + $0x178] sm:$0xff] %v4875_v41 }
 0xace   : > { %4938 = vst [vmem:[%s6705_s12 + $0x170] sm:$0xff] %v4874_v26  ;;  %v4756_v1 = vpop.permute.xlu1 %4755 }
 0xacf   : > { %v4877_v58 = vmul.f32 %v4756_v1, %v4493_v10  ;;  %v4751_v45 = vpop.permute.xlu0 %4750 }
 0xad0   : > { %v4876_v43 = vmul.f32 %v4751_v45, %v4492_v57 }
 0xad1   : > { %4941 = vst [vmem:[%s6705_s12 + $0x188] sm:$0xff] %v4877_v58 }
 0xad2   : > { %4940 = vst [vmem:[%s6705_s12 + $0x180] sm:$0xff] %v4876_v43  ;;  %v4766_v29 = vpop.permute.xlu1 %4765 }
 0xad3   : > { %v4879_v11 = vmul.f32 %v4766_v29, %v4495_v33  ;;  %v4761_v20 = vpop.permute.xlu0 %4760 }
 0xad4   : > { %v4878_v24 = vmul.f32 %v4761_v20, %v4494_v49 }
 0xad5   : > { %4943 = vst [vmem:[%s6705_s12 + $0x198] sm:$0xff] %v4879_v11 }
 0xad6   : > { %4942 = vst [vmem:[%s6705_s12 + $0x190] sm:$0xff] %v4878_v24  ;;  %v4776_v25 = vpop.permute.xlu1 %4775 }
 0xad7   : > { %v4881_v46 = vmul.f32 %v4776_v25, %v4497_v50  ;;  %v4771_v51 = vpop.permute.xlu0 %4770 }
 0xad8   : > { %v4880_v15 = vmul.f32 %v4771_v51, %v4496_v28 }
 0xad9   : > { %4945 = vst [vmem:[%s6705_s12 + $0x1a8] sm:$0xff] %v4881_v46 }
 0xada   : > { %4944 = vst [vmem:[%s6705_s12 + $0x1a0] sm:$0xff] %v4880_v15  ;;  %v4786_v23 = vpop.permute.xlu1 %4785 }
 0xadb   : > { %v4883_v63 = vmul.f32 %v4786_v23, %v4499_v17  ;;  %v4781_v60 = vpop.permute.xlu0 %4780 }
 0xadc   : > { %v4882_v36 = vmul.f32 %v4781_v60, %v4498_v21 }
 0xadd   : > { %4947 = vst [vmem:[%s6705_s12 + $0x1b8] sm:$0xff] %v4883_v63 }
 0xade   : > { %4946 = vst [vmem:[%s6705_s12 + $0x1b0] sm:$0xff] %v4882_v36  ;;  %v4796_v54 = vpop.permute.xlu1 %4795 }
 0xadf   : > { %v4885_v0 = vmul.f32 %v4796_v54, %v4501_v37  ;;  %v4791_v12 = vpop.permute.xlu0 %4790 }
 0xae0   : > { %v4884_v13 = vmul.f32 %v4791_v12, %v4500_v2 }
 0xae1   : > { %4949 = vst [vmem:[%s6705_s12 + $0x1c8] sm:$0xff] %v4885_v0 }
 0xae2   : > { %4948 = vst [vmem:[%s6705_s12 + $0x1c0] sm:$0xff] %v4884_v13  ;;  %v4806_v32 = vpop.permute.xlu1 %4805 }
 0xae3   : > { %v4887_v9 = vmul.f32 %v4806_v32, %v4503_v19  ;;  %v4801_v47 = vpop.permute.xlu0 %4800 }
 0xae4   : > { %v4886_v4 = vmul.f32 %v4801_v47, %v4502_v27 }
 0xae5   : > { %4951 = vst [vmem:[%s6705_s12 + $0x1d8] sm:$0xff] %v4887_v9 }
 0xae6   : > { %4950 = vst [vmem:[%s6705_s12 + $0x1d0] sm:$0xff] %v4886_v4  ;;  %v4816_v61 = vpop.permute.xlu1 %4815 }
 0xae7   : > { %v4889_v55 = vmul.f32 %v4816_v61, %v4505_v34  ;;  %v4811_v38 = vpop.permute.xlu0 %4810 }
 0xae8   : > { %v4888_v6 = vmul.f32 %v4811_v38, %v4504_v52 }
 0xae9   : > { %4953 = vst [vmem:[%s6705_s12 + $0x1e8] sm:$0xff] %v4889_v55 }
 0xaea   : > { %4952 = vst [vmem:[%s6705_s12 + $0x1e0] sm:$0xff] %v4888_v6  ;;  %v4826_v53 = vpop.permute.xlu1 %4825 }
 0xaeb   : > { %v4891_v16 = vmul.f32 %v4826_v53, %v4507_v8  ;;  %v4821_v39 = vpop.permute.xlu0 %4820 }
 0xaec   : > { %v4890_v31 = vmul.f32 %v4821_v39, %v4506_v22 }
 0xaed   : > { %4955 = vst [vmem:[%s6705_s12 + $0x1f8] sm:$0xff] %v4891_v16 }
 0xaee   : > { %4954 = vst [vmem:[%s6705_s12 + $0x1f0] sm:$0xff] %v4890_v31 }
 0xaef PF: > { %s10200_s18 = sld [smem:[#allocation16_spill]]  ;;  %s4972_s21 = sshll.u32 %s6705_s12, 4  ;;  %s9235_s21 = int_to_ptr.vmem [resolvable:$true] %s4972_s21 }
 0xaf0   : > { %s10201_s3 = sld [smem:[#allocation188_spill]]  ;;  %s4957_s19 = scalar_lea.sflag [#allocation8], %s6685_s1 }
 0xaf1   : > { %s6326_s11 = scalar_lea.vmem %s9235_s21, 8192  ;;  %p10202_p3 = scmp.ne.s32.totalorder %s9631_s8, 0 }
 0xaf2   : > { %p6327_p10 = scmp.ne.s32.totalorder %s9235_s21, %s6326_s11  ;;  %s6461_s2 = smov [#allocation12]  }
 0xaf3   : > { %s6330_s20 = sshll.u32 %s6461_s2, 4  ;;  %s6331_s20 = int_to_ptr.vmem [resolvable:$false] %s6330_s20 }
 0xaf4   : > { %p6328_p13 = pnand %p6327_p10, %p10202_p3  ;;  %s6332_s23 = scalar_lea.vmem %s6331_s20, 16384 }
 0xaf5   : > { %s5302_s25 = sshll.u32 %s10200_s18, 13  ;;  %p6333_p1 = scmp.lt.s32.totalorder %s9235_s21, %s6331_s20 }
 0xaf6   : > { %s9232_s26 = scalar_lea.hbm %s10201_s3, %s5302_s25  ;;  %p6329_p2 = pneg %p6328_p13 }
 0xaf7   : > { %p6334_p11 = scmp.lt.s32.totalorder %s6332_s23, %s6326_s11 }
 0xaf9   : > { %p6335_p4 = por %p6334_p11, %p6333_p1 }
 0xafb   : > { %p6336_p5 = pnand %p6335_p4, %p6329_p2 }
 0xafd   : > { %6339 = shalt.err (!%p6336_p5)
}
 0xafe   : > { %s6340_s27 = scalar_lea.hbm %s9232_s26, 8192  ;;  %s6344_s4 = scalar_lea.hbm %s10201_s3, 65536 }
 0xaff   : > { %p6341_p0 = scmp.ne.s32.totalorder %s9232_s26, %s6340_s27  ;;  %p6345_p12 = scmp.lt.s32.totalorder %s9232_s26, %s10201_s3 }
 0xb00   : > { %p6346_p8 = scmp.lt.s32.totalorder %s6344_s4, %s6340_s27 }
 0xb01   : > { %p6342_p7 = pnand %p6341_p0, %p10202_p3 }
 0xb02   : > { %p6347_p6 = por %p6346_p8, %p6345_p12 }
 0xb03   : > { %p6343_p9 = pneg %p6342_p7 }
 0xb05   : > { %p6348_p10 = pnand %p6347_p6, %p6343_p9 }
 0xb07   : > { %6351 = shalt.err (!%p6348_p10)
}
 0xb08   : > { %s6462_s12 = smov 128   ;;  %s6463_s18 = smov 8  }
 0xb09   : > { %5580 = dma.vmem_to_hbm [thread:$0]  (%p10202_p3), %s9235_s21, 8192, %s9232_s26, %s4957_s19, %s6462_s12, %s6462_s12, %s6463_s18  }
 0xb0a PF: > { %p5597_p13 = scmp.ge.s32.totalorder %s6450_s22, 2  ;;  %s4987_s25 = sand.u32 1, %s6422_s15  }
 0xb0b   : > { %p10203_p2 = scmp.ne.s32.totalorder %s9632_s29, 0  ;;  %s4988_s28 = scalar_lea.sflag [#allocation8], %s4987_s25 }
 0xb0d   : > { %p5593_p1 = pnand %p5597_p13, %p10203_p2 }
 0xb0f   : > { %p5594_p11 = pneg %p5593_p1 }
 0xb11   : > { %6405 = dma.done.wait (%p5594_p11), %s4988_s28, 8192  }
 0xb12   : > { %6407 = vsyncadd (%p5594_p11), %s4988_s28, 4294959104  ;;  %s22_s22 = sadd.s32 1, %s6450_s22   ;;  %s10204_s18 = sld [smem:[#allocation17_spill]] }
 0xb13   : > { %p19_p4 = scmp.ge.s32.totalorder %s22_s22, 18   ;;  %s10205_s19 = sld [smem:[#allocation18_spill]] }
 0xb14   : > { %s10206_s20 = sld [smem:[#allocation19_spill]]  ;;  %s10208_s12 = smov %s6414_s13 }
 0xb15   : > { %s10207_s21 = sld [smem:[#allocation20_spill]]  ;;  %s10209_s13 = smov %s6418_s14 }
 0xb16   : > { %s10210_s14 = smov %s6575_s6  ;;  %s10211_s15 = smov %s6426_s16 }
 0xb17   : > { %s10212_s16 = smov %s6430_s17  ;;  %s10213_s17 = smov %s6625_s30 }
 0xb18   :  { %21 = sbr.rel (!%p19_p4) target bundleno = 15 (0xf), region = 109 }
 0xb1d   :  { %4993 = vsyncpa [#allocation7], 1 }
 0xb1e   :  { %4995 = vsyncpa [#allocation7 + $0x1], 1 }
 0xb1f   :  { %4996 = vsyncpa [#allocation10], 1 }
 0xb20   :  { %4998 = vsyncpa [#allocation10 + $0x1], 1 }
 0xb21   :  { %4999 = vsyncpa [#allocation8], 1 }
 0xb22   :  { %5001 = vsyncpa [#allocation8 + $0x1], 1 }

</bundles_post_ra>
